<compile_context>
chip_gen: v6e
topology: v6e:2x2x1
jax: 0.10.0
libtpu: 0.0.40
codegen_flags: <defaults>
</compile_context>

<pallas_src>
import functools

import numpy as np

import jax
import jax.numpy as jnp
from jax.experimental import pallas as pl
from jax.experimental.pallas import tpu as pltpu

# Explicit scoped-VMEM budget (>= default on v5e/v6e/v7x, well under physical).
VMEM_LIMIT_BYTES = 32 * 1024 * 1024


def _round_up(x, m):
    return ((x + m - 1) // m) * m


# ---------------------------------------------------------------------------
# Pallas kernels
# ---------------------------------------------------------------------------

def _gemm_bias_relu_kernel(x_ref, w_ref, b_ref, o_ref, *, relu):
    """out = act(x @ w + b) on one (tm, N) tile.  bf16 operands, f32 accumulate."""
    acc = jnp.dot(x_ref[...], w_ref[...], preferred_element_type=jnp.float32)
    acc = acc + b_ref[...]
    if relu:
        acc = jnp.maximum(acc, 0.0)
    o_ref[...] = acc


def pallas_gemm_bias_relu(x, w, b_row, *, relu=True, tm=256):
    """act(x @ w + b).  x:(M,K) bf16, w:(K,N) bf16, b:(1,N) f32 -> (M,N) f32."""
    M, K = x.shape
    _, N = w.shape
    tm = min(tm, _round_up(M, 8))
    Mp = _round_up(M, tm)
    if Mp != M:
        x = jnp.pad(x, ((0, Mp - M), (0, 0)))

    out = pl.pallas_call(
        functools.partial(_gemm_bias_relu_kernel, relu=relu),
        out_shape=jax.ShapeDtypeStruct((Mp, N), jnp.float32),
        grid_spec=pltpu.PrefetchScalarGridSpec(
            num_scalar_prefetch=0,
            grid=(Mp // tm,),
            in_specs=[
                pl.BlockSpec((tm, K), lambda i: (i, 0)),   # activation tile
                pl.BlockSpec((K, N), lambda i: (0, 0)),    # full weight (resident)
                pl.BlockSpec((1, N), lambda i: (0, 0)),    # bias row
            ],
            out_specs=pl.BlockSpec((tm, N), lambda i: (i, 0)),
        ),
        compiler_params=pltpu.CompilerParams(
            dimension_semantics=("parallel",),
            vmem_limit_bytes=VMEM_LIMIT_BYTES),
    )(x, w, b_row)
    return out if Mp == M else out[:M]


def _conv_tap_kernel(x_ref, w_ref, b_ref, o_ref, *, kh, kw, ow, relu):
    """Stride-1 conv, one output row per grid step, im2col fused in-kernel.

    x_ref: (Hp, Wp, Cin)      bf16  whole padded image (resident across oh axis)
    w_ref: (kh*kw*Cin, Cout)  bf16  repacked weight, rows ordered (kh, kw, cin)
    b_ref: (1, Cout)          f32
    o_ref: (ow, Cout)         f32   one output row
    """
    oh = pl.program_id(1)
    cin = x_ref.shape[-1]
    cout = o_ref.shape[-1]

    acc = jnp.zeros((ow, cout), jnp.float32)
    for di in range(kh):
        row = x_ref[oh + di]                               # (Wp, Cin)
        for dj in range(kw):
            tap = di * kw + dj
            acc = acc + jnp.dot(
                row[dj:dj + ow, :],                        # (ow, Cin)
                w_ref[tap * cin:(tap + 1) * cin, :],       # (Cin, Cout)
                preferred_element_type=jnp.float32)

    acc = acc + b_ref[...]
    if relu:
        acc = jnp.maximum(acc, 0.0)
    o_ref[...] = acc


def pallas_conv2d_relu_s1(x_nhwc, w_mat, b_row, *, kh, kw, pad, relu=True):
    """Stride-1 Conv2d + bias + ReLU in NHWC; no patch matrix in HBM."""
    N, H, W, C = x_nhwc.shape
    cout = w_mat.shape[1]
    xp = jnp.pad(x_nhwc.astype(jnp.bfloat16),
                 ((0, 0), (pad, pad), (pad, pad), (0, 0)))
    Hp, Wp = H + 2 * pad, W + 2 * pad
    oh, ow = Hp - kh + 1, Wp - kw + 1

    return pl.pallas_call(
        functools.partial(_conv_tap_kernel, kh=kh, kw=kw, ow=ow, relu=relu),
        out_shape=jax.ShapeDtypeStruct((N, oh, ow, cout), jnp.float32),
        grid_spec=pltpu.PrefetchScalarGridSpec(
            num_scalar_prefetch=0,
            grid=(N, oh),
            in_specs=[
                # whole padded image; index depends only on n -> DMA'd once per image
                pl.BlockSpec((None, Hp, Wp, C), lambda n, i: (n, 0, 0, 0)),
                pl.BlockSpec((kh * kw * C, cout), lambda n, i: (0, 0)),
                pl.BlockSpec((1, cout), lambda n, i: (0, 0)),
            ],
            out_specs=pl.BlockSpec((None, None, ow, cout),
                                   lambda n, i: (n, i, 0, 0)),
        ),
        compiler_params=pltpu.CompilerParams(
            dimension_semantics=("parallel", "parallel"),
            vmem_limit_bytes=VMEM_LIMIT_BYTES),
    )(xp, w_mat, b_row)


def _maxpool_kernel(x_ref, o_ref, *, k, stride, ow):
    """k x k / stride max-pool, one output row per grid step, windows in-register.

    x_ref: (H, W, C) f32 whole image (resident across oh axis)
    o_ref: (ow, C)   f32 one pooled output row
    """
    oh = pl.program_id(1)
    r0 = oh * stride

    rowmax = x_ref[r0]
    for di in range(1, k):
        rowmax = jnp.maximum(rowmax, x_ref[r0 + di])       # (W, C)

    w_full = rowmax.shape[0]
    nwin = w_full - k + 1
    win = rowmax[0:nwin, :]
    for dj in range(1, k):
        win = jnp.maximum(win, rowmax[dj:dj + nwin, :])    # sliding max (nwin, C)

    for j in range(ow):                                    # keep stride-spaced cols
        o_ref[j:j + 1, :] = win[j * stride:j * stride + 1, :]


def pallas_maxpool2d(x_nhwc, *, k=3, stride=2):
    N, H, W, C = x_nhwc.shape
    oh = (H - k) // stride + 1
    ow = (W - k) // stride + 1
    return pl.pallas_call(
        functools.partial(_maxpool_kernel, k=k, stride=stride, ow=ow),
        out_shape=jax.ShapeDtypeStruct((N, oh, ow, C), x_nhwc.dtype),
        grid_spec=pltpu.PrefetchScalarGridSpec(
            num_scalar_prefetch=0,
            grid=(N, oh),
            in_specs=[pl.BlockSpec((None, H, W, C), lambda n, i: (n, 0, 0, 0))],
            out_specs=pl.BlockSpec((None, None, ow, C),
                                   lambda n, i: (n, i, 0, 0)),
        ),
        compiler_params=pltpu.CompilerParams(
            dimension_semantics=("parallel", "parallel"),
            vmem_limit_bytes=VMEM_LIMIT_BYTES),
    )(x_nhwc)


# ---------------------------------------------------------------------------
# conv1 (stride 4, k=11, Cin=3): small XLA-side im2col + Pallas GEMM
# ---------------------------------------------------------------------------

def _im2col(x_nhwc, kh, kw, stride, pad):
    N, H, W, C = x_nhwc.shape
    xp = jnp.pad(x_nhwc, ((0, 0), (pad, pad), (pad, pad), (0, 0)))
    Hp, Wp = H + 2 * pad, W + 2 * pad
    oh = (Hp - kh) // stride + 1
    ow = (Wp - kw) // stride + 1
    cols = []
    for i in range(kh):
        for j in range(kw):
            cols.append(xp[:, i:i + stride * oh:stride,
                           j:j + stride * ow:stride, :])
    patches = jnp.concatenate(cols, axis=-1)         # (N, oh, ow, kh*kw*C), (kh,kw,cin)
    return patches.reshape(N * oh * ow, kh * kw * C), oh, ow


def conv2d_relu_im2col(x_nhwc, w_mat, b_row, *, kh, kw, stride, pad, relu=True):
    N = x_nhwc.shape[0]
    cout = w_mat.shape[1]
    patches, oh, ow = _im2col(x_nhwc.astype(jnp.bfloat16), kh, kw, stride, pad)
    K = patches.shape[1]
    Kp = w_mat.shape[0]                  # weight pre-padded once outside jit
    if Kp != K:                          # single (bf16) pad of the patch matrix
        patches = jnp.pad(patches, ((0, 0), (0, Kp - K)))
    out = pallas_gemm_bias_relu(patches, w_mat, b_row, relu=relu, tm=256)
    return out.reshape(N, oh, ow, cout)


# ---------------------------------------------------------------------------
# Parameters (shapes of torchvision alexnet.features) and forward wiring
# ---------------------------------------------------------------------------

_ALEXNET_CFG = [
    # (cin, cout, k, stride, pad)
    (3, 64, 11, 4, 2),
    (64, 192, 5, 1, 2),
    (192, 384, 3, 1, 1),
    (384, 256, 3, 1, 1),
    (256, 256, 3, 1, 1),
]


def init_alexnet_features_params(key):
    # TODO(synk): torchvision's pretrained weights cannot be loaded in-script
    # (no file/network access); He-initialised random weights stand in — same
    # shapes and forward semantics.
    params = []
    for (cin, cout, k, s, p) in _ALEXNET_CFG:
        key, kw_, kb_ = jax.random.split(key, 3)
        fan_in = cin * k * k
        w = jax.random.normal(kw_, (cout, cin, k, k), jnp.float32) * (2.0 / fan_in) ** 0.5
        b = jax.random.normal(kb_, (cout,), jnp.float32) * 0.01
        params.append(dict(w=w, b=b, stride=s, pad=p))
    return params


def prepare_params(raw_params):
    """One-time weight repack (outside jit): OIHW -> (KH*KW*Cin, Cout) bf16."""
    prepared = []
    for idx, rp in enumerate(raw_params):
        w = rp['w']
        cout, cin, kh, kw = w.shape
        w_mat = jnp.transpose(w, (2, 3, 1, 0)).reshape(kh * kw * cin, cout)
        w_mat = w_mat.astype(jnp.bfloat16)
        if idx == 0:
            # conv1 goes through the im2col GEMM: pad K to a lane multiple once here.
            kp = _round_up(kh * kw * cin, 128)
            w_mat = jnp.pad(w_mat, ((0, kp - kh * kw * cin), (0, 0)))
        prepared.append(dict(
            w=w_mat,
            b=rp['b'].astype(jnp.float32).reshape(1, cout),
            kh=kh, kw=kw, stride=rp['stride'], pad=rp['pad'], cout=cout))
    return prepared


def alexnet_forward(x_nchw, params):
    # NCHW (PyTorch) -> NHWC (lane-dense channels for the TPU kernels)
    x = jnp.transpose(x_nchw, (0, 2, 3, 1))

    p0 = params[0]
    relu1_1 = conv2d_relu_im2col(x, p0['w'], p0['b'],
                                 kh=p0['kh'], kw=p0['kw'],
                                 stride=p0['stride'], pad=p0['pad'])

    p1 = params[1]
    relu2_1 = pallas_conv2d_relu_s1(pallas_maxpool2d(relu1_1), p1['w'], p1['b'],
                                    kh=p1['kh'], kw=p1['kw'], pad=p1['pad'])
    p2 = params[2]
    relu3_1 = pallas_conv2d_relu_s1(pallas_maxpool2d(relu2_1), p2['w'], p2['b'],
                                    kh=p2['kh'], kw=p2['kw'], pad=p2['pad'])
    p3 = params[3]
    relu3_2 = pallas_conv2d_relu_s1(relu3_1, p3['w'], p3['b'],
                                    kh=p3['kh'], kw=p3['kw'], pad=p3['pad'])
    p4 = params[4]
    relu3_3 = pallas_conv2d_relu_s1(relu3_2, p4['w'], p4['b'],
                                    kh=p4['kh'], kw=p4['kw'], pad=p4['pad'])
    relu4_1 = pallas_maxpool2d(relu3_3)

    to_nchw = lambda t: jnp.transpose(t, (0, 3, 1, 2))
    return {
        'relu1_1': to_nchw(relu1_1),
        'relu2_1': to_nchw(relu2_1),
        'relu3_1': to_nchw(relu3_1),
        'relu3_2': to_nchw(relu3_2),
        'relu3_3': to_nchw(relu3_3),
        'relu4_1': to_nchw(relu4_1),
    }


# ---------------------------------------------------------------------------
# Pure-JAX reference (same bf16-operand / f32-accumulate discipline)
# ---------------------------------------------------------------------------

def _reference_forward(x_nchw, raw_params):
    def conv(x, w, b, stride, pad):
        y = jax.lax.conv_general_dilated(
            x.astype(jnp.bfloat16), w.astype(jnp.bfloat16),
            window_strides=(stride, stride),
            padding=((pad, pad), (pad, pad)),
            dimension_numbers=('NHWC', 'OIHW', 'NHWC'),
            preferred_element_type=jnp.float32)
        return jnp.maximum(y + b.reshape(1, 1, 1, -1), 0.0)

    def pool(x):
        return jax.lax.reduce_window(x, -jnp.inf, jax.lax.max,
                                     (1, 3, 3, 1), (1, 2, 2, 1), 'VALID')

    x = jnp.transpose(x_nchw, (0, 2, 3, 1))
    r11 = conv(x, raw_params[0]['w'], raw_params[0]['b'], 4, 2)
    r21 = conv(pool(r11), raw_params[1]['w'], raw_params[1]['b'], 1, 2)
    r31 = conv(pool(r21), raw_params[2]['w'], raw_params[2]['b'], 1, 1)
    r32 = conv(r31, raw_params[3]['w'], raw_params[3]['b'], 1, 1)
    r33 = conv(r32, raw_params[4]['w'], raw_params[4]['b'], 1, 1)
    r41 = pool(r33)
    to_nchw = lambda t: jnp.transpose(t, (0, 3, 1, 2))
    return {'relu1_1': to_nchw(r11), 'relu2_1': to_nchw(r21),
            'relu3_1': to_nchw(r31), 'relu3_2': to_nchw(r32),
            'relu3_3': to_nchw(r33), 'relu4_1': to_nchw(r41)}


if __name__ == "__main__":
    key = jax.random.PRNGKey(0)
    kx, kp = jax.random.split(key)

    # Small NCHW input (PyTorch layout). 67x67 keeps every conv / pool valid:
    # 67 -> 16 (conv1) -> 7 (pool) -> 7 -> 3 (pool) -> 3 -> 3 -> 3 -> 1 (pool)
    x = jax.random.normal(kx, (2, 3, 67, 67), jnp.float32)
    raw_params = init_alexnet_features_params(kp)
    params = prepare_params(raw_params)      # one-time bf16 repack, outside jit

    fwd = jax.jit(lambda inp: alexnet_forward(inp, params))
    out = fwd(x)
    out = jax.tree_util.tree_map(jax.block_until_ready, out)

    expected = {
        'relu1_1': (2, 64, 16, 16),
        'relu2_1': (2, 192, 7, 7),
        'relu3_1': (2, 384, 3, 3),
        'relu3_2': (2, 256, 3, 3),
        'relu3_3': (2, 256, 3, 3),
        'relu4_1': (2, 256, 1, 1),
    }
    for name, shp in expected.items():
        assert out[name].shape == shp, (name, out[name].shape, shp)

    # Numerical check vs. a pure-JAX reference with the same bf16 casts
    # (differences come only from accumulation order -> very small).
    ref = jax.jit(lambda inp: _reference_forward(inp, raw_params))(x)
    ref = jax.tree_util.tree_map(jax.block_until_ready, ref)
    for name in expected:
        a = np.asarray(out[name])
        r = np.asarray(ref[name])
        rel = np.max(np.abs(a - r)) / (np.max(np.abs(r)) + 1e-6)
        assert rel < 5e-2, (name, float(rel))

    print("KERNEL_OK")
</pallas_src>

<mosaic_0001>
module attributes {stable_mosaic.version = 11 : i64} {
  func.func @_maxpool_kernel(%arg0: i32, %arg1: i32, %arg2: memref<1x16x16x64xf32, #tpu.memory_space<vmem>>, %arg3: memref<1x1x7x64xf32, #tpu.memory_space<vmem>>) attributes {dimension_semantics = [#tpu.dimension_semantics<parallel>, #tpu.dimension_semantics<parallel>], iteration_bounds = array<i64: 2, 7>, scalar_prefetch = 0 : i64, scratch_operands = 0 : i64, tpu.core_type = #tpu.core_type<tc>, window_params = [{transform_indices = @transform_0, window_bounds = array<i64: 1, 16, 16, 64>}, {transform_indices = @transform_1, window_bounds = array<i64: 1, 1, 7, 64>}]} {
    %c2_i32 = arith.constant 2 : i32
    %0 = arith.muli %arg1, %c2_i32 : i32
    %c0 = arith.constant 0 : index
    %1 = arith.index_cast %0 : i32 to index
    %c0_0 = arith.constant 0 : index
    %c0_1 = arith.constant 0 : index
    %2 = vector.load %arg2[%c0, %1, %c0_0, %c0_1] : memref<1x16x16x64xf32, #tpu.memory_space<vmem>>, vector<1x1x16x64xf32>
    %3 = vector.shape_cast %2 : vector<1x1x16x64xf32> to vector<16x64xf32>
    %c1_i32 = arith.constant 1 : i32
    %4 = arith.addi %0, %c1_i32 : i32
    %c0_2 = arith.constant 0 : index
    %5 = arith.index_cast %4 : i32 to index
    %c0_3 = arith.constant 0 : index
    %c0_4 = arith.constant 0 : index
    %6 = vector.load %arg2[%c0_2, %5, %c0_3, %c0_4] : memref<1x16x16x64xf32, #tpu.memory_space<vmem>>, vector<1x1x16x64xf32>
    %7 = vector.shape_cast %6 : vector<1x1x16x64xf32> to vector<16x64xf32>
    %8 = arith.maximumf %3, %7 : vector<16x64xf32>
    %c2_i32_5 = arith.constant 2 : i32
    %9 = arith.addi %0, %c2_i32_5 : i32
    %c0_6 = arith.constant 0 : index
    %10 = arith.index_cast %9 : i32 to index
    %c0_7 = arith.constant 0 : index
    %c0_8 = arith.constant 0 : index
    %11 = vector.load %arg2[%c0_6, %10, %c0_7, %c0_8] : memref<1x16x16x64xf32, #tpu.memory_space<vmem>>, vector<1x1x16x64xf32>
    %12 = vector.shape_cast %11 : vector<1x1x16x64xf32> to vector<16x64xf32>
    %13 = arith.maximumf %8, %12 : vector<16x64xf32>
    %14 = vector.extract_strided_slice %13 {offsets = [0, 0], sizes = [14, 64], strides = [1, 1]} : vector<16x64xf32> to vector<14x64xf32>
    %15 = vector.extract_strided_slice %13 {offsets = [1, 0], sizes = [14, 64], strides = [1, 1]} : vector<16x64xf32> to vector<14x64xf32>
    %16 = arith.maximumf %14, %15 : vector<14x64xf32>
    %17 = vector.extract_strided_slice %13 {offsets = [2, 0], sizes = [14, 64], strides = [1, 1]} : vector<16x64xf32> to vector<14x64xf32>
    %18 = arith.maximumf %16, %17 : vector<14x64xf32>
    %19 = vector.extract_strided_slice %18 {offsets = [0, 0], sizes = [1, 64], strides = [1, 1]} : vector<14x64xf32> to vector<1x64xf32>
    %c0_9 = arith.constant 0 : index
    %c0_10 = arith.constant 0 : index
    %c0_11 = arith.constant 0 : index
    %c0_12 = arith.constant 0 : index
    %20 = vector.load %arg3[%c0_9, %c0_10, %c0_11, %c0_12] : memref<1x1x7x64xf32, #tpu.memory_space<vmem>>, vector<1x1x1x64xf32>
    %21 = vector.shape_cast %20 : vector<1x1x1x64xf32> to vector<1x64xf32>
    %22 = vector.shape_cast %19 : vector<1x64xf32> to vector<1x1x1x64xf32>
    tpu.vector_store %arg3[%c0_9, %c0_10, %c0_11, %c0_12], %22 {strides = array<i32>} : memref<1x1x7x64xf32, #tpu.memory_space<vmem>>, vector<1x1x1x64xf32>,
    %23 = vector.extract_strided_slice %18 {offsets = [2, 0], sizes = [1, 64], strides = [1, 1]} : vector<14x64xf32> to vector<1x64xf32>
    %c0_13 = arith.constant 0 : index
    %c0_14 = arith.constant 0 : index
    %c1 = arith.constant 1 : index
    %c0_15 = arith.constant 0 : index
    %24 = vector.load %arg3[%c0_13, %c0_14, %c1, %c0_15] : memref<1x1x7x64xf32, #tpu.memory_space<vmem>>, vector<1x1x1x64xf32>
    %25 = vector.shape_cast %24 : vector<1x1x1x64xf32> to vector<1x64xf32>
    %26 = vector.shape_cast %23 : vector<1x64xf32> to vector<1x1x1x64xf32>
    tpu.vector_store %arg3[%c0_13, %c0_14, %c1, %c0_15], %26 {strides = array<i32>} : memref<1x1x7x64xf32, #tpu.memory_space<vmem>>, vector<1x1x1x64xf32>,
    %27 = vector.extract_strided_slice %18 {offsets = [4, 0], sizes = [1, 64], strides = [1, 1]} : vector<14x64xf32> to vector<1x64xf32>
    %c0_16 = arith.constant 0 : index
    %c0_17 = arith.constant 0 : index
    %c2 = arith.constant 2 : index
    %c0_18 = arith.constant 0 : index
    %28 = vector.load %arg3[%c0_16, %c0_17, %c2, %c0_18] : memref<1x1x7x64xf32, #tpu.memory_space<vmem>>, vector<1x1x1x64xf32>
    %29 = vector.shape_cast %28 : vector<1x1x1x64xf32> to vector<1x64xf32>
    %30 = vector.shape_cast %27 : vector<1x64xf32> to vector<1x1x1x64xf32>
    tpu.vector_store %arg3[%c0_16, %c0_17, %c2, %c0_18], %30 {strides = array<i32>} : memref<1x1x7x64xf32, #tpu.memory_space<vmem>>, vector<1x1x1x64xf32>,
    %31 = vector.extract_strided_slice %18 {offsets = [6, 0], sizes = [1, 64], strides = [1, 1]} : vector<14x64xf32> to vector<1x64xf32>
    %c0_19 = arith.constant 0 : index
    %c0_20 = arith.constant 0 : index
    %c3 = arith.constant 3 : index
    %c0_21 = arith.constant 0 : index
    %32 = vector.load %arg3[%c0_19, %c0_20, %c3, %c0_21] : memref<1x1x7x64xf32, #tpu.memory_space<vmem>>, vector<1x1x1x64xf32>
    %33 = vector.shape_cast %32 : vector<1x1x1x64xf32> to vector<1x64xf32>
    %34 = vector.shape_cast %31 : vector<1x64xf32> to vector<1x1x1x64xf32>
    tpu.vector_store %arg3[%c0_19, %c0_20, %c3, %c0_21], %34 {strides = array<i32>} : memref<1x1x7x64xf32, #tpu.memory_space<vmem>>, vector<1x1x1x64xf32>,
    %35 = vector.extract_strided_slice %18 {offsets = [8, 0], sizes = [1, 64], strides = [1, 1]} : vector<14x64xf32> to vector<1x64xf32>
    %c0_22 = arith.constant 0 : index
    %c0_23 = arith.constant 0 : index
    %c4 = arith.constant 4 : index
    %c0_24 = arith.constant 0 : index
    %36 = vector.load %arg3[%c0_22, %c0_23, %c4, %c0_24] : memref<1x1x7x64xf32, #tpu.memory_space<vmem>>, vector<1x1x1x64xf32>
    %37 = vector.shape_cast %36 : vector<1x1x1x64xf32> to vector<1x64xf32>
    %38 = vector.shape_cast %35 : vector<1x64xf32> to vector<1x1x1x64xf32>
    tpu.vector_store %arg3[%c0_22, %c0_23, %c4, %c0_24], %38 {strides = array<i32>} : memref<1x1x7x64xf32, #tpu.memory_space<vmem>>, vector<1x1x1x64xf32>,
    %39 = vector.extract_strided_slice %18 {offsets = [10, 0], sizes = [1, 64], strides = [1, 1]} : vector<14x64xf32> to vector<1x64xf32>
    %c0_25 = arith.constant 0 : index
    %c0_26 = arith.constant 0 : index
    %c5 = arith.constant 5 : index
    %c0_27 = arith.constant 0 : index
    %40 = vector.load %arg3[%c0_25, %c0_26, %c5, %c0_27] : memref<1x1x7x64xf32, #tpu.memory_space<vmem>>, vector<1x1x1x64xf32>
    %41 = vector.shape_cast %40 : vector<1x1x1x64xf32> to vector<1x64xf32>
    %42 = vector.shape_cast %39 : vector<1x64xf32> to vector<1x1x1x64xf32>
    tpu.vector_store %arg3[%c0_25, %c0_26, %c5, %c0_27], %42 {strides = array<i32>} : memref<1x1x7x64xf32, #tpu.memory_space<vmem>>, vector<1x1x1x64xf32>,
    %43 = vector.extract_strided_slice %18 {offsets = [12, 0], sizes = [1, 64], strides = [1, 1]} : vector<14x64xf32> to vector<1x64xf32>
    %c0_28 = arith.constant 0 : index
    %c0_29 = arith.constant 0 : index
    %c6 = arith.constant 6 : index
    %c0_30 = arith.constant 0 : index
    %44 = vector.load %arg3[%c0_28, %c0_29, %c6, %c0_30] : memref<1x1x7x64xf32, #tpu.memory_space<vmem>>, vector<1x1x1x64xf32>
    %45 = vector.shape_cast %44 : vector<1x1x1x64xf32> to vector<1x64xf32>
    %46 = vector.shape_cast %43 : vector<1x64xf32> to vector<1x1x1x64xf32>
    tpu.vector_store %arg3[%c0_28, %c0_29, %c6, %c0_30], %46 {strides = array<i32>} : memref<1x1x7x64xf32, #tpu.memory_space<vmem>>, vector<1x1x1x64xf32>,
    return
  }
  func.func @transform_0(%arg0: i32, %arg1: i32) -> (i32, i32, i32, i32) {
    %c0_i32 = arith.constant 0 : i32
    %c0_i32_0 = arith.constant 0 : i32
    %c0_i32_1 = arith.constant 0 : i32
    %c0_i32_2 = arith.constant 0 : i32
    return %arg0, %c0_i32, %c0_i32_0, %c0_i32_1 : i32, i32, i32, i32
  }
  func.func @transform_1(%arg0: i32, %arg1: i32) -> (i32, i32, i32, i32) {
    %c0_i32 = arith.constant 0 : i32
    %c0_i32_0 = arith.constant 0 : i32
    %c0_i32_1 = arith.constant 0 : i32
    return %arg0, %arg1, %c0_i32, %c0_i32_0 : i32, i32, i32, i32
  }
}

module attributes {stable_mosaic.version = 11 : i64} {
  func.func @_gemm_bias_relu_kernel(%arg0: i32, %arg1: memref<256x384xbf16, #tpu.memory_space<vmem>>, %arg2: memref<384x64xbf16, #tpu.memory_space<vmem>>, %arg3: memref<1x64xf32, #tpu.memory_space<vmem>>, %arg4: memref<256x64xf32, #tpu.memory_space<vmem>>) attributes {dimension_semantics = [#tpu.dimension_semantics<parallel>], iteration_bounds = array<i64: 2>, scalar_prefetch = 0 : i64, scratch_operands = 0 : i64, tpu.core_type = #tpu.core_type<tc>, window_params = [{transform_indices = @transform_0, window_bounds = array<i64: 256, 384>}, {pipeline_mode = #tpu.pipeline_mode<synchronous>, transform_indices = @transform_1, window_bounds = array<i64: 384, 64>}, {pipeline_mode = #tpu.pipeline_mode<synchronous>, transform_indices = @transform_2, window_bounds = array<i64: 1, 64>}, {transform_indices = @transform_3, window_bounds = array<i64: 256, 64>}]} {
    %c0 = arith.constant 0 : index
    %c0_0 = arith.constant 0 : index
    %0 = vector.load %arg1[%c0, %c0_0] : memref<256x384xbf16, #tpu.memory_space<vmem>>, vector<256x384xbf16>
    %c0_1 = arith.constant 0 : index
    %c0_2 = arith.constant 0 : index
    %1 = vector.load %arg2[%c0_1, %c0_2] : memref<384x64xbf16, #tpu.memory_space<vmem>>, vector<384x64xbf16>
    %cst = arith.constant dense<0.000000e+00> : vector<256x64xf32>
    %2 = tpu.matmul %0, %1, %cst {dimension_numbers = #tpu.dot_dimension_numbers<[1], [0], [0], [1], [0, 0, 1, 1], [], []>} : vector<256x384xbf16>, vector<384x64xbf16>, vector<256x64xf32> -> vector<256x64xf32>
    %c0_3 = arith.constant 0 : index
    %c0_4 = arith.constant 0 : index
    %3 = vector.load %arg3[%c0_3, %c0_4] : memref<1x64xf32, #tpu.memory_space<vmem>>, vector<1x64xf32>
    %4 = vector.broadcast %3 : vector<1x64xf32> to vector<256x64xf32>
    %5 = arith.addf %2, %4 : vector<256x64xf32>
    %cst_5 = arith.constant 0.000000e+00 : f32
    %6 = vector.broadcast %cst_5 : f32 to vector<256x64xf32>
    %7 = arith.maximumf %5, %6 : vector<256x64xf32>
    %c0_6 = arith.constant 0 : index
    %c0_7 = arith.constant 0 : index
    %8 = vector.load %arg4[%c0_6, %c0_7] : memref<256x64xf32, #tpu.memory_space<vmem>>, vector<256x64xf32>
    tpu.vector_store %arg4[%c0_6, %c0_7], %7 {strides = array<i32>} : memref<256x64xf32, #tpu.memory_space<vmem>>, vector<256x64xf32>,
    return
  }
  func.func @transform_0(%arg0: i32) -> (i32, i32) {
    %c0_i32 = arith.constant 0 : i32
    %c0_i32_0 = arith.constant 0 : i32
    return %arg0, %c0_i32 : i32, i32
  }
  func.func @transform_1(%arg0: i32) -> (i32, i32) {
    %c0_i32 = arith.constant 0 : i32
    %c0_i32_0 = arith.constant 0 : i32
    %c0_i32_1 = arith.constant 0 : i32
    return %c0_i32, %c0_i32_0 : i32, i32
  }
  func.func @transform_2(%arg0: i32) -> (i32, i32) {
    %c0_i32 = arith.constant 0 : i32
    %c0_i32_0 = arith.constant 0 : i32
    %c0_i32_1 = arith.constant 0 : i32
    return %c0_i32, %c0_i32_0 : i32, i32
  }
  func.func @transform_3(%arg0: i32) -> (i32, i32) {
    %c0_i32 = arith.constant 0 : i32
    %c0_i32_0 = arith.constant 0 : i32
    return %arg0, %c0_i32 : i32, i32
  }
}

module attributes {stable_mosaic.version = 11 : i64} {
  func.func @_conv_tap_kernel(%arg0: i32, %arg1: i32, %arg2: memref<1x11x11x64xbf16, #tpu.memory_space<vmem>>, %arg3: memref<1600x192xbf16, #tpu.memory_space<vmem>>, %arg4: memref<1x192xf32, #tpu.memory_space<vmem>>, %arg5: memref<1x1x7x192xf32, #tpu.memory_space<vmem>>) attributes {dimension_semantics = [#tpu.dimension_semantics<parallel>, #tpu.dimension_semantics<parallel>], iteration_bounds = array<i64: 2, 7>, scalar_prefetch = 0 : i64, scratch_operands = 0 : i64, tpu.core_type = #tpu.core_type<tc>, window_params = [{transform_indices = @transform_0, window_bounds = array<i64: 1, 11, 11, 64>}, {pipeline_mode = #tpu.pipeline_mode<synchronous>, transform_indices = @transform_1, window_bounds = array<i64: 1600, 192>}, {pipeline_mode = #tpu.pipeline_mode<synchronous>, transform_indices = @transform_2, window_bounds = array<i64: 1, 192>}, {transform_indices = @transform_3, window_bounds = array<i64: 1, 1, 7, 192>}]} {
    %cst = arith.constant 0.000000e+00 : f32
    %0 = vector.broadcast %cst : f32 to vector<7x192xf32>
    %c0_i32 = arith.constant 0 : i32
    %1 = arith.addi %arg1, %c0_i32 : i32
    %c0 = arith.constant 0 : index
    %2 = arith.index_cast %1 : i32 to index
    %c0_0 = arith.constant 0 : index
    %c0_1 = arith.constant 0 : index
    %3 = vector.load %arg2[%c0, %2, %c0_0, %c0_1] : memref<1x11x11x64xbf16, #tpu.memory_space<vmem>>, vector<1x1x11x64xbf16>
    %4 = vector.shape_cast %3 : vector<1x1x11x64xbf16> to vector<11x64xbf16>
    %5 = vector.extract_strided_slice %4 {offsets = [0, 0], sizes = [7, 64], strides = [1, 1]} : vector<11x64xbf16> to vector<7x64xbf16>
    %c0_2 = arith.constant 0 : index
    %c0_3 = arith.constant 0 : index
    %6 = vector.load %arg3[%c0_2, %c0_3] : memref<1600x192xbf16, #tpu.memory_space<vmem>>, vector<64x192xbf16>
    %cst_4 = arith.constant dense<0.000000e+00> : vector<7x192xf32>
    %7 = tpu.matmul %5, %6, %cst_4 {dimension_numbers = #tpu.dot_dimension_numbers<[1], [0], [0], [1], [0, 0, 1, 1], [], []>} : vector<7x64xbf16>, vector<64x192xbf16>, vector<7x192xf32> -> vector<7x192xf32>
    %8 = arith.addf %0, %7 : vector<7x192xf32>
    %9 = vector.extract_strided_slice %4 {offsets = [1, 0], sizes = [7, 64], strides = [1, 1]} : vector<11x64xbf16> to vector<7x64xbf16>
    %c64 = arith.constant 64 : index
    %c0_5 = arith.constant 0 : index
    %10 = vector.load %arg3[%c64, %c0_5] : memref<1600x192xbf16, #tpu.memory_space<vmem>>, vector<64x192xbf16>
    %cst_6 = arith.constant dense<0.000000e+00> : vector<7x192xf32>
    %11 = tpu.matmul %9, %10, %cst_6 {dimension_numbers = #tpu.dot_dimension_numbers<[1], [0], [0], [1], [0, 0, 1, 1], [], []>} : vector<7x64xbf16>, vector<64x192xbf16>, vector<7x192xf32> -> vector<7x192xf32>
    %12 = arith.addf %8, %11 : vector<7x192xf32>
    %13 = vector.extract_strided_slice %4 {offsets = [2, 0], sizes = [7, 64], strides = [1, 1]} : vector<11x64xbf16> to vector<7x64xbf16>
    %c128 = arith.constant 128 : index
    %c0_7 = arith.constant 0 : index
    %14 = vector.load %arg3[%c128, %c0_7] : memref<1600x192xbf16, #tpu.memory_space<vmem>>, vector<64x192xbf16>
    %cst_8 = arith.constant dense<0.000000e+00> : vector<7x192xf32>
    %15 = tpu.matmul %13, %14, %cst_8 {dimension_numbers = #tpu.dot_dimension_numbers<[1], [0], [0], [1], [0, 0, 1, 1], [], []>} : vector<7x64xbf16>, vector<64x192xbf16>, vector<7x192xf32> -> vector<7x192xf32>
    %16 = arith.addf %12, %15 : vector<7x192xf32>
    %17 = vector.extract_strided_slice %4 {offsets = [3, 0], sizes = [7, 64], strides = [1, 1]} : vector<11x64xbf16> to vector<7x64xbf16>
    %c192 = arith.constant 192 : index
    %c0_9 = arith.constant 0 : index
    %18 = vector.load %arg3[%c192, %c0_9] : memref<1600x192xbf16, #tpu.memory_space<vmem>>, vector<64x192xbf16>
    %cst_10 = arith.constant dense<0.000000e+00> : vector<7x192xf32>
    %19 = tpu.matmul %17, %18, %cst_10 {dimension_numbers = #tpu.dot_dimension_numbers<[1], [0], [0], [1], [0, 0, 1, 1], [], []>} : vector<7x64xbf16>, vector<64x192xbf16>, vector<7x192xf32> -> vector<7x192xf32>
    %20 = arith.addf %16, %19 : vector<7x192xf32>
    %21 = vector.extract_strided_slice %4 {offsets = [4, 0], sizes = [7, 64], strides = [1, 1]} : vector<11x64xbf16> to vector<7x64xbf16>
    %c256 = arith.constant 256 : index
    %c0_11 = arith.constant 0 : index
    %22 = vector.load %arg3[%c256, %c0_11] : memref<1600x192xbf16, #tpu.memory_space<vmem>>, vector<64x192xbf16>
    %cst_12 = arith.constant dense<0.000000e+00> : vector<7x192xf32>
    %23 = tpu.matmul %21, %22, %cst_12 {dimension_numbers = #tpu.dot_dimension_numbers<[1], [0], [0], [1], [0, 0, 1, 1], [], []>} : vector<7x64xbf16>, vector<64x192xbf16>, vector<7x192xf32> -> vector<7x192xf32>
    %24 = arith.addf %20, %23 : vector<7x192xf32>
    %c1_i32 = arith.constant 1 : i32
    %25 = arith.addi %arg1, %c1_i32 : i32
    %c0_13 = arith.constant 0 : index
    %26 = arith.index_cast %25 : i32 to index
    %c0_14 = arith.constant 0 : index
    %c0_15 = arith.constant 0 : index
    %27 = vector.load %arg2[%c0_13, %26, %c0_14, %c0_15] : memref<1x11x11x64xbf16, #tpu.memory_space<vmem>>, vector<1x1x11x64xbf16>
    %28 = vector.shape_cast %27 : vector<1x1x11x64xbf16> to vector<11x64xbf16>
    %29 = vector.extract_strided_slice %28 {offsets = [0, 0], sizes = [7, 64], strides = [1, 1]} : vector<11x64xbf16> to vector<7x64xbf16>
    %c320 = arith.constant 320 : index
    %c0_16 = arith.constant 0 : index
    %30 = vector.load %arg3[%c320, %c0_16] : memref<1600x192xbf16, #tpu.memory_space<vmem>>, vector<64x192xbf16>
    %cst_17 = arith.constant dense<0.000000e+00> : vector<7x192xf32>
    %31 = tpu.matmul %29, %30, %cst_17 {dimension_numbers = #tpu.dot_dimension_numbers<[1], [0], [0], [1], [0, 0, 1, 1], [], []>} : vector<7x64xbf16>, vector<64x192xbf16>, vector<7x192xf32> -> vector<7x192xf32>
    %32 = arith.addf %24, %31 : vector<7x192xf32>
    %33 = vector.extract_strided_slice %28 {offsets = [1, 0], sizes = [7, 64], strides = [1, 1]} : vector<11x64xbf16> to vector<7x64xbf16>
    %c384 = arith.constant 384 : index
    %c0_18 = arith.constant 0 : index
    %34 = vector.load %arg3[%c384, %c0_18] : memref<1600x192xbf16, #tpu.memory_space<vmem>>, vector<64x192xbf16>
    %cst_19 = arith.constant dense<0.000000e+00> : vector<7x192xf32>
    %35 = tpu.matmul %33, %34, %cst_19 {dimension_numbers = #tpu.dot_dimension_numbers<[1], [0], [0], [1], [0, 0, 1, 1], [], []>} : vector<7x64xbf16>, vector<64x192xbf16>, vector<7x192xf32> -> vector<7x192xf32>
    %36 = arith.addf %32, %35 : vector<7x192xf32>
    %37 = vector.extract_strided_slice %28 {offsets = [2, 0], sizes = [7, 64], strides = [1, 1]} : vector<11x64xbf16> to vector<7x64xbf16>
    %c448 = arith.constant 448 : index
    %c0_20 = arith.constant 0 : index
    %38 = vector.load %arg3[%c448, %c0_20] : memref<1600x192xbf16, #tpu.memory_space<vmem>>, vector<64x192xbf16>
    %cst_21 = arith.constant dense<0.000000e+00> : vector<7x192xf32>
    %39 = tpu.matmul %37, %38, %cst_21 {dimension_numbers = #tpu.dot_dimension_numbers<[1], [0], [0], [1], [0, 0, 1, 1], [], []>} : vector<7x64xbf16>, vector<64x192xbf16>, vector<7x192xf32> -> vector<7x192xf32>
    %40 = arith.addf %36, %39 : vector<7x192xf32>
    %41 = vector.extract_strided_slice %28 {offsets = [3, 0], sizes = [7, 64], strides = [1, 1]} : vector<11x64xbf16> to vector<7x64xbf16>
    %c512 = arith.constant 512 : index
    %c0_22 = arith.constant 0 : index
    %42 = vector.load %arg3[%c512, %c0_22] : memref<1600x192xbf16, #tpu.memory_space<vmem>>, vector<64x192xbf16>
    %cst_23 = arith.constant dense<0.000000e+00> : vector<7x192xf32>
    %43 = tpu.matmul %41, %42, %cst_23 {dimension_numbers = #tpu.dot_dimension_numbers<[1], [0], [0], [1], [0, 0, 1, 1], [], []>} : vector<7x64xbf16>, vector<64x192xbf16>, vector<7x192xf32> -> vector<7x192xf32>
    %44 = arith.addf %40, %43 : vector<7x192xf32>
    %45 = vector.extract_strided_slice %28 {offsets = [4, 0], sizes = [7, 64], strides = [1, 1]} : vector<11x64xbf16> to vector<7x64xbf16>
    %c576 = arith.constant 576 : index
    %c0_24 = arith.constant 0 : index
    %46 = vector.load %arg3[%c576, %c0_24] : memref<1600x192xbf16, #tpu.memory_space<vmem>>, vector<64x192xbf16>
    %cst_25 = arith.constant dense<0.000000e+00> : vector<7x192xf32>
    %47 = tpu.matmul %45, %46, %cst_25 {dimension_numbers = #tpu.dot_dimension_numbers<[1], [0], [0], [1], [0, 0, 1, 1], [], []>} : vector<7x64xbf16>, vector<64x192xbf16>, vector<7x192xf32> -> vector<7x192xf32>
    %48 = arith.addf %44, %47 : vector<7x192xf32>
    %c2_i32 = arith.constant 2 : i32
    %49 = arith.addi %arg1, %c2_i32 : i32
    %c0_26 = arith.constant 0 : index
    %50 = arith.index_cast %49 : i32 to index
    %c0_27 = arith.constant 0 : index
    %c0_28 = arith.constant 0 : index
    %51 = vector.load %arg2[%c0_26, %50, %c0_27, %c0_28] : memref<1x11x11x64xbf16, #tpu.memory_space<vmem>>, vector<1x1x11x64xbf16>
    %52 = vector.shape_cast %51 : vector<1x1x11x64xbf16> to vector<11x64xbf16>
    %53 = vector.extract_strided_slice %52 {offsets = [0, 0], sizes = [7, 64], strides = [1, 1]} : vector<11x64xbf16> to vector<7x64xbf16>
    %c640 = arith.constant 640 : index
    %c0_29 = arith.constant 0 : index
    %54 = vector.load %arg3[%c640, %c0_29] : memref<1600x192xbf16, #tpu.memory_space<vmem>>, vector<64x192xbf16>
    %cst_30 = arith.constant dense<0.000000e+00> : vector<7x192xf32>
    %55 = tpu.matmul %53, %54, %cst_30 {dimension_numbers = #tpu.dot_dimension_numbers<[1], [0], [0], [1], [0, 0, 1, 1], [], []>} : vector<7x64xbf16>, vector<64x192xbf16>, vector<7x192xf32> -> vector<7x192xf32>
    %56 = arith.addf %48, %55 : vector<7x192xf32>
    %57 = vector.extract_strided_slice %52 {offsets = [1, 0], sizes = [7, 64], strides = [1, 1]} : vector<11x64xbf16> to vector<7x64xbf16>
    %c704 = arith.constant 704 : index
    %c0_31 = arith.constant 0 : index
    %58 = vector.load %arg3[%c704, %c0_31] : memref<1600x192xbf16, #tpu.memory_space<vmem>>, vector<64x192xbf16>
    %cst_32 = arith.constant dense<0.000000e+00> : vector<7x192xf32>
    %59 = tpu.matmul %57, %58, %cst_32 {dimension_numbers = #tpu.dot_dimension_numbers<[1], [0], [0], [1], [0, 0, 1, 1], [], []>} : vector<7x64xbf16>, vector<64x192xbf16>, vector<7x192xf32> -> vector<7x192xf32>
    %60 = arith.addf %56, %59 : vector<7x192xf32>
    %61 = vector.extract_strided_slice %52 {offsets = [2, 0], sizes = [7, 64], strides = [1, 1]} : vector<11x64xbf16> to vector<7x64xbf16>
    %c768 = arith.constant 768 : index
    %c0_33 = arith.constant 0 : index
    %62 = vector.load %arg3[%c768, %c0_33] : memref<1600x192xbf16, #tpu.memory_space<vmem>>, vector<64x192xbf16>
    %cst_34 = arith.constant dense<0.000000e+00> : vector<7x192xf32>
    %63 = tpu.matmul %61, %62, %cst_34 {dimension_numbers = #tpu.dot_dimension_numbers<[1], [0], [0], [1], [0, 0, 1, 1], [], []>} : vector<7x64xbf16>, vector<64x192xbf16>, vector<7x192xf32> -> vector<7x192xf32>
    %64 = arith.addf %60, %63 : vector<7x192xf32>
    %65 = vector.extract_strided_slice %52 {offsets = [3, 0], sizes = [7, 64], strides = [1, 1]} : vector<11x64xbf16> to vector<7x64xbf16>
    %c832 = arith.constant 832 : index
    %c0_35 = arith.constant 0 : index
    %66 = vector.load %arg3[%c832, %c0_35] : memref<1600x192xbf16, #tpu.memory_space<vmem>>, vector<64x192xbf16>
    %cst_36 = arith.constant dense<0.000000e+00> : vector<7x192xf32>
    %67 = tpu.matmul %65, %66, %cst_36 {dimension_numbers = #tpu.dot_dimension_numbers<[1], [0], [0], [1], [0, 0, 1, 1], [], []>} : vector<7x64xbf16>, vector<64x192xbf16>, vector<7x192xf32> -> vector<7x192xf32>
    %68 = arith.addf %64, %67 : vector<7x192xf32>
    %69 = vector.extract_strided_slice %52 {offsets = [4, 0], sizes = [7, 64], strides = [1, 1]} : vector<11x64xbf16> to vector<7x64xbf16>
    %c896 = arith.constant 896 : index
    %c0_37 = arith.constant 0 : index
    %70 = vector.load %arg3[%c896, %c0_37] : memref<1600x192xbf16, #tpu.memory_space<vmem>>, vector<64x192xbf16>
    %cst_38 = arith.constant dense<0.000000e+00> : vector<7x192xf32>
    %71 = tpu.matmul %69, %70, %cst_38 {dimension_numbers = #tpu.dot_dimension_numbers<[1], [0], [0], [1], [0, 0, 1, 1], [], []>} : vector<7x64xbf16>, vector<64x192xbf16>, vector<7x192xf32> -> vector<7x192xf32>
    %72 = arith.addf %68, %71 : vector<7x192xf32>
    %c3_i32 = arith.constant 3 : i32
    %73 = arith.addi %arg1, %c3_i32 : i32
    %c0_39 = arith.constant 0 : index
    %74 = arith.index_cast %73 : i32 to index
    %c0_40 = arith.constant 0 : index
    %c0_41 = arith.constant 0 : index
    %75 = vector.load %arg2[%c0_39, %74, %c0_40, %c0_41] : memref<1x11x11x64xbf16, #tpu.memory_space<vmem>>, vector<1x1x11x64xbf16>
    %76 = vector.shape_cast %75 : vector<1x1x11x64xbf16> to vector<11x64xbf16>
    %77 = vector.extract_strided_slice %76 {offsets = [0, 0], sizes = [7, 64], strides = [1, 1]} : vector<11x64xbf16> to vector<7x64xbf16>
    %c960 = arith.constant 960 : index
    %c0_42 = arith.constant 0 : index
    %78 = vector.load %arg3[%c960, %c0_42] : memref<1600x192xbf16, #tpu.memory_space<vmem>>, vector<64x192xbf16>
    %cst_43 = arith.constant dense<0.000000e+00> : vector<7x192xf32>
    %79 = tpu.matmul %77, %78, %cst_43 {dimension_numbers = #tpu.dot_dimension_numbers<[1], [0], [0], [1], [0, 0, 1, 1], [], []>} : vector<7x64xbf16>, vector<64x192xbf16>, vector<7x192xf32> -> vector<7x192xf32>
    %80 = arith.addf %72, %79 : vector<7x192xf32>
    %81 = vector.extract_strided_slice %76 {offsets = [1, 0], sizes = [7, 64], strides = [1, 1]} : vector<11x64xbf16> to vector<7x64xbf16>
    %c1024 = arith.constant 1024 : index
    %c0_44 = arith.constant 0 : index
    %82 = vector.load %arg3[%c1024, %c0_44] : memref<1600x192xbf16, #tpu.memory_space<vmem>>, vector<64x192xbf16>
    %cst_45 = arith.constant dense<0.000000e+00> : vector<7x192xf32>
    %83 = tpu.matmul %81, %82, %cst_45 {dimension_numbers = #tpu.dot_dimension_numbers<[1], [0], [0], [1], [0, 0, 1, 1], [], []>} : vector<7x64xbf16>, vector<64x192xbf16>, vector<7x192xf32> -> vector<7x192xf32>
    %84 = arith.addf %80, %83 : vector<7x192xf32>
    %85 = vector.extract_strided_slice %76 {offsets = [2, 0], sizes = [7, 64], strides = [1, 1]} : vector<11x64xbf16> to vector<7x64xbf16>
    %c1088 = arith.constant 1088 : index
    %c0_46 = arith.constant 0 : index
    %86 = vector.load %arg3[%c1088, %c0_46] : memref<1600x192xbf16, #tpu.memory_space<vmem>>, vector<64x192xbf16>
    %cst_47 = arith.constant dense<0.000000e+00> : vector<7x192xf32>
    %87 = tpu.matmul %85, %86, %cst_47 {dimension_numbers = #tpu.dot_dimension_numbers<[1], [0], [0], [1], [0, 0, 1, 1], [], []>} : vector<7x64xbf16>, vector<64x192xbf16>, vector<7x192xf32> -> vector<7x192xf32>
    %88 = arith.addf %84, %87 : vector<7x192xf32>
    %89 = vector.extract_strided_slice %76 {offsets = [3, 0], sizes = [7, 64], strides = [1, 1]} : vector<11x64xbf16> to vector<7x64xbf16>
    %c1152 = arith.constant 1152 : index
    %c0_48 = arith.constant 0 : index
    %90 = vector.load %arg3[%c1152, %c0_48] : memref<1600x192xbf16, #tpu.memory_space<vmem>>, vector<64x192xbf16>
    %cst_49 = arith.constant dense<0.000000e+00> : vector<7x192xf32>
    %91 = tpu.matmul %89, %90, %cst_49 {dimension_numbers = #tpu.dot_dimension_numbers<[1], [0], [0], [1], [0, 0, 1, 1], [], []>} : vector<7x64xbf16>, vector<64x192xbf16>, vector<7x192xf32> -> vector<7x192xf32>
    %92 = arith.addf %88, %91 : vector<7x192xf32>
    %93 = vector.extract_strided_slice %76 {offsets = [4, 0], sizes = [7, 64], strides = [1, 1]} : vector<11x64xbf16> to vector<7x64xbf16>
    %c1216 = arith.constant 1216 : index
    %c0_50 = arith.constant 0 : index
    %94 = vector.load %arg3[%c1216, %c0_50] : memref<1600x192xbf16, #tpu.memory_space<vmem>>, vector<64x192xbf16>
    %cst_51 = arith.constant dense<0.000000e+00> : vector<7x192xf32>
    %95 = tpu.matmul %93, %94, %cst_51 {dimension_numbers = #tpu.dot_dimension_numbers<[1], [0], [0], [1], [0, 0, 1, 1], [], []>} : vector<7x64xbf16>, vector<64x192xbf16>, vector<7x192xf32> -> vector<7x192xf32>
    %96 = arith.addf %92, %95 : vector<7x192xf32>
    %c4_i32 = arith.constant 4 : i32
    %97 = arith.addi %arg1, %c4_i32 : i32
    %c0_52 = arith.constant 0 : index
    %98 = arith.index_cast %97 : i32 to index
    %c0_53 = arith.constant 0 : index
    %c0_54 = arith.constant 0 : index
    %99 = vector.load %arg2[%c0_52, %98, %c0_53, %c0_54] : memref<1x11x11x64xbf16, #tpu.memory_space<vmem>>, vector<1x1x11x64xbf16>
    %100 = vector.shape_cast %99 : vector<1x1x11x64xbf16> to vector<11x64xbf16>
    %101 = vector.extract_strided_slice %100 {offsets = [0, 0], sizes = [7, 64], strides = [1, 1]} : vector<11x64xbf16> to vector<7x64xbf16>
    %c1280 = arith.constant 1280 : index
    %c0_55 = arith.constant 0 : index
    %102 = vector.load %arg3[%c1280, %c0_55] : memref<1600x192xbf16, #tpu.memory_space<vmem>>, vector<64x192xbf16>
    %cst_56 = arith.constant dense<0.000000e+00> : vector<7x192xf32>
    %103 = tpu.matmul %101, %102, %cst_56 {dimension_numbers = #tpu.dot_dimension_numbers<[1], [0], [0], [1], [0, 0, 1, 1], [], []>} : vector<7x64xbf16>, vector<64x192xbf16>, vector<7x192xf32> -> vector<7x192xf32>
    %104 = arith.addf %96, %103 : vector<7x192xf32>
    %105 = vector.extract_strided_slice %100 {offsets = [1, 0], sizes = [7, 64], strides = [1, 1]} : vector<11x64xbf16> to vector<7x64xbf16>
    %c1344 = arith.constant 1344 : index
    %c0_57 = arith.constant 0 : index
    %106 = vector.load %arg3[%c1344, %c0_57] : memref<1600x192xbf16, #tpu.memory_space<vmem>>, vector<64x192xbf16>
    %cst_58 = arith.constant dense<0.000000e+00> : vector<7x192xf32>
    %107 = tpu.matmul %105, %106, %cst_58 {dimension_numbers = #tpu.dot_dimension_numbers<[1], [0], [0], [1], [0, 0, 1, 1], [], []>} : vector<7x64xbf16>, vector<64x192xbf16>, vector<7x192xf32> -> vector<7x192xf32>
    %108 = arith.addf %104, %107 : vector<7x192xf32>
    %109 = vector.extract_strided_slice %100 {offsets = [2, 0], sizes = [7, 64], strides = [1, 1]} : vector<11x64xbf16> to vector<7x64xbf16>
    %c1408 = arith.constant 1408 : index
    %c0_59 = arith.constant 0 : index
    %110 = vector.load %arg3[%c1408, %c0_59] : memref<1600x192xbf16, #tpu.memory_space<vmem>>, vector<64x192xbf16>
    %cst_60 = arith.constant dense<0.000000e+00> : vector<7x192xf32>
    %111 = tpu.matmul %109, %110, %cst_60 {dimension_numbers = #tpu.dot_dimension_numbers<[1], [0], [0], [1], [0, 0, 1, 1], [], []>} : vector<7x64xbf16>, vector<64x192xbf16>, vector<7x192xf32> -> vector<7x192xf32>
    %112 = arith.addf %108, %111 : vector<7x192xf32>
    %113 = vector.extract_strided_slice %100 {offsets = [3, 0], sizes = [7, 64], strides = [1, 1]} : vector<11x64xbf16> to vector<7x64xbf16>
    %c1472 = arith.constant 1472 : index
    %c0_61 = arith.constant 0 : index
    %114 = vector.load %arg3[%c1472, %c0_61] : memref<1600x192xbf16, #tpu.memory_space<vmem>>, vector<64x192xbf16>
    %cst_62 = arith.constant dense<0.000000e+00> : vector<7x192xf32>
    %115 = tpu.matmul %113, %114, %cst_62 {dimension_numbers = #tpu.dot_dimension_numbers<[1], [0], [0], [1], [0, 0, 1, 1], [], []>} : vector<7x64xbf16>, vector<64x192xbf16>, vector<7x192xf32> -> vector<7x192xf32>
    %116 = arith.addf %112, %115 : vector<7x192xf32>
    %117 = vector.extract_strided_slice %100 {offsets = [4, 0], sizes = [7, 64], strides = [1, 1]} : vector<11x64xbf16> to vector<7x64xbf16>
    %c1536 = arith.constant 1536 : index
    %c0_63 = arith.constant 0 : index
    %118 = vector.load %arg3[%c1536, %c0_63] : memref<1600x192xbf16, #tpu.memory_space<vmem>>, vector<64x192xbf16>
    %cst_64 = arith.constant dense<0.000000e+00> : vector<7x192xf32>
    %119 = tpu.matmul %117, %118, %cst_64 {dimension_numbers = #tpu.dot_dimension_numbers<[1], [0], [0], [1], [0, 0, 1, 1], [], []>} : vector<7x64xbf16>, vector<64x192xbf16>, vector<7x192xf32> -> vector<7x192xf32>
    %120 = arith.addf %116, %119 : vector<7x192xf32>
    %c0_65 = arith.constant 0 : index
    %c0_66 = arith.constant 0 : index
    %121 = vector.load %arg4[%c0_65, %c0_66] : memref<1x192xf32, #tpu.memory_space<vmem>>, vector<1x192xf32>
    %122 = vector.broadcast %121 : vector<1x192xf32> to vector<7x192xf32>
    %123 = arith.addf %120, %122 : vector<7x192xf32>
    %cst_67 = arith.constant 0.000000e+00 : f32
    %124 = vector.broadcast %cst_67 : f32 to vector<7x192xf32>
    %125 = arith.maximumf %123, %124 : vector<7x192xf32>
    %c0_68 = arith.constant 0 : index
    %c0_69 = arith.constant 0 : index
    %c0_70 = arith.constant 0 : index
    %c0_71 = arith.constant 0 : index
    %126 = vector.load %arg5[%c0_68, %c0_69, %c0_70, %c0_71] : memref<1x1x7x192xf32, #tpu.memory_space<vmem>>, vector<1x1x7x192xf32>
    %127 = vector.shape_cast %126 : vector<1x1x7x192xf32> to vector<7x192xf32>
    %128 = vector.shape_cast %125 : vector<7x192xf32> to vector<1x1x7x192xf32>
    tpu.vector_store %arg5[%c0_68, %c0_69, %c0_70, %c0_71], %128 {strides = array<i32>} : memref<1x1x7x192xf32, #tpu.memory_space<vmem>>, vector<1x1x7x192xf32>,
    return
  }
  func.func @transform_0(%arg0: i32, %arg1: i32) -> (i32, i32, i32, i32) {
    %c0_i32 = arith.constant 0 : i32
    %c0_i32_0 = arith.constant 0 : i32
    %c0_i32_1 = arith.constant 0 : i32
    %c0_i32_2 = arith.constant 0 : i32
    return %arg0, %c0_i32, %c0_i32_0, %c0_i32_1 : i32, i32, i32, i32
  }
  func.func @transform_1(%arg0: i32, %arg1: i32) -> (i32, i32) {
    %c0_i32 = arith.constant 0 : i32
    %c0_i32_0 = arith.constant 0 : i32
    %c0_i32_1 = arith.constant 0 : i32
    return %c0_i32, %c0_i32_0 : i32, i32
  }
  func.func @transform_2(%arg0: i32, %arg1: i32) -> (i32, i32) {
    %c0_i32 = arith.constant 0 : i32
    %c0_i32_0 = arith.constant 0 : i32
    %c0_i32_1 = arith.constant 0 : i32
    return %c0_i32, %c0_i32_0 : i32, i32
  }
  func.func @transform_3(%arg0: i32, %arg1: i32) -> (i32, i32, i32, i32) {
    %c0_i32 = arith.constant 0 : i32
    %c0_i32_0 = arith.constant 0 : i32
    %c0_i32_1 = arith.constant 0 : i32
    return %arg0, %arg1, %c0_i32, %c0_i32_0 : i32, i32, i32, i32
  }
}

module attributes {stable_mosaic.version = 11 : i64} {
  func.func @_maxpool_kernel(%arg0: i32, %arg1: i32, %arg2: memref<1x7x7x192xf32, #tpu.memory_space<vmem>>, %arg3: memref<1x1x3x192xf32, #tpu.memory_space<vmem>>) attributes {dimension_semantics = [#tpu.dimension_semantics<parallel>, #tpu.dimension_semantics<parallel>], iteration_bounds = array<i64: 2, 3>, scalar_prefetch = 0 : i64, scratch_operands = 0 : i64, tpu.core_type = #tpu.core_type<tc>, window_params = [{transform_indices = @transform_0, window_bounds = array<i64: 1, 7, 7, 192>}, {transform_indices = @transform_1, window_bounds = array<i64: 1, 1, 3, 192>}]} {
    %c2_i32 = arith.constant 2 : i32
    %0 = arith.muli %arg1, %c2_i32 : i32
    %c0 = arith.constant 0 : index
    %1 = arith.index_cast %0 : i32 to index
    %c0_0 = arith.constant 0 : index
    %c0_1 = arith.constant 0 : index
    %2 = vector.load %arg2[%c0, %1, %c0_0, %c0_1] : memref<1x7x7x192xf32, #tpu.memory_space<vmem>>, vector<1x1x7x192xf32>
    %3 = vector.shape_cast %2 : vector<1x1x7x192xf32> to vector<7x192xf32>
    %c1_i32 = arith.constant 1 : i32
    %4 = arith.addi %0, %c1_i32 : i32
    %c0_2 = arith.constant 0 : index
    %5 = arith.index_cast %4 : i32 to index
    %c0_3 = arith.constant 0 : index
    %c0_4 = arith.constant 0 : index
    %6 = vector.load %arg2[%c0_2, %5, %c0_3, %c0_4] : memref<1x7x7x192xf32, #tpu.memory_space<vmem>>, vector<1x1x7x192xf32>
    %7 = vector.shape_cast %6 : vector<1x1x7x192xf32> to vector<7x192xf32>
    %8 = arith.maximumf %3, %7 : vector<7x192xf32>
    %c2_i32_5 = arith.constant 2 : i32
    %9 = arith.addi %0, %c2_i32_5 : i32
    %c0_6 = arith.constant 0 : index
    %10 = arith.index_cast %9 : i32 to index
    %c0_7 = arith.constant 0 : index
    %c0_8 = arith.constant 0 : index
    %11 = vector.load %arg2[%c0_6, %10, %c0_7, %c0_8] : memref<1x7x7x192xf32, #tpu.memory_space<vmem>>, vector<1x1x7x192xf32>
    %12 = vector.shape_cast %11 : vector<1x1x7x192xf32> to vector<7x192xf32>
    %13 = arith.maximumf %8, %12 : vector<7x192xf32>
    %14 = vector.extract_strided_slice %13 {offsets = [0, 0], sizes = [5, 192], strides = [1, 1]} : vector<7x192xf32> to vector<5x192xf32>
    %15 = vector.extract_strided_slice %13 {offsets = [1, 0], sizes = [5, 192], strides = [1, 1]} : vector<7x192xf32> to vector<5x192xf32>
    %16 = arith.maximumf %14, %15 : vector<5x192xf32>
    %17 = vector.extract_strided_slice %13 {offsets = [2, 0], sizes = [5, 192], strides = [1, 1]} : vector<7x192xf32> to vector<5x192xf32>
    %18 = arith.maximumf %16, %17 : vector<5x192xf32>
    %19 = vector.extract_strided_slice %18 {offsets = [0, 0], sizes = [1, 192], strides = [1, 1]} : vector<5x192xf32> to vector<1x192xf32>
    %c0_9 = arith.constant 0 : index
    %c0_10 = arith.constant 0 : index
    %c0_11 = arith.constant 0 : index
    %c0_12 = arith.constant 0 : index
    %20 = vector.load %arg3[%c0_9, %c0_10, %c0_11, %c0_12] : memref<1x1x3x192xf32, #tpu.memory_space<vmem>>, vector<1x1x1x192xf32>
    %21 = vector.shape_cast %20 : vector<1x1x1x192xf32> to vector<1x192xf32>
    %22 = vector.shape_cast %19 : vector<1x192xf32> to vector<1x1x1x192xf32>
    tpu.vector_store %arg3[%c0_9, %c0_10, %c0_11, %c0_12], %22 {strides = array<i32>} : memref<1x1x3x192xf32, #tpu.memory_space<vmem>>, vector<1x1x1x192xf32>,
    %23 = vector.extract_strided_slice %18 {offsets = [2, 0], sizes = [1, 192], strides = [1, 1]} : vector<5x192xf32> to vector<1x192xf32>
    %c0_13 = arith.constant 0 : index
    %c0_14 = arith.constant 0 : index
    %c1 = arith.constant 1 : index
    %c0_15 = arith.constant 0 : index
    %24 = vector.load %arg3[%c0_13, %c0_14, %c1, %c0_15] : memref<1x1x3x192xf32, #tpu.memory_space<vmem>>, vector<1x1x1x192xf32>
    %25 = vector.shape_cast %24 : vector<1x1x1x192xf32> to vector<1x192xf32>
    %26 = vector.shape_cast %23 : vector<1x192xf32> to vector<1x1x1x192xf32>
    tpu.vector_store %arg3[%c0_13, %c0_14, %c1, %c0_15], %26 {strides = array<i32>} : memref<1x1x3x192xf32, #tpu.memory_space<vmem>>, vector<1x1x1x192xf32>,
    %27 = vector.extract_strided_slice %18 {offsets = [4, 0], sizes = [1, 192], strides = [1, 1]} : vector<5x192xf32> to vector<1x192xf32>
    %c0_16 = arith.constant 0 : index
    %c0_17 = arith.constant 0 : index
    %c2 = arith.constant 2 : index
    %c0_18 = arith.constant 0 : index
    %28 = vector.load %arg3[%c0_16, %c0_17, %c2, %c0_18] : memref<1x1x3x192xf32, #tpu.memory_space<vmem>>, vector<1x1x1x192xf32>
    %29 = vector.shape_cast %28 : vector<1x1x1x192xf32> to vector<1x192xf32>
    %30 = vector.shape_cast %27 : vector<1x192xf32> to vector<1x1x1x192xf32>
    tpu.vector_store %arg3[%c0_16, %c0_17, %c2, %c0_18], %30 {strides = array<i32>} : memref<1x1x3x192xf32, #tpu.memory_space<vmem>>, vector<1x1x1x192xf32>,
    return
  }
  func.func @transform_0(%arg0: i32, %arg1: i32) -> (i32, i32, i32, i32) {
    %c0_i32 = arith.constant 0 : i32
    %c0_i32_0 = arith.constant 0 : i32
    %c0_i32_1 = arith.constant 0 : i32
    %c0_i32_2 = arith.constant 0 : i32
    return %arg0, %c0_i32, %c0_i32_0, %c0_i32_1 : i32, i32, i32, i32
  }
  func.func @transform_1(%arg0: i32, %arg1: i32) -> (i32, i32, i32, i32) {
    %c0_i32 = arith.constant 0 : i32
    %c0_i32_0 = arith.constant 0 : i32
    %c0_i32_1 = arith.constant 0 : i32
    return %arg0, %arg1, %c0_i32, %c0_i32_0 : i32, i32, i32, i32
  }
}

module attributes {stable_mosaic.version = 11 : i64} {
  func.func @_conv_tap_kernel(%arg0: i32, %arg1: i32, %arg2: memref<1x5x5x192xbf16, #tpu.memory_space<vmem>>, %arg3: memref<1728x384xbf16, #tpu.memory_space<vmem>>, %arg4: memref<1x384xf32, #tpu.memory_space<vmem>>, %arg5: memref<1x1x3x384xf32, #tpu.memory_space<vmem>>) attributes {dimension_semantics = [#tpu.dimension_semantics<parallel>, #tpu.dimension_semantics<parallel>], iteration_bounds = array<i64: 2, 3>, scalar_prefetch = 0 : i64, scratch_operands = 0 : i64, tpu.core_type = #tpu.core_type<tc>, window_params = [{transform_indices = @transform_0, window_bounds = array<i64: 1, 5, 5, 192>}, {pipeline_mode = #tpu.pipeline_mode<synchronous>, transform_indices = @transform_1, window_bounds = array<i64: 1728, 384>}, {pipeline_mode = #tpu.pipeline_mode<synchronous>, transform_indices = @transform_2, window_bounds = array<i64: 1, 384>}, {transform_indices = @transform_3, window_bounds = array<i64: 1, 1, 3, 384>}]} {
    %cst = arith.constant 0.000000e+00 : f32
    %0 = vector.broadcast %cst : f32 to vector<3x384xf32>
    %c0_i32 = arith.constant 0 : i32
    %1 = arith.addi %arg1, %c0_i32 : i32
    %c0 = arith.constant 0 : index
    %2 = arith.index_cast %1 : i32 to index
    %c0_0 = arith.constant 0 : index
    %c0_1 = arith.constant 0 : index
    %3 = vector.load %arg2[%c0, %2, %c0_0, %c0_1] : memref<1x5x5x192xbf16, #tpu.memory_space<vmem>>, vector<1x1x5x192xbf16>
    %4 = vector.shape_cast %3 : vector<1x1x5x192xbf16> to vector<5x192xbf16>
    %5 = vector.extract_strided_slice %4 {offsets = [0, 0], sizes = [3, 192], strides = [1, 1]} : vector<5x192xbf16> to vector<3x192xbf16>
    %c0_2 = arith.constant 0 : index
    %c0_3 = arith.constant 0 : index
    %6 = vector.load %arg3[%c0_2, %c0_3] : memref<1728x384xbf16, #tpu.memory_space<vmem>>, vector<192x384xbf16>
    %cst_4 = arith.constant dense<0.000000e+00> : vector<3x384xf32>
    %7 = tpu.matmul %5, %6, %cst_4 {dimension_numbers = #tpu.dot_dimension_numbers<[1], [0], [0], [1], [0, 0, 1, 1], [], []>} : vector<3x192xbf16>, vector<192x384xbf16>, vector<3x384xf32> -> vector<3x384xf32>
    %8 = arith.addf %0, %7 : vector<3x384xf32>
    %9 = vector.extract_strided_slice %4 {offsets = [1, 0], sizes = [3, 192], strides = [1, 1]} : vector<5x192xbf16> to vector<3x192xbf16>
    %c192 = arith.constant 192 : index
    %c0_5 = arith.constant 0 : index
    %10 = vector.load %arg3[%c192, %c0_5] : memref<1728x384xbf16, #tpu.memory_space<vmem>>, vector<192x384xbf16>
    %cst_6 = arith.constant dense<0.000000e+00> : vector<3x384xf32>
    %11 = tpu.matmul %9, %10, %cst_6 {dimension_numbers = #tpu.dot_dimension_numbers<[1], [0], [0], [1], [0, 0, 1, 1], [], []>} : vector<3x192xbf16>, vector<192x384xbf16>, vector<3x384xf32> -> vector<3x384xf32>
    %12 = arith.addf %8, %11 : vector<3x384xf32>
    %13 = vector.extract_strided_slice %4 {offsets = [2, 0], sizes = [3, 192], strides = [1, 1]} : vector<5x192xbf16> to vector<3x192xbf16>
    %c384 = arith.constant 384 : index
    %c0_7 = arith.constant 0 : index
    %14 = vector.load %arg3[%c384, %c0_7] : memref<1728x384xbf16, #tpu.memory_space<vmem>>, vector<192x384xbf16>
    %cst_8 = arith.constant dense<0.000000e+00> : vector<3x384xf32>
    %15 = tpu.matmul %13, %14, %cst_8 {dimension_numbers = #tpu.dot_dimension_numbers<[1], [0], [0], [1], [0, 0, 1, 1], [], []>} : vector<3x192xbf16>, vector<192x384xbf16>, vector<3x384xf32> -> vector<3x384xf32>
    %16 = arith.addf %12, %15 : vector<3x384xf32>
    %c1_i32 = arith.constant 1 : i32
    %17 = arith.addi %arg1, %c1_i32 : i32
    %c0_9 = arith.constant 0 : index
    %18 = arith.index_cast %17 : i32 to index
    %c0_10 = arith.constant 0 : index
    %c0_11 = arith.constant 0 : index
    %19 = vector.load %arg2[%c0_9, %18, %c0_10, %c0_11] : memref<1x5x5x192xbf16, #tpu.memory_space<vmem>>, vector<1x1x5x192xbf16>
    %20 = vector.shape_cast %19 : vector<1x1x5x192xbf16> to vector<5x192xbf16>
    %21 = vector.extract_strided_slice %20 {offsets = [0, 0], sizes = [3, 192], strides = [1, 1]} : vector<5x192xbf16> to vector<3x192xbf16>
    %c576 = arith.constant 576 : index
    %c0_12 = arith.constant 0 : index
    %22 = vector.load %arg3[%c576, %c0_12] : memref<1728x384xbf16, #tpu.memory_space<vmem>>, vector<192x384xbf16>
    %cst_13 = arith.constant dense<0.000000e+00> : vector<3x384xf32>
    %23 = tpu.matmul %21, %22, %cst_13 {dimension_numbers = #tpu.dot_dimension_numbers<[1], [0], [0], [1], [0, 0, 1, 1], [], []>} : vector<3x192xbf16>, vector<192x384xbf16>, vector<3x384xf32> -> vector<3x384xf32>
    %24 = arith.addf %16, %23 : vector<3x384xf32>
    %25 = vector.extract_strided_slice %20 {offsets = [1, 0], sizes = [3, 192], strides = [1, 1]} : vector<5x192xbf16> to vector<3x192xbf16>
    %c768 = arith.constant 768 : index
    %c0_14 = arith.constant 0 : index
    %26 = vector.load %arg3[%c768, %c0_14] : memref<1728x384xbf16, #tpu.memory_space<vmem>>, vector<192x384xbf16>
    %cst_15 = arith.constant dense<0.000000e+00> : vector<3x384xf32>
    %27 = tpu.matmul %25, %26, %cst_15 {dimension_numbers = #tpu.dot_dimension_numbers<[1], [0], [0], [1], [0, 0, 1, 1], [], []>} : vector<3x192xbf16>, vector<192x384xbf16>, vector<3x384xf32> -> vector<3x384xf32>
    %28 = arith.addf %24, %27 : vector<3x384xf32>
    %29 = vector.extract_strided_slice %20 {offsets = [2, 0], sizes = [3, 192], strides = [1, 1]} : vector<5x192xbf16> to vector<3x192xbf16>
    %c960 = arith.constant 960 : index
    %c0_16 = arith.constant 0 : index
    %30 = vector.load %arg3[%c960, %c0_16] : memref<1728x384xbf16, #tpu.memory_space<vmem>>, vector<192x384xbf16>
    %cst_17 = arith.constant dense<0.000000e+00> : vector<3x384xf32>
    %31 = tpu.matmul %29, %30, %cst_17 {dimension_numbers = #tpu.dot_dimension_numbers<[1], [0], [0], [1], [0, 0, 1, 1], [], []>} : vector<3x192xbf16>, vector<192x384xbf16>, vector<3x384xf32> -> vector<3x384xf32>
    %32 = arith.addf %28, %31 : vector<3x384xf32>
    %c2_i32 = arith.constant 2 : i32
    %33 = arith.addi %arg1, %c2_i32 : i32
    %c0_18 = arith.constant 0 : index
    %34 = arith.index_cast %33 : i32 to index
    %c0_19 = arith.constant 0 : index
    %c0_20 = arith.constant 0 : index
    %35 = vector.load %arg2[%c0_18, %34, %c0_19, %c0_20] : memref<1x5x5x192xbf16, #tpu.memory_space<vmem>>, vector<1x1x5x192xbf16>
    %36 = vector.shape_cast %35 : vector<1x1x5x192xbf16> to vector<5x192xbf16>
    %37 = vector.extract_strided_slice %36 {offsets = [0, 0], sizes = [3, 192], strides = [1, 1]} : vector<5x192xbf16> to vector<3x192xbf16>
    %c1152 = arith.constant 1152 : index
    %c0_21 = arith.constant 0 : index
    %38 = vector.load %arg3[%c1152, %c0_21] : memref<1728x384xbf16, #tpu.memory_space<vmem>>, vector<192x384xbf16>
    %cst_22 = arith.constant dense<0.000000e+00> : vector<3x384xf32>
    %39 = tpu.matmul %37, %38, %cst_22 {dimension_numbers = #tpu.dot_dimension_numbers<[1], [0], [0], [1], [0, 0, 1, 1], [], []>} : vector<3x192xbf16>, vector<192x384xbf16>, vector<3x384xf32> -> vector<3x384xf32>
    %40 = arith.addf %32, %39 : vector<3x384xf32>
    %41 = vector.extract_strided_slice %36 {offsets = [1, 0], sizes = [3, 192], strides = [1, 1]} : vector<5x192xbf16> to vector<3x192xbf16>
    %c1344 = arith.constant 1344 : index
    %c0_23 = arith.constant 0 : index
    %42 = vector.load %arg3[%c1344, %c0_23] : memref<1728x384xbf16, #tpu.memory_space<vmem>>, vector<192x384xbf16>
    %cst_24 = arith.constant dense<0.000000e+00> : vector<3x384xf32>
    %43 = tpu.matmul %41, %42, %cst_24 {dimension_numbers = #tpu.dot_dimension_numbers<[1], [0], [0], [1], [0, 0, 1, 1], [], []>} : vector<3x192xbf16>, vector<192x384xbf16>, vector<3x384xf32> -> vector<3x384xf32>
    %44 = arith.addf %40, %43 : vector<3x384xf32>
    %45 = vector.extract_strided_slice %36 {offsets = [2, 0], sizes = [3, 192], strides = [1, 1]} : vector<5x192xbf16> to vector<3x192xbf16>
    %c1536 = arith.constant 1536 : index
    %c0_25 = arith.constant 0 : index
    %46 = vector.load %arg3[%c1536, %c0_25] : memref<1728x384xbf16, #tpu.memory_space<vmem>>, vector<192x384xbf16>
    %cst_26 = arith.constant dense<0.000000e+00> : vector<3x384xf32>
    %47 = tpu.matmul %45, %46, %cst_26 {dimension_numbers = #tpu.dot_dimension_numbers<[1], [0], [0], [1], [0, 0, 1, 1], [], []>} : vector<3x192xbf16>, vector<192x384xbf16>, vector<3x384xf32> -> vector<3x384xf32>
    %48 = arith.addf %44, %47 : vector<3x384xf32>
    %c0_27 = arith.constant 0 : index
    %c0_28 = arith.constant 0 : index
    %49 = vector.load %arg4[%c0_27, %c0_28] : memref<1x384xf32, #tpu.memory_space<vmem>>, vector<1x384xf32>
    %50 = vector.broadcast %49 : vector<1x384xf32> to vector<3x384xf32>
    %51 = arith.addf %48, %50 : vector<3x384xf32>
    %cst_29 = arith.constant 0.000000e+00 : f32
    %52 = vector.broadcast %cst_29 : f32 to vector<3x384xf32>
    %53 = arith.maximumf %51, %52 : vector<3x384xf32>
    %c0_30 = arith.constant 0 : index
    %c0_31 = arith.constant 0 : index
    %c0_32 = arith.constant 0 : index
    %c0_33 = arith.constant 0 : index
    %54 = vector.load %arg5[%c0_30, %c0_31, %c0_32, %c0_33] : memref<1x1x3x384xf32, #tpu.memory_space<vmem>>, vector<1x1x3x384xf32>
    %55 = vector.shape_cast %54 : vector<1x1x3x384xf32> to vector<3x384xf32>
    %56 = vector.shape_cast %53 : vector<3x384xf32> to vector<1x1x3x384xf32>
    tpu.vector_store %arg5[%c0_30, %c0_31, %c0_32, %c0_33], %56 {strides = array<i32>} : memref<1x1x3x384xf32, #tpu.memory_space<vmem>>, vector<1x1x3x384xf32>,
    return
  }
  func.func @transform_0(%arg0: i32, %arg1: i32) -> (i32, i32, i32, i32) {
    %c0_i32 = arith.constant 0 : i32
    %c0_i32_0 = arith.constant 0 : i32
    %c0_i32_1 = arith.constant 0 : i32
    %c0_i32_2 = arith.constant 0 : i32
    return %arg0, %c0_i32, %c0_i32_0, %c0_i32_1 : i32, i32, i32, i32
  }
  func.func @transform_1(%arg0: i32, %arg1: i32) -> (i32, i32) {
    %c0_i32 = arith.constant 0 : i32
    %c0_i32_0 = arith.constant 0 : i32
    %c0_i32_1 = arith.constant 0 : i32
    return %c0_i32, %c0_i32_0 : i32, i32
  }
  func.func @transform_2(%arg0: i32, %arg1: i32) -> (i32, i32) {
    %c0_i32 = arith.constant 0 : i32
    %c0_i32_0 = arith.constant 0 : i32
    %c0_i32_1 = arith.constant 0 : i32
    return %c0_i32, %c0_i32_0 : i32, i32
  }
  func.func @transform_3(%arg0: i32, %arg1: i32) -> (i32, i32, i32, i32) {
    %c0_i32 = arith.constant 0 : i32
    %c0_i32_0 = arith.constant 0 : i32
    %c0_i32_1 = arith.constant 0 : i32
    return %arg0, %arg1, %c0_i32, %c0_i32_0 : i32, i32, i32, i32
  }
}

module attributes {stable_mosaic.version = 11 : i64} {
  func.func @_conv_tap_kernel(%arg0: i32, %arg1: i32, %arg2: memref<1x5x5x384xbf16, #tpu.memory_space<vmem>>, %arg3: memref<3456x256xbf16, #tpu.memory_space<vmem>>, %arg4: memref<1x256xf32, #tpu.memory_space<vmem>>, %arg5: memref<1x1x3x256xf32, #tpu.memory_space<vmem>>) attributes {dimension_semantics = [#tpu.dimension_semantics<parallel>, #tpu.dimension_semantics<parallel>], iteration_bounds = array<i64: 2, 3>, scalar_prefetch = 0 : i64, scratch_operands = 0 : i64, tpu.core_type = #tpu.core_type<tc>, window_params = [{transform_indices = @transform_0, window_bounds = array<i64: 1, 5, 5, 384>}, {pipeline_mode = #tpu.pipeline_mode<synchronous>, transform_indices = @transform_1, window_bounds = array<i64: 3456, 256>}, {pipeline_mode = #tpu.pipeline_mode<synchronous>, transform_indices = @transform_2, window_bounds = array<i64: 1, 256>}, {transform_indices = @transform_3, window_bounds = array<i64: 1, 1, 3, 256>}]} {
    %cst = arith.constant 0.000000e+00 : f32
    %0 = vector.broadcast %cst : f32 to vector<3x256xf32>
    %c0_i32 = arith.constant 0 : i32
    %1 = arith.addi %arg1, %c0_i32 : i32
    %c0 = arith.constant 0 : index
    %2 = arith.index_cast %1 : i32 to index
    %c0_0 = arith.constant 0 : index
    %c0_1 = arith.constant 0 : index
    %3 = vector.load %arg2[%c0, %2, %c0_0, %c0_1] : memref<1x5x5x384xbf16, #tpu.memory_space<vmem>>, vector<1x1x5x384xbf16>
    %4 = vector.shape_cast %3 : vector<1x1x5x384xbf16> to vector<5x384xbf16>
    %5 = vector.extract_strided_slice %4 {offsets = [0, 0], sizes = [3, 384], strides = [1, 1]} : vector<5x384xbf16> to vector<3x384xbf16>
    %c0_2 = arith.constant 0 : index
    %c0_3 = arith.constant 0 : index
    %6 = vector.load %arg3[%c0_2, %c0_3] : memref<3456x256xbf16, #tpu.memory_space<vmem>>, vector<384x256xbf16>
    %cst_4 = arith.constant dense<0.000000e+00> : vector<3x256xf32>
    %7 = tpu.matmul %5, %6, %cst_4 {dimension_numbers = #tpu.dot_dimension_numbers<[1], [0], [0], [1], [0, 0, 1, 1], [], []>} : vector<3x384xbf16>, vector<384x256xbf16>, vector<3x256xf32> -> vector<3x256xf32>
    %8 = arith.addf %0, %7 : vector<3x256xf32>
    %9 = vector.extract_strided_slice %4 {offsets = [1, 0], sizes = [3, 384], strides = [1, 1]} : vector<5x384xbf16> to vector<3x384xbf16>
    %c384 = arith.constant 384 : index
    %c0_5 = arith.constant 0 : index
    %10 = vector.load %arg3[%c384, %c0_5] : memref<3456x256xbf16, #tpu.memory_space<vmem>>, vector<384x256xbf16>
    %cst_6 = arith.constant dense<0.000000e+00> : vector<3x256xf32>
    %11 = tpu.matmul %9, %10, %cst_6 {dimension_numbers = #tpu.dot_dimension_numbers<[1], [0], [0], [1], [0, 0, 1, 1], [], []>} : vector<3x384xbf16>, vector<384x256xbf16>, vector<3x256xf32> -> vector<3x256xf32>
    %12 = arith.addf %8, %11 : vector<3x256xf32>
    %13 = vector.extract_strided_slice %4 {offsets = [2, 0], sizes = [3, 384], strides = [1, 1]} : vector<5x384xbf16> to vector<3x384xbf16>
    %c768 = arith.constant 768 : index
    %c0_7 = arith.constant 0 : index
    %14 = vector.load %arg3[%c768, %c0_7] : memref<3456x256xbf16, #tpu.memory_space<vmem>>, vector<384x256xbf16>
    %cst_8 = arith.constant dense<0.000000e+00> : vector<3x256xf32>
    %15 = tpu.matmul %13, %14, %cst_8 {dimension_numbers = #tpu.dot_dimension_numbers<[1], [0], [0], [1], [0, 0, 1, 1], [], []>} : vector<3x384xbf16>, vector<384x256xbf16>, vector<3x256xf32> -> vector<3x256xf32>
    %16 = arith.addf %12, %15 : vector<3x256xf32>
    %c1_i32 = arith.constant 1 : i32
    %17 = arith.addi %arg1, %c1_i32 : i32
    %c0_9 = arith.constant 0 : index
    %18 = arith.index_cast %17 : i32 to index
    %c0_10 = arith.constant 0 : index
    %c0_11 = arith.constant 0 : index
    %19 = vector.load %arg2[%c0_9, %18, %c0_10, %c0_11] : memref<1x5x5x384xbf16, #tpu.memory_space<vmem>>, vector<1x1x5x384xbf16>
    %20 = vector.shape_cast %19 : vector<1x1x5x384xbf16> to vector<5x384xbf16>
    %21 = vector.extract_strided_slice %20 {offsets = [0, 0], sizes = [3, 384], strides = [1, 1]} : vector<5x384xbf16> to vector<3x384xbf16>
    %c1152 = arith.constant 1152 : index
    %c0_12 = arith.constant 0 : index
    %22 = vector.load %arg3[%c1152, %c0_12] : memref<3456x256xbf16, #tpu.memory_space<vmem>>, vector<384x256xbf16>
    %cst_13 = arith.constant dense<0.000000e+00> : vector<3x256xf32>
    %23 = tpu.matmul %21, %22, %cst_13 {dimension_numbers = #tpu.dot_dimension_numbers<[1], [0], [0], [1], [0, 0, 1, 1], [], []>} : vector<3x384xbf16>, vector<384x256xbf16>, vector<3x256xf32> -> vector<3x256xf32>
    %24 = arith.addf %16, %23 : vector<3x256xf32>
    %25 = vector.extract_strided_slice %20 {offsets = [1, 0], sizes = [3, 384], strides = [1, 1]} : vector<5x384xbf16> to vector<3x384xbf16>
    %c1536 = arith.constant 1536 : index
    %c0_14 = arith.constant 0 : index
    %26 = vector.load %arg3[%c1536, %c0_14] : memref<3456x256xbf16, #tpu.memory_space<vmem>>, vector<384x256xbf16>
    %cst_15 = arith.constant dense<0.000000e+00> : vector<3x256xf32>
    %27 = tpu.matmul %25, %26, %cst_15 {dimension_numbers = #tpu.dot_dimension_numbers<[1], [0], [0], [1], [0, 0, 1, 1], [], []>} : vector<3x384xbf16>, vector<384x256xbf16>, vector<3x256xf32> -> vector<3x256xf32>
    %28 = arith.addf %24, %27 : vector<3x256xf32>
    %29 = vector.extract_strided_slice %20 {offsets = [2, 0], sizes = [3, 384], strides = [1, 1]} : vector<5x384xbf16> to vector<3x384xbf16>
    %c1920 = arith.constant 1920 : index
    %c0_16 = arith.constant 0 : index
    %30 = vector.load %arg3[%c1920, %c0_16] : memref<3456x256xbf16, #tpu.memory_space<vmem>>, vector<384x256xbf16>
    %cst_17 = arith.constant dense<0.000000e+00> : vector<3x256xf32>
    %31 = tpu.matmul %29, %30, %cst_17 {dimension_numbers = #tpu.dot_dimension_numbers<[1], [0], [0], [1], [0, 0, 1, 1], [], []>} : vector<3x384xbf16>, vector<384x256xbf16>, vector<3x256xf32> -> vector<3x256xf32>
    %32 = arith.addf %28, %31 : vector<3x256xf32>
    %c2_i32 = arith.constant 2 : i32
    %33 = arith.addi %arg1, %c2_i32 : i32
    %c0_18 = arith.constant 0 : index
    %34 = arith.index_cast %33 : i32 to index
    %c0_19 = arith.constant 0 : index
    %c0_20 = arith.constant 0 : index
    %35 = vector.load %arg2[%c0_18, %34, %c0_19, %c0_20] : memref<1x5x5x384xbf16, #tpu.memory_space<vmem>>, vector<1x1x5x384xbf16>
    %36 = vector.shape_cast %35 : vector<1x1x5x384xbf16> to vector<5x384xbf16>
    %37 = vector.extract_strided_slice %36 {offsets = [0, 0], sizes = [3, 384], strides = [1, 1]} : vector<5x384xbf16> to vector<3x384xbf16>
    %c2304 = arith.constant 2304 : index
    %c0_21 = arith.constant 0 : index
    %38 = vector.load %arg3[%c2304, %c0_21] : memref<3456x256xbf16, #tpu.memory_space<vmem>>, vector<384x256xbf16>
    %cst_22 = arith.constant dense<0.000000e+00> : vector<3x256xf32>
    %39 = tpu.matmul %37, %38, %cst_22 {dimension_numbers = #tpu.dot_dimension_numbers<[1], [0], [0], [1], [0, 0, 1, 1], [], []>} : vector<3x384xbf16>, vector<384x256xbf16>, vector<3x256xf32> -> vector<3x256xf32>
    %40 = arith.addf %32, %39 : vector<3x256xf32>
    %41 = vector.extract_strided_slice %36 {offsets = [1, 0], sizes = [3, 384], strides = [1, 1]} : vector<5x384xbf16> to vector<3x384xbf16>
    %c2688 = arith.constant 2688 : index
    %c0_23 = arith.constant 0 : index
    %42 = vector.load %arg3[%c2688, %c0_23] : memref<3456x256xbf16, #tpu.memory_space<vmem>>, vector<384x256xbf16>
    %cst_24 = arith.constant dense<0.000000e+00> : vector<3x256xf32>
    %43 = tpu.matmul %41, %42, %cst_24 {dimension_numbers = #tpu.dot_dimension_numbers<[1], [0], [0], [1], [0, 0, 1, 1], [], []>} : vector<3x384xbf16>, vector<384x256xbf16>, vector<3x256xf32> -> vector<3x256xf32>
    %44 = arith.addf %40, %43 : vector<3x256xf32>
    %45 = vector.extract_strided_slice %36 {offsets = [2, 0], sizes = [3, 384], strides = [1, 1]} : vector<5x384xbf16> to vector<3x384xbf16>
    %c3072 = arith.constant 3072 : index
    %c0_25 = arith.constant 0 : index
    %46 = vector.load %arg3[%c3072, %c0_25] : memref<3456x256xbf16, #tpu.memory_space<vmem>>, vector<384x256xbf16>
    %cst_26 = arith.constant dense<0.000000e+00> : vector<3x256xf32>
    %47 = tpu.matmul %45, %46, %cst_26 {dimension_numbers = #tpu.dot_dimension_numbers<[1], [0], [0], [1], [0, 0, 1, 1], [], []>} : vector<3x384xbf16>, vector<384x256xbf16>, vector<3x256xf32> -> vector<3x256xf32>
    %48 = arith.addf %44, %47 : vector<3x256xf32>
    %c0_27 = arith.constant 0 : index
    %c0_28 = arith.constant 0 : index
    %49 = vector.load %arg4[%c0_27, %c0_28] : memref<1x256xf32, #tpu.memory_space<vmem>>, vector<1x256xf32>
    %50 = vector.broadcast %49 : vector<1x256xf32> to vector<3x256xf32>
    %51 = arith.addf %48, %50 : vector<3x256xf32>
    %cst_29 = arith.constant 0.000000e+00 : f32
    %52 = vector.broadcast %cst_29 : f32 to vector<3x256xf32>
    %53 = arith.maximumf %51, %52 : vector<3x256xf32>
    %c0_30 = arith.constant 0 : index
    %c0_31 = arith.constant 0 : index
    %c0_32 = arith.constant 0 : index
    %c0_33 = arith.constant 0 : index
    %54 = vector.load %arg5[%c0_30, %c0_31, %c0_32, %c0_33] : memref<1x1x3x256xf32, #tpu.memory_space<vmem>>, vector<1x1x3x256xf32>
    %55 = vector.shape_cast %54 : vector<1x1x3x256xf32> to vector<3x256xf32>
    %56 = vector.shape_cast %53 : vector<3x256xf32> to vector<1x1x3x256xf32>
    tpu.vector_store %arg5[%c0_30, %c0_31, %c0_32, %c0_33], %56 {strides = array<i32>} : memref<1x1x3x256xf32, #tpu.memory_space<vmem>>, vector<1x1x3x256xf32>,
    return
  }
  func.func @transform_0(%arg0: i32, %arg1: i32) -> (i32, i32, i32, i32) {
    %c0_i32 = arith.constant 0 : i32
    %c0_i32_0 = arith.constant 0 : i32
    %c0_i32_1 = arith.constant 0 : i32
    %c0_i32_2 = arith.constant 0 : i32
    return %arg0, %c0_i32, %c0_i32_0, %c0_i32_1 : i32, i32, i32, i32
  }
  func.func @transform_1(%arg0: i32, %arg1: i32) -> (i32, i32) {
    %c0_i32 = arith.constant 0 : i32
    %c0_i32_0 = arith.constant 0 : i32
    %c0_i32_1 = arith.constant 0 : i32
    return %c0_i32, %c0_i32_0 : i32, i32
  }
  func.func @transform_2(%arg0: i32, %arg1: i32) -> (i32, i32) {
    %c0_i32 = arith.constant 0 : i32
    %c0_i32_0 = arith.constant 0 : i32
    %c0_i32_1 = arith.constant 0 : i32
    return %c0_i32, %c0_i32_0 : i32, i32
  }
  func.func @transform_3(%arg0: i32, %arg1: i32) -> (i32, i32, i32, i32) {
    %c0_i32 = arith.constant 0 : i32
    %c0_i32_0 = arith.constant 0 : i32
    %c0_i32_1 = arith.constant 0 : i32
    return %arg0, %arg1, %c0_i32, %c0_i32_0 : i32, i32, i32, i32
  }
}

module attributes {stable_mosaic.version = 11 : i64} {
  func.func @_conv_tap_kernel(%arg0: i32, %arg1: i32, %arg2: memref<1x5x5x256xbf16, #tpu.memory_space<vmem>>, %arg3: memref<2304x256xbf16, #tpu.memory_space<vmem>>, %arg4: memref<1x256xf32, #tpu.memory_space<vmem>>, %arg5: memref<1x1x3x256xf32, #tpu.memory_space<vmem>>) attributes {dimension_semantics = [#tpu.dimension_semantics<parallel>, #tpu.dimension_semantics<parallel>], iteration_bounds = array<i64: 2, 3>, scalar_prefetch = 0 : i64, scratch_operands = 0 : i64, tpu.core_type = #tpu.core_type<tc>, window_params = [{transform_indices = @transform_0, window_bounds = array<i64: 1, 5, 5, 256>}, {pipeline_mode = #tpu.pipeline_mode<synchronous>, transform_indices = @transform_1, window_bounds = array<i64: 2304, 256>}, {pipeline_mode = #tpu.pipeline_mode<synchronous>, transform_indices = @transform_2, window_bounds = array<i64: 1, 256>}, {transform_indices = @transform_3, window_bounds = array<i64: 1, 1, 3, 256>}]} {
    %cst = arith.constant 0.000000e+00 : f32
    %0 = vector.broadcast %cst : f32 to vector<3x256xf32>
    %c0_i32 = arith.constant 0 : i32
    %1 = arith.addi %arg1, %c0_i32 : i32
    %c0 = arith.constant 0 : index
    %2 = arith.index_cast %1 : i32 to index
    %c0_0 = arith.constant 0 : index
    %c0_1 = arith.constant 0 : index
    %3 = vector.load %arg2[%c0, %2, %c0_0, %c0_1] : memref<1x5x5x256xbf16, #tpu.memory_space<vmem>>, vector<1x1x5x256xbf16>
    %4 = vector.shape_cast %3 : vector<1x1x5x256xbf16> to vector<5x256xbf16>
    %5 = vector.extract_strided_slice %4 {offsets = [0, 0], sizes = [3, 256], strides = [1, 1]} : vector<5x256xbf16> to vector<3x256xbf16>
    %c0_2 = arith.constant 0 : index
    %c0_3 = arith.constant 0 : index
    %6 = vector.load %arg3[%c0_2, %c0_3] : memref<2304x256xbf16, #tpu.memory_space<vmem>>, vector<256x256xbf16>
    %cst_4 = arith.constant dense<0.000000e+00> : vector<3x256xf32>
    %7 = tpu.matmul %5, %6, %cst_4 {dimension_numbers = #tpu.dot_dimension_numbers<[1], [0], [0], [1], [0, 0, 1, 1], [], []>} : vector<3x256xbf16>, vector<256x256xbf16>, vector<3x256xf32> -> vector<3x256xf32>
    %8 = arith.addf %0, %7 : vector<3x256xf32>
    %9 = vector.extract_strided_slice %4 {offsets = [1, 0], sizes = [3, 256], strides = [1, 1]} : vector<5x256xbf16> to vector<3x256xbf16>
    %c256 = arith.constant 256 : index
    %c0_5 = arith.constant 0 : index
    %10 = vector.load %arg3[%c256, %c0_5] : memref<2304x256xbf16, #tpu.memory_space<vmem>>, vector<256x256xbf16>
    %cst_6 = arith.constant dense<0.000000e+00> : vector<3x256xf32>
    %11 = tpu.matmul %9, %10, %cst_6 {dimension_numbers = #tpu.dot_dimension_numbers<[1], [0], [0], [1], [0, 0, 1, 1], [], []>} : vector<3x256xbf16>, vector<256x256xbf16>, vector<3x256xf32> -> vector<3x256xf32>
    %12 = arith.addf %8, %11 : vector<3x256xf32>
    %13 = vector.extract_strided_slice %4 {offsets = [2, 0], sizes = [3, 256], strides = [1, 1]} : vector<5x256xbf16> to vector<3x256xbf16>
    %c512 = arith.constant 512 : index
    %c0_7 = arith.constant 0 : index
    %14 = vector.load %arg3[%c512, %c0_7] : memref<2304x256xbf16, #tpu.memory_space<vmem>>, vector<256x256xbf16>
    %cst_8 = arith.constant dense<0.000000e+00> : vector<3x256xf32>
    %15 = tpu.matmul %13, %14, %cst_8 {dimension_numbers = #tpu.dot_dimension_numbers<[1], [0], [0], [1], [0, 0, 1, 1], [], []>} : vector<3x256xbf16>, vector<256x256xbf16>, vector<3x256xf32> -> vector<3x256xf32>
    %16 = arith.addf %12, %15 : vector<3x256xf32>
    %c1_i32 = arith.constant 1 : i32
    %17 = arith.addi %arg1, %c1_i32 : i32
    %c0_9 = arith.constant 0 : index
    %18 = arith.index_cast %17 : i32 to index
    %c0_10 = arith.constant 0 : index
    %c0_11 = arith.constant 0 : index
    %19 = vector.load %arg2[%c0_9, %18, %c0_10, %c0_11] : memref<1x5x5x256xbf16, #tpu.memory_space<vmem>>, vector<1x1x5x256xbf16>
    %20 = vector.shape_cast %19 : vector<1x1x5x256xbf16> to vector<5x256xbf16>
    %21 = vector.extract_strided_slice %20 {offsets = [0, 0], sizes = [3, 256], strides = [1, 1]} : vector<5x256xbf16> to vector<3x256xbf16>
    %c768 = arith.constant 768 : index
    %c0_12 = arith.constant 0 : index
    %22 = vector.load %arg3[%c768, %c0_12] : memref<2304x256xbf16, #tpu.memory_space<vmem>>, vector<256x256xbf16>
    %cst_13 = arith.constant dense<0.000000e+00> : vector<3x256xf32>
    %23 = tpu.matmul %21, %22, %cst_13 {dimension_numbers = #tpu.dot_dimension_numbers<[1], [0], [0], [1], [0, 0, 1, 1], [], []>} : vector<3x256xbf16>, vector<256x256xbf16>, vector<3x256xf32> -> vector<3x256xf32>
    %24 = arith.addf %16, %23 : vector<3x256xf32>
    %25 = vector.extract_strided_slice %20 {offsets = [1, 0], sizes = [3, 256], strides = [1, 1]} : vector<5x256xbf16> to vector<3x256xbf16>
    %c1024 = arith.constant 1024 : index
    %c0_14 = arith.constant 0 : index
    %26 = vector.load %arg3[%c1024, %c0_14] : memref<2304x256xbf16, #tpu.memory_space<vmem>>, vector<256x256xbf16>
    %cst_15 = arith.constant dense<0.000000e+00> : vector<3x256xf32>
    %27 = tpu.matmul %25, %26, %cst_15 {dimension_numbers = #tpu.dot_dimension_numbers<[1], [0], [0], [1], [0, 0, 1, 1], [], []>} : vector<3x256xbf16>, vector<256x256xbf16>, vector<3x256xf32> -> vector<3x256xf32>
    %28 = arith.addf %24, %27 : vector<3x256xf32>
    %29 = vector.extract_strided_slice %20 {offsets = [2, 0], sizes = [3, 256], strides = [1, 1]} : vector<5x256xbf16> to vector<3x256xbf16>
    %c1280 = arith.constant 1280 : index
    %c0_16 = arith.constant 0 : index
    %30 = vector.load %arg3[%c1280, %c0_16] : memref<2304x256xbf16, #tpu.memory_space<vmem>>, vector<256x256xbf16>
    %cst_17 = arith.constant dense<0.000000e+00> : vector<3x256xf32>
    %31 = tpu.matmul %29, %30, %cst_17 {dimension_numbers = #tpu.dot_dimension_numbers<[1], [0], [0], [1], [0, 0, 1, 1], [], []>} : vector<3x256xbf16>, vector<256x256xbf16>, vector<3x256xf32> -> vector<3x256xf32>
    %32 = arith.addf %28, %31 : vector<3x256xf32>
    %c2_i32 = arith.constant 2 : i32
    %33 = arith.addi %arg1, %c2_i32 : i32
    %c0_18 = arith.constant 0 : index
    %34 = arith.index_cast %33 : i32 to index
    %c0_19 = arith.constant 0 : index
    %c0_20 = arith.constant 0 : index
    %35 = vector.load %arg2[%c0_18, %34, %c0_19, %c0_20] : memref<1x5x5x256xbf16, #tpu.memory_space<vmem>>, vector<1x1x5x256xbf16>
    %36 = vector.shape_cast %35 : vector<1x1x5x256xbf16> to vector<5x256xbf16>
    %37 = vector.extract_strided_slice %36 {offsets = [0, 0], sizes = [3, 256], strides = [1, 1]} : vector<5x256xbf16> to vector<3x256xbf16>
    %c1536 = arith.constant 1536 : index
    %c0_21 = arith.constant 0 : index
    %38 = vector.load %arg3[%c1536, %c0_21] : memref<2304x256xbf16, #tpu.memory_space<vmem>>, vector<256x256xbf16>
    %cst_22 = arith.constant dense<0.000000e+00> : vector<3x256xf32>
    %39 = tpu.matmul %37, %38, %cst_22 {dimension_numbers = #tpu.dot_dimension_numbers<[1], [0], [0], [1], [0, 0, 1, 1], [], []>} : vector<3x256xbf16>, vector<256x256xbf16>, vector<3x256xf32> -> vector<3x256xf32>
    %40 = arith.addf %32, %39 : vector<3x256xf32>
    %41 = vector.extract_strided_slice %36 {offsets = [1, 0], sizes = [3, 256], strides = [1, 1]} : vector<5x256xbf16> to vector<3x256xbf16>
    %c1792 = arith.constant 1792 : index
    %c0_23 = arith.constant 0 : index
    %42 = vector.load %arg3[%c1792, %c0_23] : memref<2304x256xbf16, #tpu.memory_space<vmem>>, vector<256x256xbf16>
    %cst_24 = arith.constant dense<0.000000e+00> : vector<3x256xf32>
    %43 = tpu.matmul %41, %42, %cst_24 {dimension_numbers = #tpu.dot_dimension_numbers<[1], [0], [0], [1], [0, 0, 1, 1], [], []>} : vector<3x256xbf16>, vector<256x256xbf16>, vector<3x256xf32> -> vector<3x256xf32>
    %44 = arith.addf %40, %43 : vector<3x256xf32>
    %45 = vector.extract_strided_slice %36 {offsets = [2, 0], sizes = [3, 256], strides = [1, 1]} : vector<5x256xbf16> to vector<3x256xbf16>
    %c2048 = arith.constant 2048 : index
    %c0_25 = arith.constant 0 : index
    %46 = vector.load %arg3[%c2048, %c0_25] : memref<2304x256xbf16, #tpu.memory_space<vmem>>, vector<256x256xbf16>
    %cst_26 = arith.constant dense<0.000000e+00> : vector<3x256xf32>
    %47 = tpu.matmul %45, %46, %cst_26 {dimension_numbers = #tpu.dot_dimension_numbers<[1], [0], [0], [1], [0, 0, 1, 1], [], []>} : vector<3x256xbf16>, vector<256x256xbf16>, vector<3x256xf32> -> vector<3x256xf32>
    %48 = arith.addf %44, %47 : vector<3x256xf32>
    %c0_27 = arith.constant 0 : index
    %c0_28 = arith.constant 0 : index
    %49 = vector.load %arg4[%c0_27, %c0_28] : memref<1x256xf32, #tpu.memory_space<vmem>>, vector<1x256xf32>
    %50 = vector.broadcast %49 : vector<1x256xf32> to vector<3x256xf32>
    %51 = arith.addf %48, %50 : vector<3x256xf32>
    %cst_29 = arith.constant 0.000000e+00 : f32
    %52 = vector.broadcast %cst_29 : f32 to vector<3x256xf32>
    %53 = arith.maximumf %51, %52 : vector<3x256xf32>
    %c0_30 = arith.constant 0 : index
    %c0_31 = arith.constant 0 : index
    %c0_32 = arith.constant 0 : index
    %c0_33 = arith.constant 0 : index
    %54 = vector.load %arg5[%c0_30, %c0_31, %c0_32, %c0_33] : memref<1x1x3x256xf32, #tpu.memory_space<vmem>>, vector<1x1x3x256xf32>
    %55 = vector.shape_cast %54 : vector<1x1x3x256xf32> to vector<3x256xf32>
    %56 = vector.shape_cast %53 : vector<3x256xf32> to vector<1x1x3x256xf32>
    tpu.vector_store %arg5[%c0_30, %c0_31, %c0_32, %c0_33], %56 {strides = array<i32>} : memref<1x1x3x256xf32, #tpu.memory_space<vmem>>, vector<1x1x3x256xf32>,
    return
  }
  func.func @transform_0(%arg0: i32, %arg1: i32) -> (i32, i32, i32, i32) {
    %c0_i32 = arith.constant 0 : i32
    %c0_i32_0 = arith.constant 0 : i32
    %c0_i32_1 = arith.constant 0 : i32
    %c0_i32_2 = arith.constant 0 : i32
    return %arg0, %c0_i32, %c0_i32_0, %c0_i32_1 : i32, i32, i32, i32
  }
  func.func @transform_1(%arg0: i32, %arg1: i32) -> (i32, i32) {
    %c0_i32 = arith.constant 0 : i32
    %c0_i32_0 = arith.constant 0 : i32
    %c0_i32_1 = arith.constant 0 : i32
    return %c0_i32, %c0_i32_0 : i32, i32
  }
  func.func @transform_2(%arg0: i32, %arg1: i32) -> (i32, i32) {
    %c0_i32 = arith.constant 0 : i32
    %c0_i32_0 = arith.constant 0 : i32
    %c0_i32_1 = arith.constant 0 : i32
    return %c0_i32, %c0_i32_0 : i32, i32
  }
  func.func @transform_3(%arg0: i32, %arg1: i32) -> (i32, i32, i32, i32) {
    %c0_i32 = arith.constant 0 : i32
    %c0_i32_0 = arith.constant 0 : i32
    %c0_i32_1 = arith.constant 0 : i32
    return %arg0, %arg1, %c0_i32, %c0_i32_0 : i32, i32, i32, i32
  }
}

module attributes {stable_mosaic.version = 11 : i64} {
  func.func @_maxpool_kernel(%arg0: i32, %arg1: i32, %arg2: memref<1x3x3x256xf32, #tpu.memory_space<vmem>>, %arg3: memref<1x1x1x256xf32, #tpu.memory_space<vmem>>) attributes {dimension_semantics = [#tpu.dimension_semantics<parallel>, #tpu.dimension_semantics<parallel>], iteration_bounds = array<i64: 2, 1>, scalar_prefetch = 0 : i64, scratch_operands = 0 : i64, tpu.core_type = #tpu.core_type<tc>, window_params = [{transform_indices = @transform_0, window_bounds = array<i64: 1, 3, 3, 256>}, {transform_indices = @transform_1, window_bounds = array<i64: 1, 1, 1, 256>}]} {
    %c2_i32 = arith.constant 2 : i32
    %0 = arith.muli %arg1, %c2_i32 : i32
    %c0 = arith.constant 0 : index
    %1 = arith.index_cast %0 : i32 to index
    %c0_0 = arith.constant 0 : index
    %c0_1 = arith.constant 0 : index
    %2 = vector.load %arg2[%c0, %1, %c0_0, %c0_1] : memref<1x3x3x256xf32, #tpu.memory_space<vmem>>, vector<1x1x3x256xf32>
    %3 = vector.shape_cast %2 : vector<1x1x3x256xf32> to vector<3x256xf32>
    %c1_i32 = arith.constant 1 : i32
    %4 = arith.addi %0, %c1_i32 : i32
    %c0_2 = arith.constant 0 : index
    %5 = arith.index_cast %4 : i32 to index
    %c0_3 = arith.constant 0 : index
    %c0_4 = arith.constant 0 : index
    %6 = vector.load %arg2[%c0_2, %5, %c0_3, %c0_4] : memref<1x3x3x256xf32, #tpu.memory_space<vmem>>, vector<1x1x3x256xf32>
    %7 = vector.shape_cast %6 : vector<1x1x3x256xf32> to vector<3x256xf32>
    %8 = arith.maximumf %3, %7 : vector<3x256xf32>
    %c2_i32_5 = arith.constant 2 : i32
    %9 = arith.addi %0, %c2_i32_5 : i32
    %c0_6 = arith.constant 0 : index
    %10 = arith.index_cast %9 : i32 to index
    %c0_7 = arith.constant 0 : index
    %c0_8 = arith.constant 0 : index
    %11 = vector.load %arg2[%c0_6, %10, %c0_7, %c0_8] : memref<1x3x3x256xf32, #tpu.memory_space<vmem>>, vector<1x1x3x256xf32>
    %12 = vector.shape_cast %11 : vector<1x1x3x256xf32> to vector<3x256xf32>
    %13 = arith.maximumf %8, %12 : vector<3x256xf32>
    %14 = vector.extract_strided_slice %13 {offsets = [0, 0], sizes = [1, 256], strides = [1, 1]} : vector<3x256xf32> to vector<1x256xf32>
    %15 = vector.extract_strided_slice %13 {offsets = [1, 0], sizes = [1, 256], strides = [1, 1]} : vector<3x256xf32> to vector<1x256xf32>
    %16 = arith.maximumf %14, %15 : vector<1x256xf32>
    %17 = vector.extract_strided_slice %13 {offsets = [2, 0], sizes = [1, 256], strides = [1, 1]} : vector<3x256xf32> to vector<1x256xf32>
    %18 = arith.maximumf %16, %17 : vector<1x256xf32>
    %c0_9 = arith.constant 0 : index
    %c0_10 = arith.constant 0 : index
    %c0_11 = arith.constant 0 : index
    %c0_12 = arith.constant 0 : index
    %19 = vector.load %arg3[%c0_9, %c0_10, %c0_11, %c0_12] : memref<1x1x1x256xf32, #tpu.memory_space<vmem>>, vector<1x1x1x256xf32>
    %20 = vector.shape_cast %19 : vector<1x1x1x256xf32> to vector<1x256xf32>
    %21 = vector.shape_cast %18 : vector<1x256xf32> to vector<1x1x1x256xf32>
    tpu.vector_store %arg3[%c0_9, %c0_10, %c0_11, %c0_12], %21 {strides = array<i32>} : memref<1x1x1x256xf32, #tpu.memory_space<vmem>>, vector<1x1x1x256xf32>,
    return
  }
  func.func @transform_0(%arg0: i32, %arg1: i32) -> (i32, i32, i32, i32) {
    %c0_i32 = arith.constant 0 : i32
    %c0_i32_0 = arith.constant 0 : i32
    %c0_i32_1 = arith.constant 0 : i32
    %c0_i32_2 = arith.constant 0 : i32
    return %arg0, %c0_i32, %c0_i32_0, %c0_i32_1 : i32, i32, i32, i32
  }
  func.func @transform_1(%arg0: i32, %arg1: i32) -> (i32, i32, i32, i32) {
    %c0_i32 = arith.constant 0 : i32
    %c0_i32_0 = arith.constant 0 : i32
    %c0_i32_1 = arith.constant 0 : i32
    return %arg0, %arg1, %c0_i32, %c0_i32_0 : i32, i32, i32, i32
  }
}

</mosaic_0001>

<bundles_post_ra>
// kernel: _lambda_.9
= control target key start
LH: loop header
LB: loop body
LE: loop exit
PB: predicated region body
PF: predicated region fallthrough
CT: control target
= control target key end

     0   :  { %s390_s6 = smov 0   ;;  %s392_s7 = smov 0   ;;  %s441_s0 = inlined_call_operand.vmem [shape: f32[2,16,16,64], index: 0, kind: input, shape index: {}]   ;;  %s442_s1 = inlined_call_operand.vmem [shape: f32[2,7,7,64], index: 1, kind: output, shape index: {}]  }
   0x1   :  { %s394_s8 = smov 0   ;;  %s396_s9 = smov 0  }
   0x2   :  { %s398_s10 = smov 0  }
   0x3 LB: > { %s20_s11 = sadd.s32 1, %s370_s8  ;;  %s23_s12 = sadd.s32 1, %s374_s9  ;;  %s378_s10 = sphi %s398_s10, %s11_s10   ;;  %s374_s9 = sphi %s396_s9, %s446_s9   ;;  %s370_s8 = sphi %s394_s8, %s445_s8   ;;  %s366_s7 = sphi %s392_s7, %s444_s7   ;;  %s362_s6 = sphi %s390_s6, %s443_s6  }
   0x4   : > { %p21_p0 = scmp.ge.s32.totalorder %s20_s11, 7  ;;  %p279_p1 = scmp.ge.s32.totalorder %s378_s10, 1 }
   0x5   : > { %p101_p2 = scmp.lt.s32.totalorder %s378_s10, 15 }
   0x6   : > { %s448_s11 = smov (%p21_p0, %s20_s11), 0  ;;  %s450_s12 = smov (!%p21_p0, %s23_s12), %s374_s9 }
   0x7   : > { %p102_p3 = pnand %p279_p1, %p101_p2  ;;  %p25_p4 = scmp.ge.s32.totalorder %s450_s12, 2 }
   0x8   : > { %p124_p5 = scmp.lt.s32.totalorder (!%p102_p3), %s366_s7, 1  ;;  %p131_p6 = scmp.lt.s32.totalorder (!%p102_p3), %s362_s6, 6 }
   0x9   : > { %s452_s12 = smov (%p25_p4, %s450_s12), 0  ;;  %105 = sbr.rel (%p102_p3) target bundleno = 35 (0x23), region = 24 }
   0xa   : > { %s296_s13 = sshll.u32 (!%p102_p3), %s362_s6, 5 }
   0xe   : > { %s454_s7 = smov (!%p124_p5, %s366_s7), 1  ;;  %s456_s6 = smov (!%p131_p6, %s362_s6), 6  ;;  %vm158_vm0 = vcmask 1046528   ;;  %vm166_vm1 = vcmask 1045504   ;;  %vm174_vm2 = vcmask 516096   ;;  %vm176_vm3 = vcmask 518146  }
   0xf   : > { %s295_s14 = sshll.u32 %s454_s7, 8  ;;  %s299_s18 = smul.u32 7, %s454_s7  ;;  %vm178_vm4 = vcmask 520196   ;;  %vm180_vm5 = vcmask 522246  }
  0x10   : > { %s128_s17 = scalar_lea.vmem %s441_s0, %s295_s14 }
  0x11   : > { %s139_s19 = scalar_lea.vmem %s128_s17, %s296_s13  ;;  %s134_s20 = sadd.s32 %s299_s18, %s456_s6 }
  0x12   : > { %v140_v0 = vld [vmem:[%s139_s19] sm:$0xff]  ;;  %v141_v1 = vld [vmem:[%s139_s19 + $0x8] sm:$0xff]  ;;  %v287_v2 = vld [vmem:[%s139_s19 + $0x10] sm:$0xff]  ;;  %s282_s21 = sshll.u32 %s134_s20, 3 }
  0x13   : > { %v288_v3 = vld [vmem:[%s139_s19 + $0x18] sm:$0xff]  ;;  %v147_v4 = vmax.f32 %v140_v0, %v287_v2  ;;  %v291_v5 = vld [vmem:[%s139_s19 + $0x20] sm:$0xff]  ;;  %v292_v6 = vld [vmem:[%s139_s19 + $0x28] sm:$0xff]  ;;  %s136_s24 = scalar_lea.vmem %s442_s1, %s282_s21 }
  0x14   : > { %v148_v7 = vmax.f32 %v141_v1, %v288_v3 }
  0x15   : > { %v154_v8 = vmax.f32 %v147_v4, %v291_v5 }
  0x16   : > { %v155_v9 = vmax.f32 %v148_v7, %v292_v6 }
  0x17   : > { %v159_v10 = vrot.slane %v154_v8, 1  ;;  %v167_v11 = vrot.slane %v154_v8, 2 }
  0x18   : > { %v160_v12 = vrot.slane %v155_v9, 1  ;;  %v168_v13 = vrot.slane %v155_v9, 2 }
  0x1a   : > { %v161_v14 = vsel %vm158_vm0, %v159_v10, %v160_v12  ;;  %v169_v15 = vsel %vm166_vm1, %v167_v11, %v168_v13  ;;  %v165_v16 = vmax.f32 %v155_v9, %v160_v12 }
  0x1b   : > { %v164_v17 = vmax.f32 %v154_v8, %v161_v14 }
  0x1c   : > { %v173_v18 = vmax.f32 %v165_v16, %v168_v13 }
  0x1d   : > { %v172_v19 = vmax.f32 %v164_v17, %v169_v15 }
  0x1e   : > { %182 = vst.msk [vmem:[%s136_s24 + $0x4] sm:$0x1] %vm174_vm2, %v173_v18 }
  0x1f   : > { %183 = vst.msk [vmem:[%s136_s24 + $0x3] sm:$0x4] %vm176_vm3, %v173_v18  ;;  %177 = vst.msk [vmem:[%s136_s24 - $0x1] sm:$0x4] %vm176_vm3, %v172_v19 }
  0x20   : > { %184 = vst.msk [vmem:[%s136_s24 + $0x2] sm:$0x10] %vm178_vm4, %v173_v18  ;;  %179 = vst.msk [vmem:[%s136_s24 - $0x2] sm:$0x10] %vm178_vm4, %v172_v19 }
  0x21   : > { %175 = vst.msk [vmem:[%s136_s24] sm:$0x1] %vm174_vm2, %v172_v19 }
  0x22   : > { %181 = vst.msk [vmem:[%s136_s24 - $0x3] sm:$0x40] %vm180_vm5, %v172_v19 }
  0x23 PF: > { %s11_s10 = sadd.s32 1, %s378_s10   ;;  %s443_s6 = smov %s370_s8 }
  0x24   : > { %p8_p7 = scmp.ge.s32.totalorder %s11_s10, 16   ;;  %s444_s7 = smov %s374_s9 }
  0x25   : > { %s445_s8 = smov %s448_s11  ;;  %s446_s9 = smov %s452_s12 }
  0x26   :  { %10 = sbr.rel (!%p8_p7) target bundleno = 3 (0x3), region = 57 }

// kernel: _lambda_.8
= control target key start
LH: loop header
LB: loop body
LE: loop exit
PB: predicated region body
PF: predicated region fallthrough
CT: control target
= control target key end

     0   :  { %s1549_s12 = smov 0   ;;  %s1831_s0 = inlined_call_operand.vmem [shape: bf16[512,384], index: 0, kind: input, shape index: {}]   ;;  %s1832_s1 = inlined_call_operand.vmem [shape: bf16[384,64], index: 1, kind: input, shape index: {}]   ;;  %s1833_s2 = inlined_call_operand.vmem [shape: f32[1,64], index: 2, kind: input, shape index: {}]   ;;  %s1834_s3 = inlined_call_operand.vmem [shape: f32[512,64], index: 3, kind: output, shape index: {}]  }
   0x1 LB: > { %s1140_s13 = sadd.s32 4294967295, %s1527_s12   ;;  %p1144_p0 = scmp.ge.s32.totalorder %s1527_s12, 1  ;;  %s1527_s12 = sphi %s1549_s12, %s13_s12  }
   0x2   : > { %p139_p1 = scmp.lt.s32.totalorder %s1527_s12, 3 }
   0x4   : > { %p140_p2 = pnand %p1144_p0, %p139_p1 }
   0x5   : > { %s1145_s16 = sshll.u32 (!%p140_p2), %s1140_s13, 5 }
   0x6   : > { %143 = sbr.rel (%p140_p2) target bundleno = 340 (0x154), region = 32  ;;  %p165_p3 = scmp.lt.s32.totalorder (!%p140_p2), %s1145_s16, 63 }
   0xb   : > { %v1433_v0 = vld [vmem:[%s1832_s1 + $0x78] sm:$0xff]   ;;  %v1435_v2 = vld [vmem:[%s1832_s1 + $0x70] sm:$0xff]   ;;  %v1437_v4 = vld [vmem:[%s1832_s1 + $0x68] sm:$0xff]   ;;  %s1836_s16 = smov (!%p165_p3, %s1145_s16), 63  ;;  %vm1051_vm0 = vcmask 523264  }
   0xc   : > { %v1434_v1 = vld [vmem:[%s1832_s1 + $0x38] sm:$0xff]   ;;  %1224 = vmatprep.subr.bf16.mxu0 %v1433_v0  ;;  %1408 = vmatprep.subr.bf16.mxu1 %v1433_v0  ;;  %v1436_v3 = vld [vmem:[%s1832_s1 + $0x30] sm:$0xff]   ;;  %v1438_v5 = vld [vmem:[%s1832_s1 + $0x28] sm:$0xff]   ;;  %s1424_s29 = smul.u32 12, %s1836_s16  ;;  %s1148_s19 = sshll.u32 %s1836_s16, 3 }
   0xd   : > { %1225 = vmatpush3.bf16.msra.mxu0 %v1434_v1  ;;  %1416 = vmatpush3.bf16.msra.mxu1 %v1434_v1  ;;  %v1439_v6 = vld [vmem:[%s1832_s1 + $0x60] sm:$0xff]   ;;  %v1441_v8 = vld [vmem:[%s1832_s1 + $0x58] sm:$0xff]   ;;  %v1443_v10 = vld [vmem:[%s1832_s1 + $0x50] sm:$0xff]   ;;  %s1716_s22 = scalar_lea.vmem %s1834_s3, %s1148_s19 }
   0xe   : > { %1226 = vmatprep.subr.bf16.mxu0 %v1435_v2  ;;  %1409 = vmatprep.subr.bf16.mxu1 %v1435_v2  ;;  %v1440_v7 = vld [vmem:[%s1832_s1 + $0x20] sm:$0xff]   ;;  %s1590_s9 = scalar_lea.vmem %s1831_s0, %s1424_s29  ;;  %v1442_v9 = vld [vmem:[%s1832_s1 + $0x18] sm:$0xff]   ;;  %v1444_v13 = vld [vmem:[%s1832_s1 + $0x10] sm:$0xff]  }
   0xf   : > { %v1451_v11 = vld [vmem:[%s1590_s9 + $0x4] ss:$12 sps:$4 sm:$0xff]   ;;  %v1445_v14 = vld [vmem:[%s1832_s1 + $0x48] sm:$0xff]   ;;  %v1455_v18 = vld [vmem:[%s1832_s1 + $0xb8] sm:$0xff]  }
  0x10   : > { %v1454_v12 = vld [vmem:[%s1590_s9 + $0x124] ss:$12 sps:$4 sm:$0xff]   ;;  %729 = vmatprep.mubr.bf16.mxu0 %v1451_v11  ;;  %v1446_v15 = vld [vmem:[%s1832_s1 + $0x8] sm:$0xff]   ;;  %v1465_v28 = vld [vmem:[%s1590_s9 + $0x34] ss:$12 sps:$4 sm:$0xff]  }
  0x11   : > { %1227 = vmatpush3.bf16.msra.mxu0 %v1436_v3  ;;  %1417 = vmatpush3.bf16.msra.mxu1 %v1436_v3  ;;  %v1447_v16 = vld [vmem:[%s1832_s1 + $0x40] sm:$0xff]   ;;  %v1457_v21 = vld [vmem:[%s1590_s9 + $0x1c] ss:$12 sps:$4 sm:$0xff]   ;;  %v1456_v22 = vld [vmem:[%s1832_s1 + $0xb0] sm:$0xff]  }
  0x12   : > { %1228 = vmatprep.subr.bf16.mxu0 %v1437_v4  ;;  %1410 = vmatprep.subr.bf16.mxu1 %v1437_v4  ;;  %v1448_v17 = vld [vmem:[%s1832_s1] sm:$0xff]   ;;  %v1459_v23 = vld [vmem:[%s1590_s9 + $0x13c] ss:$12 sps:$4 sm:$0xff]   ;;  %v1472_v33 = vld [vmem:[%s1832_s1 + $0x90] sm:$0xff]  }
  0x13   : > { %825 = vmatprep.mubr.bf16.mxu1 %v1454_v12  ;;  %v1449_v19 = vld [vmem:[%s1590_s9] ss:$12 sps:$4 sm:$0xff]   ;;  %v1461_v24 = vld [vmem:[%s1590_s9 + $0x18] ss:$12 sps:$4 sm:$0xff]   ;;  %v1469_v31 = vld [vmem:[%s1590_s9 + $0x30] ss:$12 sps:$4 sm:$0xff]  }
  0x14   : > { %v1452_v20 = vld [vmem:[%s1590_s9 + $0x120] ss:$12 sps:$4 sm:$0xff]   ;;  %v1462_v26 = vld [vmem:[%s1590_s9 + $0x138] ss:$12 sps:$4 sm:$0xff]   ;;  %v1470_v32 = vld [vmem:[%s1590_s9 + $0x150] ss:$12 sps:$4 sm:$0xff]  }
  0x15   : > { %1229 = vmatpush3.bf16.msra.mxu0 %v1438_v5  ;;  %1418 = vmatpush3.bf16.msra.mxu1 %v1438_v5  ;;  %v1463_v25 = vld [vmem:[%s1832_s1 + $0xa8] sm:$0xff]   ;;  %v1464_v27 = vld [vmem:[%s1832_s1 + $0xa0] sm:$0xff]   ;;  %v1471_v30 = vld [vmem:[%s1832_s1 + $0x98] sm:$0xff]  }
  0x16   : > { %1230 = vmatprep.subr.bf16.mxu0 %v1439_v6  ;;  %1411 = vmatprep.subr.bf16.mxu1 %v1439_v6  ;;  %v1467_v29 = vld [vmem:[%s1590_s9 + $0x154] ss:$12 sps:$4 sm:$0xff]   ;;  %v1473_v34 = vld [vmem:[%s1590_s9 + $0x4c] ss:$12 sps:$4 sm:$0xff]   ;;  %v1481_v39 = vld [vmem:[%s1590_s9 + $0x64] ss:$12 sps:$4 sm:$0xff]  }
  0x17   : > { %v1475_v35 = vld [vmem:[%s1590_s9 + $0x16c] ss:$12 sps:$4 sm:$0xff]   ;;  %v1477_v37 = vld [vmem:[%s1590_s9 + $0x48] ss:$12 sps:$4 sm:$0xff]   ;;  %v1480_v40 = vld [vmem:[%s1832_s1 + $0x80] sm:$0xff]  }
  0x18   : > { %v1479_v36 = vld [vmem:[%s1832_s1 + $0x88] sm:$0xff]   ;;  %v1488_v45 = vld [vmem:[%s1590_s9 + $0x38] ss:$12 sps:$4 sm:$0xff]   ;;  %v1490_v47 = vld [vmem:[%s1590_s9 + $0x50] ss:$12 sps:$4 sm:$0xff]  }
  0x19   : > { %1231 = vmatpush3.bf16.msra.mxu0 %v1440_v7  ;;  %1419 = vmatpush3.bf16.msra.mxu1 %v1440_v7  ;;  %v1478_v38 = vld [vmem:[%s1590_s9 + $0x168] ss:$12 sps:$4 sm:$0xff]   ;;  %v1484_v42 = vld [vmem:[%s1590_s9 + $0x60] ss:$12 sps:$4 sm:$0xff]   ;;  %v1489_v46 = vld [vmem:[%s1590_s9 + $0x78] ss:$12 sps:$4 sm:$0xff]  }
  0x1a   : > { %1232 = vmatprep.subr.bf16.mxu0 %v1441_v8  ;;  %1412 = vmatprep.subr.bf16.mxu1 %v1441_v8  ;;  %v1483_v41 = vld [vmem:[%s1590_s9 + $0x8] ss:$12 sps:$4 sm:$0xff]   ;;  %v1485_v43 = vld [vmem:[%s1590_s9 + $0x20] ss:$12 sps:$4 sm:$0xff]   ;;  %v1494_v50 = vld [vmem:[%s1590_s9 + $0x90] ss:$12 sps:$4 sm:$0xff]  }
  0x1b   : > { %v1486_v44 = vld [vmem:[%s1590_s9 + $0x7c] ss:$12 sps:$4 sm:$0xff]   ;;  %v1491_v48 = vld [vmem:[%s1590_s9 + $0x94] ss:$12 sps:$4 sm:$0xff]   ;;  %v1496_v52 = vld [vmem:[%s1590_s9 + $0xac] ss:$12 sps:$4 sm:$0xff]  }
  0x1c   : > { %v1493_v49 = vld [vmem:[%s1590_s9 + $0x68] ss:$12 sps:$4 sm:$0xff]   ;;  %v1495_v51 = vld [vmem:[%s1590_s9 + $0x80] ss:$12 sps:$4 sm:$0xff]   ;;  %v1498_v53 = vld [vmem:[%s1590_s9 + $0x98] ss:$12 sps:$4 sm:$0xff]  }
  0x1d   : > { %1233 = vmatpush3.bf16.msra.mxu0 %v1442_v9  ;;  %1420 = vmatpush3.bf16.msra.mxu1 %v1442_v9  ;;  %v1499_v54 = vld [vmem:[%s1590_s9 + $0xa8] ss:$12 sps:$4 sm:$0xff]   ;;  %v1500_v55 = vld [vmem:[%s1590_s9 + $0xb0] ss:$12 sps:$4 sm:$0xff]   ;;  %v1504_v58 = vld [vmem:[%s1590_s9 + $0xc0] ss:$12 sps:$4 sm:$0xff]  }
  0x1e   : > { %1234 = vmatprep.subr.bf16.mxu0 %v1443_v10  ;;  %1413 = vmatprep.subr.bf16.mxu1 %v1443_v10  ;;  %v1501_v56 = vld [vmem:[%s1590_s9 + $0xc4] ss:$12 sps:$4 sm:$0xff]   ;;  %v1503_v57 = vld [vmem:[%s1590_s9 + $0xc8] ss:$12 sps:$4 sm:$0xff]   ;;  %v1505_v59 = vld [vmem:[%s1590_s9 + $0xe0] ss:$12 sps:$4 sm:$0xff]  }
  0x1f   : > { %v1506_v60 = vld [vmem:[%s1590_s9 + $0xdc] ss:$12 sps:$4 sm:$0xff]   ;;  %v1508_v61 = vld [vmem:[%s1590_s9 + $0xf8] ss:$12 sps:$4 sm:$0xff]   ;;  %v1511_v0 = vld [vmem:[%s1590_s9 + $0xf4] ss:$12 sps:$4 sm:$0xff]  }
  0x20   : > { %v1509_v62 = vld [vmem:[%s1590_s9 + $0xd8] ss:$12 sps:$4 sm:$0xff]   ;;  %v1510_v63 = vld [vmem:[%s1590_s9 + $0x110] ss:$12 sps:$4 sm:$0xff]   ;;  %v1513_v1 = vld [vmem:[%s1590_s9 + $0x128] ss:$12 sps:$4 sm:$0xff]  }
  0x21   : > { %1235 = vmatpush3.bf16.msra.mxu0 %v1444_v13  ;;  %1421 = vmatpush3.bf16.msra.mxu1 %v1444_v13  ;;  %v1514_v2 = vld [vmem:[%s1590_s9 + $0xf0] ss:$12 sps:$4 sm:$0xff]   ;;  %v1515_v3 = vld [vmem:[%s1590_s9 + $0x140] ss:$12 sps:$4 sm:$0xff]   ;;  %v1518_v5 = vld [vmem:[%s1590_s9 + $0x158] ss:$12 sps:$4 sm:$0xff]  }
  0x22   : > { %1236 = vmatprep.subr.bf16.mxu0 %v1445_v14  ;;  %1414 = vmatprep.subr.bf16.mxu1 %v1445_v14  ;;  %v1516_v4 = vld [vmem:[%s1590_s9 + $0x10c] ss:$12 sps:$4 sm:$0xff]   ;;  %v1519_v6 = vld [vmem:[%s1590_s9 + $0x108] ss:$12 sps:$4 sm:$0xff]   ;;  %v1520_v7 = vld [vmem:[%s1590_s9 + $0x170] ss:$12 sps:$4 sm:$0xff]  }
  0x25   : > { %1237 = vmatpush3.bf16.msra.mxu0 %v1446_v15  ;;  %1422 = vmatpush3.bf16.msra.mxu1 %v1446_v15 }
  0x26   : > { %1238 = vmatprep.subr.bf16.mxu0 %v1447_v16  ;;  %1415 = vmatprep.subr.bf16.mxu1 %v1447_v16 }
  0x29   : > { %1239 = vmatpush3.bf16.msra.mxu0 %v1448_v17  ;;  %1423 = vmatpush3.bf16.msra.mxu1 %v1448_v17 }
  0x2a   : > { %1360 = vmatprep.subr.bf16.mxu1 %v1455_v18 }
  0x2c   : > { %730 = vmatmul.mubr.bf16.vlgmr.msra.gmra.mxu0 %v1449_v19  ;;  %826 = vmatmul.mubr.bf16.vlgmr.msra.gmra.mxu1 %v1452_v20 }
  0x2d   : > { %1361 = vmatpush3.bf16.msra.mxu1 %v1455_v18  ;;  %737 = vmatprep.mubr.bf16.mxu0 %v1457_v21 }
  0x2e   : > { %1362 = vmatprep.subr.bf16.mxu1 %v1456_v22  ;;  %833 = vmatprep.mubr.bf16.mxu1 %v1459_v23 }
  0x31   : > { %1363 = vmatpush3.bf16.msra.mxu1 %v1456_v22 }
  0x32   : > { %1364 = vmatprep.subr.bf16.mxu1 %v1463_v25 }
  0x34   : > { %738 = vmatmul.mubr.bf16.gmra.mxu0 %v1461_v24  ;;  %834 = vmatmul.mubr.bf16.gmra.mxu1 %v1462_v26 }
  0x35   : > { %1365 = vmatpush3.bf16.msra.mxu1 %v1463_v25  ;;  %745 = vmatprep.mubr.bf16.mxu0 %v1465_v28 }
  0x36   : > { %1366 = vmatprep.subr.bf16.mxu1 %v1464_v27  ;;  %841 = vmatprep.mubr.bf16.mxu1 %v1467_v29 }
  0x39   : > { %1367 = vmatpush3.bf16.msra.mxu1 %v1464_v27 }
  0x3a   : > { %1368 = vmatprep.subr.bf16.mxu1 %v1471_v30 }
  0x3c   : > { %746 = vmatmul.mubr.bf16.gmra.mxu0 %v1469_v31  ;;  %842 = vmatmul.mubr.bf16.gmra.mxu1 %v1470_v32 }
  0x3d   : > { %1369 = vmatpush3.bf16.msra.mxu1 %v1471_v30  ;;  %753 = vmatprep.mubr.bf16.mxu0 %v1473_v34 }
  0x3e   : > { %1370 = vmatprep.subr.bf16.mxu1 %v1472_v33  ;;  %849 = vmatprep.mubr.bf16.mxu1 %v1475_v35 }
  0x41   : > { %1371 = vmatpush3.bf16.msra.mxu1 %v1472_v33 }
  0x42   : > { %1372 = vmatprep.subr.bf16.mxu1 %v1479_v36 }
  0x44   : > { %754 = vmatmul.mubr.bf16.gmra.mxu0 %v1477_v37  ;;  %850 = vmatmul.mubr.bf16.gmra.mxu1 %v1478_v38 }
  0x45   : > { %1373 = vmatpush3.bf16.msra.mxu1 %v1479_v36  ;;  %761 = vmatprep.mubr.bf16.mxu0 %v1481_v39 }
  0x46   : > { %1374 = vmatprep.subr.bf16.mxu1 %v1480_v40  ;;  %1376 = vmatprep.mubr.bf16.mxu1 %v1483_v41 }
  0x49   : > { %1375 = vmatpush3.bf16.msra.mxu1 %v1480_v40 }
  0x4c   : > { %762 = vmatmul.mubr.bf16.gmra.mxu0 %v1484_v42  ;;  %1377 = vmatmul.mubr.bf16.vlgmr.msra.gmra.mxu1 %v1485_v43 }
  0x4d   : > { %769 = vmatprep.mubr.bf16.mxu0 %v1486_v44  ;;  %1380 = vmatprep.mubr.bf16.mxu1 %v1488_v45 }
  0x54   : > { %770 = vmatmul.mubr.bf16.gmra.mxu0 %v1489_v46  ;;  %1381 = vmatmul.mubr.bf16.gmra.mxu1 %v1490_v47 }
  0x55   : > { %777 = vmatprep.mubr.bf16.mxu0 %v1491_v48  ;;  %1384 = vmatprep.mubr.bf16.mxu1 %v1493_v49  ;;  %v1708_v48 = vld [vmem:[%s1833_s2] ss:$0 sm:$0xff] }
  0x5c   : > { %778 = vmatmul.mubr.bf16.gmra.mxu0 %v1494_v50  ;;  %1385 = vmatmul.mubr.bf16.gmra.mxu1 %v1495_v51 }
  0x5d   : > { %785 = vmatprep.mubr.bf16.mxu0 %v1496_v52  ;;  %1388 = vmatprep.mubr.bf16.mxu1 %v1498_v53 }
  0x64   : > { %786 = vmatmul.mubr.bf16.gmra.mxu0 %v1499_v54  ;;  %1389 = vmatmul.mubr.bf16.gmra.mxu1 %v1500_v55 }
  0x65   : > { %793 = vmatprep.mubr.bf16.mxu0 %v1501_v56  ;;  %1392 = vmatprep.mubr.bf16.mxu1 %v1503_v57 }
  0x6c   : > { %794 = vmatmul.mubr.bf16.gmra.mxu0 %v1504_v58  ;;  %1393 = vmatmul.mubr.bf16.gmra.mxu1 %v1505_v59 }
  0x6d   : > { %801 = vmatprep.mubr.bf16.mxu0 %v1506_v60  ;;  %1396 = vmatprep.mubr.bf16.mxu1 %v1508_v61 }
  0x74   : > { %802 = vmatmul.mubr.bf16.gmra.mxu0 %v1509_v62  ;;  %1397 = vmatmul.mubr.bf16.gmra.mxu1 %v1510_v63 }
  0x75   : > { %809 = vmatprep.mubr.bf16.mxu0 %v1511_v0  ;;  %1400 = vmatprep.mubr.bf16.mxu1 %v1513_v1 }
  0x7c   : > { %810 = vmatmul.mubr.bf16.gmra.mxu0 %v1514_v2  ;;  %1401 = vmatmul.mubr.bf16.gmra.mxu1 %v1515_v3 }
  0x7d   : > { %817 = vmatprep.mubr.bf16.mxu0 %v1516_v4  ;;  %1404 = vmatprep.mubr.bf16.mxu1 %v1518_v5 }
  0x84   : > { %818 = vmatmul.mubr.bf16.gmra.mxu0 %v1519_v6  ;;  %1405 = vmatmul.mubr.bf16.gmra.mxu1 %v1520_v7 }
  0xec   : > { %v1240_v8 = vpop.f32.mrf.mxu0  ;;  %v1312_v9 = vpop.f32.mrf.mxu1 }
  0xee   : > { %v1241_v10 = vpop.f32.mrf.mxu0  ;;  %v1313_v11 = vpop.f32.mrf.mxu1 }
  0xef   : > { %v1685_v12 = vadd.f32 %v1313_v11, %v1312_v9  ;;  %v1242_v45 = vadd.f32 %v1241_v10, %v1240_v8 }
  0xf0   : > { %v1243_v13 = vpop.f32.mrf.mxu0  ;;  %v1315_v14 = vpop.f32.mrf.mxu1 }
  0xf1   : > { %v732_v55 = vadd.f32 %v1242_v45, %v1708_v48 }
  0xf2   : > { %v1244_v15 = vpop.f32.mrf.mxu0  ;;  %v1316_v16 = vpop.f32.mrf.mxu1 }
  0xf3   : > { %v1687_v17 = vadd.f32 %v1316_v16, %v1315_v14  ;;  %v1245_v53 = vadd.f32 %v1244_v15, %v1243_v13 }
  0xf4   : > { %v1246_v18 = vpop.f32.mrf.mxu0  ;;  %v1318_v19 = vpop.f32.mrf.mxu1 }
  0xf5   : > { %v735_v3 = vadd.f32 %v1245_v53, %v1708_v48 }
  0xf6   : > { %v1247_v20 = vpop.f32.mrf.mxu0  ;;  %v1319_v21 = vpop.f32.mrf.mxu1 }
  0xf7   : > { %v1689_v22 = vadd.f32 %v1319_v21, %v1318_v19  ;;  %v1248_v42 = vadd.f32 %v1247_v20, %v1246_v18 }
  0xf8   : > { %v1249_v23 = vpop.f32.mrf.mxu0  ;;  %v1321_v24 = vpop.f32.mrf.mxu1 }
  0xf9   : > { %v740_v50 = vadd.f32 %v1248_v42, %v1708_v48 }
  0xfa   : > { %v1250_v25 = vpop.f32.mrf.mxu0  ;;  %v1322_v26 = vpop.f32.mrf.mxu1 }
  0xfb   : > { %v1691_v27 = vadd.f32 %v1322_v26, %v1321_v24  ;;  %v1251_v49 = vadd.f32 %v1250_v25, %v1249_v23 }
  0xfc   : > { %v1252_v28 = vpop.f32.mrf.mxu0  ;;  %v1324_v29 = vpop.f32.mrf.mxu1 }
  0xfd   : > { %v743_v61 = vadd.f32 %v1251_v49, %v1708_v48 }
  0xfe   : > { %v1253_v30 = vpop.f32.mrf.mxu0  ;;  %v1325_v31 = vpop.f32.mrf.mxu1 }
  0xff   : > { %v1693_v32 = vadd.f32 %v1325_v31, %v1324_v29  ;;  %v1254_v0 = vadd.f32 %v1253_v30, %v1252_v28 }
 0x100   : > { %v1255_v33 = vpop.f32.mrf.mxu0  ;;  %v1327_v34 = vpop.f32.mrf.mxu1 }
 0x101   : > { %v748_v16 = vadd.f32 %v1254_v0, %v1708_v48 }
 0x102   : > { %v1256_v35 = vpop.f32.mrf.mxu0  ;;  %v1328_v36 = vpop.f32.mrf.mxu1 }
 0x103   : > { %v1695_v37 = vadd.f32 %v1328_v36, %v1327_v34  ;;  %v1257_v13 = vadd.f32 %v1256_v35, %v1255_v33 }
 0x104   : > { %v1258_v38 = vpop.f32.mrf.mxu0  ;;  %v1697_v39 = vpop.f32.mrf.mxu1 }
 0x105   : > { %v751_v31 = vadd.f32 %v1257_v13, %v1708_v48 }
 0x106   : > { %v1259_v40 = vpop.f32.mrf.mxu0  ;;  %v1699_v41 = vpop.f32.mrf.mxu1 }
 0x107   : > { %v1260_v58 = vadd.f32 %v1259_v40, %v1258_v38 }
 0x108   : > { %v1261_v43 = vpop.f32.mrf.mxu0  ;;  %v1701_v44 = vpop.f32.mrf.mxu1 }
 0x109   : > { %v756_v9 = vadd.f32 %v1260_v58, %v1708_v48 }
 0x10a   : > { %v1262_v46 = vpop.f32.mrf.mxu0  ;;  %v1703_v47 = vpop.f32.mrf.mxu1 }
 0x10b   : > { %v1263_v6 = vadd.f32 %v1262_v46, %v1261_v43 }
 0x10c   : > { %v1264_v51 = vpop.f32.mrf.mxu0  ;;  %v1378_v52 = vpop.f32.mrf.mxu1 }
 0x10d   : > { %v901_v54 = vadd.f32 %v1378_v52, %v740_v50  ;;  %v759_v24 = vadd.f32 %v1263_v6, %v1708_v48 }
 0x10e   : > { %v1265_v56 = vpop.f32.mrf.mxu0  ;;  %v892_v57 = vpop.f32.mrf.mxu1 }
 0x10f   : > { %v1021_v59 = vmax.f32 %v901_v54, 0.0  ;;  %v893_v60 = vadd.f32 %v892_v57, %v732_v55  ;;  %v1266_v28 = vadd.f32 %v1265_v56, %v1264_v51 }
 0x110   : > { %v1267_v62 = vpop.f32.mrf.mxu0  ;;  %v1379_v63 = vpop.f32.mrf.mxu1 }
 0x111   : > { %1054 = vst.msk [vmem:[%s1716_s22 + $0x10] sm:$0xff] %vm1051_vm0, %v1021_v59  ;;  %v1019_v1 = vmax.f32 %v893_v60, 0.0  ;;  %v904_v2 = vadd.f32 %v1379_v63, %v743_v61  ;;  %v764_v50 = vadd.f32 %v1266_v28, %v1708_v48 }
 0x112   : > { %v1268_v4 = vpop.f32.mrf.mxu0  ;;  %v895_v5 = vpop.f32.mrf.mxu1 }
 0x113   : > { %1052 = vst.msk [vmem:[%s1716_s22] sm:$0xff] %vm1051_vm0, %v1019_v1  ;;  %v1022_v7 = vmax.f32 %v904_v2, 0.0  ;;  %v896_v8 = vadd.f32 %v895_v5, %v735_v3  ;;  %v1269_v45 = vadd.f32 %v1268_v4, %v1267_v62 }
 0x114   : > { %v1270_v10 = vpop.f32.mrf.mxu0  ;;  %v1382_v11 = vpop.f32.mrf.mxu1 }
 0x115   : > { %1055 = vst.msk [vmem:[%s1716_s22 + $0x18] sm:$0xff] %vm1051_vm0, %v1022_v7  ;;  %v1020_v14 = vmax.f32 %v896_v8, 0.0  ;;  %v917_v15 = vadd.f32 %v1382_v11, %v756_v9  ;;  %v767_v61 = vadd.f32 %v1269_v45, %v1708_v48 }
 0x116   : > { %v1271_v18 = vpop.f32.mrf.mxu0  ;;  %v908_v19 = vpop.f32.mrf.mxu1 }
 0x117   : > { %1053 = vst.msk [vmem:[%s1716_s22 + $0x8] sm:$0xff] %vm1051_vm0, %v1020_v14  ;;  %v1025_v20 = vmax.f32 %v917_v15, 0.0  ;;  %v1272_v21 = vadd.f32 %v1271_v18, %v1270_v10  ;;  %v909_v23 = vadd.f32 %v908_v19, %v748_v16 }
 0x118   : > { %v1273_v25 = vpop.f32.mrf.mxu0  ;;  %v1383_v26 = vpop.f32.mrf.mxu1 }
 0x119   : > { %1058 = vst.msk [vmem:[%s1716_s22 + $0x30] sm:$0xff] %vm1051_vm0, %v1025_v20  ;;  %v1023_v29 = vmax.f32 %v909_v23, 0.0  ;;  %v920_v30 = vadd.f32 %v1383_v26, %v759_v24  ;;  %v772_v40 = vadd.f32 %v1272_v21, %v1708_v48 }
 0x11a   : > { %v1274_v33 = vpop.f32.mrf.mxu0  ;;  %v911_v34 = vpop.f32.mrf.mxu1 }
 0x11b   : > { %1056 = vst.msk [vmem:[%s1716_s22 + $0x20] sm:$0xff] %vm1051_vm0, %v1023_v29  ;;  %v1026_v35 = vmax.f32 %v920_v30, 0.0  ;;  %v1275_v36 = vadd.f32 %v1274_v33, %v1273_v25  ;;  %v912_v38 = vadd.f32 %v911_v34, %v751_v31 }
 0x11c   : > { %v1276_v42 = vpop.f32.mrf.mxu0  ;;  %v1386_v43 = vpop.f32.mrf.mxu1 }
 0x11d   : > { %1059 = vst.msk [vmem:[%s1716_s22 + $0x38] sm:$0xff] %vm1051_vm0, %v1026_v35  ;;  %v1024_v46 = vmax.f32 %v912_v38, 0.0  ;;  %v933_v49 = vadd.f32 %v1386_v43, %v772_v40  ;;  %v775_v55 = vadd.f32 %v1275_v36, %v1708_v48 }
 0x11e   : > { %v1277_v51 = vpop.f32.mrf.mxu0  ;;  %v924_v52 = vpop.f32.mrf.mxu1 }
 0x11f   : > { %1057 = vst.msk [vmem:[%s1716_s22 + $0x28] sm:$0xff] %vm1051_vm0, %v1024_v46  ;;  %v1029_v53 = vmax.f32 %v933_v49, 0.0  ;;  %v925_v54 = vadd.f32 %v924_v52, %v764_v50  ;;  %v1278_v58 = vadd.f32 %v1277_v51, %v1276_v42 }
 0x120   : > { %v1279_v56 = vpop.f32.mrf.mxu0  ;;  %v1387_v57 = vpop.f32.mrf.mxu1 }
 0x121   : > { %1062 = vst.msk [vmem:[%s1716_s22 + $0x50] sm:$0xff] %vm1051_vm0, %v1029_v53  ;;  %v1027_v59 = vmax.f32 %v925_v54, 0.0  ;;  %v936_v60 = vadd.f32 %v1387_v57, %v775_v55  ;;  %v780_v6 = vadd.f32 %v1278_v58, %v1708_v48 }
 0x122   : > { %v1280_v62 = vpop.f32.mrf.mxu0  ;;  %v927_v63 = vpop.f32.mrf.mxu1 }
 0x123   : > { %1060 = vst.msk [vmem:[%s1716_s22 + $0x40] sm:$0xff] %vm1051_vm0, %v1027_v59  ;;  %v1030_v0 = vmax.f32 %v936_v60, 0.0  ;;  %v928_v1 = vadd.f32 %v927_v63, %v767_v61  ;;  %v1281_v4 = vadd.f32 %v1280_v62, %v1279_v56 }
 0x124   : > { %v1282_v2 = vpop.f32.mrf.mxu0  ;;  %v1390_v3 = vpop.f32.mrf.mxu1 }
 0x125   : > { %1063 = vst.msk [vmem:[%s1716_s22 + $0x58] sm:$0xff] %vm1051_vm0, %v1030_v0  ;;  %v1028_v5 = vmax.f32 %v928_v1, 0.0  ;;  %v783_v16 = vadd.f32 %v1281_v4, %v1708_v48  ;;  %v836_v1 = vadd.f32 %v1689_v22, %v1708_v48 }
 0x126   : > { %v1283_v7 = vpop.f32.mrf.mxu0  ;;  %v940_v8 = vpop.f32.mrf.mxu1 }
 0x127   : > { %1061 = vst.msk [vmem:[%s1716_s22 + $0x48] sm:$0xff] %vm1051_vm0, %v1028_v5  ;;  %v1284_v9 = vadd.f32 %v1283_v7, %v1282_v2  ;;  %v941_v10 = vadd.f32 %v940_v8, %v780_v6  ;;  %v828_v7 = vadd.f32 %v1685_v12, %v1708_v48  ;;  %v1332_v8 = vadd.f32 %v1699_v41, %v1697_v39 }
 0x128   : > { %v1285_v11 = vpop.f32.mrf.mxu0  ;;  %v1391_v13 = vpop.f32.mrf.mxu1  ;;  %v831_v12 = vadd.f32 %v1687_v17, %v1708_v48 }
 0x129   : > { %v788_v14 = vadd.f32 %v1284_v9, %v1708_v48  ;;  %v1031_v15 = vmax.f32 %v941_v10, 0.0 }
 0x12a   : > { %v1286_v18 = vpop.f32.mrf.mxu0  ;;  %v943_v19 = vpop.f32.mrf.mxu1 }
 0x12b   : > { %v949_v20 = vadd.f32 %v1390_v3, %v788_v14  ;;  %1064 = vst.msk [vmem:[%s1716_s22 + $0x60] sm:$0xff] %vm1051_vm0, %v1031_v15  ;;  %v1287_v21 = vadd.f32 %v1286_v18, %v1285_v11  ;;  %v944_v23 = vadd.f32 %v943_v19, %v783_v16  ;;  %v839_v11 = vadd.f32 %v1691_v27, %v1708_v48 }
 0x12c   : > { %v1288_v24 = vpop.f32.mrf.mxu0  ;;  %v1394_v25 = vpop.f32.mrf.mxu1 }
 0x12d   : > { %v1033_v26 = vmax.f32 %v949_v20, 0.0  ;;  %v791_v28 = vadd.f32 %v1287_v21, %v1708_v48  ;;  %v1032_v29 = vmax.f32 %v944_v23, 0.0  ;;  %v1335_v20 = vadd.f32 %v1703_v47, %v1701_v44 }
 0x12e   : > { %v1289_v30 = vpop.f32.mrf.mxu0  ;;  %v956_v31 = vpop.f32.mrf.mxu1 }
 0x12f   : > { %1066 = vst.msk [vmem:[%s1716_s22 + $0x70] sm:$0xff] %vm1051_vm0, %v1033_v26  ;;  %v952_v33 = vadd.f32 %v1391_v13, %v791_v28  ;;  %1065 = vst.msk [vmem:[%s1716_s22 + $0x68] sm:$0xff] %vm1051_vm0, %v1032_v29  ;;  %v1290_v34 = vadd.f32 %v1289_v30, %v1288_v24  ;;  %v852_v24 = vadd.f32 %v1332_v8, %v1708_v48 }
 0x130   : > { %v1291_v35 = vpop.f32.mrf.mxu0  ;;  %v1395_v36 = vpop.f32.mrf.mxu1 }
 0x131   : > { %v1034_v38 = vmax.f32 %v952_v33, 0.0  ;;  %v796_v40 = vadd.f32 %v1290_v34, %v1708_v48 }
 0x132   : > { %v1292_v42 = vpop.f32.mrf.mxu0  ;;  %v959_v43 = vpop.f32.mrf.mxu1 }
 0x133   : > { %1067 = vst.msk [vmem:[%s1716_s22 + $0x78] sm:$0xff] %vm1051_vm0, %v1034_v38  ;;  %v957_v45 = vadd.f32 %v956_v31, %v796_v40  ;;  %v1293_v46 = vadd.f32 %v1292_v42, %v1291_v35  ;;  %v844_v31 = vadd.f32 %v1693_v32, %v1708_v48  ;;  %v855_v38 = vadd.f32 %v1335_v20, %v1708_v48 }
 0x134   : > { %v1294_v49 = vpop.f32.mrf.mxu0  ;;  %v1765_v50 = vpop.f32.mrf.mxu1 }
 0x135   : > { %v1035_v51 = vmax.f32 %v957_v45, 0.0  ;;  %v799_v52 = vadd.f32 %v1293_v46, %v1708_v48 }
 0x136   : > { %v1295_v53 = vpop.f32.mrf.mxu0  ;;  %v972_v54 = vpop.f32.mrf.mxu1 }
 0x137   : > { %1068 = vst.msk [vmem:[%s1716_s22 + $0x80] sm:$0xff] %vm1051_vm0, %v1035_v51  ;;  %v960_v55 = vadd.f32 %v959_v43, %v799_v52  ;;  %v1296_v56 = vadd.f32 %v1295_v53, %v1294_v49  ;;  %v847_v49 = vadd.f32 %v1695_v37, %v1708_v48 }
 0x138   : > { %v1297_v57 = vpop.f32.mrf.mxu0  ;;  %v1770_v58 = vpop.f32.mrf.mxu1 }
 0x139   : > { %v1036_v59 = vmax.f32 %v960_v55, 0.0  ;;  %v804_v60 = vadd.f32 %v1296_v56, %v1708_v48 }
 0x13a   : > { %v1298_v61 = vpop.f32.mrf.mxu0  ;;  %v975_v62 = vpop.f32.mrf.mxu1 }
 0x13b   : > { %1069 = vst.msk [vmem:[%s1716_s22 + $0x88] sm:$0xff] %vm1051_vm0, %v1036_v59  ;;  %v965_v63 = vadd.f32 %v1394_v25, %v804_v60  ;;  %v1299_v0 = vadd.f32 %v1298_v61, %v1297_v57 }
 0x13c   : > { %v1300_v2 = vpop.f32.mrf.mxu0  ;;  %v1402_v3 = vpop.f32.mrf.mxu1 }
 0x13d   : > { %v1037_v4 = vmax.f32 %v965_v63, 0.0  ;;  %v807_v5 = vadd.f32 %v1299_v0, %v1708_v48  ;;  %v997_v6 = vadd.f32 %v1402_v3, %v836_v1 }
 0x13e   : > { %v1301_v9 = vpop.f32.mrf.mxu0  ;;  %v988_v10 = vpop.f32.mrf.mxu1 }
 0x13f   : > { %1070 = vst.msk [vmem:[%s1716_s22 + $0x90] sm:$0xff] %vm1051_vm0, %v1037_v4  ;;  %v968_v22 = vadd.f32 %v1395_v36, %v807_v5  ;;  %v1045_v13 = vmax.f32 %v997_v6, 0.0  ;;  %v1302_v14 = vadd.f32 %v1301_v9, %v1300_v2  ;;  %v989_v15 = vadd.f32 %v988_v10, %v828_v7 }
 0x140   : > { %v1303_v16 = vpop.f32.mrf.mxu0  ;;  %v1403_v18 = vpop.f32.mrf.mxu1 }
 0x141   : > { %v1038_v19 = vmax.f32 %v968_v22, 0.0  ;;  %1078 = vst.msk [vmem:[%s1716_s22 + $0xd0] sm:$0xff] %vm1051_vm0, %v1045_v13  ;;  %v812_v39 = vadd.f32 %v1302_v14, %v1708_v48  ;;  %v1043_v41 = vmax.f32 %v989_v15, 0.0  ;;  %v1000_v27 = vadd.f32 %v1403_v18, %v839_v11 }
 0x142   : > { %v1304_v21 = vpop.f32.mrf.mxu0  ;;  %v991_v23 = vpop.f32.mrf.mxu1 }
 0x143   : > { %1071 = vst.msk [vmem:[%s1716_s22 + $0x98] sm:$0xff] %vm1051_vm0, %v1038_v19  ;;  %v973_v25 = vadd.f32 %v972_v54, %v812_v39  ;;  %1076 = vst.msk [vmem:[%s1716_s22 + $0xc0] sm:$0xff] %vm1051_vm0, %v1043_v41  ;;  %v1046_v17 = vmax.f32 %v1000_v27, 0.0  ;;  %v1305_v26 = vadd.f32 %v1304_v21, %v1303_v16  ;;  %v992_v28 = vadd.f32 %v991_v23, %v831_v12 }
 0x144   : > { %v1306_v29 = vpop.f32.mrf.mxu0  ;;  %v1406_v30 = vpop.f32.mrf.mxu1 }
 0x145   : > { %v1039_v44 = vmax.f32 %v973_v25, 0.0  ;;  %1079 = vst.msk [vmem:[%s1716_s22 + $0xd8] sm:$0xff] %vm1051_vm0, %v1046_v17  ;;  %v815_v47 = vadd.f32 %v1305_v26, %v1708_v48  ;;  %v1044_v33 = vmax.f32 %v992_v28, 0.0  ;;  %v1013_v34 = vadd.f32 %v1406_v30, %v852_v24 }
 0x146   : > { %v1307_v35 = vpop.f32.mrf.mxu0  ;;  %v1004_v36 = vpop.f32.mrf.mxu1 }
 0x147   : > { %1072 = vst.msk [vmem:[%s1716_s22 + $0xa0] sm:$0xff] %vm1051_vm0, %v1039_v44  ;;  %v976_v40 = vadd.f32 %v975_v62, %v815_v47  ;;  %1077 = vst.msk [vmem:[%s1716_s22 + $0xc8] sm:$0xff] %vm1051_vm0, %v1044_v33  ;;  %v1049_v32 = vmax.f32 %v1013_v34, 0.0  ;;  %v1308_v42 = vadd.f32 %v1307_v35, %v1306_v29  ;;  %v1005_v43 = vadd.f32 %v1004_v36, %v844_v31 }
 0x148   : > { %v1309_v45 = vpop.f32.mrf.mxu0  ;;  %v1407_v46 = vpop.f32.mrf.mxu1 }
 0x149   : > { %v1040_v51 = vmax.f32 %v976_v40, 0.0  ;;  %1082 = vst.msk [vmem:[%s1716_s22 + $0xf0] sm:$0xff] %vm1051_vm0, %v1049_v32  ;;  %v820_v52 = vadd.f32 %v1308_v42, %v1708_v48  ;;  %v1047_v53 = vmax.f32 %v1005_v43, 0.0  ;;  %v1016_v54 = vadd.f32 %v1407_v46, %v855_v38 }
 0x14a   : > { %v1310_v55 = vpop.f32.mrf.mxu0  ;;  %v1007_v56 = vpop.f32.mrf.mxu1 }
 0x14b   : > { %1073 = vst.msk [vmem:[%s1716_s22 + $0xa8] sm:$0xff] %vm1051_vm0, %v1040_v51  ;;  %v981_v57 = vadd.f32 %v1765_v50, %v820_v52  ;;  %1080 = vst.msk [vmem:[%s1716_s22 + $0xe0] sm:$0xff] %vm1051_vm0, %v1047_v53  ;;  %v1050_v59 = vmax.f32 %v1016_v54, 0.0  ;;  %v1311_v37 = vadd.f32 %v1310_v55, %v1309_v45  ;;  %v1008_v60 = vadd.f32 %v1007_v56, %v847_v49 }
 0x14d   : > { %v1041_v61 = vmax.f32 %v981_v57, 0.0  ;;  %1083 = vst.msk [vmem:[%s1716_s22 + $0xf8] sm:$0xff] %vm1051_vm0, %v1050_v59  ;;  %v823_v62 = vadd.f32 %v1311_v37, %v1708_v48  ;;  %v1048_v63 = vmax.f32 %v1008_v60, 0.0 }
 0x14f   : > { %1074 = vst.msk [vmem:[%s1716_s22 + $0xb0] sm:$0xff] %vm1051_vm0, %v1041_v61  ;;  %v984_v0 = vadd.f32 %v1770_v58, %v823_v62  ;;  %1081 = vst.msk [vmem:[%s1716_s22 + $0xe8] sm:$0xff] %vm1051_vm0, %v1048_v63 }
 0x151   : > { %v1042_v1 = vmax.f32 %v984_v0, 0.0 }
 0x153   : > { %1075 = vst.msk [vmem:[%s1716_s22 + $0xb8] sm:$0xff] %vm1051_vm0, %v1042_v1 }
 0x154 PF: > { %s13_s12 = sadd.s32 1, %s1527_s12  }
 0x155   : > { %p10_p4 = scmp.ge.s32.totalorder %s13_s12, 4  }
 0x157   :  { %12 = sbr.rel (!%p10_p4) target bundleno = 1 (0x1), region = 62 }

// kernel: _lambda_.11
= control target key start
LH: loop header
LB: loop body
LE: loop exit
PB: predicated region body
PF: predicated region fallthrough
CT: control target
= control target key end

     0   :  { %s437_s6 = smov 0   ;;  %s439_s7 = smov 0   ;;  %s497_s0 = inlined_call_operand.vmem [shape: f32[2,7,7,192], index: 0, kind: input, shape index: {}]   ;;  %s498_s1 = inlined_call_operand.vmem [shape: f32[2,3,3,192], index: 1, kind: output, shape index: {}]  }
   0x1   :  { %s441_s8 = smov 0   ;;  %s443_s9 = smov 0  }
   0x2   :  { %s445_s10 = smov 0  }
   0x3 LB: > { %s20_s11 = sadd.s32 1, %s416_s8  ;;  %s23_s12 = sadd.s32 1, %s420_s9  ;;  %s424_s10 = sphi %s445_s10, %s11_s10   ;;  %s420_s9 = sphi %s443_s9, %s502_s9   ;;  %s416_s8 = sphi %s441_s8, %s501_s8   ;;  %s412_s7 = sphi %s439_s7, %s500_s7   ;;  %s408_s6 = sphi %s437_s6, %s499_s6  }
   0x4   : > { %p21_p0 = scmp.ge.s32.totalorder %s20_s11, 3  ;;  %p320_p1 = scmp.ge.s32.totalorder %s424_s10, 1 }
   0x5   : > { %p101_p2 = scmp.lt.s32.totalorder %s424_s10, 7 }
   0x6   : > { %s504_s11 = smov (%p21_p0, %s20_s11), 0  ;;  %s506_s12 = smov (!%p21_p0, %s23_s12), %s420_s9 }
   0x7   : > { %p102_p3 = pnand %p320_p1, %p101_p2  ;;  %p25_p4 = scmp.ge.s32.totalorder %s506_s12, 2 }
   0x8   : > { %p125_p5 = scmp.lt.s32.totalorder (!%p102_p3), %s412_s7, 1  ;;  %s340_s14 = sshll.u32 (!%p102_p3), %s408_s6, 5 }
   0x9   : > { %s508_s12 = smov (%p25_p4, %s506_s12), 0  ;;  %105 = sbr.rel (%p102_p3) target bundleno = 40 (0x28), region = 24 }
   0xa   : > { %p132_p6 = scmp.lt.s32.totalorder (!%p102_p3), %s408_s6, 2 }
   0xe   : > { %s510_s7 = smov (!%p125_p5, %s412_s7), 1  ;;  %v426_v5 = vmov 1966171168   ;;  %v181_v7 = vlaneseq  ;;  %s512_s6 = smov (!%p132_p6, %s408_s6), 2 }
   0xf   : > { %s343_s13 = smul.u32 112, %s510_s7  ;;  %v179_v6 = vunpack.c.l.s4 %v426_v5  ;;  %s322_s20 = sshll.u32 %s512_s6, 1 }
  0x10   : > { %s344_s19 = smul.u32 6, %s510_s7  ;;  %v182_v14 = vshrl.u32 %v181_v7, 7  ;;  %vm195_vm0 = vcmp.lt.s32.totalorder %v181_v7, 192 }
  0x11   : > { %s129_s17 = scalar_lea.vmem %s497_s0, %s343_s13  ;;  %v180_v13 = vunpack.c.0.s8 %v179_v6 }
  0x12   : > { %s142_s18 = scalar_lea.vmem %s129_s17, %s340_s14  ;;  %s136_s21 = sadd.s32 %s344_s19, %s322_s20 }
  0x13   : > { %v143_v0 = vld [vmem:[%s142_s18] sm:$0x7f]  ;;  %v144_v1 = vld [vmem:[%s142_s18 + $0x8] sm:$0x7f]  ;;  %v329_v2 = vld [vmem:[%s142_s18 + $0x10] sm:$0x7f]  ;;  %v183_v23 = vsub.s32 %v180_v13, %v182_v14 }
  0x14   : > { %v330_v3 = vld [vmem:[%s142_s18 + $0x18] sm:$0x7f]  ;;  %v333_v4 = vld [vmem:[%s142_s18 + $0x20] sm:$0x7f]  ;;  %v151_v8 = vmax.f32 %v143_v0, %v329_v2  ;;  %v334_v10 = vld [vmem:[%s142_s18 + $0x28] sm:$0x7f] }
  0x15   : > { %v152_v9 = vmax.f32 %v144_v1, %v330_v3  ;;  %s323_s22 = sshll.u32 %s136_s21, 2 }
  0x16   : > { %v159_v11 = vmax.f32 %v151_v8, %v333_v4  ;;  %s138_s25 = scalar_lea.vmem %s498_s1, %s323_s22 }
  0x17   : > { %v160_v12 = vmax.f32 %v152_v9, %v334_v10 }
  0x18   : > { %v163_v15 = vrot.slane %v159_v11, 1  ;;  %v169_v17 = vrot.slane %v159_v11, 2 }
  0x19   : > { %v164_v16 = vrot.slane %v160_v12, 1  ;;  %v170_v18 = vrot.slane %v160_v12, 2 }
  0x1a   : > { %v167_v19 = vmax.f32 %v159_v11, %v163_v15 }
  0x1b   : > { %v168_v20 = vmax.f32 %v160_v12, %v164_v16 }
  0x1c   : > { %v173_v21 = vmax.f32 %v167_v19, %v169_v17 }
  0x1d   : > { %v174_v22 = vmax.f32 %v168_v20, %v170_v18 }
  0x1f   : > { %v177_v24 = vcombine.low %v173_v21, %v174_v22  ;;  %v202_v25 = vcombine.high %v173_v21, %v174_v22 }
  0x21   : > { %v184_v26 = vrot.slane %v177_v24, %v183_v23  ;;  %v209_v27 = vrot.slane %v202_v25, %v183_v23 }
  0x23   : > { %v191_v28 = vrot.slane %v184_v26, %v183_v23  ;;  %v216_v29 = vrot.slane %v209_v27, %v183_v23 }
  0x25   : > { %197 = vst.msk [vmem:[%s138_s25] ss:$4 sm:$0x3] %vm195_vm0, %v191_v28  ;;  %v198_v30 = vcombine.high %v191_v28, %v191_v28  ;;  %336 = vst.msk [vmem:[%s138_s25 + $0x2] ss:$4 sm:$0x3] %vm195_vm0, %v216_v29 }
  0x27   : > { %335 = vst.msk [vmem:[%s138_s25 + $0x1] ss:$4 sm:$0x3] %vm195_vm0, %v198_v30 }
  0x28 PF: > { %s11_s10 = sadd.s32 1, %s424_s10   ;;  %s499_s6 = smov %s416_s8 }
  0x29   : > { %p8_p7 = scmp.ge.s32.totalorder %s11_s10, 8   ;;  %s500_s7 = smov %s420_s9 }
  0x2a   : > { %s501_s8 = smov %s504_s11  ;;  %s502_s9 = smov %s508_s12 }
  0x2b   :  { %10 = sbr.rel (!%p8_p7) target bundleno = 3 (0x3), region = 59 }

// kernel: _lambda_.10
= control target key start
LH: loop header
LB: loop body
LE: loop exit
PB: predicated region body
PF: predicated region fallthrough
CT: control target
= control target key end

     0   :  { %s3478_s12 = smov 0   ;;  %s3480_s13 = smov 0   ;;  %s4227_s0 = inlined_call_operand.vmem [shape: bf16[2,11,11,64], index: 0, kind: input, shape index: {}]   ;;  %s4228_s1 = inlined_call_operand.vmem [shape: bf16[1600,192], index: 1, kind: input, shape index: {}]   ;;  %s4229_s2 = inlined_call_operand.vmem [shape: f32[1,192], index: 2, kind: input, shape index: {}]   ;;  %s4230_s3 = inlined_call_operand.vmem [shape: f32[2,7,7,192], index: 3, kind: output, shape index: {}]  }
   0x1   :  { %s3482_s14 = smov 0   ;;  %s3484_s15 = smov 0  }
   0x2   :  { %s3486_s16 = smov 0  }
   0x3 LB: > { %s22_s17 = sadd.s32 1, %s3447_s14  ;;  %s25_s18 = sadd.s32 1, %s3451_s15  ;;  %s3455_s16 = sphi %s3486_s16, %s13_s16   ;;  %s3451_s15 = sphi %s3484_s15, %s4234_s15   ;;  %s3447_s14 = sphi %s3482_s14, %s4233_s14   ;;  %s3443_s13 = sphi %s3480_s13, %s4232_s13   ;;  %s3439_s12 = sphi %s3478_s12, %s4231_s12  }
   0x4   : > { %p23_p0 = scmp.ge.s32.totalorder %s22_s17, 7  ;;  %p2808_p1 = scmp.ge.s32.totalorder %s3455_s16, 1 }
   0x5   : > { %p151_p2 = scmp.lt.s32.totalorder %s3455_s16, 15 }
   0x6   : > { %s4236_s17 = smov (%p23_p0, %s22_s17), 0  ;;  %s4238_s18 = smov (!%p23_p0, %s25_s18), %s3451_s15 }
   0x7   : > { %p152_p3 = pnand %p2808_p1, %p151_p2  ;;  %p27_p4 = scmp.ge.s32.totalorder %s4238_s18, 2 }
   0x8   : > { %p179_p5 = scmp.lt.s32.totalorder (!%p152_p3), %s3443_s13, 1  ;;  %s3063_s29 = sshll.u32 (!%p152_p3), %s3439_s12, 3 }
   0x9   : > { %s4240_s18 = smov (%p27_p4, %s4238_s18), 0  ;;  %155 = sbr.rel (%p152_p3) target bundleno = 426 (0x1aa), region = 32 }
   0xa   : > { %p186_p6 = scmp.lt.s32.totalorder (!%p152_p3), %s3439_s12, 6 }
   0xe   : > { %v3107_v0 = vld [vmem:[%s4228_s1 + $0x74] ss:$8 sps:$4 sm:$0xff]   ;;  %v3457_v2 = vmov 0   ;;  %v3111_v3 = vld [vmem:[%s4228_s1 + $0x70] ss:$8 sps:$4 sm:$0xff]   ;;  %s4242_s13 = smov (!%p179_p5, %s3443_s13), 1 }
   0xf   : > { %v3109_v1 = vld [vmem:[%s4228_s1 + $0x34] ss:$8 sps:$4 sm:$0xff]   ;;  %301 = vmatprep.mubr.bf16.mxu0 %v3457_v2  ;;  %385 = vmatprep.mubr.bf16.mxu1 %v3457_v2  ;;  %v3112_v4 = vld [vmem:[%s4228_s1 + $0x30] ss:$8 sps:$4 sm:$0xff]   ;;  %v3113_v5 = vld [vmem:[%s4228_s1 + $0x64] ss:$8 sps:$4 sm:$0xff]  }
  0x10   : > { %277 = vmatprep.subr.bf16.mxu0 %v3107_v0  ;;  %361 = vmatprep.subr.bf16.mxu1 %v3109_v1  ;;  %v3115_v6 = vld [vmem:[%s4228_s1 + $0x24] ss:$8 sps:$4 sm:$0xff]   ;;  %v3117_v7 = vld [vmem:[%s4228_s1 + $0x60] ss:$8 sps:$4 sm:$0xff]   ;;  %s3064_s7 = smul.u32 88, %s4242_s13  ;;  %vm265_vm0 = vcmask 523264  }
  0x11   : > { %278 = vmatpush1.bf16.msra.mxu0 %v3111_v3  ;;  %362 = vmatpush1.bf16.msra.mxu1 %v3112_v4  ;;  %v3118_v8 = vld [vmem:[%s4228_s1 + $0x20] ss:$8 sps:$4 sm:$0xff]   ;;  %v3119_v9 = vld [vmem:[%s4228_s1 + $0x54] ss:$8 sps:$4 sm:$0xff]   ;;  %v3123_v11 = vld [vmem:[%s4228_s1 + $0x50] ss:$8 sps:$4 sm:$0xff]  }
  0x12   : > { %279 = vmatprep.subr.bf16.mxu0 %v3113_v5  ;;  %363 = vmatprep.subr.bf16.mxu1 %v3115_v6  ;;  %s183_s21 = scalar_lea.vmem %s4227_s0, %s3064_s7  ;;  %v3121_v10 = vld [vmem:[%s4228_s1 + $0x14] ss:$8 sps:$4 sm:$0xff]   ;;  %v3124_v12 = vld [vmem:[%s4228_s1 + $0x10] ss:$8 sps:$4 sm:$0xff]   ;;  %v3125_v13 = vld [vmem:[%s4228_s1 + $0x44] ss:$8 sps:$4 sm:$0xff]  }
  0x13   : > { %s3555_s28 = scalar_lea.vmem %s183_s21, %s3063_s29  ;;  %v3127_v14 = vld [vmem:[%s4228_s1 + $0x4] ss:$8 sps:$4 sm:$0xff]   ;;  %v3129_v17 = vld [vmem:[%s4228_s1 + $0x40] ss:$8 sps:$4 sm:$0xff]   ;;  %v3135_v21 = vld [vmem:[%s4228_s1 + $0xb4] ss:$8 sps:$4 sm:$0xff]  }
  0x14   : > { %v197_v15 = vld [vmem:[%s3555_s28] sm:$0xf]  ;;  %v3138_v22 = vld [vmem:[%s4228_s1 + $0xf4] ss:$8 sps:$4 sm:$0xff]   ;;  %v198_v23 = vld [vmem:[%s3555_s28 + $0x4] sm:$0x3] }
  0x15   : > { %280 = vmatpush1.bf16.msra.mxu0 %v3117_v7  ;;  %364 = vmatpush1.bf16.msra.mxu1 %v3118_v8  ;;  %v2814_v16 = vcombine.low %v197_v15, %v197_v15  ;;  %v3130_v18 = vld [vmem:[%s4228_s1] ss:$8 sps:$4 sm:$0xff]   ;;  %v3133_v25 = vld [vmem:[%s4228_s1 + $0xb0] ss:$8 sps:$4 sm:$0xff]   ;;  %v3141_v28 = vld [vmem:[%s4228_s1 + $0xa4] ss:$8 sps:$4 sm:$0xff]   ;;  %v3590_v30 = vcombine.low %v197_v15, %v198_v23 }
  0x16   : > { %281 = vmatprep.subr.bf16.mxu0 %v3119_v9  ;;  %365 = vmatprep.subr.bf16.mxu1 %v3121_v10  ;;  %v3136_v26 = vld [vmem:[%s4228_s1 + $0xf0] ss:$8 sps:$4 sm:$0xff]   ;;  %v3144_v29 = vld [vmem:[%s4228_s1 + $0xe4] ss:$8 sps:$4 sm:$0xff]   ;;  %v3139_v31 = vld [vmem:[%s4228_s1 + $0xa0] ss:$8 sps:$4 sm:$0xff]  }
  0x17   : > { %v219_v19 = vshrl.u32 %v2814_v16, 16  ;;  %v221_v20 = vshll.u32 %v2814_v16, 16  ;;  %v3142_v32 = vld [vmem:[%s4228_s1 + $0xe0] ss:$8 sps:$4 sm:$0xff]   ;;  %v3147_v33 = vld [vmem:[%s4228_s1 + $0x94] ss:$8 sps:$4 sm:$0xff]  }
  0x18   : > { %v3150_v34 = vld [vmem:[%s4228_s1 + $0xd4] ss:$8 sps:$4 sm:$0xff]   ;;  %v501_v35 = vshrl.u32 %v3590_v30, 16  ;;  %v504_v36 = vshll.u32 %v3590_v30, 16  ;;  %v3145_v37 = vld [vmem:[%s4228_s1 + $0x90] ss:$8 sps:$4 sm:$0xff]  }
  0x19   : > { %282 = vmatpush1.bf16.msra.mxu0 %v3123_v11  ;;  %366 = vmatpush1.bf16.msra.mxu1 %v3124_v12  ;;  %v223_v24 = vrot.slane %v221_v20, 1  ;;  %v3148_v38 = vld [vmem:[%s4228_s1 + $0xd0] ss:$8 sps:$4 sm:$0xff]   ;;  %v3153_v39 = vld [vmem:[%s4228_s1 + $0x84] ss:$8 sps:$4 sm:$0xff]   ;;  %v405_v47 = vrot.slane %v3590_v30, 1 }
  0x1a   : > { %283 = vmatprep.subr.bf16.mxu0 %v3125_v13  ;;  %367 = vmatprep.subr.bf16.mxu1 %v3127_v14  ;;  %v3156_v40 = vld [vmem:[%s4228_s1 + $0xc4] ss:$8 sps:$4 sm:$0xff]   ;;  %v503_v41 = vrot.slane %v501_v35, 1  ;;  %v506_v42 = vrot.slane %v504_v36, 2  ;;  %v3151_v43 = vld [vmem:[%s4228_s1 + $0x80] ss:$8 sps:$4 sm:$0xff]  }
  0x1b   : > { %v224_v27 = vor.u32 %v223_v24, %v219_v19  ;;  %v3154_v44 = vld [vmem:[%s4228_s1 + $0xc0] ss:$8 sps:$4 sm:$0xff]   ;;  %v3159_v45 = vld [vmem:[%s4228_s1 + $0x134] ss:$8 sps:$4 sm:$0xff]   ;;  %v3157_v49 = vld [vmem:[%s4228_s1 + $0x130] ss:$8 sps:$4 sm:$0xff]  }
  0x1c   : > { %v3162_v46 = vld [vmem:[%s4228_s1 + $0x174] ss:$8 sps:$4 sm:$0xff]   ;;  %v507_v48 = vor.u32 %v506_v42, %v503_v41  ;;  %v3160_v50 = vld [vmem:[%s4228_s1 + $0x170] ss:$8 sps:$4 sm:$0xff]   ;;  %v3165_v51 = vld [vmem:[%s4228_s1 + $0x124] ss:$8 sps:$4 sm:$0xff]  }
  0x1d   : > { %284 = vmatpush1.bf16.msra.mxu0 %v3129_v17  ;;  %368 = vmatpush1.bf16.msra.mxu1 %v3130_v18  ;;  %v3168_v52 = vld [vmem:[%s4228_s1 + $0x164] ss:$8 sps:$4 sm:$0xff]   ;;  %v3163_v53 = vld [vmem:[%s4228_s1 + $0x120] ss:$8 sps:$4 sm:$0xff]   ;;  %v3171_v55 = vld [vmem:[%s4228_s1 + $0x114] ss:$8 sps:$4 sm:$0xff]  }
  0x1e   : > { %457 = vmatprep.subr.bf16.mxu0 %v3135_v21  ;;  %559 = vmatprep.subr.bf16.mxu1 %v3138_v22  ;;  %v3166_v54 = vld [vmem:[%s4228_s1 + $0x160] ss:$8 sps:$4 sm:$0xff]   ;;  %v3174_v56 = vld [vmem:[%s4228_s1 + $0x154] ss:$8 sps:$4 sm:$0xff]   ;;  %v3169_v57 = vld [vmem:[%s4228_s1 + $0x110] ss:$8 sps:$4 sm:$0xff]  }
  0x1f   : > { %v3172_v58 = vld [vmem:[%s4228_s1 + $0x150] ss:$8 sps:$4 sm:$0xff]   ;;  %v3177_v59 = vld [vmem:[%s4228_s1 + $0x104] ss:$8 sps:$4 sm:$0xff]   ;;  %v3175_v61 = vld [vmem:[%s4228_s1 + $0x100] ss:$8 sps:$4 sm:$0xff]  }
  0x20   : > { %2823 = vmatmul.mubr.msk.bf16.vlgmr.msra.gmra.mxu0 %vm265_vm0, %v224_v27  ;;  %2832 = vmatmul.mubr.msk.bf16.vlgmr.msra.gmra.mxu1 %vm265_vm0, %v197_v15  ;;  %v3180_v60 = vld [vmem:[%s4228_s1 + $0x144] ss:$8 sps:$4 sm:$0xff]   ;;  %v3178_v62 = vld [vmem:[%s4228_s1 + $0x140] ss:$8 sps:$4 sm:$0xff]   ;;  %v3183_v63 = vld [vmem:[%s4228_s1 + $0x1b4] ss:$8 sps:$4 sm:$0xff]  }
  0x21   : > { %458 = vmatpush1.bf16.msra.mxu0 %v3133_v25  ;;  %560 = vmatpush1.bf16.msra.mxu1 %v3136_v26  ;;  %v3188_v0 = vld [vmem:[%s4228_s1 + $0x1f4] ss:$8 sps:$4 sm:$0xff]   ;;  %v3181_v1 = vld [vmem:[%s4228_s1 + $0x1b0] ss:$8 sps:$4 sm:$0xff]   ;;  %v602_v3 = vrot.slane %v3590_v30, 2  ;;  %s4244_s12 = smov (!%p186_p6, %s3439_s12), 6 }
  0x22   : > { %459 = vmatprep.subr.bf16.mxu0 %v3141_v28  ;;  %561 = vmatprep.subr.bf16.mxu1 %v3144_v29  ;;  %v2862_v4 = vld [vmem:[%s3555_s28 + $0x8] sm:$0xf]  ;;  %v3186_v5 = vld [vmem:[%s4228_s1 + $0x1f0] ss:$8 sps:$4 sm:$0xff]   ;;  %v3191_v6 = vld [vmem:[%s4228_s1 + $0x1a4] ss:$8 sps:$4 sm:$0xff]  }
  0x23   : > { %481 = vmatprep.mubr.bf16.mxu0 %v3457_v2  ;;  %583 = vmatprep.mubr.bf16.mxu1 %v3457_v2  ;;  %v3194_v7 = vld [vmem:[%s4228_s1 + $0x1e4] ss:$8 sps:$4 sm:$0xff]   ;;  %v2873_v8 = vcombine.low %v2862_v4, %v2862_v4  ;;  %v3189_v9 = vld [vmem:[%s4228_s1 + $0x1a0] ss:$8 sps:$4 sm:$0xff]   ;;  %v3197_v11 = vld [vmem:[%s4228_s1 + $0x194] ss:$8 sps:$4 sm:$0xff]  }
  0x24   : > { %v3192_v10 = vld [vmem:[%s4228_s1 + $0x1e0] ss:$8 sps:$4 sm:$0xff]   ;;  %v3200_v12 = vld [vmem:[%s4228_s1 + $0x1d4] ss:$8 sps:$4 sm:$0xff]   ;;  %v2863_v13 = vld [vmem:[%s3555_s28 + $0xc] sm:$0x3] }
  0x25   : > { %460 = vmatpush1.bf16.msra.mxu0 %v3139_v31  ;;  %562 = vmatpush1.bf16.msra.mxu1 %v3142_v32  ;;  %v803_v14 = vshll.u32 %v2873_v8, 16  ;;  %v3195_v15 = vld [vmem:[%s4228_s1 + $0x190] ss:$8 sps:$4 sm:$0xff]   ;;  %v3203_v17 = vld [vmem:[%s4228_s1 + $0x184] ss:$8 sps:$4 sm:$0xff]   ;;  %v801_v19 = vshrl.u32 %v2873_v8, 16  ;;  %v3729_v21 = vcombine.low %v2862_v4, %v2863_v13 }
  0x26   : > { %461 = vmatprep.subr.bf16.mxu0 %v3147_v33  ;;  %563 = vmatprep.subr.bf16.mxu1 %v3150_v34  ;;  %v3198_v16 = vld [vmem:[%s4228_s1 + $0x1d0] ss:$8 sps:$4 sm:$0xff]   ;;  %v3206_v18 = vld [vmem:[%s4228_s1 + $0x1c4] ss:$8 sps:$4 sm:$0xff]   ;;  %v3201_v22 = vld [vmem:[%s4228_s1 + $0x180] ss:$8 sps:$4 sm:$0xff]  }
  0x27   : > { %v805_v20 = vrot.slane %v803_v14, 1  ;;  %v3204_v23 = vld [vmem:[%s4228_s1 + $0x1c0] ss:$8 sps:$4 sm:$0xff]   ;;  %v3209_v24 = vld [vmem:[%s4228_s1 + $0x234] ss:$8 sps:$4 sm:$0xff]   ;;  %v904_v28 = vrot.slane %v3729_v21, 1 }
  0x28   : > { %v3212_v25 = vld [vmem:[%s4228_s1 + $0x274] ss:$8 sps:$4 sm:$0xff]   ;;  %v3207_v27 = vld [vmem:[%s4228_s1 + $0x230] ss:$8 sps:$4 sm:$0xff]   ;;  %v3215_v30 = vld [vmem:[%s4228_s1 + $0x224] ss:$8 sps:$4 sm:$0xff]  }
  0x29   : > { %462 = vmatpush1.bf16.msra.mxu0 %v3145_v37  ;;  %564 = vmatpush1.bf16.msra.mxu1 %v3148_v38  ;;  %v806_v26 = vor.u32 %v805_v20, %v801_v19  ;;  %v3210_v29 = vld [vmem:[%s4228_s1 + $0x270] ss:$8 sps:$4 sm:$0xff]   ;;  %v3218_v31 = vld [vmem:[%s4228_s1 + $0x264] ss:$8 sps:$4 sm:$0xff]   ;;  %v3213_v32 = vld [vmem:[%s4228_s1 + $0x220] ss:$8 sps:$4 sm:$0xff]  }
  0x2a   : > { %463 = vmatprep.subr.bf16.mxu0 %v3153_v39  ;;  %565 = vmatprep.subr.bf16.mxu1 %v3156_v40  ;;  %v3216_v33 = vld [vmem:[%s4228_s1 + $0x260] ss:$8 sps:$4 sm:$0xff]   ;;  %v3221_v34 = vld [vmem:[%s4228_s1 + $0x214] ss:$8 sps:$4 sm:$0xff]   ;;  %v3219_v36 = vld [vmem:[%s4228_s1 + $0x210] ss:$8 sps:$4 sm:$0xff]  }
  0x2b   : > { %v3224_v35 = vld [vmem:[%s4228_s1 + $0x254] ss:$8 sps:$4 sm:$0xff]   ;;  %v1000_v37 = vshrl.u32 %v3729_v21, 16  ;;  %v1003_v38 = vshll.u32 %v3729_v21, 16  ;;  %v3222_v39 = vld [vmem:[%s4228_s1 + $0x250] ss:$8 sps:$4 sm:$0xff]  }
  0x2c   : > { %v3227_v40 = vld [vmem:[%s4228_s1 + $0x204] ss:$8 sps:$4 sm:$0xff]   ;;  %v3225_v42 = vld [vmem:[%s4228_s1 + $0x200] ss:$8 sps:$4 sm:$0xff]   ;;  %v2913_v8 = vld [vmem:[%s3555_s28 + $0x14] sm:$0x3] }
  0x2d   : > { %464 = vmatpush1.bf16.msra.mxu0 %v3151_v43  ;;  %566 = vmatpush1.bf16.msra.mxu1 %v3154_v44  ;;  %v3230_v41 = vld [vmem:[%s4228_s1 + $0x244] ss:$8 sps:$4 sm:$0xff]   ;;  %v1002_v43 = vrot.slane %v1000_v37, 1  ;;  %v1005_v44 = vrot.slane %v1003_v38, 2  ;;  %v3269_v19 = vld [vmem:[%s4228_s1 + $0x310] ss:$8 sps:$4 sm:$0xff]  }
  0x2e   : > { %654 = vmatprep.subr.bf16.mxu0 %v3159_v45  ;;  %754 = vmatprep.subr.bf16.mxu1 %v3162_v46  ;;  %v3228_v45 = vld [vmem:[%s4228_s1 + $0x240] ss:$8 sps:$4 sm:$0xff]   ;;  %v3233_v46 = vld [vmem:[%s4228_s1 + $0x2b4] ss:$8 sps:$4 sm:$0xff]   ;;  %v3268_v13 = vld [vmem:[%s4228_s1 + $0x364] ss:$8 sps:$4 sm:$0xff]  }
  0x2f   : > { %v3287_v37 = vld [vmem:[%s4228_s1 + $0x3a0] ss:$8 sps:$4 sm:$0xff]   ;;  %s3065_s22 = smul.u32 14, %s4242_s13  ;;  %s2810_s23 = sshll.u32 %s4244_s12, 1  ;;  %vm2702_vm1 = vcmask 522240  }
  0x30   : > { %2842 = vmatmul.mubr.msk.bf16.vlgmr.msra.gmra.mxu0 %vm265_vm0, %v405_v47  ;;  %2851 = vmatmul.mubr.msk.bf16.vlgmr.msra.gmra.mxu1 %vm265_vm0, %v507_v48  ;;  %v3236_v47 = vld [vmem:[%s4228_s1 + $0x2f4] ss:$8 sps:$4 sm:$0xff]   ;;  %v1006_v48 = vor.u32 %v1005_v44, %v1002_v43  ;;  %v3290_v38 = vld [vmem:[%s4228_s1 + $0x3e0] ss:$8 sps:$4 sm:$0xff]   ;;  %v3301_v43 = vld [vmem:[%s4228_s1 + $0x384] ss:$8 sps:$4 sm:$0xff]  }
  0x31   : > { %655 = vmatpush1.bf16.msra.mxu0 %v3157_v49  ;;  %755 = vmatpush1.bf16.msra.mxu1 %v3160_v50  ;;  %v3231_v49 = vld [vmem:[%s4228_s1 + $0x2b0] ss:$8 sps:$4 sm:$0xff]   ;;  %v1101_v50 = vrot.slane %v3729_v21, 2  ;;  %v3304_v44 = vld [vmem:[%s4228_s1 + $0x3c4] ss:$8 sps:$4 sm:$0xff]  }
  0x32   : > { %656 = vmatprep.subr.bf16.mxu0 %v3165_v51  ;;  %756 = vmatprep.subr.bf16.mxu1 %v3168_v52  ;;  %v3234_v51 = vld [vmem:[%s4228_s1 + $0x2f0] ss:$8 sps:$4 sm:$0xff]   ;;  %v3239_v52 = vld [vmem:[%s4228_s1 + $0x2a4] ss:$8 sps:$4 sm:$0xff]  }
  0x33   : > { %678 = vmatprep.mubr.bf16.mxu0 %v3457_v2  ;;  %778 = vmatprep.mubr.bf16.mxu1 %v3457_v2 }
  0x35   : > { %657 = vmatpush1.bf16.msra.mxu0 %v3163_v53  ;;  %757 = vmatpush1.bf16.msra.mxu1 %v3166_v54  ;;  %v2912_v53 = vld [vmem:[%s3555_s28 + $0x10] sm:$0xf]  ;;  %v3242_v54 = vld [vmem:[%s4228_s1 + $0x2e4] ss:$8 sps:$4 sm:$0xff]  }
  0x36   : > { %658 = vmatprep.subr.bf16.mxu0 %v3171_v55  ;;  %758 = vmatprep.subr.bf16.mxu1 %v3174_v56  ;;  %v3237_v55 = vld [vmem:[%s4228_s1 + $0x2a0] ss:$8 sps:$4 sm:$0xff]   ;;  %v2923_v56 = vcombine.low %v2912_v53, %v2912_v53  ;;  %v3866_v14 = vcombine.low %v2912_v53, %v2913_v8  ;;  %v3333_v8 = vld [vmem:[%s4228_s1 + $0x4b4] ss:$8 sps:$4 sm:$0xff]  }
  0x38   : > { %v1499_v20 = vshrl.u32 %v3866_v14, 16  ;;  %v1502_v21 = vshll.u32 %v3866_v14, 16 }
  0x39   : > { %659 = vmatpush1.bf16.msra.mxu0 %v3169_v57  ;;  %759 = vmatpush1.bf16.msra.mxu1 %v3172_v58  ;;  %v3240_v57 = vld [vmem:[%s4228_s1 + $0x2e0] ss:$8 sps:$4 sm:$0xff]   ;;  %v3245_v58 = vld [vmem:[%s4228_s1 + $0x294] ss:$8 sps:$4 sm:$0xff]  }
  0x3a   : > { %660 = vmatprep.subr.bf16.mxu0 %v3177_v59  ;;  %760 = vmatprep.subr.bf16.mxu1 %v3180_v60  ;;  %v3248_v59 = vld [vmem:[%s4228_s1 + $0x2d4] ss:$8 sps:$4 sm:$0xff]   ;;  %v1302_v60 = vshll.u32 %v2923_v56, 16 }
  0x3d   : > { %661 = vmatpush1.bf16.msra.mxu0 %v3175_v61  ;;  %761 = vmatpush1.bf16.msra.mxu1 %v3178_v62  ;;  %v3243_v61 = vld [vmem:[%s4228_s1 + $0x290] ss:$8 sps:$4 sm:$0xff]  }
  0x3e   : > { %858 = vmatprep.subr.bf16.mxu0 %v3183_v63  ;;  %956 = vmatprep.subr.bf16.mxu1 %v3188_v0  ;;  %v3246_v62 = vld [vmem:[%s4228_s1 + $0x2d0] ss:$8 sps:$4 sm:$0xff]   ;;  %v3251_v63 = vld [vmem:[%s4228_s1 + $0x284] ss:$8 sps:$4 sm:$0xff]  }
  0x3f   : > { %v3254_v0 = vld [vmem:[%s4228_s1 + $0x2c4] ss:$8 sps:$4 sm:$0xff]  }
  0x40   : > { %2860 = vmatmul.mubr.msk.bf16.vlgmr.msra.gmra.mxu0 %vm265_vm0, %v602_v3  ;;  %2872 = vmatmul.mubr.msk.bf16.vlgmr.msra.gmra.mxu1 %vm265_vm0, %v2862_v4  ;;  %v1300_v3 = vshrl.u32 %v2923_v56, 16  ;;  %v1304_v4 = vrot.slane %v1302_v60, 1  ;;  %v3313_v56 = vld [vmem:[%s4228_s1 + $0x420] ss:$8 sps:$4 sm:$0xff]   ;;  %v2963_v60 = vld [vmem:[%s3555_s28 + $0x1c] sm:$0x3] }
  0x41   : > { %859 = vmatpush1.bf16.msra.mxu0 %v3181_v1  ;;  %957 = vmatpush1.bf16.msra.mxu1 %v3186_v5  ;;  %v3249_v1 = vld [vmem:[%s4228_s1 + $0x280] ss:$8 sps:$4 sm:$0xff]  }
  0x42   : > { %860 = vmatprep.subr.bf16.mxu0 %v3191_v6  ;;  %958 = vmatprep.subr.bf16.mxu1 %v3194_v7  ;;  %v3252_v5 = vld [vmem:[%s4228_s1 + $0x2c0] ss:$8 sps:$4 sm:$0xff]   ;;  %v3259_v6 = vld [vmem:[%s4228_s1 + $0x334] ss:$8 sps:$4 sm:$0xff]  }
  0x43   : > { %882 = vmatprep.mubr.bf16.mxu0 %v3457_v2  ;;  %980 = vmatprep.mubr.bf16.mxu1 %v3457_v2  ;;  %v3262_v7 = vld [vmem:[%s4228_s1 + $0x374] ss:$8 sps:$4 sm:$0xff]  }
  0x45   : > { %861 = vmatpush1.bf16.msra.mxu0 %v3189_v9  ;;  %959 = vmatpush1.bf16.msra.mxu1 %v3192_v10  ;;  %v3257_v9 = vld [vmem:[%s4228_s1 + $0x330] ss:$8 sps:$4 sm:$0xff]   ;;  %v1305_v10 = vor.u32 %v1304_v4, %v1300_v3 }
  0x46   : > { %862 = vmatprep.subr.bf16.mxu0 %v3197_v11  ;;  %960 = vmatprep.subr.bf16.mxu1 %v3200_v12  ;;  %v3260_v11 = vld [vmem:[%s4228_s1 + $0x370] ss:$8 sps:$4 sm:$0xff]   ;;  %v3265_v12 = vld [vmem:[%s4228_s1 + $0x324] ss:$8 sps:$4 sm:$0xff]  }
  0x49   : > { %863 = vmatpush1.bf16.msra.mxu0 %v3195_v15  ;;  %961 = vmatpush1.bf16.msra.mxu1 %v3198_v16  ;;  %v3263_v15 = vld [vmem:[%s4228_s1 + $0x320] ss:$8 sps:$4 sm:$0xff]  }
  0x4a   : > { %864 = vmatprep.subr.bf16.mxu0 %v3203_v17  ;;  %962 = vmatprep.subr.bf16.mxu1 %v3206_v18  ;;  %v3266_v16 = vld [vmem:[%s4228_s1 + $0x360] ss:$8 sps:$4 sm:$0xff]   ;;  %v3271_v17 = vld [vmem:[%s4228_s1 + $0x314] ss:$8 sps:$4 sm:$0xff]  }
  0x4b   : > { %v3274_v18 = vld [vmem:[%s4228_s1 + $0x354] ss:$8 sps:$4 sm:$0xff]  }
  0x4d   : > { %865 = vmatpush1.bf16.msra.mxu0 %v3201_v22  ;;  %963 = vmatpush1.bf16.msra.mxu1 %v3204_v23  ;;  %v3272_v22 = vld [vmem:[%s4228_s1 + $0x350] ss:$8 sps:$4 sm:$0xff]   ;;  %v3277_v23 = vld [vmem:[%s4228_s1 + $0x304] ss:$8 sps:$4 sm:$0xff]  }
  0x4e   : > { %1058 = vmatprep.subr.bf16.mxu0 %v3209_v24  ;;  %1153 = vmatprep.subr.bf16.mxu1 %v3212_v25  ;;  %v3280_v24 = vld [vmem:[%s4228_s1 + $0x344] ss:$8 sps:$4 sm:$0xff]   ;;  %v3275_v25 = vld [vmem:[%s4228_s1 + $0x300] ss:$8 sps:$4 sm:$0xff]  }
  0x50   : > { %2882 = vmatmul.mubr.msk.bf16.vlgmr.msra.gmra.mxu0 %vm265_vm0, %v806_v26  ;;  %2892 = vmatmul.mubr.msk.bf16.vlgmr.msra.gmra.mxu1 %vm265_vm0, %v904_v28  ;;  %v1501_v26 = vrot.slane %v1499_v20, 1  ;;  %v3278_v28 = vld [vmem:[%s4228_s1 + $0x340] ss:$8 sps:$4 sm:$0xff]  }
  0x51   : > { %1059 = vmatpush1.bf16.msra.mxu0 %v3207_v27  ;;  %1154 = vmatpush1.bf16.msra.mxu1 %v3210_v29  ;;  %v1504_v27 = vrot.slane %v1502_v21, 2  ;;  %v3283_v29 = vld [vmem:[%s4228_s1 + $0x3b4] ss:$8 sps:$4 sm:$0xff]  }
  0x52   : > { %1060 = vmatprep.subr.bf16.mxu0 %v3215_v30  ;;  %1155 = vmatprep.subr.bf16.mxu1 %v3218_v31  ;;  %v3286_v30 = vld [vmem:[%s4228_s1 + $0x3f4] ss:$8 sps:$4 sm:$0xff]   ;;  %v1403_v31 = vrot.slane %v3866_v14, 1 }
  0x53   : > { %1082 = vmatprep.mubr.bf16.mxu0 %v3457_v2  ;;  %1177 = vmatprep.mubr.bf16.mxu1 %v3457_v2 }
  0x55   : > { %1061 = vmatpush1.bf16.msra.mxu0 %v3213_v32  ;;  %1156 = vmatpush1.bf16.msra.mxu1 %v3216_v33  ;;  %v3281_v32 = vld [vmem:[%s4228_s1 + $0x3b0] ss:$8 sps:$4 sm:$0xff]   ;;  %v1505_v33 = vor.u32 %v1504_v27, %v1501_v26 }
  0x56   : > { %1062 = vmatprep.subr.bf16.mxu0 %v3221_v34  ;;  %1157 = vmatprep.subr.bf16.mxu1 %v3224_v35  ;;  %v3284_v34 = vld [vmem:[%s4228_s1 + $0x3f0] ss:$8 sps:$4 sm:$0xff]   ;;  %v3289_v35 = vld [vmem:[%s4228_s1 + $0x3a4] ss:$8 sps:$4 sm:$0xff]  }
  0x59   : > { %1063 = vmatpush1.bf16.msra.mxu0 %v3219_v36  ;;  %1158 = vmatpush1.bf16.msra.mxu1 %v3222_v39  ;;  %v3292_v36 = vld [vmem:[%s4228_s1 + $0x3e4] ss:$8 sps:$4 sm:$0xff]   ;;  %v3295_v39 = vld [vmem:[%s4228_s1 + $0x394] ss:$8 sps:$4 sm:$0xff]  }
  0x5a   : > { %1064 = vmatprep.subr.bf16.mxu0 %v3227_v40  ;;  %1159 = vmatprep.subr.bf16.mxu1 %v3230_v41  ;;  %v3298_v40 = vld [vmem:[%s4228_s1 + $0x3d4] ss:$8 sps:$4 sm:$0xff]   ;;  %v3293_v41 = vld [vmem:[%s4228_s1 + $0x390] ss:$8 sps:$4 sm:$0xff]  }
  0x5d   : > { %1065 = vmatpush1.bf16.msra.mxu0 %v3225_v42  ;;  %1160 = vmatpush1.bf16.msra.mxu1 %v3228_v45  ;;  %v3296_v42 = vld [vmem:[%s4228_s1 + $0x3d0] ss:$8 sps:$4 sm:$0xff]   ;;  %v3299_v45 = vld [vmem:[%s4228_s1 + $0x380] ss:$8 sps:$4 sm:$0xff]  }
  0x5e   : > { %1253 = vmatprep.subr.bf16.mxu0 %v3233_v46  ;;  %1357 = vmatprep.subr.bf16.mxu1 %v3236_v47  ;;  %v3302_v46 = vld [vmem:[%s4228_s1 + $0x3c0] ss:$8 sps:$4 sm:$0xff]   ;;  %v3307_v47 = vld [vmem:[%s4228_s1 + $0x434] ss:$8 sps:$4 sm:$0xff]  }
  0x60   : > { %2901 = vmatmul.mubr.msk.bf16.vlgmr.msra.gmra.mxu0 %vm265_vm0, %v1006_v48  ;;  %2910 = vmatmul.mubr.msk.bf16.vlgmr.msra.gmra.mxu1 %vm265_vm0, %v1101_v50  ;;  %v3312_v48 = vld [vmem:[%s4228_s1 + $0x474] ss:$8 sps:$4 sm:$0xff]   ;;  %v1600_v50 = vrot.slane %v3866_v14, 2  ;;  %v3339_v14 = vld [vmem:[%s4228_s1 + $0x4a4] ss:$8 sps:$4 sm:$0xff]  }
  0x61   : > { %1254 = vmatpush1.bf16.msra.mxu0 %v3231_v49  ;;  %1358 = vmatpush1.bf16.msra.mxu1 %v3234_v51  ;;  %v3305_v49 = vld [vmem:[%s4228_s1 + $0x430] ss:$8 sps:$4 sm:$0xff]  }
  0x62   : > { %1255 = vmatprep.subr.bf16.mxu0 %v3239_v52  ;;  %1359 = vmatprep.subr.bf16.mxu1 %v3242_v54  ;;  %v2962_v51 = vld [vmem:[%s3555_s28 + $0x18] sm:$0xf]  ;;  %v3318_v54 = vld [vmem:[%s4228_s1 + $0x464] ss:$8 sps:$4 sm:$0xff]  }
  0x63   : > { %1277 = vmatprep.mubr.bf16.mxu0 %v3457_v2  ;;  %1381 = vmatprep.mubr.bf16.mxu1 %v3457_v2  ;;  %v3310_v52 = vld [vmem:[%s4228_s1 + $0x470] ss:$8 sps:$4 sm:$0xff]  }
  0x65   : > { %1256 = vmatpush1.bf16.msra.mxu0 %v3237_v55  ;;  %1360 = vmatpush1.bf16.msra.mxu1 %v3240_v57  ;;  %v2973_v55 = vcombine.low %v2962_v51, %v2962_v51  ;;  %v3316_v57 = vld [vmem:[%s4228_s1 + $0x460] ss:$8 sps:$4 sm:$0xff]  }
  0x66   : > { %1257 = vmatprep.subr.bf16.mxu0 %v3245_v58  ;;  %1361 = vmatprep.subr.bf16.mxu1 %v3248_v59  ;;  %v3321_v58 = vld [vmem:[%s4228_s1 + $0x414] ss:$8 sps:$4 sm:$0xff]  }
  0x67   : > { %v3324_v59 = vld [vmem:[%s4228_s1 + $0x454] ss:$8 sps:$4 sm:$0xff]   ;;  %v1799_v3 = vshrl.u32 %v2973_v55, 16 }
  0x69   : > { %1258 = vmatpush1.bf16.msra.mxu0 %v3243_v61  ;;  %1362 = vmatpush1.bf16.msra.mxu1 %v3246_v62  ;;  %v1801_v61 = vshll.u32 %v2973_v55, 16  ;;  %v3319_v62 = vld [vmem:[%s4228_s1 + $0x410] ss:$8 sps:$4 sm:$0xff]  }
  0x6a   : > { %1259 = vmatprep.subr.bf16.mxu0 %v3251_v63  ;;  %1363 = vmatprep.subr.bf16.mxu1 %v3254_v0  ;;  %v3322_v63 = vld [vmem:[%s4228_s1 + $0x450] ss:$8 sps:$4 sm:$0xff]   ;;  %v3327_v0 = vld [vmem:[%s4228_s1 + $0x404] ss:$8 sps:$4 sm:$0xff]  }
  0x6b   : > { %v1803_v4 = vrot.slane %v1801_v61, 1 }
  0x6d   : > { %1260 = vmatpush1.bf16.msra.mxu0 %v3249_v1  ;;  %1364 = vmatpush1.bf16.msra.mxu1 %v3252_v5  ;;  %v3330_v1 = vld [vmem:[%s4228_s1 + $0x444] ss:$8 sps:$4 sm:$0xff]   ;;  %v4005_v5 = vcombine.low %v2962_v51, %v2963_v60 }
  0x6e   : > { %1455 = vmatprep.subr.bf16.mxu0 %v3259_v6  ;;  %1557 = vmatprep.subr.bf16.mxu1 %v3262_v7  ;;  %v3325_v6 = vld [vmem:[%s4228_s1 + $0x400] ss:$8 sps:$4 sm:$0xff]   ;;  %v3392_v60 = vld [vmem:[%s4228_s1 + $0x5e4] ss:$8 sps:$4 sm:$0xff]  }
  0x6f   : > { %v3328_v7 = vld [vmem:[%s4228_s1 + $0x440] ss:$8 sps:$4 sm:$0xff]   ;;  %v1998_v20 = vshrl.u32 %v4005_v5, 16  ;;  %v2001_v21 = vshll.u32 %v4005_v5, 16 }
  0x70   : > { %2922 = vmatmul.mubr.msk.bf16.vlgmr.msra.gmra.mxu0 %vm265_vm0, %v2912_v53  ;;  %2932 = vmatmul.mubr.msk.bf16.vlgmr.msra.gmra.mxu1 %vm265_vm0, %v1305_v10  ;;  %v3315_v53 = vld [vmem:[%s4228_s1 + $0x424] ss:$8 sps:$4 sm:$0xff]   ;;  %v1804_v10 = vor.u32 %v1803_v4, %v1799_v3 }
  0x71   : > { %1456 = vmatpush1.bf16.msra.mxu0 %v3257_v9  ;;  %1558 = vmatpush1.bf16.msra.mxu1 %v3260_v11  ;;  %v3336_v9 = vld [vmem:[%s4228_s1 + $0x4f4] ss:$8 sps:$4 sm:$0xff]   ;;  %v1902_v11 = vrot.slane %v4005_v5, 1  ;;  %v2000_v26 = vrot.slane %v1998_v20, 1  ;;  %v2003_v27 = vrot.slane %v2001_v21, 2 }
  0x72   : > { %1457 = vmatprep.subr.bf16.mxu0 %v3265_v12  ;;  %1559 = vmatprep.subr.bf16.mxu1 %v3268_v13  ;;  %v3331_v12 = vld [vmem:[%s4228_s1 + $0x4b0] ss:$8 sps:$4 sm:$0xff]   ;;  %v3416_v21 = vld [vmem:[%s4228_s1 + $0x604] ss:$8 sps:$4 sm:$0xff]  }
  0x73   : > { %1479 = vmatprep.mubr.bf16.mxu0 %v3457_v2  ;;  %1581 = vmatprep.mubr.bf16.mxu1 %v3457_v2  ;;  %v3334_v13 = vld [vmem:[%s4228_s1 + $0x4f0] ss:$8 sps:$4 sm:$0xff]  }
  0x74   : > { %v3411_v20 = vld [vmem:[%s4228_s1 + $0x610] ss:$8 sps:$4 sm:$0xff]  }
  0x75   : > { %1458 = vmatpush1.bf16.msra.mxu0 %v3263_v15  ;;  %1560 = vmatpush1.bf16.msra.mxu1 %v3266_v16  ;;  %v3342_v15 = vld [vmem:[%s4228_s1 + $0x4e4] ss:$8 sps:$4 sm:$0xff]   ;;  %v3337_v16 = vld [vmem:[%s4228_s1 + $0x4a0] ss:$8 sps:$4 sm:$0xff]  }
  0x76   : > { %1459 = vmatprep.subr.bf16.mxu0 %v3271_v17  ;;  %1561 = vmatprep.subr.bf16.mxu1 %v3274_v18  ;;  %v3340_v17 = vld [vmem:[%s4228_s1 + $0x4e0] ss:$8 sps:$4 sm:$0xff]   ;;  %v3345_v18 = vld [vmem:[%s4228_s1 + $0x494] ss:$8 sps:$4 sm:$0xff]  }
  0x79   : > { %1460 = vmatpush1.bf16.msra.mxu0 %v3269_v19  ;;  %1562 = vmatpush1.bf16.msra.mxu1 %v3272_v22  ;;  %v3348_v19 = vld [vmem:[%s4228_s1 + $0x4d4] ss:$8 sps:$4 sm:$0xff]   ;;  %v3343_v22 = vld [vmem:[%s4228_s1 + $0x490] ss:$8 sps:$4 sm:$0xff]  }
  0x7a   : > { %1461 = vmatprep.subr.bf16.mxu0 %v3277_v23  ;;  %1563 = vmatprep.subr.bf16.mxu1 %v3280_v24  ;;  %v3346_v23 = vld [vmem:[%s4228_s1 + $0x4d0] ss:$8 sps:$4 sm:$0xff]   ;;  %v3351_v24 = vld [vmem:[%s4228_s1 + $0x484] ss:$8 sps:$4 sm:$0xff]  }
  0x7d   : > { %1462 = vmatpush1.bf16.msra.mxu0 %v3275_v25  ;;  %1564 = vmatpush1.bf16.msra.mxu1 %v3278_v28  ;;  %v3354_v25 = vld [vmem:[%s4228_s1 + $0x4c4] ss:$8 sps:$4 sm:$0xff]   ;;  %v3349_v28 = vld [vmem:[%s4228_s1 + $0x480] ss:$8 sps:$4 sm:$0xff]  }
  0x7e   : > { %1652 = vmatprep.subr.bf16.mxu0 %v3283_v29  ;;  %1752 = vmatprep.subr.bf16.mxu1 %v3286_v30  ;;  %v3352_v29 = vld [vmem:[%s4228_s1 + $0x4c0] ss:$8 sps:$4 sm:$0xff]   ;;  %v3357_v30 = vld [vmem:[%s4228_s1 + $0x534] ss:$8 sps:$4 sm:$0xff]  }
  0x80   : > { %2942 = vmatmul.mubr.msk.bf16.vlgmr.msra.gmra.mxu0 %vm265_vm0, %v1403_v31  ;;  %2951 = vmatmul.mubr.msk.bf16.vlgmr.msra.gmra.mxu1 %vm265_vm0, %v1505_v33  ;;  %v3360_v31 = vld [vmem:[%s4228_s1 + $0x574] ss:$8 sps:$4 sm:$0xff]   ;;  %v2099_v33 = vrot.slane %v4005_v5, 2  ;;  %v3393_v5 = vld [vmem:[%s4228_s1 + $0x590] ss:$8 sps:$4 sm:$0xff]  }
  0x81   : > { %1653 = vmatpush1.bf16.msra.mxu0 %v3281_v32  ;;  %1753 = vmatpush1.bf16.msra.mxu1 %v3284_v34  ;;  %v2004_v32 = vor.u32 %v2003_v27, %v2000_v26  ;;  %v3355_v34 = vld [vmem:[%s4228_s1 + $0x530] ss:$8 sps:$4 sm:$0xff]  }
  0x82   : > { %1654 = vmatprep.subr.bf16.mxu0 %v3289_v35  ;;  %1754 = vmatprep.subr.bf16.mxu1 %v3292_v36  ;;  %v3358_v35 = vld [vmem:[%s4228_s1 + $0x570] ss:$8 sps:$4 sm:$0xff]   ;;  %v3012_v36 = vld [vmem:[%s3555_s28 + $0x20] sm:$0xf] }
  0x83   : > { %1676 = vmatprep.mubr.bf16.mxu0 %v3457_v2  ;;  %1776 = vmatprep.mubr.bf16.mxu1 %v3457_v2 }
  0x85   : > { %1655 = vmatpush1.bf16.msra.mxu0 %v3287_v37  ;;  %1755 = vmatpush1.bf16.msra.mxu1 %v3290_v38  ;;  %v3363_v37 = vld [vmem:[%s4228_s1 + $0x524] ss:$8 sps:$4 sm:$0xff]  }
  0x86   : > { %1656 = vmatprep.subr.bf16.mxu0 %v3295_v39  ;;  %1756 = vmatprep.subr.bf16.mxu1 %v3298_v40  ;;  %v3366_v38 = vld [vmem:[%s4228_s1 + $0x564] ss:$8 sps:$4 sm:$0xff]   ;;  %v3023_v39 = vcombine.low %v3012_v36, %v3012_v36  ;;  %v3361_v40 = vld [vmem:[%s4228_s1 + $0x520] ss:$8 sps:$4 sm:$0xff]  }
  0x89   : > { %1657 = vmatpush1.bf16.msra.mxu0 %v3293_v41  ;;  %1757 = vmatpush1.bf16.msra.mxu1 %v3296_v42  ;;  %v3364_v41 = vld [vmem:[%s4228_s1 + $0x560] ss:$8 sps:$4 sm:$0xff]   ;;  %v3369_v42 = vld [vmem:[%s4228_s1 + $0x514] ss:$8 sps:$4 sm:$0xff]  }
  0x8a   : > { %1658 = vmatprep.subr.bf16.mxu0 %v3301_v43  ;;  %1758 = vmatprep.subr.bf16.mxu1 %v3304_v44  ;;  %v3372_v43 = vld [vmem:[%s4228_s1 + $0x554] ss:$8 sps:$4 sm:$0xff]   ;;  %v2300_v44 = vshll.u32 %v3023_v39, 16 }
  0x8d   : > { %1659 = vmatpush1.bf16.msra.mxu0 %v3299_v45  ;;  %1759 = vmatpush1.bf16.msra.mxu1 %v3302_v46  ;;  %v3367_v45 = vld [vmem:[%s4228_s1 + $0x510] ss:$8 sps:$4 sm:$0xff]  }
  0x8e   : > { %1856 = vmatprep.subr.bf16.mxu0 %v3307_v47  ;;  %1954 = vmatprep.subr.bf16.mxu1 %v3312_v48  ;;  %v3370_v46 = vld [vmem:[%s4228_s1 + $0x550] ss:$8 sps:$4 sm:$0xff]   ;;  %v3375_v47 = vld [vmem:[%s4228_s1 + $0x504] ss:$8 sps:$4 sm:$0xff]  }
  0x8f   : > { %v3378_v48 = vld [vmem:[%s4228_s1 + $0x544] ss:$8 sps:$4 sm:$0xff]  }
  0x90   : > { %2960 = vmatmul.mubr.msk.bf16.vlgmr.msra.gmra.mxu0 %vm265_vm0, %v1600_v50  ;;  %2972 = vmatmul.mubr.msk.bf16.vlgmr.msra.gmra.mxu1 %vm265_vm0, %v2962_v51  ;;  %v2302_v50 = vrot.slane %v2300_v44, 1  ;;  %v3373_v51 = vld [vmem:[%s4228_s1 + $0x500] ss:$8 sps:$4 sm:$0xff]  }
  0x91   : > { %1857 = vmatpush1.bf16.msra.mxu0 %v3305_v49  ;;  %1955 = vmatpush1.bf16.msra.mxu1 %v3310_v52  ;;  %v2298_v49 = vshrl.u32 %v3023_v39, 16  ;;  %v3376_v52 = vld [vmem:[%s4228_s1 + $0x540] ss:$8 sps:$4 sm:$0xff]  }
  0x92   : > { %1858 = vmatprep.subr.bf16.mxu0 %v3315_v53  ;;  %1956 = vmatprep.subr.bf16.mxu1 %v3318_v54  ;;  %v3383_v53 = vld [vmem:[%s4228_s1 + $0x5b4] ss:$8 sps:$4 sm:$0xff]  }
  0x93   : > { %1880 = vmatprep.mubr.bf16.mxu0 %v3457_v2  ;;  %1978 = vmatprep.mubr.bf16.mxu1 %v3457_v2  ;;  %v3386_v54 = vld [vmem:[%s4228_s1 + $0x5f4] ss:$8 sps:$4 sm:$0xff]   ;;  %v2303_v55 = vor.u32 %v2302_v50, %v2298_v49 }
  0x95   : > { %1859 = vmatpush1.bf16.msra.mxu0 %v3313_v56  ;;  %1957 = vmatpush1.bf16.msra.mxu1 %v3316_v57  ;;  %v3013_v56 = vld [vmem:[%s3555_s28 + $0x24] sm:$0x3]  ;;  %v3381_v57 = vld [vmem:[%s4228_s1 + $0x5b0] ss:$8 sps:$4 sm:$0xff]   ;;  %s190_s28 = sadd.s32 %s3065_s22, %s2810_s23 }
  0x96   : > { %1860 = vmatprep.subr.bf16.mxu0 %v3321_v58  ;;  %1958 = vmatprep.subr.bf16.mxu1 %v3324_v59  ;;  %v3384_v58 = vld [vmem:[%s4228_s1 + $0x5f0] ss:$8 sps:$4 sm:$0xff]   ;;  %v3389_v59 = vld [vmem:[%s4228_s1 + $0x5a4] ss:$8 sps:$4 sm:$0xff]   ;;  %v3033_v61 = vcombine.low %v3012_v36, %v3013_v56  ;;  %s2811_s26 = sshll.u32 %s190_s28, 3 }
  0x97   : > { %s192_s27 = scalar_lea.vmem %s4230_s3, %s2811_s26 }
  0x98   : > { %v2497_v3 = vshrl.u32 %v3033_v61, 16  ;;  %v2500_v4 = vshll.u32 %v3033_v61, 16 }
  0x99   : > { %1861 = vmatpush1.bf16.msra.mxu0 %v3319_v62  ;;  %1959 = vmatpush1.bf16.msra.mxu1 %v3322_v63  ;;  %v3387_v62 = vld [vmem:[%s4228_s1 + $0x5a0] ss:$8 sps:$4 sm:$0xff]  }
  0x9a   : > { %1862 = vmatprep.subr.bf16.mxu0 %v3327_v0  ;;  %1960 = vmatprep.subr.bf16.mxu1 %v3330_v1  ;;  %v3390_v63 = vld [vmem:[%s4228_s1 + $0x5e0] ss:$8 sps:$4 sm:$0xff]   ;;  %v3395_v0 = vld [vmem:[%s4228_s1 + $0x594] ss:$8 sps:$4 sm:$0xff]  }
  0x9b   : > { %v3398_v1 = vld [vmem:[%s4228_s1 + $0x5d4] ss:$8 sps:$4 sm:$0xff]  }
  0x9d   : > { %1863 = vmatpush1.bf16.msra.mxu0 %v3325_v6  ;;  %1961 = vmatpush1.bf16.msra.mxu1 %v3328_v7  ;;  %v3396_v6 = vld [vmem:[%s4228_s1 + $0x5d0] ss:$8 sps:$4 sm:$0xff]   ;;  %v3401_v7 = vld [vmem:[%s4228_s1 + $0x584] ss:$8 sps:$4 sm:$0xff]  }
  0x9e   : > { %2056 = vmatprep.subr.bf16.mxu0 %v3333_v8  ;;  %2151 = vmatprep.subr.bf16.mxu1 %v3336_v9  ;;  %v3404_v8 = vld [vmem:[%s4228_s1 + $0x5c4] ss:$8 sps:$4 sm:$0xff]   ;;  %v2499_v9 = vrot.slane %v2497_v3, 1 }
  0xa0   : > { %2982 = vmatmul.mubr.msk.bf16.vlgmr.msra.gmra.mxu0 %vm265_vm0, %v1804_v10  ;;  %2992 = vmatmul.mubr.msk.bf16.vlgmr.msra.gmra.mxu1 %vm265_vm0, %v1902_v11  ;;  %v2502_v10 = vrot.slane %v2500_v4, 2  ;;  %v3399_v11 = vld [vmem:[%s4228_s1 + $0x580] ss:$8 sps:$4 sm:$0xff]  }
  0xa1   : > { %2057 = vmatpush1.bf16.msra.mxu0 %v3331_v12  ;;  %2152 = vmatpush1.bf16.msra.mxu1 %v3334_v13  ;;  %v3402_v12 = vld [vmem:[%s4228_s1 + $0x5c0] ss:$8 sps:$4 sm:$0xff]   ;;  %v3407_v13 = vld [vmem:[%s4228_s1 + $0x634] ss:$8 sps:$4 sm:$0xff]  }
  0xa2   : > { %2058 = vmatprep.subr.bf16.mxu0 %v3339_v14  ;;  %2153 = vmatprep.subr.bf16.mxu1 %v3342_v15  ;;  %v2401_v14 = vrot.slane %v3033_v61, 1  ;;  %v2503_v15 = vor.u32 %v2502_v10, %v2499_v9 }
  0xa3   : > { %2080 = vmatprep.mubr.bf16.mxu0 %v3457_v2  ;;  %2175 = vmatprep.mubr.bf16.mxu1 %v3457_v2 }
  0xa5   : > { %2059 = vmatpush1.bf16.msra.mxu0 %v3337_v16  ;;  %2154 = vmatpush1.bf16.msra.mxu1 %v3340_v17  ;;  %v3405_v16 = vld [vmem:[%s4228_s1 + $0x630] ss:$8 sps:$4 sm:$0xff]   ;;  %v3410_v17 = vld [vmem:[%s4228_s1 + $0x624] ss:$8 sps:$4 sm:$0xff]  }
  0xa6   : > { %2060 = vmatprep.subr.bf16.mxu0 %v3345_v18  ;;  %2155 = vmatprep.subr.bf16.mxu1 %v3348_v19  ;;  %v3408_v18 = vld [vmem:[%s4228_s1 + $0x620] ss:$8 sps:$4 sm:$0xff]   ;;  %v3413_v19 = vld [vmem:[%s4228_s1 + $0x614] ss:$8 sps:$4 sm:$0xff]  }
  0xa9   : > { %2061 = vmatpush1.bf16.msra.mxu0 %v3343_v22  ;;  %2156 = vmatpush1.bf16.msra.mxu1 %v3346_v23  ;;  %v2598_v22 = vrot.slane %v3033_v61, 2 }
  0xaa   : > { %2062 = vmatprep.subr.bf16.mxu0 %v3351_v24  ;;  %2157 = vmatprep.subr.bf16.mxu1 %v3354_v25 }
  0xad   : > { %2063 = vmatpush1.bf16.msra.mxu0 %v3349_v28  ;;  %2158 = vmatpush1.bf16.msra.mxu1 %v3352_v29 }
  0xae   : > { %2251 = vmatprep.subr.bf16.mxu0 %v3357_v30  ;;  %2355 = vmatprep.subr.bf16.mxu1 %v3360_v31 }
  0xb0   : > { %3001 = vmatmul.mubr.msk.bf16.vlgmr.msra.gmra.mxu0 %vm265_vm0, %v2004_v32  ;;  %3010 = vmatmul.mubr.msk.bf16.vlgmr.msra.gmra.mxu1 %vm265_vm0, %v2099_v33 }
  0xb1   : > { %2252 = vmatpush1.bf16.msra.mxu0 %v3355_v34  ;;  %2356 = vmatpush1.bf16.msra.mxu1 %v3358_v35 }
  0xb2   : > { %2253 = vmatprep.subr.bf16.mxu0 %v3363_v37  ;;  %2357 = vmatprep.subr.bf16.mxu1 %v3366_v38 }
  0xb3   : > { %2275 = vmatprep.mubr.bf16.mxu0 %v3457_v2  ;;  %2379 = vmatprep.mubr.bf16.mxu1 %v3457_v2 }
  0xb5   : > { %2254 = vmatpush1.bf16.msra.mxu0 %v3361_v40  ;;  %2358 = vmatpush1.bf16.msra.mxu1 %v3364_v41 }
  0xb6   : > { %2255 = vmatprep.subr.bf16.mxu0 %v3369_v42  ;;  %2359 = vmatprep.subr.bf16.mxu1 %v3372_v43 }
  0xb9   : > { %2256 = vmatpush1.bf16.msra.mxu0 %v3367_v45  ;;  %2360 = vmatpush1.bf16.msra.mxu1 %v3370_v46 }
  0xba   : > { %2257 = vmatprep.subr.bf16.mxu0 %v3375_v47  ;;  %2361 = vmatprep.subr.bf16.mxu1 %v3378_v48 }
  0xbd   : > { %2258 = vmatpush1.bf16.msra.mxu0 %v3373_v51  ;;  %2362 = vmatpush1.bf16.msra.mxu1 %v3376_v52 }
  0xbe   : > { %2453 = vmatprep.subr.bf16.mxu0 %v3383_v53  ;;  %2555 = vmatprep.subr.bf16.mxu1 %v3386_v54 }
  0xc0   : > { %3022 = vmatmul.mubr.msk.bf16.vlgmr.msra.gmra.mxu0 %vm265_vm0, %v3012_v36  ;;  %3032 = vmatmul.mubr.msk.bf16.vlgmr.msra.gmra.mxu1 %vm265_vm0, %v2303_v55 }
  0xc1   : > { %2454 = vmatpush1.bf16.msra.mxu0 %v3381_v57  ;;  %2556 = vmatpush1.bf16.msra.mxu1 %v3384_v58 }
  0xc2   : > { %2455 = vmatprep.subr.bf16.mxu0 %v3389_v59  ;;  %2557 = vmatprep.subr.bf16.mxu1 %v3392_v60 }
  0xc3   : > { %2477 = vmatprep.mubr.bf16.mxu0 %v3457_v2  ;;  %2579 = vmatprep.mubr.bf16.mxu1 %v3457_v2 }
  0xc5   : > { %2456 = vmatpush1.bf16.msra.mxu0 %v3387_v62  ;;  %2558 = vmatpush1.bf16.msra.mxu1 %v3390_v63 }
  0xc6   : > { %2457 = vmatprep.subr.bf16.mxu0 %v3395_v0  ;;  %2559 = vmatprep.subr.bf16.mxu1 %v3398_v1 }
  0xc9   : > { %2458 = vmatpush1.bf16.msra.mxu0 %v3393_v5  ;;  %2560 = vmatpush1.bf16.msra.mxu1 %v3396_v6 }
  0xca   : > { %2459 = vmatprep.subr.bf16.mxu0 %v3401_v7  ;;  %2561 = vmatprep.subr.bf16.mxu1 %v3404_v8 }
  0xcd   : > { %2460 = vmatpush1.bf16.msra.mxu0 %v3399_v11  ;;  %2562 = vmatpush1.bf16.msra.mxu1 %v3402_v12 }
  0xce   : > { %2650 = vmatprep.subr.bf16.mxu0 %v3407_v13 }
  0xd0   : > { %3042 = vmatmul.mubr.msk.bf16.vlgmr.msra.gmra.mxu0 %vm265_vm0, %v2401_v14  ;;  %3051 = vmatmul.mubr.msk.bf16.vlgmr.msra.gmra.mxu1 %vm265_vm0, %v2503_v15 }
  0xd1   : > { %2651 = vmatpush1.bf16.msra.mxu0 %v3405_v16  ;;  %2674 = vmatprep.mubr.bf16.mxu0 %v3457_v2  ;;  %v3414_v2 = vld [vmem:[%s4228_s1 + $0x600] ss:$8 sps:$4 sm:$0xff]  }
  0xd2   : > { %2652 = vmatprep.subr.bf16.mxu0 %v3410_v17 }
  0xd5   : > { %2653 = vmatpush1.bf16.msra.mxu0 %v3408_v18 }
  0xd6   : > { %2654 = vmatprep.subr.bf16.mxu0 %v3413_v19 }
  0xd9   : > { %2655 = vmatpush1.bf16.msra.mxu0 %v3411_v20 }
  0xda   : > { %2656 = vmatprep.subr.bf16.mxu0 %v3416_v21 }
  0xdd   : > { %2657 = vmatpush1.bf16.msra.mxu0 %v3414_v2 }
  0xe0   : > { %v303_v23 = vpop.f32.mrf.mxu0  ;;  %v387_v24 = vpop.f32.mrf.mxu1  ;;  %3060 = vmatmul.mubr.msk.bf16.vlgmr.msra.gmra.mxu0 %vm265_vm0, %v2598_v22 }
  0xe1   : > { %v388_v25 = vadd.f32 %v387_v24, %v303_v23 }
  0xe2   : > { %v305_v26 = vpop.f32.mrf.mxu0  ;;  %v389_v27 = vpop.f32.mrf.mxu1 }
  0xe3   : > { %v390_v28 = vadd.f32 %v389_v27, %v305_v26 }
  0xe4   : > { %v307_v29 = vpop.f32.mrf.mxu0  ;;  %v391_v30 = vpop.f32.mrf.mxu1 }
  0xe6   : > { %v308_v31 = vpop.f32.mrf.mxu0  ;;  %v392_v32 = vpop.f32.mrf.mxu1 }
  0xf0   : > { %v483_v33 = vpop.f32.mrf.mxu0  ;;  %v585_v34 = vpop.f32.mrf.mxu1 }
  0xf1   : > { %v490_v35 = vadd.f32 %v483_v33, %v388_v25 }
  0xf2   : > { %v485_v36 = vpop.f32.mrf.mxu0  ;;  %v587_v37 = vpop.f32.mrf.mxu1 }
  0xf3   : > { %v491_v38 = vadd.f32 %v485_v36, %v390_v28  ;;  %v592_v39 = vadd.f32 %v585_v34, %v490_v35 }
  0xf4   : > { %v487_v40 = vpop.f32.mrf.mxu0  ;;  %v589_v41 = vpop.f32.mrf.mxu1 }
  0xf5   : > { %v593_v42 = vadd.f32 %v587_v37, %v491_v38 }
  0xf6   : > { %v488_v43 = vpop.f32.mrf.mxu0  ;;  %v590_v44 = vpop.f32.mrf.mxu1 }
 0x100   : > { %v680_v45 = vpop.f32.mrf.mxu0  ;;  %v780_v46 = vpop.f32.mrf.mxu1 }
 0x101   : > { %v687_v47 = vadd.f32 %v680_v45, %v592_v39 }
 0x102   : > { %v682_v48 = vpop.f32.mrf.mxu0  ;;  %v782_v49 = vpop.f32.mrf.mxu1 }
 0x103   : > { %v688_v50 = vadd.f32 %v682_v48, %v593_v42  ;;  %v787_v51 = vadd.f32 %v780_v46, %v687_v47 }
 0x104   : > { %v684_v52 = vpop.f32.mrf.mxu0  ;;  %v784_v53 = vpop.f32.mrf.mxu1 }
 0x105   : > { %v788_v54 = vadd.f32 %v782_v49, %v688_v50 }
 0x106   : > { %v685_v55 = vpop.f32.mrf.mxu0  ;;  %v785_v56 = vpop.f32.mrf.mxu1 }
 0x110   : > { %v884_v57 = vpop.f32.mrf.mxu0  ;;  %v982_v58 = vpop.f32.mrf.mxu1 }
 0x111   : > { %v891_v59 = vadd.f32 %v884_v57, %v787_v51 }
 0x112   : > { %v886_v60 = vpop.f32.mrf.mxu0  ;;  %v984_v61 = vpop.f32.mrf.mxu1 }
 0x113   : > { %v892_v62 = vadd.f32 %v886_v60, %v788_v54  ;;  %v989_v63 = vadd.f32 %v982_v58, %v891_v59 }
 0x114   : > { %v888_v0 = vpop.f32.mrf.mxu0  ;;  %v986_v1 = vpop.f32.mrf.mxu1 }
 0x115   : > { %v990_v3 = vadd.f32 %v984_v61, %v892_v62 }
 0x116   : > { %v889_v4 = vpop.f32.mrf.mxu0  ;;  %v987_v5 = vpop.f32.mrf.mxu1 }
 0x120   : > { %v1084_v6 = vpop.f32.mrf.mxu0  ;;  %v1179_v7 = vpop.f32.mrf.mxu1 }
 0x121   : > { %v1091_v8 = vadd.f32 %v1084_v6, %v989_v63 }
 0x122   : > { %v1086_v9 = vpop.f32.mrf.mxu0  ;;  %v1181_v10 = vpop.f32.mrf.mxu1 }
 0x123   : > { %v1092_v11 = vadd.f32 %v1086_v9, %v990_v3  ;;  %v1186_v12 = vadd.f32 %v1179_v7, %v1091_v8 }
 0x124   : > { %v1088_v13 = vpop.f32.mrf.mxu0  ;;  %v1183_v14 = vpop.f32.mrf.mxu1 }
 0x125   : > { %v1187_v15 = vadd.f32 %v1181_v10, %v1092_v11 }
 0x126   : > { %v1089_v16 = vpop.f32.mrf.mxu0  ;;  %v1184_v17 = vpop.f32.mrf.mxu1 }
 0x130   : > { %v1279_v18 = vpop.f32.mrf.mxu0  ;;  %v1383_v19 = vpop.f32.mrf.mxu1 }
 0x131   : > { %v1286_v20 = vadd.f32 %v1279_v18, %v1186_v12 }
 0x132   : > { %v1281_v21 = vpop.f32.mrf.mxu0  ;;  %v1385_v2 = vpop.f32.mrf.mxu1 }
 0x133   : > { %v1287_v22 = vadd.f32 %v1281_v21, %v1187_v15  ;;  %v1390_v23 = vadd.f32 %v1383_v19, %v1286_v20 }
 0x134   : > { %v1283_v24 = vpop.f32.mrf.mxu0  ;;  %v1387_v25 = vpop.f32.mrf.mxu1 }
 0x135   : > { %v1391_v26 = vadd.f32 %v1385_v2, %v1287_v22  ;;  %v2687_v24 = vlaneseq }
 0x136   : > { %v1284_v27 = vpop.f32.mrf.mxu0  ;;  %v1388_v28 = vpop.f32.mrf.mxu1 }
 0x140   : > { %v1481_v29 = vpop.f32.mrf.mxu0  ;;  %v1583_v30 = vpop.f32.mrf.mxu1 }
 0x141   : > { %v1488_v31 = vadd.f32 %v1481_v29, %v1390_v23 }
 0x142   : > { %v1483_v32 = vpop.f32.mrf.mxu0  ;;  %v1585_v33 = vpop.f32.mrf.mxu1 }
 0x143   : > { %v1489_v34 = vadd.f32 %v1483_v32, %v1391_v26  ;;  %v1590_v35 = vadd.f32 %v1583_v30, %v1488_v31  ;;  %v2688_v32 = vshrl.u32 %v2687_v24, 7 }
 0x144   : > { %v1485_v36 = vpop.f32.mrf.mxu0  ;;  %v1587_v37 = vpop.f32.mrf.mxu1 }
 0x145   : > { %v1591_v38 = vadd.f32 %v1585_v33, %v1489_v34  ;;  %v2689_v36 = vsub.s32 0, %v2688_v32  ;;  %v2685_v37 = vld [vmem:[%s4229_s2] sm:$0x3] }
 0x146   : > { %v1486_v39 = vpop.f32.mrf.mxu0  ;;  %v1588_v40 = vpop.f32.mrf.mxu1 }
 0x147   : > { %v2693_v39 = vsub.s32 1, %v2688_v32 }
 0x150   : > { %v1678_v41 = vpop.f32.mrf.mxu0  ;;  %v1778_v42 = vpop.f32.mrf.mxu1 }
 0x151   : > { %v1685_v6 = vadd.f32 %v1678_v41, %v1590_v35  ;;  %v2690_v41 = vrot.slane %v2685_v37, %v2689_v36 }
 0x152   : > { %v1680_v43 = vpop.f32.mrf.mxu0  ;;  %v1780_v44 = vpop.f32.mrf.mxu1 }
 0x153   : > { %v1686_v9 = vadd.f32 %v1680_v43, %v1591_v38  ;;  %v1785_v12 = vadd.f32 %v1778_v42, %v1685_v6 }
 0x154   : > { %v1682_v45 = vpop.f32.mrf.mxu0  ;;  %v1782_v46 = vpop.f32.mrf.mxu1 }
 0x155   : > { %v1786_v13 = vadd.f32 %v1780_v44, %v1686_v9  ;;  %v2694_v45 = vrot.slane %v2685_v37, %v2693_v39 }
 0x156   : > { %v1683_v47 = vpop.f32.mrf.mxu0  ;;  %v1783_v48 = vpop.f32.mrf.mxu1 }
 0x160   : > { %v1882_v49 = vpop.f32.mrf.mxu0  ;;  %v1980_v50 = vpop.f32.mrf.mxu1 }
 0x161   : > { %v1889_v14 = vadd.f32 %v1882_v49, %v1785_v12 }
 0x162   : > { %v1884_v51 = vpop.f32.mrf.mxu0  ;;  %v1982_v52 = vpop.f32.mrf.mxu1 }
 0x163   : > { %v1890_v15 = vadd.f32 %v1884_v51, %v1786_v13  ;;  %v1987_v16 = vadd.f32 %v1980_v50, %v1889_v14 }
 0x164   : > { %v1886_v53 = vpop.f32.mrf.mxu0  ;;  %v1984_v54 = vpop.f32.mrf.mxu1 }
 0x165   : > { %v1988_v17 = vadd.f32 %v1982_v52, %v1890_v15 }
 0x166   : > { %v1887_v55 = vpop.f32.mrf.mxu0  ;;  %v1985_v56 = vpop.f32.mrf.mxu1 }
 0x170   : > { %v2082_v57 = vpop.f32.mrf.mxu0  ;;  %v2177_v58 = vpop.f32.mrf.mxu1 }
 0x171   : > { %v2089_v18 = vadd.f32 %v2082_v57, %v1987_v16 }
 0x172   : > { %v2084_v59 = vpop.f32.mrf.mxu0  ;;  %v2179_v60 = vpop.f32.mrf.mxu1 }
 0x173   : > { %v2090_v21 = vadd.f32 %v2084_v59, %v1988_v17  ;;  %v2184_v23 = vadd.f32 %v2177_v58, %v2089_v18 }
 0x174   : > { %v2086_v61 = vpop.f32.mrf.mxu0  ;;  %v2181_v62 = vpop.f32.mrf.mxu1 }
 0x175   : > { %v2185_v27 = vadd.f32 %v2179_v60, %v2090_v21 }
 0x176   : > { %v2087_v63 = vpop.f32.mrf.mxu0  ;;  %v2182_v0 = vpop.f32.mrf.mxu1 }
 0x180   : > { %v2277_v1 = vpop.f32.mrf.mxu0  ;;  %v2381_v3 = vpop.f32.mrf.mxu1 }
 0x181   : > { %v2284_v28 = vadd.f32 %v2277_v1, %v2184_v23 }
 0x182   : > { %v2279_v4 = vpop.f32.mrf.mxu0  ;;  %v2383_v5 = vpop.f32.mrf.mxu1 }
 0x183   : > { %v2285_v31 = vadd.f32 %v2279_v4, %v2185_v27  ;;  %v2388_v33 = vadd.f32 %v2381_v3, %v2284_v28 }
 0x184   : > { %v2281_v7 = vpop.f32.mrf.mxu0  ;;  %v2385_v8 = vpop.f32.mrf.mxu1 }
 0x185   : > { %v2389_v34 = vadd.f32 %v2383_v5, %v2285_v31 }
 0x186   : > { %v2282_v10 = vpop.f32.mrf.mxu0  ;;  %v2386_v11 = vpop.f32.mrf.mxu1 }
 0x190   : > { %v2479_v19 = vpop.f32.mrf.mxu0  ;;  %v2581_v20 = vpop.f32.mrf.mxu1 }
 0x191   : > { %v2486_v35 = vadd.f32 %v2479_v19, %v2388_v33 }
 0x192   : > { %v2481_v2 = vpop.f32.mrf.mxu0  ;;  %v2583_v22 = vpop.f32.mrf.mxu1 }
 0x193   : > { %v2487_v38 = vadd.f32 %v2481_v2, %v2389_v34  ;;  %v2588_v40 = vadd.f32 %v2581_v20, %v2486_v35 }
 0x194   : > { %v2483_v25 = vpop.f32.mrf.mxu0  ;;  %v2585_v26 = vpop.f32.mrf.mxu1 }
 0x195   : > { %v2589_v43 = vadd.f32 %v2583_v22, %v2487_v38 }
 0x196   : > { %v2484_v29 = vpop.f32.mrf.mxu0  ;;  %v2586_v30 = vpop.f32.mrf.mxu1 }
 0x1a0   : > { %v2676_v42 = vpop.f32.mrf.mxu0 }
 0x1a1   : > { %v2683_v44 = vadd.f32 %v2676_v42, %v2588_v40 }
 0x1a2   : > { %v2678_v46 = vpop.f32.mrf.mxu0 }
 0x1a3   : > { %v2697_v47 = vadd.f32 %v2690_v41, %v2683_v44  ;;  %v2684_v48 = vadd.f32 %v2678_v46, %v2589_v43 }
 0x1a4   : > { %v2680_v49 = vpop.f32.mrf.mxu0 }
 0x1a5   : > { %v2699_v50 = vmax.f32 %v2697_v47, 0.0  ;;  %v2698_v51 = vadd.f32 %v2694_v45, %v2684_v48 }
 0x1a6   : > { %v2681_v52 = vpop.f32.mrf.mxu0 }
 0x1a7   : > { %2701 = vst [vmem:[%s192_s27] sm:$0x7f] %v2699_v50  ;;  %v2700_v53 = vmax.f32 %v2698_v51, 0.0 }
 0x1a9   : > { %2703 = vst.msk [vmem:[%s192_s27 + $0x8] sm:$0x7f] %vm2702_vm1, %v2700_v53 }
 0x1aa PF: > { %s13_s16 = sadd.s32 1, %s3455_s16   ;;  %s4231_s12 = smov %s3447_s14 }
 0x1ab   : > { %p10_p7 = scmp.ge.s32.totalorder %s13_s16, 16   ;;  %s4232_s13 = smov %s3451_s15 }
 0x1ac   : > { %s4233_s14 = smov %s4236_s17  ;;  %s4234_s15 = smov %s4240_s18 }
 0x1ad   :  { %12 = sbr.rel (!%p10_p7) target bundleno = 3 (0x3), region = 67 }

// kernel: _lambda_.12
= control target key start
LH: loop header
LB: loop body
LE: loop exit
PB: predicated region body
PF: predicated region fallthrough
CT: control target
= control target key end

     0   :  { %s4245_s12 = smov 0   ;;  %s4247_s13 = smov 0   ;;  %s5505_s0 = inlined_call_operand.vmem [shape: bf16[2,5,5,192], index: 0, kind: input, shape index: {}]   ;;  %s5506_s1 = inlined_call_operand.vmem [shape: bf16[1728,384], index: 1, kind: input, shape index: {}]   ;;  %s5507_s2 = inlined_call_operand.vmem [shape: f32[1,384], index: 2, kind: input, shape index: {}]   ;;  %s5508_s3 = inlined_call_operand.vmem [shape: f32[2,3,3,384], index: 3, kind: output, shape index: {}]  }
   0x1   :  { %s4249_s14 = smov 0   ;;  %s4251_s15 = smov 0  }
   0x2   :  { %s4253_s16 = smov 0  }
   0x3 LB: > { %s22_s17 = sadd.s32 1, %s4214_s14  ;;  %s25_s18 = sadd.s32 1, %s4218_s15  ;;  %s4222_s16 = sphi %s4253_s16, %s13_s16   ;;  %s4218_s15 = sphi %s4251_s15, %s5512_s15   ;;  %s4214_s14 = sphi %s4249_s14, %s5511_s14   ;;  %s4210_s13 = sphi %s4247_s13, %s5510_s13   ;;  %s4206_s12 = sphi %s4245_s12, %s5509_s12  }
   0x4   : > { %p23_p0 = scmp.ge.s32.totalorder %s22_s17, 3  ;;  %p3342_p1 = scmp.ge.s32.totalorder %s4222_s16, 1 }
   0x5   : > { %p151_p2 = scmp.lt.s32.totalorder %s4222_s16, 7 }
   0x6   : > { %s5514_s17 = smov (%p23_p0, %s22_s17), 0  ;;  %s5516_s18 = smov (!%p23_p0, %s25_s18), %s4218_s15 }
   0x7   : > { %p152_p3 = pnand %p3342_p1, %p151_p2  ;;  %p27_p4 = scmp.ge.s32.totalorder %s5516_s18, 2 }
   0x8   : > { %p179_p5 = scmp.lt.s32.totalorder (!%p152_p3), %s4210_s13, 1  ;;  %s3701_s21 = sshll.u32 (!%p152_p3), %s4206_s12, 3 }
   0x9   : > { %s5518_s18 = smov (%p27_p4, %s5516_s18), 0  ;;  %155 = sbr.rel (%p152_p3) target bundleno = 651 (0x28b), region = 32 }
   0xa   : > { %p186_p6 = scmp.lt.s32.totalorder (!%p152_p3), %s4206_s12, 2 }
   0xe   : > { %v3746_v0 = vld [vmem:[%s5506_s1 + $0x1cc] ss:$12 sps:$4 sm:$0xff]   ;;  %v4224_v1 = vmov 0   ;;  %v3748_v2 = vld [vmem:[%s5506_s1 + $0x1d0] ss:$12 sps:$4 sm:$0xff]   ;;  %s5520_s13 = smov (!%p179_p5, %s4210_s13), 1 }
   0xf   : > { %551 = vmatprep.subr.bf16.mxu1 %v4224_v1  ;;  %510 = vmatprep.subr.bf16.mxu0 %v3746_v0  ;;  %v3749_v3 = vld [vmem:[%s5506_s1 + $0x1c8] ss:$12 sps:$4 sm:$0xff]   ;;  %v3752_v5 = vld [vmem:[%s5506_s1 + $0x1b8] ss:$12 sps:$4 sm:$0xff]   ;;  %v3753_v6 = vld [vmem:[%s5506_s1 + $0x1b0] ss:$12 sps:$4 sm:$0xff]  }
  0x10   : > { %552 = vmatpush1.bf16.msra.mxu1 %v3748_v2  ;;  %v3750_v4 = vld [vmem:[%s5506_s1 + $0x1b4] ss:$12 sps:$4 sm:$0xff]   ;;  %511 = vmatpush1.bf16.msra.mxu0 %v3749_v3  ;;  %v3754_v7 = vld [vmem:[%s5506_s1 + $0x19c] ss:$12 sps:$4 sm:$0xff]   ;;  %v3757_v9 = vld [vmem:[%s5506_s1 + $0x198] ss:$12 sps:$4 sm:$0xff]  }
  0x11   : > { %553 = vmatprep.subr.bf16.mxu1 %v4224_v1  ;;  %512 = vmatprep.subr.bf16.mxu0 %v3750_v4  ;;  %v3756_v8 = vld [vmem:[%s5506_s1 + $0x1a0] ss:$12 sps:$4 sm:$0xff]   ;;  %v3758_v10 = vld [vmem:[%s5506_s1 + $0x184] ss:$12 sps:$4 sm:$0xff]   ;;  %v3760_v11 = vld [vmem:[%s5506_s1 + $0x188] ss:$12 sps:$4 sm:$0xff]  }
  0x12   : > { %v3761_v12 = vld [vmem:[%s5506_s1 + $0x180] ss:$12 sps:$4 sm:$0xff]   ;;  %v3764_v14 = vld [vmem:[%s5506_s1 + $0x170] ss:$12 sps:$4 sm:$0xff]   ;;  %v3765_v15 = vld [vmem:[%s5506_s1 + $0x168] ss:$12 sps:$4 sm:$0xff]  }
  0x13   : > { %v3762_v13 = vld [vmem:[%s5506_s1 + $0x16c] ss:$12 sps:$4 sm:$0xff]   ;;  %v3766_v16 = vld [vmem:[%s5506_s1 + $0x154] ss:$12 sps:$4 sm:$0xff]   ;;  %s3702_s4 = smul.u32 40, %s5520_s13  ;;  %vm506_vm0 = vcmask 523264  }
  0x14   : > { %554 = vmatpush1.bf16.msra.mxu1 %v3752_v5  ;;  %513 = vmatpush1.bf16.msra.mxu0 %v3753_v6  ;;  %v3768_v17 = vld [vmem:[%s5506_s1 + $0x158] ss:$12 sps:$4 sm:$0xff]   ;;  %v3769_v18 = vld [vmem:[%s5506_s1 + $0x150] ss:$12 sps:$4 sm:$0xff]   ;;  %v3772_v20 = vld [vmem:[%s5506_s1 + $0x140] ss:$12 sps:$4 sm:$0xff]  }
  0x15   : > { %555 = vmatprep.subr.bf16.mxu1 %v4224_v1  ;;  %514 = vmatprep.subr.bf16.mxu0 %v3754_v7  ;;  %v3770_v19 = vld [vmem:[%s5506_s1 + $0x13c] ss:$12 sps:$4 sm:$0xff]   ;;  %s183_s20 = scalar_lea.vmem %s5505_s0, %s3702_s4  ;;  %v3773_v21 = vld [vmem:[%s5506_s1 + $0x138] ss:$12 sps:$4 sm:$0xff]   ;;  %v3777_v24 = vld [vmem:[%s5506_s1 + $0x120] ss:$12 sps:$4 sm:$0xff]  }
  0x16   : > { %v3774_v22 = vld [vmem:[%s5506_s1 + $0x124] ss:$12 sps:$4 sm:$0xff]   ;;  %s4361_s28 = scalar_lea.vmem %s183_s20, %s3701_s21  ;;  %v3776_v23 = vld [vmem:[%s5506_s1 + $0x128] ss:$12 sps:$4 sm:$0xff]   ;;  %v3778_v26 = vld [vmem:[%s5506_s1 + $0x22c] ss:$12 sps:$4 sm:$0xff]  }
  0x17   : > { %v197_v25 = vld [vmem:[%s4361_s28] sm:$0x77]  ;;  %v3780_v28 = vld [vmem:[%s5506_s1 + $0x230] ss:$12 sps:$4 sm:$0xff]   ;;  %v3781_v31 = vld [vmem:[%s5506_s1 + $0x228] ss:$12 sps:$4 sm:$0xff]  }
  0x18   : > { %556 = vmatpush1.bf16.msra.mxu1 %v3756_v8  ;;  %515 = vmatpush1.bf16.msra.mxu0 %v3757_v9  ;;  %v4374_v27 = vcombine.high %v197_v25, %v197_v25  ;;  %v3782_v32 = vld [vmem:[%s5506_s1 + $0x214] ss:$12 sps:$4 sm:$0xff]   ;;  %v4388_v34 = vcombine.low %v197_v25, %v197_v25  ;;  %v3784_v35 = vld [vmem:[%s5506_s1 + $0x218] ss:$12 sps:$4 sm:$0xff]   ;;  %v3785_v37 = vld [vmem:[%s5506_s1 + $0x210] ss:$12 sps:$4 sm:$0xff]  }
  0x19   : > { %557 = vmatprep.subr.bf16.mxu1 %v4224_v1  ;;  %516 = vmatprep.subr.bf16.mxu0 %v3758_v10  ;;  %v3786_v38 = vld [vmem:[%s5506_s1 + $0x1fc] ss:$12 sps:$4 sm:$0xff]   ;;  %v3788_v40 = vld [vmem:[%s5506_s1 + $0x200] ss:$12 sps:$4 sm:$0xff]   ;;  %v3789_v41 = vld [vmem:[%s5506_s1 + $0x1f8] ss:$12 sps:$4 sm:$0xff]  }
  0x1a   : > { %v307_v29 = vshrl.u32 %v4374_v27, 16  ;;  %v309_v30 = vshll.u32 %v4374_v27, 16  ;;  %v302_v39 = vshll.u32 %v4388_v34, 16  ;;  %v3790_v42 = vld [vmem:[%s5506_s1 + $0x1e4] ss:$12 sps:$4 sm:$0xff]   ;;  %v300_v43 = vshrl.u32 %v4388_v34, 16 }
  0x1b   : > { %v3792_v45 = vld [vmem:[%s5506_s1 + $0x1e8] ss:$12 sps:$4 sm:$0xff]   ;;  %v3793_v46 = vld [vmem:[%s5506_s1 + $0x1e0] ss:$12 sps:$4 sm:$0xff]   ;;  %v3799_v49 = vld [vmem:[%s5506_s1 + $0xb0] ss:$12 sps:$4 sm:$0xff]  }
  0x1c   : > { %558 = vmatpush1.bf16.msra.mxu1 %v3760_v11  ;;  %517 = vmatpush1.bf16.msra.mxu0 %v3761_v12  ;;  %v311_v33 = vrot.slane %v309_v30, 1  ;;  %v304_v44 = vrot.slane %v302_v39, 1  ;;  %v3798_v47 = vld [vmem:[%s5506_s1 + $0xac] ss:$12 sps:$4 sm:$0xff]   ;;  %v3796_v50 = vld [vmem:[%s5506_s1 + $0xa8] ss:$12 sps:$4 sm:$0xff]  }
  0x1d   : > { %559 = vmatprep.subr.bf16.mxu1 %v4224_v1  ;;  %518 = vmatprep.subr.bf16.mxu0 %v3762_v13  ;;  %v3802_v51 = vld [vmem:[%s5506_s1 + $0x94] ss:$12 sps:$4 sm:$0xff]   ;;  %v3803_v52 = vld [vmem:[%s5506_s1 + $0x98] ss:$12 sps:$4 sm:$0xff]   ;;  %v3800_v53 = vld [vmem:[%s5506_s1 + $0x90] ss:$12 sps:$4 sm:$0xff]  }
  0x1e   : > { %v312_v36 = vor.u32 %v311_v33, %v307_v29  ;;  %v305_v48 = vor.u32 %v304_v44, %v300_v43  ;;  %v3806_v54 = vld [vmem:[%s5506_s1 + $0x7c] ss:$12 sps:$4 sm:$0xff]   ;;  %v3807_v55 = vld [vmem:[%s5506_s1 + $0x80] ss:$12 sps:$4 sm:$0xff]   ;;  %v3804_v56 = vld [vmem:[%s5506_s1 + $0x78] ss:$12 sps:$4 sm:$0xff]  }
  0x1f   : > { %v3810_v57 = vld [vmem:[%s5506_s1 + $0x64] ss:$12 sps:$4 sm:$0xff]   ;;  %v3811_v58 = vld [vmem:[%s5506_s1 + $0x68] ss:$12 sps:$4 sm:$0xff]   ;;  %v3808_v59 = vld [vmem:[%s5506_s1 + $0x60] ss:$12 sps:$4 sm:$0xff]  }
  0x20   : > { %560 = vmatpush1.bf16.msra.mxu1 %v3764_v14  ;;  %519 = vmatpush1.bf16.msra.mxu0 %v3765_v15  ;;  %v3814_v60 = vld [vmem:[%s5506_s1 + $0x4c] ss:$12 sps:$4 sm:$0xff]   ;;  %v3815_v61 = vld [vmem:[%s5506_s1 + $0x50] ss:$12 sps:$4 sm:$0xff]   ;;  %v3812_v62 = vld [vmem:[%s5506_s1 + $0x48] ss:$12 sps:$4 sm:$0xff]  }
  0x21   : > { %561 = vmatprep.subr.bf16.mxu1 %v4224_v1  ;;  %520 = vmatprep.subr.bf16.mxu0 %v3766_v16  ;;  %v3818_v63 = vld [vmem:[%s5506_s1 + $0x34] ss:$12 sps:$4 sm:$0xff]   ;;  %v3819_v0 = vld [vmem:[%s5506_s1 + $0x38] ss:$12 sps:$4 sm:$0xff]   ;;  %v3816_v2 = vld [vmem:[%s5506_s1 + $0x30] ss:$12 sps:$4 sm:$0xff]  }
  0x22   : > { %3386 = vmatprep.mubr.msk.bf16.mxu1 %vm506_vm0, %v312_v36  ;;  %3385 = vmatprep.mubr.msk.bf16.mxu0 %vm506_vm0, %v312_v36  ;;  %v3822_v3 = vld [vmem:[%s5506_s1 + $0x1c] ss:$12 sps:$4 sm:$0xff]   ;;  %v3823_v4 = vld [vmem:[%s5506_s1 + $0x20] ss:$12 sps:$4 sm:$0xff]   ;;  %v3820_v5 = vld [vmem:[%s5506_s1 + $0x18] ss:$12 sps:$4 sm:$0xff]  }
  0x23   : > { %v3826_v6 = vld [vmem:[%s5506_s1 + $0x4] ss:$12 sps:$4 sm:$0xff]   ;;  %v3827_v7 = vld [vmem:[%s5506_s1 + $0x8] ss:$12 sps:$4 sm:$0xff]   ;;  %v3824_v8 = vld [vmem:[%s5506_s1] ss:$12 sps:$4 sm:$0xff]  }
  0x24   : > { %562 = vmatpush1.bf16.msra.mxu1 %v3768_v17  ;;  %521 = vmatpush1.bf16.msra.mxu0 %v3769_v18  ;;  %v3830_v9 = vld [vmem:[%s5506_s1 + $0x10c] ss:$12 sps:$4 sm:$0xff]   ;;  %v3831_v10 = vld [vmem:[%s5506_s1 + $0x110] ss:$12 sps:$4 sm:$0xff]   ;;  %v3828_v11 = vld [vmem:[%s5506_s1 + $0x108] ss:$12 sps:$4 sm:$0xff]  }
  0x25   : > { %563 = vmatprep.subr.bf16.mxu1 %v4224_v1  ;;  %522 = vmatprep.subr.bf16.mxu0 %v3770_v19  ;;  %v3834_v12 = vld [vmem:[%s5506_s1 + $0xf4] ss:$12 sps:$4 sm:$0xff]   ;;  %v3835_v13 = vld [vmem:[%s5506_s1 + $0xf8] ss:$12 sps:$4 sm:$0xff]   ;;  %v3832_v14 = vld [vmem:[%s5506_s1 + $0xf0] ss:$12 sps:$4 sm:$0xff]  }
  0x26   : > { %v3838_v15 = vld [vmem:[%s5506_s1 + $0xdc] ss:$12 sps:$4 sm:$0xff]   ;;  %v3839_v16 = vld [vmem:[%s5506_s1 + $0xe0] ss:$12 sps:$4 sm:$0xff]   ;;  %v3836_v17 = vld [vmem:[%s5506_s1 + $0xd8] ss:$12 sps:$4 sm:$0xff]  }
  0x27   : > { %v3842_v18 = vld [vmem:[%s5506_s1 + $0xc4] ss:$12 sps:$4 sm:$0xff]   ;;  %v3843_v19 = vld [vmem:[%s5506_s1 + $0xc8] ss:$12 sps:$4 sm:$0xff]   ;;  %v916_v25 = vrot.slane %v4374_v27, 1  ;;  %s5522_s12 = smov (!%p186_p6, %s4206_s12), 2 }
  0x28   : > { %564 = vmatpush1.bf16.msra.mxu1 %v3772_v20  ;;  %523 = vmatpush1.bf16.msra.mxu0 %v3773_v21  ;;  %v3840_v20 = vld [vmem:[%s5506_s1 + $0xc0] ss:$12 sps:$4 sm:$0xff]   ;;  %v3852_v30 = vld [vmem:[%s5506_s1 + $0x2b8] ss:$12 sps:$4 sm:$0xff]   ;;  %v3863_v36 = vld [vmem:[%s5506_s1 + $0x290] ss:$12 sps:$4 sm:$0xff]  }
  0x29   : > { %565 = vmatprep.subr.bf16.mxu1 %v4224_v1  ;;  %524 = vmatprep.subr.bf16.mxu0 %v3774_v22  ;;  %v3846_v21 = vld [vmem:[%s5506_s1 + $0x2ec] ss:$12 sps:$4 sm:$0xff]   ;;  %v3847_v22 = vld [vmem:[%s5506_s1 + $0x2f0] ss:$12 sps:$4 sm:$0xff]   ;;  %s3704_s6 = smul.u32 9, %s5520_s13 }
  0x2a   : > { %v3855_v29 = vld [vmem:[%s5506_s1 + $0x2c0] ss:$12 sps:$4 sm:$0xff]   ;;  %v3867_v39 = vld [vmem:[%s5506_s1 + $0x278] ss:$12 sps:$4 sm:$0xff]   ;;  %s3703_s7 = smul.u32 3, %s5522_s12 }
  0x2b   : > { %v3856_v33 = vld [vmem:[%s5506_s1 + $0x2a0] ss:$12 sps:$4 sm:$0xff]   ;;  %v3868_v43 = vld [vmem:[%s5506_s1 + $0x258] ss:$12 sps:$4 sm:$0xff]  }
  0x2c   : > { %566 = vmatpush1.bf16.msra.mxu1 %v3776_v23  ;;  %525 = vmatpush1.bf16.msra.mxu0 %v3777_v24  ;;  %v3844_v23 = vld [vmem:[%s5506_s1 + $0x2e8] ss:$12 sps:$4 sm:$0xff]   ;;  %v3874_v44 = vld [vmem:[%s5506_s1 + $0x244] ss:$12 sps:$4 sm:$0xff]   ;;  %s190_s10 = sadd.s32 %s3704_s6, %s3703_s7 }
  0x2d   : > { %575 = vmatprep.subr.bf16.mxu1 %v4224_v1  ;;  %534 = vmatprep.subr.bf16.mxu0 %v3778_v26  ;;  %v3850_v24 = vld [vmem:[%s5506_s1 + $0x2d4] ss:$12 sps:$4 sm:$0xff]   ;;  %v3851_v26 = vld [vmem:[%s5506_s1 + $0x2d8] ss:$12 sps:$4 sm:$0xff]   ;;  %s3344_s11 = sshll.u32 %s190_s10, 2 }
  0x2e   : > { %s192_s19 = scalar_lea.vmem %s5508_s3, %s3344_s11 }
  0x30   : > { %576 = vmatpush2.bf16.msra.mxu1 %v3780_v28  ;;  %535 = vmatpush2.bf16.msra.mxu0 %v3781_v31  ;;  %v3848_v28 = vld [vmem:[%s5506_s1 + $0x2d0] ss:$12 sps:$4 sm:$0xff]  }
  0x31   : > { %577 = vmatprep.subr.bf16.mxu1 %v4224_v1  ;;  %536 = vmatprep.subr.bf16.mxu0 %v3782_v32  ;;  %v3858_v31 = vld [vmem:[%s5506_s1 + $0x2a4] ss:$12 sps:$4 sm:$0xff]   ;;  %v3859_v32 = vld [vmem:[%s5506_s1 + $0x2a8] ss:$12 sps:$4 sm:$0xff]  }
  0x34   : > { %578 = vmatpush2.bf16.msra.mxu1 %v3784_v35  ;;  %537 = vmatpush2.bf16.msra.mxu0 %v3785_v37  ;;  %v3862_v35 = vld [vmem:[%s5506_s1 + $0x28c] ss:$12 sps:$4 sm:$0xff]   ;;  %v3860_v37 = vld [vmem:[%s5506_s1 + $0x288] ss:$12 sps:$4 sm:$0xff]  }
  0x35   : > { %579 = vmatprep.subr.bf16.mxu1 %v4224_v1  ;;  %538 = vmatprep.subr.bf16.mxu0 %v3786_v38  ;;  %v3866_v38 = vld [vmem:[%s5506_s1 + $0x274] ss:$12 sps:$4 sm:$0xff]  }
  0x38   : > { %580 = vmatpush2.bf16.msra.mxu1 %v3788_v40  ;;  %539 = vmatpush2.bf16.msra.mxu0 %v3789_v41  ;;  %v3864_v40 = vld [vmem:[%s5506_s1 + $0x270] ss:$12 sps:$4 sm:$0xff]  }
  0x39   : > { %581 = vmatprep.subr.bf16.mxu1 %v4224_v1  ;;  %540 = vmatprep.subr.bf16.mxu0 %v3790_v42  ;;  %v3870_v41 = vld [vmem:[%s5506_s1 + $0x25c] ss:$12 sps:$4 sm:$0xff]   ;;  %v3871_v42 = vld [vmem:[%s5506_s1 + $0x260] ss:$12 sps:$4 sm:$0xff]  }
  0x3c   : > { %582 = vmatpush2.bf16.msra.mxu1 %v3792_v45  ;;  %541 = vmatpush2.bf16.msra.mxu0 %v3793_v46  ;;  %v3875_v45 = vld [vmem:[%s5506_s1 + $0x248] ss:$12 sps:$4 sm:$0xff]   ;;  %v3872_v46 = vld [vmem:[%s5506_s1 + $0x240] ss:$12 sps:$4 sm:$0xff]  }
  0x3d   : > { %827 = vmatprep.subr.bf16.mxu1 %v4224_v1  ;;  %786 = vmatprep.subr.bf16.mxu0 %v3798_v47  ;;  %v3878_v47 = vld [vmem:[%s5506_s1 + $0x34c] ss:$12 sps:$4 sm:$0xff]  }
  0x3f   : > { %584 = vmatmul.mubr.bf16.vlgmr.msra.gmra.mxu1 %v305_v48  ;;  %543 = vmatmul.mubr.bf16.vlgmr.msra.gmra.mxu0 %v305_v48  ;;  %v3879_v48 = vld [vmem:[%s5506_s1 + $0x350] ss:$12 sps:$4 sm:$0xff]  }
  0x40   : > { %828 = vmatpush1.bf16.msra.mxu1 %v3799_v49  ;;  %787 = vmatpush1.bf16.msra.mxu0 %v3796_v50  ;;  %v3876_v49 = vld [vmem:[%s5506_s1 + $0x348] ss:$12 sps:$4 sm:$0xff]  }
  0x41   : > { %829 = vmatprep.subr.bf16.mxu1 %v4224_v1  ;;  %788 = vmatprep.subr.bf16.mxu0 %v3802_v51  ;;  %v3882_v50 = vld [vmem:[%s5506_s1 + $0x334] ss:$12 sps:$4 sm:$0xff]   ;;  %v3883_v51 = vld [vmem:[%s5506_s1 + $0x338] ss:$12 sps:$4 sm:$0xff]  }
  0x42   : > { %3424 = vmatprep.mubr.msk.bf16.mxu1 %vm506_vm0, %v4374_v27  ;;  %3423 = vmatprep.mubr.msk.bf16.mxu0 %vm506_vm0, %v4374_v27  ;;  %v3854_v27 = vld [vmem:[%s5506_s1 + $0x2bc] ss:$12 sps:$4 sm:$0xff]  }
  0x44   : > { %830 = vmatpush1.bf16.msra.mxu1 %v3803_v52  ;;  %789 = vmatpush1.bf16.msra.mxu0 %v3800_v53  ;;  %v3880_v52 = vld [vmem:[%s5506_s1 + $0x330] ss:$12 sps:$4 sm:$0xff]  }
  0x45   : > { %831 = vmatprep.subr.bf16.mxu1 %v4224_v1  ;;  %790 = vmatprep.subr.bf16.mxu0 %v3806_v54  ;;  %v3886_v53 = vld [vmem:[%s5506_s1 + $0x31c] ss:$12 sps:$4 sm:$0xff]   ;;  %v3887_v54 = vld [vmem:[%s5506_s1 + $0x320] ss:$12 sps:$4 sm:$0xff]  }
  0x48   : > { %832 = vmatpush1.bf16.msra.mxu1 %v3807_v55  ;;  %791 = vmatpush1.bf16.msra.mxu0 %v3804_v56  ;;  %v3884_v55 = vld [vmem:[%s5506_s1 + $0x318] ss:$12 sps:$4 sm:$0xff]  }
  0x49   : > { %833 = vmatprep.subr.bf16.mxu1 %v4224_v1  ;;  %792 = vmatprep.subr.bf16.mxu0 %v3810_v57  ;;  %v3890_v56 = vld [vmem:[%s5506_s1 + $0x304] ss:$12 sps:$4 sm:$0xff]   ;;  %v3891_v57 = vld [vmem:[%s5506_s1 + $0x308] ss:$12 sps:$4 sm:$0xff]  }
  0x4c   : > { %834 = vmatpush1.bf16.msra.mxu1 %v3811_v58  ;;  %793 = vmatpush1.bf16.msra.mxu0 %v3808_v59  ;;  %v3888_v58 = vld [vmem:[%s5506_s1 + $0x300] ss:$12 sps:$4 sm:$0xff]  }
  0x4d   : > { %835 = vmatprep.subr.bf16.mxu1 %v4224_v1  ;;  %794 = vmatprep.subr.bf16.mxu0 %v3814_v60  ;;  %v3894_v59 = vld [vmem:[%s5506_s1 + $0x40c] ss:$12 sps:$4 sm:$0xff]   ;;  %v915_v60 = vrot.slane %v4388_v34, 1 }
  0x50   : > { %836 = vmatpush1.bf16.msra.mxu1 %v3815_v61  ;;  %795 = vmatpush1.bf16.msra.mxu0 %v3812_v62  ;;  %v4675_v61 = vld [vmem:[%s4361_s28 + $0x8] sm:$0x77]  ;;  %v3895_v62 = vld [vmem:[%s5506_s1 + $0x410] ss:$12 sps:$4 sm:$0xff]  }
  0x51   : > { %837 = vmatprep.subr.bf16.mxu1 %v4224_v1  ;;  %796 = vmatprep.subr.bf16.mxu0 %v3818_v63  ;;  %v3892_v63 = vld [vmem:[%s5506_s1 + $0x408] ss:$12 sps:$4 sm:$0xff]  }
  0x54   : > { %838 = vmatpush1.bf16.msra.mxu1 %v3819_v0  ;;  %797 = vmatpush1.bf16.msra.mxu0 %v3816_v2  ;;  %v3898_v0 = vld [vmem:[%s5506_s1 + $0x3f4] ss:$12 sps:$4 sm:$0xff]   ;;  %v3899_v2 = vld [vmem:[%s5506_s1 + $0x3f8] ss:$12 sps:$4 sm:$0xff]  }
  0x55   : > { %839 = vmatprep.subr.bf16.mxu1 %v4224_v1  ;;  %798 = vmatprep.subr.bf16.mxu0 %v3822_v3  ;;  %v3896_v3 = vld [vmem:[%s5506_s1 + $0x3f0] ss:$12 sps:$4 sm:$0xff]  }
  0x58   : > { %840 = vmatpush1.bf16.msra.mxu1 %v3823_v4  ;;  %799 = vmatpush1.bf16.msra.mxu0 %v3820_v5  ;;  %v3902_v4 = vld [vmem:[%s5506_s1 + $0x3dc] ss:$12 sps:$4 sm:$0xff]   ;;  %v3903_v5 = vld [vmem:[%s5506_s1 + $0x3e0] ss:$12 sps:$4 sm:$0xff]  }
  0x59   : > { %841 = vmatprep.subr.bf16.mxu1 %v4224_v1  ;;  %800 = vmatprep.subr.bf16.mxu0 %v3826_v6  ;;  %v3900_v6 = vld [vmem:[%s5506_s1 + $0x3d8] ss:$12 sps:$4 sm:$0xff]  }
  0x5c   : > { %842 = vmatpush1.bf16.msra.mxu1 %v3827_v7  ;;  %801 = vmatpush1.bf16.msra.mxu0 %v3824_v8  ;;  %v3906_v7 = vld [vmem:[%s5506_s1 + $0x3c4] ss:$12 sps:$4 sm:$0xff]   ;;  %v3907_v8 = vld [vmem:[%s5506_s1 + $0x3c8] ss:$12 sps:$4 sm:$0xff]  }
  0x5d   : > { %851 = vmatprep.subr.bf16.mxu1 %v4224_v1  ;;  %810 = vmatprep.subr.bf16.mxu0 %v3830_v9  ;;  %v3904_v9 = vld [vmem:[%s5506_s1 + $0x3c0] ss:$12 sps:$4 sm:$0xff]  }
  0x60   : > { %852 = vmatpush2.bf16.msra.mxu1 %v3831_v10  ;;  %811 = vmatpush2.bf16.msra.mxu0 %v3828_v11  ;;  %v3910_v10 = vld [vmem:[%s5506_s1 + $0x3ac] ss:$12 sps:$4 sm:$0xff]   ;;  %v3911_v11 = vld [vmem:[%s5506_s1 + $0x3b0] ss:$12 sps:$4 sm:$0xff]  }
  0x61   : > { %853 = vmatprep.subr.bf16.mxu1 %v4224_v1  ;;  %812 = vmatprep.subr.bf16.mxu0 %v3834_v12  ;;  %v3908_v12 = vld [vmem:[%s5506_s1 + $0x3a8] ss:$12 sps:$4 sm:$0xff]  }
  0x64   : > { %854 = vmatpush2.bf16.msra.mxu1 %v3835_v13  ;;  %813 = vmatpush2.bf16.msra.mxu0 %v3832_v14  ;;  %v3914_v13 = vld [vmem:[%s5506_s1 + $0x394] ss:$12 sps:$4 sm:$0xff]   ;;  %v3915_v14 = vld [vmem:[%s5506_s1 + $0x398] ss:$12 sps:$4 sm:$0xff]  }
  0x65   : > { %855 = vmatprep.subr.bf16.mxu1 %v4224_v1  ;;  %814 = vmatprep.subr.bf16.mxu0 %v3838_v15  ;;  %v3912_v15 = vld [vmem:[%s5506_s1 + $0x390] ss:$12 sps:$4 sm:$0xff]  }
  0x68   : > { %856 = vmatpush2.bf16.msra.mxu1 %v3839_v16  ;;  %815 = vmatpush2.bf16.msra.mxu0 %v3836_v17  ;;  %v3918_v16 = vld [vmem:[%s5506_s1 + $0x37c] ss:$12 sps:$4 sm:$0xff]   ;;  %v3919_v17 = vld [vmem:[%s5506_s1 + $0x380] ss:$12 sps:$4 sm:$0xff]  }
  0x69   : > { %857 = vmatprep.subr.bf16.mxu1 %v4224_v1  ;;  %816 = vmatprep.subr.bf16.mxu0 %v3842_v18  ;;  %v3916_v18 = vld [vmem:[%s5506_s1 + $0x378] ss:$12 sps:$4 sm:$0xff]  }
  0x6c   : > { %858 = vmatpush2.bf16.msra.mxu1 %v3843_v19  ;;  %817 = vmatpush2.bf16.msra.mxu0 %v3840_v20  ;;  %v3922_v19 = vld [vmem:[%s5506_s1 + $0x364] ss:$12 sps:$4 sm:$0xff]   ;;  %v3923_v20 = vld [vmem:[%s5506_s1 + $0x368] ss:$12 sps:$4 sm:$0xff]  }
  0x6d   : > { %1154 = vmatprep.subr.bf16.mxu1 %v4224_v1  ;;  %1113 = vmatprep.subr.bf16.mxu0 %v3846_v21  ;;  %v3920_v21 = vld [vmem:[%s5506_s1 + $0x360] ss:$12 sps:$4 sm:$0xff]  }
  0x6f   : > { %860 = vmatmul.mubr.bf16.vlgmr.msra.gmra.mxu1 %v4388_v34  ;;  %819 = vmatmul.mubr.bf16.vlgmr.msra.gmra.mxu0 %v4388_v34  ;;  %v4689_v34 = vcombine.high %v4675_v61, %v4675_v61 }
  0x70   : > { %1155 = vmatpush1.bf16.msra.mxu1 %v3847_v22  ;;  %1114 = vmatpush1.bf16.msra.mxu0 %v3844_v23  ;;  %v3926_v22 = vld [vmem:[%s5506_s1 + $0x46c] ss:$12 sps:$4 sm:$0xff]   ;;  %v3927_v23 = vld [vmem:[%s5506_s1 + $0x470] ss:$12 sps:$4 sm:$0xff]  }
  0x71   : > { %1156 = vmatprep.subr.bf16.mxu1 %v4224_v1  ;;  %1115 = vmatprep.subr.bf16.mxu0 %v3850_v24  ;;  %v3924_v24 = vld [vmem:[%s5506_s1 + $0x468] ss:$12 sps:$4 sm:$0xff]  }
  0x72   : > { %3462 = vmatprep.mubr.msk.bf16.mxu1 %vm506_vm0, %v916_v25  ;;  %3461 = vmatprep.mubr.msk.bf16.mxu0 %vm506_vm0, %v916_v25  ;;  %v3930_v25 = vld [vmem:[%s5506_s1 + $0x454] ss:$12 sps:$4 sm:$0xff]  }
  0x74   : > { %1157 = vmatpush1.bf16.msra.mxu1 %v3851_v26  ;;  %1116 = vmatpush1.bf16.msra.mxu0 %v3848_v28  ;;  %v3931_v26 = vld [vmem:[%s5506_s1 + $0x458] ss:$12 sps:$4 sm:$0xff]   ;;  %v3928_v28 = vld [vmem:[%s5506_s1 + $0x450] ss:$12 sps:$4 sm:$0xff]  }
  0x75   : > { %1158 = vmatprep.subr.bf16.mxu1 %v4224_v1  ;;  %1117 = vmatprep.subr.bf16.mxu0 %v3854_v27  ;;  %v3934_v27 = vld [vmem:[%s5506_s1 + $0x43c] ss:$12 sps:$4 sm:$0xff]  }
  0x78   : > { %1159 = vmatpush1.bf16.msra.mxu1 %v3855_v29  ;;  %1118 = vmatpush1.bf16.msra.mxu0 %v3852_v30  ;;  %v3935_v29 = vld [vmem:[%s5506_s1 + $0x440] ss:$12 sps:$4 sm:$0xff]   ;;  %v3932_v30 = vld [vmem:[%s5506_s1 + $0x438] ss:$12 sps:$4 sm:$0xff]  }
  0x79   : > { %1160 = vmatprep.subr.bf16.mxu1 %v4224_v1  ;;  %1119 = vmatprep.subr.bf16.mxu0 %v3858_v31  ;;  %v3938_v31 = vld [vmem:[%s5506_s1 + $0x424] ss:$12 sps:$4 sm:$0xff]  }
  0x7c   : > { %1161 = vmatpush1.bf16.msra.mxu1 %v3859_v32  ;;  %1120 = vmatpush1.bf16.msra.mxu0 %v3856_v33  ;;  %v3939_v32 = vld [vmem:[%s5506_s1 + $0x428] ss:$12 sps:$4 sm:$0xff]   ;;  %v1592_v33 = vshll.u32 %v4689_v34, 16 }
  0x7d   : > { %1162 = vmatprep.subr.bf16.mxu1 %v4224_v1  ;;  %1121 = vmatprep.subr.bf16.mxu0 %v3862_v35  ;;  %v3936_v35 = vld [vmem:[%s5506_s1 + $0x420] ss:$12 sps:$4 sm:$0xff]  }
  0x80   : > { %1163 = vmatpush1.bf16.msra.mxu1 %v3863_v36  ;;  %1122 = vmatpush1.bf16.msra.mxu0 %v3860_v37  ;;  %v3944_v36 = vld [vmem:[%s5506_s1 + $0x52c] ss:$12 sps:$4 sm:$0xff]   ;;  %v3945_v37 = vld [vmem:[%s5506_s1 + $0x530] ss:$12 sps:$4 sm:$0xff]  }
  0x81   : > { %1164 = vmatprep.subr.bf16.mxu1 %v4224_v1  ;;  %1123 = vmatprep.subr.bf16.mxu0 %v3866_v38  ;;  %v1590_v38 = vshrl.u32 %v4689_v34, 16 }
  0x84   : > { %1165 = vmatpush1.bf16.msra.mxu1 %v3867_v39  ;;  %1124 = vmatpush1.bf16.msra.mxu0 %v3864_v40  ;;  %v1594_v39 = vrot.slane %v1592_v33, 1  ;;  %v4812_v40 = vcombine.low %v4675_v61, %v4675_v61  ;;  %v3972_v61 = vld [vmem:[%s5506_s1 + $0x484] ss:$12 sps:$4 sm:$0xff]  }
  0x85   : > { %1166 = vmatprep.subr.bf16.mxu1 %v4224_v1  ;;  %1125 = vmatprep.subr.bf16.mxu0 %v3870_v41  ;;  %v3942_v41 = vld [vmem:[%s5506_s1 + $0x528] ss:$12 sps:$4 sm:$0xff]  }
  0x88   : > { %1167 = vmatpush1.bf16.msra.mxu1 %v3871_v42  ;;  %1126 = vmatpush1.bf16.msra.mxu0 %v3868_v43  ;;  %v3948_v42 = vld [vmem:[%s5506_s1 + $0x514] ss:$12 sps:$4 sm:$0xff]   ;;  %v3949_v43 = vld [vmem:[%s5506_s1 + $0x518] ss:$12 sps:$4 sm:$0xff]  }
  0x89   : > { %1168 = vmatprep.subr.bf16.mxu1 %v4224_v1  ;;  %1127 = vmatprep.subr.bf16.mxu0 %v3874_v44  ;;  %v1595_v44 = vor.u32 %v1594_v39, %v1590_v38  ;;  %v4008_v38 = vld [vmem:[%s5506_s1 + $0x5ec] ss:$12 sps:$4 sm:$0xff]   ;;  %v4009_v39 = vld [vmem:[%s5506_s1 + $0x5f0] ss:$12 sps:$4 sm:$0xff]  }
  0x8c   : > { %1169 = vmatpush1.bf16.msra.mxu1 %v3875_v45  ;;  %1128 = vmatpush1.bf16.msra.mxu0 %v3872_v46  ;;  %v3946_v45 = vld [vmem:[%s5506_s1 + $0x510] ss:$12 sps:$4 sm:$0xff]  }
  0x8d   : > { %1178 = vmatprep.subr.bf16.mxu1 %v4224_v1  ;;  %1137 = vmatprep.subr.bf16.mxu0 %v3878_v47  ;;  %v3952_v46 = vld [vmem:[%s5506_s1 + $0x4fc] ss:$12 sps:$4 sm:$0xff]   ;;  %v3953_v47 = vld [vmem:[%s5506_s1 + $0x500] ss:$12 sps:$4 sm:$0xff]  }
  0x90   : > { %1179 = vmatpush2.bf16.msra.mxu1 %v3879_v48  ;;  %1138 = vmatpush2.bf16.msra.mxu0 %v3876_v49  ;;  %v3950_v48 = vld [vmem:[%s5506_s1 + $0x4f8] ss:$12 sps:$4 sm:$0xff]  }
  0x91   : > { %1180 = vmatprep.subr.bf16.mxu1 %v4224_v1  ;;  %1139 = vmatprep.subr.bf16.mxu0 %v3882_v50  ;;  %v3956_v49 = vld [vmem:[%s5506_s1 + $0x4e4] ss:$12 sps:$4 sm:$0xff]   ;;  %v3957_v50 = vld [vmem:[%s5506_s1 + $0x4e8] ss:$12 sps:$4 sm:$0xff]  }
  0x94   : > { %1181 = vmatpush2.bf16.msra.mxu1 %v3883_v51  ;;  %1140 = vmatpush2.bf16.msra.mxu0 %v3880_v52  ;;  %v3954_v51 = vld [vmem:[%s5506_s1 + $0x4e0] ss:$12 sps:$4 sm:$0xff]  }
  0x95   : > { %1182 = vmatprep.subr.bf16.mxu1 %v4224_v1  ;;  %1141 = vmatprep.subr.bf16.mxu0 %v3886_v53  ;;  %v3960_v52 = vld [vmem:[%s5506_s1 + $0x4cc] ss:$12 sps:$4 sm:$0xff]   ;;  %v3958_v53 = vld [vmem:[%s5506_s1 + $0x4c8] ss:$12 sps:$4 sm:$0xff]  }
  0x98   : > { %1183 = vmatpush2.bf16.msra.mxu1 %v3887_v54  ;;  %1142 = vmatpush2.bf16.msra.mxu0 %v3884_v55  ;;  %v3961_v54 = vld [vmem:[%s5506_s1 + $0x4d0] ss:$12 sps:$4 sm:$0xff]   ;;  %v3964_v55 = vld [vmem:[%s5506_s1 + $0x4b4] ss:$12 sps:$4 sm:$0xff]  }
  0x99   : > { %1184 = vmatprep.subr.bf16.mxu1 %v4224_v1  ;;  %1143 = vmatprep.subr.bf16.mxu0 %v3890_v56  ;;  %v3962_v56 = vld [vmem:[%s5506_s1 + $0x4b0] ss:$12 sps:$4 sm:$0xff]  }
  0x9c   : > { %1185 = vmatpush2.bf16.msra.mxu1 %v3891_v57  ;;  %1144 = vmatpush2.bf16.msra.mxu0 %v3888_v58  ;;  %v3965_v57 = vld [vmem:[%s5506_s1 + $0x4b8] ss:$12 sps:$4 sm:$0xff]   ;;  %v3968_v58 = vld [vmem:[%s5506_s1 + $0x49c] ss:$12 sps:$4 sm:$0xff]  }
  0x9d   : > { %1492 = vmatprep.subr.bf16.mxu1 %v4224_v1  ;;  %1451 = vmatprep.subr.bf16.mxu0 %v3894_v59  ;;  %v3966_v59 = vld [vmem:[%s5506_s1 + $0x498] ss:$12 sps:$4 sm:$0xff]  }
  0x9f   : > { %1187 = vmatmul.mubr.bf16.vlgmr.msra.gmra.mxu1 %v915_v60  ;;  %1146 = vmatmul.mubr.bf16.vlgmr.msra.gmra.mxu0 %v915_v60  ;;  %v3969_v60 = vld [vmem:[%s5506_s1 + $0x4a0] ss:$12 sps:$4 sm:$0xff]  }
  0xa0   : > { %1493 = vmatpush1.bf16.msra.mxu1 %v3895_v62  ;;  %1452 = vmatpush1.bf16.msra.mxu0 %v3892_v63  ;;  %v3973_v62 = vld [vmem:[%s5506_s1 + $0x488] ss:$12 sps:$4 sm:$0xff]   ;;  %v3970_v63 = vld [vmem:[%s5506_s1 + $0x480] ss:$12 sps:$4 sm:$0xff]  }
  0xa1   : > { %1494 = vmatprep.subr.bf16.mxu1 %v4224_v1  ;;  %1453 = vmatprep.subr.bf16.mxu0 %v3898_v0  ;;  %v3976_v0 = vld [vmem:[%s5506_s1 + $0x58c] ss:$12 sps:$4 sm:$0xff]  }
  0xa2   : > { %3504 = vmatprep.mubr.msk.bf16.mxu1 %vm506_vm0, %v4689_v34  ;;  %3503 = vmatprep.mubr.msk.bf16.mxu0 %vm506_vm0, %v4689_v34 }
  0xa4   : > { %1495 = vmatpush1.bf16.msra.mxu1 %v3899_v2  ;;  %1454 = vmatpush1.bf16.msra.mxu0 %v3896_v3  ;;  %v3977_v2 = vld [vmem:[%s5506_s1 + $0x590] ss:$12 sps:$4 sm:$0xff]   ;;  %v3974_v3 = vld [vmem:[%s5506_s1 + $0x588] ss:$12 sps:$4 sm:$0xff]  }
  0xa5   : > { %1496 = vmatprep.subr.bf16.mxu1 %v4224_v1  ;;  %1455 = vmatprep.subr.bf16.mxu0 %v3902_v4  ;;  %v3980_v4 = vld [vmem:[%s5506_s1 + $0x574] ss:$12 sps:$4 sm:$0xff]  }
  0xa8   : > { %1497 = vmatpush1.bf16.msra.mxu1 %v3903_v5  ;;  %1456 = vmatpush1.bf16.msra.mxu0 %v3900_v6  ;;  %v3981_v5 = vld [vmem:[%s5506_s1 + $0x578] ss:$12 sps:$4 sm:$0xff]   ;;  %v3978_v6 = vld [vmem:[%s5506_s1 + $0x570] ss:$12 sps:$4 sm:$0xff]  }
  0xa9   : > { %1498 = vmatprep.subr.bf16.mxu1 %v4224_v1  ;;  %1457 = vmatprep.subr.bf16.mxu0 %v3906_v7  ;;  %v3984_v7 = vld [vmem:[%s5506_s1 + $0x55c] ss:$12 sps:$4 sm:$0xff]  }
  0xac   : > { %1499 = vmatpush1.bf16.msra.mxu1 %v3907_v8  ;;  %1458 = vmatpush1.bf16.msra.mxu0 %v3904_v9  ;;  %v3985_v8 = vld [vmem:[%s5506_s1 + $0x560] ss:$12 sps:$4 sm:$0xff]   ;;  %v1586_v9 = vshll.u32 %v4812_v40, 16 }
  0xad   : > { %1500 = vmatprep.subr.bf16.mxu1 %v4224_v1  ;;  %1459 = vmatprep.subr.bf16.mxu0 %v3910_v10  ;;  %v3982_v10 = vld [vmem:[%s5506_s1 + $0x558] ss:$12 sps:$4 sm:$0xff]  }
  0xb0   : > { %1501 = vmatpush1.bf16.msra.mxu1 %v3911_v11  ;;  %1460 = vmatpush1.bf16.msra.mxu0 %v3908_v12  ;;  %v3988_v11 = vld [vmem:[%s5506_s1 + $0x544] ss:$12 sps:$4 sm:$0xff]   ;;  %v3989_v12 = vld [vmem:[%s5506_s1 + $0x548] ss:$12 sps:$4 sm:$0xff]  }
  0xb1   : > { %1502 = vmatprep.subr.bf16.mxu1 %v4224_v1  ;;  %1461 = vmatprep.subr.bf16.mxu0 %v3914_v13  ;;  %v1584_v13 = vshrl.u32 %v4812_v40, 16 }
  0xb4   : > { %1503 = vmatpush1.bf16.msra.mxu1 %v3915_v14  ;;  %1462 = vmatpush1.bf16.msra.mxu0 %v3912_v15  ;;  %v1588_v14 = vrot.slane %v1586_v9, 1  ;;  %v3986_v15 = vld [vmem:[%s5506_s1 + $0x540] ss:$12 sps:$4 sm:$0xff]   ;;  %v4045_v9 = vld [vmem:[%s5506_s1 + $0x758] ss:$12 sps:$4 sm:$0xff]  }
  0xb5   : > { %1504 = vmatprep.subr.bf16.mxu1 %v4224_v1  ;;  %1463 = vmatprep.subr.bf16.mxu0 %v3918_v16  ;;  %v3992_v16 = vld [vmem:[%s5506_s1 + $0x64c] ss:$12 sps:$4 sm:$0xff]  }
  0xb8   : > { %1505 = vmatpush1.bf16.msra.mxu1 %v3919_v17  ;;  %1464 = vmatpush1.bf16.msra.mxu0 %v3916_v18  ;;  %v1589_v17 = vor.u32 %v1588_v14, %v1584_v13  ;;  %v3993_v18 = vld [vmem:[%s5506_s1 + $0x650] ss:$12 sps:$4 sm:$0xff]  }
  0xb9   : > { %1506 = vmatprep.subr.bf16.mxu1 %v4224_v1  ;;  %1465 = vmatprep.subr.bf16.mxu0 %v3922_v19  ;;  %v3990_v19 = vld [vmem:[%s5506_s1 + $0x648] ss:$12 sps:$4 sm:$0xff]  }
  0xba   : > { %v4048_v14 = vld [vmem:[%s5506_s1 + $0x73c] ss:$12 sps:$4 sm:$0xff]  }
  0xbc   : > { %1507 = vmatpush1.bf16.msra.mxu1 %v3923_v20  ;;  %1466 = vmatpush1.bf16.msra.mxu0 %v3920_v21  ;;  %v3996_v20 = vld [vmem:[%s5506_s1 + $0x634] ss:$12 sps:$4 sm:$0xff]   ;;  %v1925_v21 = vrot.slane %v4689_v34, 1 }
  0xbd   : > { %1516 = vmatprep.subr.bf16.mxu1 %v4224_v1  ;;  %1475 = vmatprep.subr.bf16.mxu0 %v3926_v22 }
  0xc0   : > { %1517 = vmatpush2.bf16.msra.mxu1 %v3927_v23  ;;  %1476 = vmatpush2.bf16.msra.mxu0 %v3924_v24  ;;  %v3997_v24 = vld [vmem:[%s5506_s1 + $0x638] ss:$12 sps:$4 sm:$0xff]  }
  0xc1   : > { %1518 = vmatprep.subr.bf16.mxu1 %v4224_v1  ;;  %1477 = vmatprep.subr.bf16.mxu0 %v3930_v25 }
  0xc4   : > { %1519 = vmatpush2.bf16.msra.mxu1 %v3931_v26  ;;  %1478 = vmatpush2.bf16.msra.mxu0 %v3928_v28  ;;  %v3994_v26 = vld [vmem:[%s5506_s1 + $0x630] ss:$12 sps:$4 sm:$0xff]  }
  0xc5   : > { %1520 = vmatprep.subr.bf16.mxu1 %v4224_v1  ;;  %1479 = vmatprep.subr.bf16.mxu0 %v3934_v27  ;;  %v4000_v28 = vld [vmem:[%s5506_s1 + $0x61c] ss:$12 sps:$4 sm:$0xff]  }
  0xc8   : > { %1521 = vmatpush2.bf16.msra.mxu1 %v3935_v29  ;;  %1480 = vmatpush2.bf16.msra.mxu0 %v3932_v30  ;;  %v4001_v30 = vld [vmem:[%s5506_s1 + $0x620] ss:$12 sps:$4 sm:$0xff]  }
  0xc9   : > { %1522 = vmatprep.subr.bf16.mxu1 %v4224_v1  ;;  %1481 = vmatprep.subr.bf16.mxu0 %v3938_v31 }
  0xcc   : > { %1523 = vmatpush2.bf16.msra.mxu1 %v3939_v32  ;;  %1482 = vmatpush2.bf16.msra.mxu0 %v3936_v35  ;;  %v3998_v32 = vld [vmem:[%s5506_s1 + $0x618] ss:$12 sps:$4 sm:$0xff]  }
  0xcd   : > { %1833 = vmatprep.subr.bf16.mxu1 %v4224_v1  ;;  %1792 = vmatprep.subr.bf16.mxu0 %v3944_v36  ;;  %v4004_v35 = vld [vmem:[%s5506_s1 + $0x604] ss:$12 sps:$4 sm:$0xff]   ;;  %v4005_v36 = vld [vmem:[%s5506_s1 + $0x608] ss:$12 sps:$4 sm:$0xff]  }
  0xcf   : > { %1525 = vmatmul.mubr.bf16.vlgmr.msra.gmra.mxu1 %v4812_v40  ;;  %1484 = vmatmul.mubr.bf16.vlgmr.msra.gmra.mxu0 %v4812_v40 }
  0xd0   : > { %1834 = vmatpush1.bf16.msra.mxu1 %v3945_v37  ;;  %1793 = vmatpush1.bf16.msra.mxu0 %v3942_v41  ;;  %v4002_v37 = vld [vmem:[%s5506_s1 + $0x600] ss:$12 sps:$4 sm:$0xff]   ;;  %v4006_v41 = vld [vmem:[%s5506_s1 + $0x5e8] ss:$12 sps:$4 sm:$0xff]  }
  0xd1   : > { %1835 = vmatprep.subr.bf16.mxu1 %v4224_v1  ;;  %1794 = vmatprep.subr.bf16.mxu0 %v3948_v42  ;;  %v4012_v42 = vld [vmem:[%s5506_s1 + $0x5d4] ss:$12 sps:$4 sm:$0xff]  }
  0xd2   : > { %3542 = vmatprep.mubr.msk.bf16.mxu1 %vm506_vm0, %v1595_v44  ;;  %3541 = vmatprep.mubr.msk.bf16.mxu0 %vm506_vm0, %v1595_v44  ;;  %v4010_v44 = vld [vmem:[%s5506_s1 + $0x5d0] ss:$12 sps:$4 sm:$0xff]  }
  0xd4   : > { %1836 = vmatpush1.bf16.msra.mxu1 %v3949_v43  ;;  %1795 = vmatpush1.bf16.msra.mxu0 %v3946_v45  ;;  %v4013_v43 = vld [vmem:[%s5506_s1 + $0x5d8] ss:$12 sps:$4 sm:$0xff]   ;;  %v4016_v45 = vld [vmem:[%s5506_s1 + $0x5bc] ss:$12 sps:$4 sm:$0xff]  }
  0xd5   : > { %1837 = vmatprep.subr.bf16.mxu1 %v4224_v1  ;;  %1796 = vmatprep.subr.bf16.mxu0 %v3952_v46  ;;  %v4017_v46 = vld [vmem:[%s5506_s1 + $0x5c0] ss:$12 sps:$4 sm:$0xff]  }
  0xd8   : > { %1838 = vmatpush1.bf16.msra.mxu1 %v3953_v47  ;;  %1797 = vmatpush1.bf16.msra.mxu0 %v3950_v48  ;;  %v4014_v47 = vld [vmem:[%s5506_s1 + $0x5b8] ss:$12 sps:$4 sm:$0xff]  }
  0xd9   : > { %1839 = vmatprep.subr.bf16.mxu1 %v4224_v1  ;;  %1798 = vmatprep.subr.bf16.mxu0 %v3956_v49  ;;  %v4020_v48 = vld [vmem:[%s5506_s1 + $0x5a4] ss:$12 sps:$4 sm:$0xff]   ;;  %v4021_v49 = vld [vmem:[%s5506_s1 + $0x5a8] ss:$12 sps:$4 sm:$0xff]  }
  0xdc   : > { %1840 = vmatpush1.bf16.msra.mxu1 %v3957_v50  ;;  %1799 = vmatpush1.bf16.msra.mxu0 %v3954_v51  ;;  %v4018_v50 = vld [vmem:[%s5506_s1 + $0x5a0] ss:$12 sps:$4 sm:$0xff]  }
  0xdd   : > { %1841 = vmatprep.subr.bf16.mxu1 %v4224_v1  ;;  %1800 = vmatprep.subr.bf16.mxu0 %v3960_v52  ;;  %v4024_v51 = vld [vmem:[%s5506_s1 + $0x6ac] ss:$12 sps:$4 sm:$0xff]   ;;  %v4025_v52 = vld [vmem:[%s5506_s1 + $0x6b0] ss:$12 sps:$4 sm:$0xff]  }
  0xe0   : > { %1842 = vmatpush1.bf16.msra.mxu1 %v3961_v54  ;;  %1801 = vmatpush1.bf16.msra.mxu0 %v3958_v53  ;;  %v4022_v53 = vld [vmem:[%s5506_s1 + $0x6a8] ss:$12 sps:$4 sm:$0xff]  }
  0xe1   : > { %1843 = vmatprep.subr.bf16.mxu1 %v4224_v1  ;;  %1802 = vmatprep.subr.bf16.mxu0 %v3964_v55  ;;  %v4028_v54 = vld [vmem:[%s5506_s1 + $0x694] ss:$12 sps:$4 sm:$0xff]   ;;  %v4029_v55 = vld [vmem:[%s5506_s1 + $0x698] ss:$12 sps:$4 sm:$0xff]  }
  0xe4   : > { %1844 = vmatpush1.bf16.msra.mxu1 %v3965_v57  ;;  %1803 = vmatpush1.bf16.msra.mxu0 %v3962_v56  ;;  %v4026_v56 = vld [vmem:[%s5506_s1 + $0x690] ss:$12 sps:$4 sm:$0xff]  }
  0xe5   : > { %1845 = vmatprep.subr.bf16.mxu1 %v4224_v1  ;;  %1804 = vmatprep.subr.bf16.mxu0 %v3968_v58  ;;  %v4032_v57 = vld [vmem:[%s5506_s1 + $0x67c] ss:$12 sps:$4 sm:$0xff]   ;;  %v4033_v58 = vld [vmem:[%s5506_s1 + $0x680] ss:$12 sps:$4 sm:$0xff]  }
  0xe8   : > { %1846 = vmatpush1.bf16.msra.mxu1 %v3969_v60  ;;  %1805 = vmatpush1.bf16.msra.mxu0 %v3966_v59  ;;  %v4030_v59 = vld [vmem:[%s5506_s1 + $0x678] ss:$12 sps:$4 sm:$0xff]  }
  0xe9   : > { %1847 = vmatprep.subr.bf16.mxu1 %v4224_v1  ;;  %1806 = vmatprep.subr.bf16.mxu0 %v3972_v61  ;;  %v4036_v60 = vld [vmem:[%s5506_s1 + $0x664] ss:$12 sps:$4 sm:$0xff]   ;;  %v4037_v61 = vld [vmem:[%s5506_s1 + $0x668] ss:$12 sps:$4 sm:$0xff]  }
  0xec   : > { %1848 = vmatpush1.bf16.msra.mxu1 %v3973_v62  ;;  %1807 = vmatpush1.bf16.msra.mxu0 %v3970_v63  ;;  %v4034_v62 = vld [vmem:[%s5506_s1 + $0x660] ss:$12 sps:$4 sm:$0xff]  }
  0xed   : > { %1857 = vmatprep.subr.bf16.mxu1 %v4224_v1  ;;  %1816 = vmatprep.subr.bf16.mxu0 %v3976_v0  ;;  %v4040_v63 = vld [vmem:[%s5506_s1 + $0x76c] ss:$12 sps:$4 sm:$0xff]   ;;  %v1924_v0 = vrot.slane %v4812_v40, 1 }
  0xf0   : > { %1858 = vmatpush2.bf16.msra.mxu1 %v3977_v2  ;;  %1817 = vmatpush2.bf16.msra.mxu0 %v3974_v3  ;;  %v5068_v2 = vld [vmem:[%s4361_s28 + $0x10] sm:$0x77] }
  0xf1   : > { %1859 = vmatprep.subr.bf16.mxu1 %v4224_v1  ;;  %1818 = vmatprep.subr.bf16.mxu0 %v3980_v4  ;;  %v4041_v3 = vld [vmem:[%s5506_s1 + $0x770] ss:$12 sps:$4 sm:$0xff]   ;;  %v4038_v4 = vld [vmem:[%s5506_s1 + $0x768] ss:$12 sps:$4 sm:$0xff]   ;;  %v5082_v40 = vcombine.high %v5068_v2, %v5068_v2 }
  0xf4   : > { %1860 = vmatpush2.bf16.msra.mxu1 %v3981_v5  ;;  %1819 = vmatpush2.bf16.msra.mxu0 %v3978_v6  ;;  %v4044_v5 = vld [vmem:[%s5506_s1 + $0x754] ss:$12 sps:$4 sm:$0xff]  }
  0xf5   : > { %1861 = vmatprep.subr.bf16.mxu1 %v4224_v1  ;;  %1820 = vmatprep.subr.bf16.mxu0 %v3984_v7 }
  0xf8   : > { %1862 = vmatpush2.bf16.msra.mxu1 %v3985_v8  ;;  %1821 = vmatpush2.bf16.msra.mxu0 %v3982_v10 }
  0xf9   : > { %1863 = vmatprep.subr.bf16.mxu1 %v4224_v1  ;;  %1822 = vmatprep.subr.bf16.mxu0 %v3988_v11 }
  0xfc   : > { %1864 = vmatpush2.bf16.msra.mxu1 %v3989_v12  ;;  %1823 = vmatpush2.bf16.msra.mxu0 %v3986_v15  ;;  %v4042_v12 = vld [vmem:[%s5506_s1 + $0x750] ss:$12 sps:$4 sm:$0xff]  }
  0xfd   : > { %2163 = vmatprep.subr.bf16.mxu1 %v4224_v1  ;;  %2122 = vmatprep.subr.bf16.mxu0 %v3992_v16 }
  0xff   : > { %v4948_v22 = vpop.f32.mrf.mxu1  ;;  %1866 = vmatmul.mubr.bf16.vlgmr.msra.gmra.mxu1 %v1589_v17  ;;  %v4950_v23 = vpop.f32.mrf.mxu0  ;;  %1825 = vmatmul.mubr.bf16.vlgmr.msra.gmra.mxu0 %v1589_v17 }
 0x100   : > { %2164 = vmatpush1.bf16.msra.mxu1 %v3993_v18  ;;  %2123 = vmatpush1.bf16.msra.mxu0 %v3990_v19  ;;  %v4049_v18 = vld [vmem:[%s5506_s1 + $0x740] ss:$12 sps:$4 sm:$0xff]  }
 0x101   : > { %v587_v25 = vpop.f32.mrf.mxu1  ;;  %2165 = vmatprep.subr.bf16.mxu1 %v4224_v1  ;;  %v4959_v34 = vpop.f32.mrf.mxu0  ;;  %2124 = vmatprep.subr.bf16.mxu0 %v3996_v20  ;;  %v4046_v20 = vld [vmem:[%s5506_s1 + $0x738] ss:$12 sps:$4 sm:$0xff]  }
 0x102   : > { %3580 = vmatprep.mubr.msk.bf16.mxu1 %vm506_vm0, %v1925_v21  ;;  %3579 = vmatprep.mubr.msk.bf16.mxu0 %vm506_vm0, %v1925_v21  ;;  %v4056_v25 = vld [vmem:[%s5506_s1 + $0x70c] ss:$12 sps:$4 sm:$0xff]  }
 0x103   : > { %v588_v27 = vpop.f32.mrf.mxu1  ;;  %v548_v29 = vpop.f32.mrf.mxu0 }
 0x104   : > { %2166 = vmatpush1.bf16.msra.mxu1 %v3997_v24  ;;  %2125 = vmatpush1.bf16.msra.mxu0 %v3994_v26  ;;  %v4050_v24 = vld [vmem:[%s5506_s1 + $0x720] ss:$12 sps:$4 sm:$0xff]   ;;  %v4057_v26 = vld [vmem:[%s5506_s1 + $0x710] ss:$12 sps:$4 sm:$0xff]   ;;  %v4061_v27 = vld [vmem:[%s5506_s1 + $0x6f8] ss:$12 sps:$4 sm:$0xff]  }
 0x105   : > { %v589_v31 = vpop.f32.mrf.mxu1  ;;  %2167 = vmatprep.subr.bf16.mxu1 %v4224_v1  ;;  %v549_v33 = vpop.f32.mrf.mxu0  ;;  %2126 = vmatprep.subr.bf16.mxu0 %v4000_v28  ;;  %v4060_v28 = vld [vmem:[%s5506_s1 + $0x6f4] ss:$12 sps:$4 sm:$0xff]   ;;  %v4058_v29 = vld [vmem:[%s5506_s1 + $0x6f0] ss:$12 sps:$4 sm:$0xff]  }
 0x106   : > { %v4065_v31 = vld [vmem:[%s5506_s1 + $0x6e0] ss:$12 sps:$4 sm:$0xff]   ;;  %v4068_v33 = vld [vmem:[%s5506_s1 + $0x6c4] ss:$12 sps:$4 sm:$0xff]  }
 0x108   : > { %2168 = vmatpush1.bf16.msra.mxu1 %v4001_v30  ;;  %2127 = vmatpush1.bf16.msra.mxu0 %v3998_v32  ;;  %v4064_v30 = vld [vmem:[%s5506_s1 + $0x6dc] ss:$12 sps:$4 sm:$0xff]   ;;  %v4062_v32 = vld [vmem:[%s5506_s1 + $0x6d8] ss:$12 sps:$4 sm:$0xff]  }
 0x109   : > { %2169 = vmatprep.subr.bf16.mxu1 %v4224_v1  ;;  %2128 = vmatprep.subr.bf16.mxu0 %v4004_v35  ;;  %v4069_v35 = vld [vmem:[%s5506_s1 + $0x6c8] ss:$12 sps:$4 sm:$0xff]  }
 0x10c   : > { %2170 = vmatpush1.bf16.msra.mxu1 %v4005_v36  ;;  %2129 = vmatpush1.bf16.msra.mxu0 %v4002_v37  ;;  %v4066_v36 = vld [vmem:[%s5506_s1 + $0x6c0] ss:$12 sps:$4 sm:$0xff]  }
 0x10d   : > { %2171 = vmatprep.subr.bf16.mxu1 %v4224_v1  ;;  %2130 = vmatprep.subr.bf16.mxu0 %v4008_v38  ;;  %v4072_v37 = vld [vmem:[%s5506_s1 + $0x7cc] ss:$12 sps:$4 sm:$0xff]   ;;  %v4073_v38 = vld [vmem:[%s5506_s1 + $0x7d0] ss:$12 sps:$4 sm:$0xff]  }
 0x110   : > { %2172 = vmatpush1.bf16.msra.mxu1 %v4009_v39  ;;  %2131 = vmatpush1.bf16.msra.mxu0 %v4006_v41  ;;  %v4070_v39 = vld [vmem:[%s5506_s1 + $0x7c8] ss:$12 sps:$4 sm:$0xff]  }
 0x111   : > { %2173 = vmatprep.subr.bf16.mxu1 %v4224_v1  ;;  %2132 = vmatprep.subr.bf16.mxu0 %v4012_v42  ;;  %v4076_v41 = vld [vmem:[%s5506_s1 + $0x7b4] ss:$12 sps:$4 sm:$0xff]   ;;  %v4077_v42 = vld [vmem:[%s5506_s1 + $0x7b8] ss:$12 sps:$4 sm:$0xff]  }
 0x114   : > { %2174 = vmatpush1.bf16.msra.mxu1 %v4013_v43  ;;  %2133 = vmatpush1.bf16.msra.mxu0 %v4010_v44  ;;  %v4074_v43 = vld [vmem:[%s5506_s1 + $0x7b0] ss:$12 sps:$4 sm:$0xff]  }
 0x115   : > { %2175 = vmatprep.subr.bf16.mxu1 %v4224_v1  ;;  %2134 = vmatprep.subr.bf16.mxu0 %v4016_v45  ;;  %v4080_v44 = vld [vmem:[%s5506_s1 + $0x79c] ss:$12 sps:$4 sm:$0xff]   ;;  %v4081_v45 = vld [vmem:[%s5506_s1 + $0x7a0] ss:$12 sps:$4 sm:$0xff]  }
 0x118   : > { %2176 = vmatpush1.bf16.msra.mxu1 %v4017_v46  ;;  %2135 = vmatpush1.bf16.msra.mxu0 %v4014_v47  ;;  %v4078_v46 = vld [vmem:[%s5506_s1 + $0x798] ss:$12 sps:$4 sm:$0xff]  }
 0x119   : > { %2177 = vmatprep.subr.bf16.mxu1 %v4224_v1  ;;  %2136 = vmatprep.subr.bf16.mxu0 %v4020_v48  ;;  %v4084_v47 = vld [vmem:[%s5506_s1 + $0x784] ss:$12 sps:$4 sm:$0xff]   ;;  %v2601_v48 = vshll.u32 %v5082_v40, 16 }
 0x11c   : > { %2178 = vmatpush1.bf16.msra.mxu1 %v4021_v49  ;;  %2137 = vmatpush1.bf16.msra.mxu0 %v4018_v50  ;;  %v4085_v49 = vld [vmem:[%s5506_s1 + $0x788] ss:$12 sps:$4 sm:$0xff]   ;;  %v4082_v50 = vld [vmem:[%s5506_s1 + $0x780] ss:$12 sps:$4 sm:$0xff]  }
 0x11d   : > { %2187 = vmatprep.subr.bf16.mxu1 %v4224_v1  ;;  %2146 = vmatprep.subr.bf16.mxu0 %v4024_v51  ;;  %v4090_v51 = vld [vmem:[%s5506_s1 + $0x88c] ss:$12 sps:$4 sm:$0xff]  }
 0x120   : > { %2188 = vmatpush2.bf16.msra.mxu1 %v4025_v52  ;;  %2147 = vmatpush2.bf16.msra.mxu0 %v4022_v53  ;;  %v2599_v52 = vshrl.u32 %v5082_v40, 16  ;;  %v2603_v53 = vrot.slane %v2601_v48, 1  ;;  %v2934_v48 = vrot.slane %v5082_v40, 1 }
 0x121   : > { %2189 = vmatprep.subr.bf16.mxu1 %v4224_v1  ;;  %2148 = vmatprep.subr.bf16.mxu0 %v4028_v54  ;;  %v5211_v54 = vcombine.low %v5068_v2, %v5068_v2  ;;  %v4092_v2 = vld [vmem:[%s5506_s1 + $0x870] ss:$12 sps:$4 sm:$0xff]  }
 0x124   : > { %2190 = vmatpush2.bf16.msra.mxu1 %v4029_v55  ;;  %2149 = vmatpush2.bf16.msra.mxu0 %v4026_v56  ;;  %v4091_v55 = vld [vmem:[%s5506_s1 + $0x890] ss:$12 sps:$4 sm:$0xff]   ;;  %v4088_v56 = vld [vmem:[%s5506_s1 + $0x888] ss:$12 sps:$4 sm:$0xff]  }
 0x125   : > { %2191 = vmatprep.subr.bf16.mxu1 %v4224_v1  ;;  %2150 = vmatprep.subr.bf16.mxu0 %v4032_v57  ;;  %v4094_v57 = vld [vmem:[%s5506_s1 + $0x874] ss:$12 sps:$4 sm:$0xff]  }
 0x128   : > { %2192 = vmatpush2.bf16.msra.mxu1 %v4033_v58  ;;  %2151 = vmatpush2.bf16.msra.mxu0 %v4030_v59  ;;  %v2604_v58 = vor.u32 %v2603_v53, %v2599_v52  ;;  %v4143_v52 = vld [vmem:[%s5506_s1 + $0x998] ss:$12 sps:$4 sm:$0xff]  }
 0x129   : > { %2193 = vmatprep.subr.bf16.mxu1 %v4224_v1  ;;  %2152 = vmatprep.subr.bf16.mxu0 %v4036_v60 }
 0x12c   : > { %2194 = vmatpush2.bf16.msra.mxu1 %v4037_v61  ;;  %2153 = vmatpush2.bf16.msra.mxu0 %v4034_v62  ;;  %v4095_v62 = vld [vmem:[%s5506_s1 + $0x878] ss:$12 sps:$4 sm:$0xff]  }
 0x12d   : > { %2501 = vmatprep.subr.bf16.mxu1 %v4224_v1  ;;  %2460 = vmatprep.subr.bf16.mxu0 %v4040_v63 }
 0x12f   : > { %v861_v6 = vpop.f32.mrf.mxu1  ;;  %2196 = vmatmul.mubr.bf16.vlgmr.msra.gmra.mxu1 %v1924_v0  ;;  %v820_v8 = vpop.f32.mrf.mxu0  ;;  %2155 = vmatmul.mubr.bf16.vlgmr.msra.gmra.mxu0 %v1924_v0 }
 0x130   : > { %v5085_v7 = vadd.f32 %v861_v6, %v4948_v22  ;;  %2502 = vmatpush1.bf16.msra.mxu1 %v4041_v3  ;;  %v5091_v10 = vadd.f32 %v820_v8, %v4950_v23  ;;  %2461 = vmatpush1.bf16.msra.mxu0 %v4038_v4  ;;  %v4052_v22 = vld [vmem:[%s5506_s1 + $0x724] ss:$12 sps:$4 sm:$0xff]   ;;  %v4053_v23 = vld [vmem:[%s5506_s1 + $0x728] ss:$12 sps:$4 sm:$0xff]   ;;  %v4099_v8 = vld [vmem:[%s5506_s1 + $0x860] ss:$12 sps:$4 sm:$0xff]  }
 0x131   : > { %v863_v11 = vpop.f32.mrf.mxu1  ;;  %2503 = vmatprep.subr.bf16.mxu1 %v4224_v1  ;;  %v822_v13 = vpop.f32.mrf.mxu0  ;;  %2462 = vmatprep.subr.bf16.mxu0 %v4044_v5  ;;  %v4098_v4 = vld [vmem:[%s5506_s1 + $0x85c] ss:$12 sps:$4 sm:$0xff]  }
 0x132   : > { %3622 = vmatprep.mubr.msk.bf16.mxu1 %vm506_vm0, %v5082_v40  ;;  %v5103_v15 = vadd.f32 %v822_v13, %v4959_v34  ;;  %3621 = vmatprep.mubr.msk.bf16.mxu0 %vm506_vm0, %v5082_v40  ;;  %v4054_v34 = vld [vmem:[%s5506_s1 + $0x708] ss:$12 sps:$4 sm:$0xff]   ;;  %v4140_v40 = vld [vmem:[%s5506_s1 + $0x990] ss:$12 sps:$4 sm:$0xff]  }
 0x133   : > { %v864_v16 = vpop.f32.mrf.mxu1  ;;  %v824_v17 = vpop.f32.mrf.mxu0  ;;  %v4103_v13 = vld [vmem:[%s5506_s1 + $0x848] ss:$12 sps:$4 sm:$0xff]  }
 0x134   : > { %2504 = vmatpush1.bf16.msra.mxu1 %v4045_v9  ;;  %2463 = vmatpush1.bf16.msra.mxu0 %v4042_v12  ;;  %v4102_v12 = vld [vmem:[%s5506_s1 + $0x844] ss:$12 sps:$4 sm:$0xff]   ;;  %v4104_v17 = vld [vmem:[%s5506_s1 + $0x828] ss:$12 sps:$4 sm:$0xff]  }
 0x135   : > { %v865_v19 = vpop.f32.mrf.mxu1  ;;  %2505 = vmatprep.subr.bf16.mxu1 %v4224_v1  ;;  %v825_v21 = vpop.f32.mrf.mxu0  ;;  %2464 = vmatprep.subr.bf16.mxu0 %v4048_v14  ;;  %v4100_v14 = vld [vmem:[%s5506_s1 + $0x840] ss:$12 sps:$4 sm:$0xff]   ;;  %v4107_v16 = vld [vmem:[%s5506_s1 + $0x830] ss:$12 sps:$4 sm:$0xff]  }
 0x136   : > { %v4111_v19 = vld [vmem:[%s5506_s1 + $0x818] ss:$12 sps:$4 sm:$0xff]   ;;  %v4114_v21 = vld [vmem:[%s5506_s1 + $0x7fc] ss:$12 sps:$4 sm:$0xff]  }
 0x138   : > { %2506 = vmatpush1.bf16.msra.mxu1 %v4049_v18  ;;  %2465 = vmatpush1.bf16.msra.mxu0 %v4046_v20  ;;  %v4110_v18 = vld [vmem:[%s5506_s1 + $0x814] ss:$12 sps:$4 sm:$0xff]   ;;  %v4108_v20 = vld [vmem:[%s5506_s1 + $0x810] ss:$12 sps:$4 sm:$0xff]  }
 0x139   : > { %2507 = vmatprep.subr.bf16.mxu1 %v4224_v1  ;;  %2466 = vmatprep.subr.bf16.mxu0 %v4052_v22  ;;  %v4115_v22 = vld [vmem:[%s5506_s1 + $0x800] ss:$12 sps:$4 sm:$0xff]  }
 0x13c   : > { %2508 = vmatpush1.bf16.msra.mxu1 %v4053_v23  ;;  %2467 = vmatpush1.bf16.msra.mxu0 %v4050_v24  ;;  %v4112_v23 = vld [vmem:[%s5506_s1 + $0x7f8] ss:$12 sps:$4 sm:$0xff]  }
 0x13d   : > { %2509 = vmatprep.subr.bf16.mxu1 %v4224_v1  ;;  %2468 = vmatprep.subr.bf16.mxu0 %v4056_v25  ;;  %v4118_v24 = vld [vmem:[%s5506_s1 + $0x7e4] ss:$12 sps:$4 sm:$0xff]   ;;  %v4119_v25 = vld [vmem:[%s5506_s1 + $0x7e8] ss:$12 sps:$4 sm:$0xff]  }
 0x140   : > { %2510 = vmatpush1.bf16.msra.mxu1 %v4057_v26  ;;  %2469 = vmatpush1.bf16.msra.mxu0 %v4054_v34  ;;  %v4116_v26 = vld [vmem:[%s5506_s1 + $0x7e0] ss:$12 sps:$4 sm:$0xff]  }
 0x141   : > { %2511 = vmatprep.subr.bf16.mxu1 %v4224_v1  ;;  %2470 = vmatprep.subr.bf16.mxu0 %v4060_v28  ;;  %v4122_v34 = vld [vmem:[%s5506_s1 + $0x8ec] ss:$12 sps:$4 sm:$0xff]   ;;  %v4123_v28 = vld [vmem:[%s5506_s1 + $0x8f0] ss:$12 sps:$4 sm:$0xff]  }
 0x144   : > { %2512 = vmatpush1.bf16.msra.mxu1 %v4061_v27  ;;  %2471 = vmatpush1.bf16.msra.mxu0 %v4058_v29  ;;  %v4120_v27 = vld [vmem:[%s5506_s1 + $0x8e8] ss:$12 sps:$4 sm:$0xff]  }
 0x145   : > { %2513 = vmatprep.subr.bf16.mxu1 %v4224_v1  ;;  %2472 = vmatprep.subr.bf16.mxu0 %v4064_v30  ;;  %v4126_v29 = vld [vmem:[%s5506_s1 + $0x8d4] ss:$12 sps:$4 sm:$0xff]   ;;  %v4127_v30 = vld [vmem:[%s5506_s1 + $0x8d8] ss:$12 sps:$4 sm:$0xff]  }
 0x148   : > { %2514 = vmatpush1.bf16.msra.mxu1 %v4065_v31  ;;  %2473 = vmatpush1.bf16.msra.mxu0 %v4062_v32  ;;  %v4124_v31 = vld [vmem:[%s5506_s1 + $0x8d0] ss:$12 sps:$4 sm:$0xff]  }
 0x149   : > { %2515 = vmatprep.subr.bf16.mxu1 %v4224_v1  ;;  %2474 = vmatprep.subr.bf16.mxu0 %v4068_v33  ;;  %v4130_v32 = vld [vmem:[%s5506_s1 + $0x8bc] ss:$12 sps:$4 sm:$0xff]   ;;  %v2595_v33 = vshll.u32 %v5211_v54, 16 }
 0x14c   : > { %2516 = vmatpush1.bf16.msra.mxu1 %v4069_v35  ;;  %2475 = vmatpush1.bf16.msra.mxu0 %v4066_v36  ;;  %v4131_v35 = vld [vmem:[%s5506_s1 + $0x8c0] ss:$12 sps:$4 sm:$0xff]   ;;  %v4128_v36 = vld [vmem:[%s5506_s1 + $0x8b8] ss:$12 sps:$4 sm:$0xff]  }
 0x14d   : > { %2525 = vmatprep.subr.bf16.mxu1 %v4224_v1  ;;  %2484 = vmatprep.subr.bf16.mxu0 %v4072_v37  ;;  %v4134_v37 = vld [vmem:[%s5506_s1 + $0x8a4] ss:$12 sps:$4 sm:$0xff]  }
 0x150   : > { %2526 = vmatpush2.bf16.msra.mxu1 %v4073_v38  ;;  %2485 = vmatpush2.bf16.msra.mxu0 %v4070_v39  ;;  %v2593_v38 = vshrl.u32 %v5211_v54, 16  ;;  %v2597_v39 = vrot.slane %v2595_v33, 1 }
 0x151   : > { %2527 = vmatprep.subr.bf16.mxu1 %v4224_v1  ;;  %2486 = vmatprep.subr.bf16.mxu0 %v4076_v41  ;;  %v4135_v41 = vld [vmem:[%s5506_s1 + $0x8a8] ss:$12 sps:$4 sm:$0xff]  }
 0x154   : > { %2528 = vmatpush2.bf16.msra.mxu1 %v4077_v42  ;;  %2487 = vmatpush2.bf16.msra.mxu0 %v4074_v43  ;;  %v4132_v42 = vld [vmem:[%s5506_s1 + $0x8a0] ss:$12 sps:$4 sm:$0xff]  }
 0x155   : > { %2529 = vmatprep.subr.bf16.mxu1 %v4224_v1  ;;  %2488 = vmatprep.subr.bf16.mxu0 %v4080_v44  ;;  %v4138_v43 = vld [vmem:[%s5506_s1 + $0x9ac] ss:$12 sps:$4 sm:$0xff]   ;;  %v2598_v44 = vor.u32 %v2597_v39, %v2593_v38 }
 0x158   : > { %2530 = vmatpush2.bf16.msra.mxu1 %v4081_v45  ;;  %2489 = vmatpush2.bf16.msra.mxu0 %v4078_v46  ;;  %v4139_v45 = vld [vmem:[%s5506_s1 + $0x9b0] ss:$12 sps:$4 sm:$0xff]   ;;  %v4136_v46 = vld [vmem:[%s5506_s1 + $0x9a8] ss:$12 sps:$4 sm:$0xff]  }
 0x159   : > { %2531 = vmatprep.subr.bf16.mxu1 %v4224_v1  ;;  %2490 = vmatprep.subr.bf16.mxu0 %v4084_v47  ;;  %v4142_v47 = vld [vmem:[%s5506_s1 + $0x994] ss:$12 sps:$4 sm:$0xff]  }
 0x15c   : > { %2532 = vmatpush2.bf16.msra.mxu1 %v4085_v49  ;;  %2491 = vmatpush2.bf16.msra.mxu0 %v4082_v50 }
 0x15d   : > { %2842 = vmatprep.subr.bf16.mxu1 %v4224_v1  ;;  %2801 = vmatprep.subr.bf16.mxu0 %v4090_v51 }
 0x15f   : > { %v1188_v59 = vpop.f32.mrf.mxu1  ;;  %2534 = vmatmul.mubr.bf16.vlgmr.msra.gmra.mxu1 %v5211_v54  ;;  %v1147_v61 = vpop.f32.mrf.mxu0  ;;  %2493 = vmatmul.mubr.bf16.vlgmr.msra.gmra.mxu0 %v5211_v54 }
 0x160   : > { %v5225_v60 = vadd.f32 %v1188_v59, %v5085_v7  ;;  %2843 = vmatpush1.bf16.msra.mxu1 %v4091_v55  ;;  %v5232_v63 = vadd.f32 %v1147_v61, %v5091_v10  ;;  %2802 = vmatpush1.bf16.msra.mxu0 %v4088_v56  ;;  %v4096_v10 = vld [vmem:[%s5506_s1 + $0x858] ss:$12 sps:$4 sm:$0xff]   ;;  %v4147_v61 = vld [vmem:[%s5506_s1 + $0x980] ss:$12 sps:$4 sm:$0xff]  }
 0x161   : > { %v1190_v0 = vpop.f32.mrf.mxu1  ;;  %2844 = vmatprep.subr.bf16.mxu1 %v4224_v1  ;;  %v1149_v3 = vpop.f32.mrf.mxu0  ;;  %2803 = vmatprep.subr.bf16.mxu0 %v4094_v57  ;;  %v4146_v57 = vld [vmem:[%s5506_s1 + $0x97c] ss:$12 sps:$4 sm:$0xff]  }
 0x162   : > { %3660 = vmatprep.mubr.msk.bf16.mxu1 %vm506_vm0, %v2604_v58  ;;  %v5243_v5 = vadd.f32 %v1149_v3, %v5103_v15  ;;  %3659 = vmatprep.mubr.msk.bf16.mxu0 %vm506_vm0, %v2604_v58  ;;  %v4106_v15 = vld [vmem:[%s5506_s1 + $0x82c] ss:$12 sps:$4 sm:$0xff]   ;;  %v4151_v3 = vld [vmem:[%s5506_s1 + $0x968] ss:$12 sps:$4 sm:$0xff]  }
 0x163   : > { %v1191_v6 = vpop.f32.mrf.mxu1  ;;  %v1151_v7 = vpop.f32.mrf.mxu0 }
 0x164   : > { %2845 = vmatpush1.bf16.msra.mxu1 %v4095_v62  ;;  %2804 = vmatpush1.bf16.msra.mxu0 %v4092_v2  ;;  %v4150_v2 = vld [vmem:[%s5506_s1 + $0x964] ss:$12 sps:$4 sm:$0xff]   ;;  %v4152_v7 = vld [vmem:[%s5506_s1 + $0x948] ss:$12 sps:$4 sm:$0xff]  }
 0x165   : > { %v1192_v9 = vpop.f32.mrf.mxu1  ;;  %2846 = vmatprep.subr.bf16.mxu1 %v4224_v1  ;;  %v1152_v11 = vpop.f32.mrf.mxu0  ;;  %2805 = vmatprep.subr.bf16.mxu0 %v4098_v4  ;;  %v4148_v4 = vld [vmem:[%s5506_s1 + $0x960] ss:$12 sps:$4 sm:$0xff]   ;;  %v4155_v6 = vld [vmem:[%s5506_s1 + $0x950] ss:$12 sps:$4 sm:$0xff]  }
 0x166   : > { %v4159_v9 = vld [vmem:[%s5506_s1 + $0x938] ss:$12 sps:$4 sm:$0xff]   ;;  %v4162_v11 = vld [vmem:[%s5506_s1 + $0x91c] ss:$12 sps:$4 sm:$0xff]  }
 0x168   : > { %2847 = vmatpush1.bf16.msra.mxu1 %v4099_v8  ;;  %2806 = vmatpush1.bf16.msra.mxu0 %v4096_v10  ;;  %v4158_v8 = vld [vmem:[%s5506_s1 + $0x934] ss:$12 sps:$4 sm:$0xff]   ;;  %v4156_v10 = vld [vmem:[%s5506_s1 + $0x930] ss:$12 sps:$4 sm:$0xff]  }
 0x169   : > { %2848 = vmatprep.subr.bf16.mxu1 %v4224_v1  ;;  %2807 = vmatprep.subr.bf16.mxu0 %v4102_v12  ;;  %v4163_v12 = vld [vmem:[%s5506_s1 + $0x920] ss:$12 sps:$4 sm:$0xff]  }
 0x16c   : > { %2849 = vmatpush1.bf16.msra.mxu1 %v4103_v13  ;;  %2808 = vmatpush1.bf16.msra.mxu0 %v4100_v14  ;;  %v4160_v13 = vld [vmem:[%s5506_s1 + $0x918] ss:$12 sps:$4 sm:$0xff]  }
 0x16d   : > { %2850 = vmatprep.subr.bf16.mxu1 %v4224_v1  ;;  %2809 = vmatprep.subr.bf16.mxu0 %v4106_v15  ;;  %v4166_v14 = vld [vmem:[%s5506_s1 + $0x904] ss:$12 sps:$4 sm:$0xff]   ;;  %v4167_v15 = vld [vmem:[%s5506_s1 + $0x908] ss:$12 sps:$4 sm:$0xff]  }
 0x170   : > { %2851 = vmatpush1.bf16.msra.mxu1 %v4107_v16  ;;  %2810 = vmatpush1.bf16.msra.mxu0 %v4104_v17  ;;  %v4164_v16 = vld [vmem:[%s5506_s1 + $0x900] ss:$12 sps:$4 sm:$0xff]  }
 0x171   : > { %2852 = vmatprep.subr.bf16.mxu1 %v4224_v1  ;;  %2811 = vmatprep.subr.bf16.mxu0 %v4110_v18  ;;  %v4170_v17 = vld [vmem:[%s5506_s1 + $0xa0c] ss:$12 sps:$4 sm:$0xff]   ;;  %v4171_v18 = vld [vmem:[%s5506_s1 + $0xa10] ss:$12 sps:$4 sm:$0xff]  }
 0x174   : > { %2853 = vmatpush1.bf16.msra.mxu1 %v4111_v19  ;;  %2812 = vmatpush1.bf16.msra.mxu0 %v4108_v20  ;;  %v4168_v19 = vld [vmem:[%s5506_s1 + $0xa08] ss:$12 sps:$4 sm:$0xff]  }
 0x175   : > { %2854 = vmatprep.subr.bf16.mxu1 %v4224_v1  ;;  %2813 = vmatprep.subr.bf16.mxu0 %v4114_v21  ;;  %v4174_v20 = vld [vmem:[%s5506_s1 + $0x9f4] ss:$12 sps:$4 sm:$0xff]   ;;  %v4175_v21 = vld [vmem:[%s5506_s1 + $0x9f8] ss:$12 sps:$4 sm:$0xff]  }
 0x178   : > { %2855 = vmatpush1.bf16.msra.mxu1 %v4115_v22  ;;  %2814 = vmatpush1.bf16.msra.mxu0 %v4112_v23  ;;  %v4172_v22 = vld [vmem:[%s5506_s1 + $0x9f0] ss:$12 sps:$4 sm:$0xff]  }
 0x179   : > { %2856 = vmatprep.subr.bf16.mxu1 %v4224_v1  ;;  %2815 = vmatprep.subr.bf16.mxu0 %v4118_v24  ;;  %v4178_v23 = vld [vmem:[%s5506_s1 + $0x9dc] ss:$12 sps:$4 sm:$0xff]   ;;  %v4179_v24 = vld [vmem:[%s5506_s1 + $0x9e0] ss:$12 sps:$4 sm:$0xff]  }
 0x17c   : > { %2857 = vmatpush1.bf16.msra.mxu1 %v4119_v25  ;;  %2816 = vmatpush1.bf16.msra.mxu0 %v4116_v26  ;;  %v4176_v25 = vld [vmem:[%s5506_s1 + $0x9d8] ss:$12 sps:$4 sm:$0xff]  }
 0x17d   : > { %2866 = vmatprep.subr.bf16.mxu1 %v4224_v1  ;;  %2825 = vmatprep.subr.bf16.mxu0 %v4122_v34  ;;  %v4182_v26 = vld [vmem:[%s5506_s1 + $0x9c4] ss:$12 sps:$4 sm:$0xff]   ;;  %v4183_v34 = vld [vmem:[%s5506_s1 + $0x9c8] ss:$12 sps:$4 sm:$0xff]  }
 0x180   : > { %2867 = vmatpush2.bf16.msra.mxu1 %v4123_v28  ;;  %2826 = vmatpush2.bf16.msra.mxu0 %v4120_v27  ;;  %v4180_v28 = vld [vmem:[%s5506_s1 + $0x9c0] ss:$12 sps:$4 sm:$0xff]   ;;  %v2933_v27 = vrot.slane %v5211_v54, 1 }
 0x181   : > { %2868 = vmatprep.subr.bf16.mxu1 %v4224_v1  ;;  %2827 = vmatprep.subr.bf16.mxu0 %v4126_v29 }
 0x184   : > { %2869 = vmatpush2.bf16.msra.mxu1 %v4127_v30  ;;  %2828 = vmatpush2.bf16.msra.mxu0 %v4124_v31 }
 0x185   : > { %2870 = vmatprep.subr.bf16.mxu1 %v4224_v1  ;;  %2829 = vmatprep.subr.bf16.mxu0 %v4130_v32 }
 0x188   : > { %2871 = vmatpush2.bf16.msra.mxu1 %v4131_v35  ;;  %2830 = vmatpush2.bf16.msra.mxu0 %v4128_v36 }
 0x189   : > { %2872 = vmatprep.subr.bf16.mxu1 %v4224_v1  ;;  %2831 = vmatprep.subr.bf16.mxu0 %v4134_v37 }
 0x18c   : > { %2873 = vmatpush2.bf16.msra.mxu1 %v4135_v41  ;;  %2832 = vmatpush2.bf16.msra.mxu0 %v4132_v42 }
 0x18d   : > { %3172 = vmatprep.subr.bf16.mxu1 %v4224_v1  ;;  %3131 = vmatprep.subr.bf16.mxu0 %v4138_v43 }
 0x18f   : > { %v1526_v49 = vpop.f32.mrf.mxu1  ;;  %2875 = vmatmul.mubr.bf16.vlgmr.msra.gmra.mxu1 %v2598_v44  ;;  %v1485_v51 = vpop.f32.mrf.mxu0  ;;  %2834 = vmatmul.mubr.bf16.vlgmr.msra.gmra.mxu0 %v2598_v44 }
 0x190   : > { %v5360_v50 = vadd.f32 %v1526_v49, %v5225_v60  ;;  %3173 = vmatpush1.bf16.msra.mxu1 %v4139_v45  ;;  %v5366_v53 = vadd.f32 %v1485_v51, %v5232_v63  ;;  %3132 = vmatpush1.bf16.msra.mxu0 %v4136_v46  ;;  %v4144_v63 = vld [vmem:[%s5506_s1 + $0x978] ss:$12 sps:$4 sm:$0xff]  }
 0x191   : > { %v1528_v55 = vpop.f32.mrf.mxu1  ;;  %3174 = vmatprep.subr.bf16.mxu1 %v4224_v1  ;;  %v1487_v56 = vpop.f32.mrf.mxu0  ;;  %3133 = vmatprep.subr.bf16.mxu0 %v4142_v47 }
 0x192   : > { %3698 = vmatprep.mubr.msk.bf16.mxu1 %vm506_vm0, %v2934_v48  ;;  %v5377_v58 = vadd.f32 %v1487_v56, %v5243_v5  ;;  %3697 = vmatprep.mubr.msk.bf16.mxu0 %vm506_vm0, %v2934_v48  ;;  %v4154_v5 = vld [vmem:[%s5506_s1 + $0x94c] ss:$12 sps:$4 sm:$0xff]  }
 0x193   : > { %v1529_v59 = vpop.f32.mrf.mxu1  ;;  %v1489_v60 = vpop.f32.mrf.mxu0 }
 0x194   : > { %3175 = vmatpush1.bf16.msra.mxu1 %v4143_v52  ;;  %3134 = vmatpush1.bf16.msra.mxu0 %v4140_v40 }
 0x195   : > { %v1530_v62 = vpop.f32.mrf.mxu1  ;;  %3176 = vmatprep.subr.bf16.mxu1 %v4224_v1  ;;  %v1490_v0 = vpop.f32.mrf.mxu0  ;;  %3135 = vmatprep.subr.bf16.mxu0 %v4146_v57 }
 0x198   : > { %3177 = vmatpush1.bf16.msra.mxu1 %v4147_v61  ;;  %3136 = vmatpush1.bf16.msra.mxu0 %v4144_v63 }
 0x199   : > { %3178 = vmatprep.subr.bf16.mxu1 %v4224_v1  ;;  %3137 = vmatprep.subr.bf16.mxu0 %v4150_v2 }
 0x19c   : > { %3179 = vmatpush1.bf16.msra.mxu1 %v4151_v3  ;;  %3138 = vmatpush1.bf16.msra.mxu0 %v4148_v4 }
 0x19d   : > { %3180 = vmatprep.subr.bf16.mxu1 %v4224_v1  ;;  %3139 = vmatprep.subr.bf16.mxu0 %v4154_v5 }
 0x1a0   : > { %3181 = vmatpush1.bf16.msra.mxu1 %v4155_v6  ;;  %3140 = vmatpush1.bf16.msra.mxu0 %v4152_v7  ;;  %v3217_v7 = vlaneseq }
 0x1a1   : > { %3182 = vmatprep.subr.bf16.mxu1 %v4224_v1  ;;  %3141 = vmatprep.subr.bf16.mxu0 %v4158_v8 }
 0x1a2   : > { %v3218_v8 = vshrl.u32 %v3217_v7, 7 }
 0x1a4   : > { %3183 = vmatpush1.bf16.msra.mxu1 %v4159_v9  ;;  %3142 = vmatpush1.bf16.msra.mxu0 %v4156_v10  ;;  %v3227_v9 = vsub.s32 2, %v3218_v8  ;;  %v3215_v10 = vld [vmem:[%s5507_s2] sm:$0x7] }
 0x1a5   : > { %3184 = vmatprep.subr.bf16.mxu1 %v4224_v1  ;;  %3143 = vmatprep.subr.bf16.mxu0 %v4162_v11  ;;  %v3219_v11 = vsub.s32 0, %v3218_v8 }
 0x1a8   : > { %3185 = vmatpush1.bf16.msra.mxu1 %v4163_v12  ;;  %3144 = vmatpush1.bf16.msra.mxu0 %v4160_v13  ;;  %v3223_v12 = vsub.s32 1, %v3218_v8 }
 0x1a9   : > { %3186 = vmatprep.subr.bf16.mxu1 %v4224_v1  ;;  %3145 = vmatprep.subr.bf16.mxu0 %v4166_v14  ;;  %v3228_v14 = vrot.slane %v3215_v10, %v3227_v9 }
 0x1ac   : > { %3187 = vmatpush1.bf16.msra.mxu1 %v4167_v15  ;;  %3146 = vmatpush1.bf16.msra.mxu0 %v4164_v16 }
 0x1ad   : > { %3196 = vmatprep.subr.bf16.mxu1 %v4224_v1  ;;  %3155 = vmatprep.subr.bf16.mxu0 %v4170_v17  ;;  %v3220_v17 = vrot.slane %v3215_v10, %v3219_v11 }
 0x1b0   : > { %3197 = vmatpush2.bf16.msra.mxu1 %v4171_v18  ;;  %3156 = vmatpush2.bf16.msra.mxu0 %v4168_v19 }
 0x1b1   : > { %3198 = vmatprep.subr.bf16.mxu1 %v4224_v1  ;;  %3157 = vmatprep.subr.bf16.mxu0 %v4174_v20 }
 0x1b4   : > { %3199 = vmatpush2.bf16.msra.mxu1 %v4175_v21  ;;  %3158 = vmatpush2.bf16.msra.mxu0 %v4172_v22 }
 0x1b5   : > { %3200 = vmatprep.subr.bf16.mxu1 %v4224_v1  ;;  %3159 = vmatprep.subr.bf16.mxu0 %v4178_v23  ;;  %v3224_v23 = vrot.slane %v3215_v10, %v3223_v12 }
 0x1b8   : > { %3201 = vmatpush2.bf16.msra.mxu1 %v4179_v24  ;;  %3160 = vmatpush2.bf16.msra.mxu0 %v4176_v25 }
 0x1b9   : > { %3202 = vmatprep.subr.bf16.mxu1 %v4224_v1  ;;  %3161 = vmatprep.subr.bf16.mxu0 %v4182_v26 }
 0x1bc   : > { %3203 = vmatpush2.bf16.msra.mxu1 %v4183_v34  ;;  %3162 = vmatpush2.bf16.msra.mxu0 %v4180_v28 }
 0x1bf   : > { %v1867_v29 = vpop.f32.mrf.mxu1  ;;  %3205 = vmatmul.mubr.bf16.vlgmr.msra.gmra.mxu1 %v2933_v27  ;;  %v1826_v31 = vpop.f32.mrf.mxu0  ;;  %3164 = vmatmul.mubr.bf16.vlgmr.msra.gmra.mxu0 %v2933_v27 }
 0x1c0   : > { %v1875_v30 = vadd.f32 %v1867_v29, %v5360_v50  ;;  %v1873_v32 = vadd.f32 %v1826_v31, %v5366_v53 }
 0x1c1   : > { %v1869_v33 = vpop.f32.mrf.mxu1  ;;  %v1828_v35 = vpop.f32.mrf.mxu0 }
 0x1c2   : > { %v1874_v1 = vadd.f32 %v1828_v35, %v5377_v58 }
 0x1c3   : > { %v1870_v36 = vpop.f32.mrf.mxu1  ;;  %v1830_v37 = vpop.f32.mrf.mxu0 }
 0x1c5   : > { %v1871_v38 = vpop.f32.mrf.mxu1  ;;  %v1831_v39 = vpop.f32.mrf.mxu0 }
 0x1ef   : > { %v2197_v41 = vpop.f32.mrf.mxu1  ;;  %v2156_v42 = vpop.f32.mrf.mxu0 }
 0x1f0   : > { %v2205_v54 = vadd.f32 %v2197_v41, %v1875_v30  ;;  %v2203_v43 = vadd.f32 %v2156_v42, %v1873_v32 }
 0x1f1   : > { %v2199_v44 = vpop.f32.mrf.mxu1  ;;  %v2158_v45 = vpop.f32.mrf.mxu0 }
 0x1f2   : > { %v2204_v46 = vadd.f32 %v2158_v45, %v1874_v1 }
 0x1f3   : > { %v2200_v47 = vpop.f32.mrf.mxu1  ;;  %v2160_v48 = vpop.f32.mrf.mxu0 }
 0x1f5   : > { %v2201_v49 = vpop.f32.mrf.mxu1  ;;  %v2161_v50 = vpop.f32.mrf.mxu0 }
 0x21f   : > { %v2535_v51 = vpop.f32.mrf.mxu1  ;;  %v2494_v53 = vpop.f32.mrf.mxu0 }
 0x220   : > { %v2543_v52 = vadd.f32 %v2535_v51, %v2205_v54  ;;  %v2541_v55 = vadd.f32 %v2494_v53, %v2203_v43 }
 0x221   : > { %v2537_v40 = vpop.f32.mrf.mxu1  ;;  %v2496_v56 = vpop.f32.mrf.mxu0 }
 0x222   : > { %v2542_v57 = vadd.f32 %v2496_v56, %v2204_v46 }
 0x223   : > { %v2538_v58 = vpop.f32.mrf.mxu1  ;;  %v2498_v59 = vpop.f32.mrf.mxu0 }
 0x225   : > { %v2539_v60 = vpop.f32.mrf.mxu1  ;;  %v2499_v61 = vpop.f32.mrf.mxu0 }
 0x24f   : > { %v2876_v62 = vpop.f32.mrf.mxu1  ;;  %v2835_v63 = vpop.f32.mrf.mxu0 }
 0x250   : > { %v2884_v13 = vadd.f32 %v2876_v62, %v2543_v52  ;;  %v2882_v15 = vadd.f32 %v2835_v63, %v2541_v55 }
 0x251   : > { %v2878_v0 = vpop.f32.mrf.mxu1  ;;  %v2837_v2 = vpop.f32.mrf.mxu0 }
 0x252   : > { %v2883_v20 = vadd.f32 %v2837_v2, %v2542_v57 }
 0x253   : > { %v2879_v3 = vpop.f32.mrf.mxu1  ;;  %v2839_v4 = vpop.f32.mrf.mxu0 }
 0x255   : > { %v2880_v5 = vpop.f32.mrf.mxu1  ;;  %v2840_v6 = vpop.f32.mrf.mxu0 }
 0x27f   : > { %v3206_v16 = vpop.f32.mrf.mxu1  ;;  %v3165_v19 = vpop.f32.mrf.mxu0 }
 0x280   : > { %v3214_v18 = vadd.f32 %v3206_v16, %v2884_v13  ;;  %v3212_v21 = vadd.f32 %v3165_v19, %v2882_v15 }
 0x281   : > { %v3208_v22 = vpop.f32.mrf.mxu1  ;;  %v3167_v25 = vpop.f32.mrf.mxu0 }
 0x282   : > { %v3234_v24 = vadd.f32 %v3228_v14, %v3214_v18  ;;  %v3232_v26 = vadd.f32 %v3220_v17, %v3212_v21  ;;  %v3213_v34 = vadd.f32 %v3167_v25, %v2883_v20 }
 0x283   : > { %v3209_v28 = vpop.f32.mrf.mxu1  ;;  %v3169_v29 = vpop.f32.mrf.mxu0 }
 0x284   : > { %v3237_v27 = vmax.f32 %v3234_v24, 0.0  ;;  %v3233_v30 = vadd.f32 %v3224_v23, %v3213_v34  ;;  %v3235_v33 = vmax.f32 %v3232_v26, 0.0 }
 0x285   : > { %v3210_v31 = vpop.f32.mrf.mxu1  ;;  %v3170_v32 = vpop.f32.mrf.mxu0 }
 0x286   : > { %3243 = vst [vmem:[%s192_s19 + $0x8] sm:$0x7] %v3237_v27  ;;  %v3236_v35 = vmax.f32 %v3233_v30, 0.0 }
 0x288   : > { %v3240_v1 = vcombine.low %v3235_v33, %v3236_v35 }
 0x28a   : > { %3242 = vst [vmem:[%s192_s19] sm:$0x77] %v3240_v1 }
 0x28b PF: > { %s13_s16 = sadd.s32 1, %s4222_s16   ;;  %s5509_s12 = smov %s4214_s14 }
 0x28c   : > { %p10_p7 = scmp.ge.s32.totalorder %s13_s16, 8   ;;  %s5510_s13 = smov %s4218_s15 }
 0x28d   : > { %s5511_s14 = smov %s5514_s17  ;;  %s5512_s15 = smov %s5518_s18 }
 0x28e   :  { %12 = sbr.rel (!%p10_p7) target bundleno = 3 (0x3), region = 65 }

// kernel: _lambda_.15
= control target key start
LH: loop header
LB: loop body
LE: loop exit
PB: predicated region body
PF: predicated region fallthrough
CT: control target
= control target key end

     0   :  { %6 = vsyncpa [#allocation3], 0  ;;  %s536_s0 = inlined_call_operand.vmem [shape: f32[2,3,3,256], index: 0, kind: input, shape index: {}]   ;;  %s537_s1 = inlined_call_operand.hbm [shape: f32[2,1,1,256], index: 1, kind: output, shape index: {}]  }
   0x1   :  { %8 = vsyncpa [#allocation3 + $0x1], 0  ;;  %s437_s6 = smov 0   ;;  %s439_s7 = smov 0  }
   0x2   :  { %s441_s8 = smov 0   ;;  %s443_s9 = smov 0  }
   0x3   :  { %s445_s10 = smov 0   ;;  %s447_s11 = smov 0  }
   0x4 LB: > { %s273_s12 = sadd.s32 4294967295, %s423_s11   ;;  %s274_s13 = sadd.s32 4294967294, %s423_s11   ;;  %s423_s11 = sphi %s447_s11, %s14_s11   ;;  %s419_s10 = sphi %s445_s10, %s544_s10   ;;  %s415_s9 = sphi %s443_s9, %s543_s9   ;;  %s411_s8 = sphi %s441_s8, %s542_s8   ;;  %s407_s7 = sphi %s439_s7, %s541_s7   ;;  %s403_s6 = sphi %s437_s6, %s540_s6  }
   0x5   : > { %s26_s14 = sadd.s32 1, %s419_s10  ;;  %s61_s15 = sadd.s32 1, %s411_s8 }
   0x6   : > { %p28_p0 = scmp.ge.s32.totalorder %s26_s14, 2  ;;  %p71_p1 = scmp.ne.s32.totalorder %s411_s8, %s407_s7 }
   0x7   : > { %p72_p2 = scmp.eq.s32.totalorder %s273_s12, 1  ;;  %p77_p3 = scmp.ne.s32.totalorder %s407_s7, %s403_s6 }
   0x8   : > { %s546_s14 = smov (%p28_p0, %s26_s14), 0  ;;  %p78_p5 = scmp.eq.s32.totalorder %s274_s13, 1 }
   0x9   : > { %p477_p4 = por %p72_p2, %p71_p1  ;;  %s56_s17 = ssub.s32 %s419_s10, %s546_s14 }
   0xa   : > { %p277_p6 = scmp.ge.s32.totalorder %s423_s11, 1  ;;  %p59_p7 = scmp.eq.s32.totalorder %s56_s17, 0 }
   0xb   : > { %p484_p8 = por %p78_p5, %p77_p3  ;;  %p104_p9 = scmp.lt.s32.totalorder %s423_s11, 3 }
   0xc   : > { %s490_s19 = scalar_select %p59_p7, %s411_s8, %s61_s15  }
   0xd   : > { %p105_p10 = pnand %p277_p6, %p104_p9 }
   0xe   : > { %p124_p11 = scmp.lt.s32.totalorder (!%p105_p10), %s415_s9, 1  ;;  %s121_s25 = sand.u32 (!%p105_p10), 1, %s407_s7  }
   0xf   : > { %108 = sbr.rel (%p105_p10) target bundleno = 53 (0x35), region = 24  ;;  %s278_s26 = sshll.u32 (!%p105_p10), %s121_s25, 1 }
  0x10   : > { %s123_s27 = scalar_lea.vmem (!%p105_p10), [#allocation2], %s278_s26  ;;  %s289_s29 = sshll.u32 (!%p105_p10), %s415_s9, 5 }
  0x11   : > { %s193_s28 = sshll.u32 (!%p105_p10), %s123_s27, 4  ;;  %s191_s3 = scalar_lea.hbm (!%p105_p10), %s537_s1, %s289_s29  ;;  %s194_s28 = int_to_ptr.vmem [resolvable:$true] %s193_s28 }
  0x12   : > { %s177_s4 = scalar_lea.sflag (!%p105_p10), [#allocation3], %s121_s25  ;;  %s347_s5 = scalar_lea.vmem (!%p105_p10), %s194_s28, 32 }
  0x13   : > { %p348_p12 = scmp.ne.s32.totalorder (!%p105_p10), %s194_s28, %s347_s5  ;;  %s426_s12 = smov (!%p105_p10), [#allocation2]  }
  0x14   : > { %s125_s20 = scalar_select %p124_p11, %s415_s9, 1  ;;  %v425_v0 = vmov 1966171168   ;;  %v159_v2 = vlaneseq }
  0x15   : > { %v157_v1 = vunpack.c.l.s4 %v425_v0  ;;  %p349_p13 = pnand %p348_p12, %p477_p4  ;;  %s351_s13 = sshll.u32 %s426_s12, 4  ;;  %s352_s13 = int_to_ptr.vmem [resolvable:$false] %s351_s13 }
  0x16   : > { %s290_s21 = smul.u32 24, %s125_s20  ;;  %v160_v9 = vshrl.u32 %v159_v2, 7  ;;  %vm173_vm0 = vcmp.lt.s32.totalorder %v159_v2, 256  ;;  %s353_s15 = scalar_lea.vmem %s352_s13, 64 }
  0x17   : > { %v158_v8 = vunpack.c.0.s8 %v157_v1  ;;  %p350_p0 = pneg %p349_p13  ;;  %p354_p1 = scmp.lt.s32.totalorder %s194_s28, %s352_s13 }
  0x18   : > { %s128_s24 = scalar_lea.vmem %s536_s0, %s290_s21  ;;  %p355_p2 = scmp.lt.s32.totalorder %s353_s15, %s347_s5 }
  0x19   : > { %v133_v3 = vld [vmem:[%s128_s24] sm:$0x77]  ;;  %v280_v4 = vld [vmem:[%s128_s24 + $0x8] sm:$0x77]  ;;  %v281_v5 = vld [vmem:[%s128_s24 + $0x10] sm:$0x77]  ;;  %v161_v13 = vsub.s32 %v158_v8, %v160_v9 }
  0x1a   : > { %v139_v6 = vmax.f32 %v133_v3, %v280_v4  ;;  %p356_p3 = por %p355_p2, %p354_p1 }
  0x1c   : > { %v145_v7 = vmax.f32 %v139_v6, %v281_v5  ;;  %p357_p5 = pnand %p356_p3, %p350_p0 }
  0x1e   : > { %v282_v10 = vrot.slane %v145_v7, 9  ;;  %v283_v11 = vrot.slane %v145_v7, 10 }
  0x20   : > { %v150_v12 = vmax.f32 %v145_v7, %v282_v10 }
  0x22   : > { %v154_v14 = vmax.f32 %v150_v12, %v283_v11 }
  0x24   : > { %v162_v15 = vrot.slane %v154_v14, %v161_v13 }
  0x26   : > { %v169_v16 = vrot.slane %v162_v15, %v161_v13 }
  0x28   : > { %175 = vst.msk [vmem:[%s123_s27] sm:$0x3] %vm173_vm0, %v169_v16 }
  0x29   : > { %360 = shalt.err (!%p357_p5)
}
  0x2a   : > { %s361_s9 = scalar_lea.hbm %s191_s3, 32  ;;  %s365_s21 = scalar_lea.hbm %s537_s1, 64 }
  0x2b   : > { %p362_p6 = scmp.ne.s32.totalorder %s191_s3, %s361_s9  ;;  %p366_p10 = scmp.lt.s32.totalorder %s191_s3, %s537_s1 }
  0x2c   : > { %p367_p11 = scmp.lt.s32.totalorder %s365_s21, %s361_s9 }
  0x2d   : > { %p363_p7 = pnand %p362_p6, %p477_p4 }
  0x2e   : > { %p368_p12 = por %p367_p11, %p366_p10 }
  0x2f   : > { %p364_p9 = pneg %p363_p7 }
  0x31   : > { %p369_p13 = pnand %p368_p12, %p364_p9 }
  0x33   : > { %372 = shalt.err (!%p369_p13)
}
  0x34   : > { %291 = dma.vmem_to_hbm [thread:$0]  (%p477_p4), %s194_s28, 32, %s191_s3, %s177_s4  }
  0x35 PF: > { %p297_p0 = scmp.ge.s32.totalorder %s423_s11, 2  ;;  %s205_s24 = sand.u32 1, %s403_s6  }
  0x36   : > { %s206_s25 = scalar_lea.sflag [#allocation3], %s205_s24 }
  0x37   : > { %p294_p1 = pnand %p297_p0, %p484_p8 }
  0x39   : > { %p295_p2 = pneg %p294_p1 }
  0x3b   : > { %398 = dma.done.wait (%p295_p2), %s206_s25, 32  }
  0x3c   : > { %400 = vsyncadd (%p295_p2), %s206_s25, 4294967264  ;;  %s14_s11 = sadd.s32 1, %s423_s11   ;;  %s540_s6 = smov %s407_s7 }
  0x3d   : > { %p11_p3 = scmp.ge.s32.totalorder %s14_s11, 4   ;;  %s541_s7 = smov %s411_s8 }
  0x3e   : > { %s542_s8 = smov %s490_s19  ;;  %s543_s9 = smov %s419_s10 }
  0x3f   : > { %s544_s10 = smov %s546_s14  ;;  %13 = sbr.rel (!%p11_p3) target bundleno = 4 (0x4), region = 62 }
  0x44   :  { %211 = vsyncpa [#allocation3], 1 }
  0x45   :  { %213 = vsyncpa [#allocation3 + $0x1], 1 }

// kernel: _lambda_.14
= control target key start
LH: loop header
LB: loop body
LE: loop exit
PB: predicated region body
PF: predicated region fallthrough
CT: control target
= control target key end

     0   :  { %s3365_s12 = smov 0   ;;  %s3367_s13 = smov 0   ;;  %s4355_s0 = inlined_call_operand.vmem [shape: bf16[2,5,5,256], index: 0, kind: input, shape index: {}]   ;;  %s4356_s1 = inlined_call_operand.vmem [shape: bf16[2304,256], index: 1, kind: input, shape index: {}]   ;;  %s4357_s2 = inlined_call_operand.vmem [shape: f32[1,256], index: 2, kind: input, shape index: {}]   ;;  %s4358_s3 = inlined_call_operand.vmem [shape: f32[2,3,3,256], index: 3, kind: output, shape index: {}]  }
   0x1   :  { %s3369_s14 = smov 0   ;;  %s3371_s15 = smov 0  }
   0x2   :  { %s3373_s16 = smov 0  }
   0x3 LB: > { %s22_s17 = sadd.s32 1, %s3335_s14  ;;  %s25_s18 = sadd.s32 1, %s3339_s15  ;;  %s3343_s16 = sphi %s3373_s16, %s13_s16   ;;  %s3339_s15 = sphi %s3371_s15, %s4362_s15   ;;  %s3335_s14 = sphi %s3369_s14, %s4361_s14   ;;  %s3331_s13 = sphi %s3367_s13, %s4360_s13   ;;  %s3327_s12 = sphi %s3365_s12, %s4359_s12  }
   0x4   : > { %p23_p0 = scmp.ge.s32.totalorder %s22_s17, 3  ;;  %p2518_p1 = scmp.ge.s32.totalorder %s3343_s16, 1 }
   0x5   : > { %p151_p2 = scmp.lt.s32.totalorder %s3343_s16, 7 }
   0x6   : > { %s4364_s17 = smov (%p23_p0, %s22_s17), 0  ;;  %s4366_s18 = smov (!%p23_p0, %s25_s18), %s3339_s15 }
   0x7   : > { %p152_p3 = pnand %p2518_p1, %p151_p2  ;;  %p27_p4 = scmp.ge.s32.totalorder %s4366_s18, 2 }
   0x8   : > { %p179_p5 = scmp.lt.s32.totalorder (!%p152_p3), %s3331_s13, 1  ;;  %s2824_s25 = sshll.u32 (!%p152_p3), %s3327_s12, 3 }
   0x9   : > { %s4368_s18 = smov (%p27_p4, %s4366_s18), 0  ;;  %155 = sbr.rel (%p152_p3) target bundleno = 539 (0x21b), region = 32 }
   0xa   : > { %p186_p6 = scmp.lt.s32.totalorder (!%p152_p3), %s3327_s12, 2 }
   0xe   : > { %v2867_v0 = vld [vmem:[%s4356_s1 + $0x174] ss:$8 sps:$4 sm:$0xff]   ;;  %v2871_v2 = vld [vmem:[%s4356_s1 + $0x170] ss:$8 sps:$4 sm:$0xff]   ;;  %v2873_v4 = vld [vmem:[%s4356_s1 + $0x164] ss:$8 sps:$4 sm:$0xff]  }
   0xf   : > { %v2869_v1 = vld [vmem:[%s4356_s1 + $0x74] ss:$8 sps:$4 sm:$0xff]   ;;  %442 = vmatprep.subr.bf16.mxu0 %v2867_v0  ;;  %v2872_v3 = vld [vmem:[%s4356_s1 + $0x70] ss:$8 sps:$4 sm:$0xff]   ;;  %v2875_v5 = vld [vmem:[%s4356_s1 + $0x64] ss:$8 sps:$4 sm:$0xff]  }
  0x10   : > { %645 = vmatprep.subr.bf16.mxu1 %v2869_v1  ;;  %443 = vmatpush1.bf16.msra.mxu0 %v2871_v2  ;;  %v2877_v6 = vld [vmem:[%s4356_s1 + $0x160] ss:$8 sps:$4 sm:$0xff]   ;;  %v2879_v8 = vld [vmem:[%s4356_s1 + $0x154] ss:$8 sps:$4 sm:$0xff]   ;;  %v2883_v10 = vld [vmem:[%s4356_s1 + $0x150] ss:$8 sps:$4 sm:$0xff]  }
  0x11   : > { %646 = vmatpush1.bf16.msra.mxu1 %v2872_v3  ;;  %444 = vmatprep.subr.bf16.mxu0 %v2873_v4  ;;  %v2878_v7 = vld [vmem:[%s4356_s1 + $0x60] ss:$8 sps:$4 sm:$0xff]   ;;  %v2881_v9 = vld [vmem:[%s4356_s1 + $0x54] ss:$8 sps:$4 sm:$0xff]   ;;  %v2884_v11 = vld [vmem:[%s4356_s1 + $0x50] ss:$8 sps:$4 sm:$0xff]  }
  0x12   : > { %647 = vmatprep.subr.bf16.mxu1 %v2875_v5  ;;  %v2885_v12 = vld [vmem:[%s4356_s1 + $0x144] ss:$8 sps:$4 sm:$0xff]   ;;  %v2889_v14 = vld [vmem:[%s4356_s1 + $0x140] ss:$8 sps:$4 sm:$0xff]   ;;  %v2891_v16 = vld [vmem:[%s4356_s1 + $0x134] ss:$8 sps:$4 sm:$0xff]  }
  0x13   : > { %v2887_v13 = vld [vmem:[%s4356_s1 + $0x44] ss:$8 sps:$4 sm:$0xff]   ;;  %v2890_v15 = vld [vmem:[%s4356_s1 + $0x40] ss:$8 sps:$4 sm:$0xff]   ;;  %v2893_v17 = vld [vmem:[%s4356_s1 + $0x34] ss:$8 sps:$4 sm:$0xff]  }
  0x14   : > { %445 = vmatpush1.bf16.msra.mxu0 %v2877_v6  ;;  %v2895_v18 = vld [vmem:[%s4356_s1 + $0x130] ss:$8 sps:$4 sm:$0xff]   ;;  %v2897_v20 = vld [vmem:[%s4356_s1 + $0x124] ss:$8 sps:$4 sm:$0xff]   ;;  %v2901_v22 = vld [vmem:[%s4356_s1 + $0x120] ss:$8 sps:$4 sm:$0xff]  }
  0x15   : > { %648 = vmatpush1.bf16.msra.mxu1 %v2878_v7  ;;  %446 = vmatprep.subr.bf16.mxu0 %v2879_v8  ;;  %v2896_v19 = vld [vmem:[%s4356_s1 + $0x30] ss:$8 sps:$4 sm:$0xff]   ;;  %v2899_v21 = vld [vmem:[%s4356_s1 + $0x24] ss:$8 sps:$4 sm:$0xff]   ;;  %v2902_v23 = vld [vmem:[%s4356_s1 + $0x20] ss:$8 sps:$4 sm:$0xff]  }
  0x16   : > { %649 = vmatprep.subr.bf16.mxu1 %v2881_v9  ;;  %v2903_v24 = vld [vmem:[%s4356_s1 + $0x114] ss:$8 sps:$4 sm:$0xff]   ;;  %v2907_v26 = vld [vmem:[%s4356_s1 + $0x110] ss:$8 sps:$4 sm:$0xff]   ;;  %v2909_v28 = vld [vmem:[%s4356_s1 + $0x104] ss:$8 sps:$4 sm:$0xff]  }
  0x17   : > { %v2905_v25 = vld [vmem:[%s4356_s1 + $0x14] ss:$8 sps:$4 sm:$0xff]   ;;  %v2908_v27 = vld [vmem:[%s4356_s1 + $0x10] ss:$8 sps:$4 sm:$0xff]   ;;  %v2911_v29 = vld [vmem:[%s4356_s1 + $0x4] ss:$8 sps:$4 sm:$0xff]  }
  0x18   : > { %447 = vmatpush1.bf16.msra.mxu0 %v2883_v10  ;;  %v2913_v30 = vld [vmem:[%s4356_s1 + $0x100] ss:$8 sps:$4 sm:$0xff]   ;;  %v2915_v32 = vld [vmem:[%s4356_s1 + $0x1f4] ss:$8 sps:$4 sm:$0xff]   ;;  %s4370_s13 = smov (!%p179_p5, %s3331_s13), 1  ;;  %s4372_s12 = smov (!%p186_p6, %s3327_s12), 2 }
  0x19   : > { %650 = vmatpush1.bf16.msra.mxu1 %v2884_v11  ;;  %448 = vmatprep.subr.bf16.mxu0 %v2885_v12  ;;  %v2914_v31 = vld [vmem:[%s4356_s1] ss:$8 sps:$4 sm:$0xff]   ;;  %v2917_v33 = vld [vmem:[%s4356_s1 + $0xf4] ss:$8 sps:$4 sm:$0xff]   ;;  %v2919_v34 = vld [vmem:[%s4356_s1 + $0x1f0] ss:$8 sps:$4 sm:$0xff]  }
  0x1a   : > { %651 = vmatprep.subr.bf16.mxu1 %v2887_v13  ;;  %v2920_v35 = vld [vmem:[%s4356_s1 + $0xf0] ss:$8 sps:$4 sm:$0xff]   ;;  %v2921_v36 = vld [vmem:[%s4356_s1 + $0x1e4] ss:$8 sps:$4 sm:$0xff]   ;;  %s2825_s6 = smul.u32 40, %s4370_s13  ;;  %s2520_s11 = sshll.u32 %s4372_s12, 1 }
  0x1b   : > { %v2923_v37 = vld [vmem:[%s4356_s1 + $0xe4] ss:$8 sps:$4 sm:$0xff]   ;;  %v2925_v38 = vld [vmem:[%s4356_s1 + $0x1e0] ss:$8 sps:$4 sm:$0xff]   ;;  %v2927_v40 = vld [vmem:[%s4356_s1 + $0x1d4] ss:$8 sps:$4 sm:$0xff]  }
  0x1c   : > { %449 = vmatpush1.bf16.msra.mxu0 %v2889_v14  ;;  %v2926_v39 = vld [vmem:[%s4356_s1 + $0xe0] ss:$8 sps:$4 sm:$0xff]   ;;  %s183_s24 = scalar_lea.vmem %s4355_s0, %s2825_s6  ;;  %v2929_v41 = vld [vmem:[%s4356_s1 + $0xd4] ss:$8 sps:$4 sm:$0xff]   ;;  %v2931_v42 = vld [vmem:[%s4356_s1 + $0x1d0] ss:$8 sps:$4 sm:$0xff]  }
  0x1d   : > { %652 = vmatpush1.bf16.msra.mxu1 %v2890_v15  ;;  %450 = vmatprep.subr.bf16.mxu0 %v2891_v16  ;;  %v2932_v43 = vld [vmem:[%s4356_s1 + $0xd0] ss:$8 sps:$4 sm:$0xff]   ;;  %s3540_s5 = scalar_lea.vmem %s183_s24, %s2824_s25  ;;  %v2933_v44 = vld [vmem:[%s4356_s1 + $0x1c4] ss:$8 sps:$4 sm:$0xff]   ;;  %v2937_v47 = vld [vmem:[%s4356_s1 + $0x1c0] ss:$8 sps:$4 sm:$0xff]  }
  0x1e   : > { %653 = vmatprep.subr.bf16.mxu1 %v2893_v17  ;;  %v2935_v45 = vld [vmem:[%s4356_s1 + $0xc4] ss:$8 sps:$4 sm:$0xff]   ;;  %v2938_v49 = vld [vmem:[%s4356_s1 + $0xc0] ss:$8 sps:$4 sm:$0xff]   ;;  %v2939_v50 = vld [vmem:[%s4356_s1 + $0x1b4] ss:$8 sps:$4 sm:$0xff]  }
  0x1f   : > { %v196_v46 = vld [vmem:[%s3540_s5] sm:$0x77]  ;;  %v2941_v51 = vld [vmem:[%s4356_s1 + $0xb4] ss:$8 sps:$4 sm:$0xff]   ;;  %v2943_v54 = vld [vmem:[%s4356_s1 + $0x1b0] ss:$8 sps:$4 sm:$0xff]  }
  0x20   : > { %451 = vmatpush1.bf16.msra.mxu0 %v2895_v18  ;;  %v3552_v48 = vcombine.high %v196_v46, %v196_v46  ;;  %v2944_v55 = vld [vmem:[%s4356_s1 + $0xb0] ss:$8 sps:$4 sm:$0xff]   ;;  %v2945_v57 = vld [vmem:[%s4356_s1 + $0x1a4] ss:$8 sps:$4 sm:$0xff]   ;;  %v2949_v60 = vld [vmem:[%s4356_s1 + $0x1a0] ss:$8 sps:$4 sm:$0xff]   ;;  %v3584_v62 = vcombine.low %v196_v46, %v196_v46 }
  0x21   : > { %654 = vmatpush1.bf16.msra.mxu1 %v2896_v19  ;;  %452 = vmatprep.subr.bf16.mxu0 %v2897_v20  ;;  %v2947_v58 = vld [vmem:[%s4356_s1 + $0xa4] ss:$8 sps:$4 sm:$0xff]   ;;  %v2950_v61 = vld [vmem:[%s4356_s1 + $0xa0] ss:$8 sps:$4 sm:$0xff]   ;;  %v2951_v63 = vld [vmem:[%s4356_s1 + $0x194] ss:$8 sps:$4 sm:$0xff]  }
  0x22   : > { %655 = vmatprep.subr.bf16.mxu1 %v2899_v21  ;;  %v274_v52 = vshrl.u32 %v3552_v48, 16  ;;  %v276_v53 = vshll.u32 %v3552_v48, 16  ;;  %677 = vmatprep.mubr.bf16.mxu1 %v3552_v48  ;;  %v2953_v0 = vld [vmem:[%s4356_s1 + $0x94] ss:$8 sps:$4 sm:$0xff]   ;;  %v2955_v1 = vld [vmem:[%s4356_s1 + $0x190] ss:$8 sps:$4 sm:$0xff]  }
  0x23   : > { %v2956_v2 = vld [vmem:[%s4356_s1 + $0x90] ss:$8 sps:$4 sm:$0xff]   ;;  %v269_v3 = vshll.u32 %v3584_v62, 16  ;;  %v2957_v4 = vld [vmem:[%s4356_s1 + $0x184] ss:$8 sps:$4 sm:$0xff]   ;;  %v267_v8 = vshrl.u32 %v3584_v62, 16 }
  0x24   : > { %453 = vmatpush1.bf16.msra.mxu0 %v2901_v22  ;;  %v278_v56 = vrot.slane %v276_v53, 1  ;;  %v2959_v5 = vld [vmem:[%s4356_s1 + $0x84] ss:$8 sps:$4 sm:$0xff]   ;;  %v2961_v6 = vld [vmem:[%s4356_s1 + $0x180] ss:$8 sps:$4 sm:$0xff]   ;;  %v719_v17 = vrot.slane %v3552_v48, 1 }
  0x25   : > { %656 = vmatpush1.bf16.msra.mxu1 %v2902_v23  ;;  %454 = vmatprep.subr.bf16.mxu0 %v2903_v24  ;;  %v2962_v7 = vld [vmem:[%s4356_s1 + $0x80] ss:$8 sps:$4 sm:$0xff]   ;;  %v271_v9 = vrot.slane %v269_v3, 1  ;;  %v2967_v10 = vld [vmem:[%s4356_s1 + $0x274] ss:$8 sps:$4 sm:$0xff]   ;;  %s2826_s10 = smul.u32 6, %s4370_s13 }
  0x26   : > { %657 = vmatprep.subr.bf16.mxu1 %v2905_v25  ;;  %v279_v59 = vor.u32 %v278_v56, %v274_v52  ;;  %v2970_v11 = vld [vmem:[%s4356_s1 + $0x374] ss:$8 sps:$4 sm:$0xff]   ;;  %v2965_v13 = vld [vmem:[%s4356_s1 + $0x270] ss:$8 sps:$4 sm:$0xff]   ;;  %v2973_v15 = vld [vmem:[%s4356_s1 + $0x264] ss:$8 sps:$4 sm:$0xff]  }
  0x27   : > { %v272_v12 = vor.u32 %v271_v9, %v267_v8  ;;  %v2968_v14 = vld [vmem:[%s4356_s1 + $0x370] ss:$8 sps:$4 sm:$0xff]   ;;  %v2976_v16 = vld [vmem:[%s4356_s1 + $0x364] ss:$8 sps:$4 sm:$0xff]   ;;  %v2971_v18 = vld [vmem:[%s4356_s1 + $0x260] ss:$8 sps:$4 sm:$0xff]   ;;  %s190_s19 = sadd.s32 %s2826_s10, %s2520_s11 }
  0x28   : > { %455 = vmatpush1.bf16.msra.mxu0 %v2907_v26  ;;  %474 = vmatprep.mubr.bf16.mxu0 %v279_v59  ;;  %v2974_v19 = vld [vmem:[%s4356_s1 + $0x360] ss:$8 sps:$4 sm:$0xff]   ;;  %v2979_v20 = vld [vmem:[%s4356_s1 + $0x254] ss:$8 sps:$4 sm:$0xff]   ;;  %v2977_v22 = vld [vmem:[%s4356_s1 + $0x250] ss:$8 sps:$4 sm:$0xff]  }
  0x29   : > { %658 = vmatpush1.bf16.msra.mxu1 %v2908_v27  ;;  %456 = vmatprep.subr.bf16.mxu0 %v2909_v28  ;;  %v2982_v21 = vld [vmem:[%s4356_s1 + $0x354] ss:$8 sps:$4 sm:$0xff]   ;;  %v2980_v23 = vld [vmem:[%s4356_s1 + $0x350] ss:$8 sps:$4 sm:$0xff]   ;;  %v2985_v24 = vld [vmem:[%s4356_s1 + $0x244] ss:$8 sps:$4 sm:$0xff]  }
  0x2a   : > { %659 = vmatprep.subr.bf16.mxu1 %v2911_v29  ;;  %v2988_v25 = vld [vmem:[%s4356_s1 + $0x344] ss:$8 sps:$4 sm:$0xff]   ;;  %v2983_v26 = vld [vmem:[%s4356_s1 + $0x240] ss:$8 sps:$4 sm:$0xff]   ;;  %v2991_v28 = vld [vmem:[%s4356_s1 + $0x234] ss:$8 sps:$4 sm:$0xff]  }
  0x2b   : > { %v2986_v27 = vld [vmem:[%s4356_s1 + $0x340] ss:$8 sps:$4 sm:$0xff]   ;;  %v2994_v29 = vld [vmem:[%s4356_s1 + $0x334] ss:$8 sps:$4 sm:$0xff]   ;;  %v3013_v48 = vld [vmem:[%s4356_s1 + $0x2f0] ss:$8 sps:$4 sm:$0xff]  }
  0x2c   : > { %457 = vmatpush1.bf16.msra.mxu0 %v2913_v30  ;;  %v2989_v30 = vld [vmem:[%s4356_s1 + $0x230] ss:$8 sps:$4 sm:$0xff]   ;;  %v3015_v46 = vld [vmem:[%s4356_s1 + $0x2f4] ss:$8 sps:$4 sm:$0xff]   ;;  %v3019_v52 = vld [vmem:[%s4356_s1 + $0x2e0] ss:$8 sps:$4 sm:$0xff]  }
  0x2d   : > { %660 = vmatpush1.bf16.msra.mxu1 %v2914_v31  ;;  %458 = vmatprep.subr.bf16.mxu0 %v2915_v32  ;;  %v2992_v31 = vld [vmem:[%s4356_s1 + $0x330] ss:$8 sps:$4 sm:$0xff]   ;;  %v2997_v32 = vld [vmem:[%s4356_s1 + $0x224] ss:$8 sps:$4 sm:$0xff]   ;;  %v3022_v53 = vld [vmem:[%s4356_s1 + $0x3e0] ss:$8 sps:$4 sm:$0xff]  }
  0x2e   : > { %661 = vmatprep.subr.bf16.mxu1 %v2917_v33  ;;  %v3000_v33 = vld [vmem:[%s4356_s1 + $0x324] ss:$8 sps:$4 sm:$0xff]   ;;  %v3025_v56 = vld [vmem:[%s4356_s1 + $0x2d0] ss:$8 sps:$4 sm:$0xff]   ;;  %v3054_v8 = vld [vmem:[%s4356_s1 + $0x394] ss:$8 sps:$4 sm:$0xff]  }
  0x2f   : > { %v3036_v59 = vld [vmem:[%s4356_s1 + $0x3c4] ss:$8 sps:$4 sm:$0xff]   ;;  %v3049_v9 = vld [vmem:[%s4356_s1 + $0x290] ss:$8 sps:$4 sm:$0xff]   ;;  %s2521_s20 = sshll.u32 %s190_s19, 2 }
  0x30   : > { %459 = vmatpush2.bf16.msra.mxu0 %v2919_v34  ;;  %v2995_v34 = vld [vmem:[%s4356_s1 + $0x220] ss:$8 sps:$4 sm:$0xff]   ;;  %v3045_v3 = vld [vmem:[%s4356_s1 + $0x2a4] ss:$8 sps:$4 sm:$0xff]   ;;  %s192_s13 = scalar_lea.vmem %s4358_s3, %s2521_s20 }
  0x31   : > { %662 = vmatpush2.bf16.msra.mxu1 %v2920_v35  ;;  %460 = vmatprep.subr.bf16.mxu0 %v2921_v36  ;;  %v2998_v35 = vld [vmem:[%s4356_s1 + $0x320] ss:$8 sps:$4 sm:$0xff]   ;;  %v3003_v36 = vld [vmem:[%s4356_s1 + $0x214] ss:$8 sps:$4 sm:$0xff]  }
  0x32   : > { %663 = vmatprep.subr.bf16.mxu1 %v2923_v37  ;;  %v3006_v37 = vld [vmem:[%s4356_s1 + $0x314] ss:$8 sps:$4 sm:$0xff]  }
  0x34   : > { %461 = vmatpush2.bf16.msra.mxu0 %v2925_v38  ;;  %v3001_v38 = vld [vmem:[%s4356_s1 + $0x210] ss:$8 sps:$4 sm:$0xff]  }
  0x35   : > { %664 = vmatpush2.bf16.msra.mxu1 %v2926_v39  ;;  %462 = vmatprep.subr.bf16.mxu0 %v2927_v40  ;;  %v3004_v39 = vld [vmem:[%s4356_s1 + $0x310] ss:$8 sps:$4 sm:$0xff]   ;;  %v3699_v40 = vld [vmem:[%s3540_s5 + $0x8] sm:$0x77] }
  0x36   : > { %665 = vmatprep.subr.bf16.mxu1 %v2929_v41  ;;  %v3009_v41 = vld [vmem:[%s4356_s1 + $0x204] ss:$8 sps:$4 sm:$0xff]  }
  0x38   : > { %463 = vmatpush2.bf16.msra.mxu0 %v2931_v42  ;;  %v3012_v42 = vld [vmem:[%s4356_s1 + $0x304] ss:$8 sps:$4 sm:$0xff]  }
  0x39   : > { %666 = vmatpush2.bf16.msra.mxu1 %v2932_v43  ;;  %464 = vmatprep.subr.bf16.mxu0 %v2933_v44  ;;  %v3709_v43 = vcombine.high %v3699_v40, %v3699_v40  ;;  %v3007_v44 = vld [vmem:[%s4356_s1 + $0x200] ss:$8 sps:$4 sm:$0xff]  }
  0x3a   : > { %667 = vmatprep.subr.bf16.mxu1 %v2935_v45  ;;  %v3010_v45 = vld [vmem:[%s4356_s1 + $0x300] ss:$8 sps:$4 sm:$0xff]  }
  0x3c   : > { %465 = vmatpush2.bf16.msra.mxu0 %v2937_v47  ;;  %v3018_v47 = vld [vmem:[%s4356_s1 + $0x3f4] ss:$8 sps:$4 sm:$0xff]  }
  0x3d   : > { %668 = vmatpush2.bf16.msra.mxu1 %v2938_v49  ;;  %466 = vmatprep.subr.bf16.mxu0 %v2939_v50  ;;  %v3016_v49 = vld [vmem:[%s4356_s1 + $0x3f0] ss:$8 sps:$4 sm:$0xff]   ;;  %v3021_v50 = vld [vmem:[%s4356_s1 + $0x2e4] ss:$8 sps:$4 sm:$0xff]  }
  0x3e   : > { %669 = vmatprep.subr.bf16.mxu1 %v2941_v51  ;;  %v3024_v51 = vld [vmem:[%s4356_s1 + $0x3e4] ss:$8 sps:$4 sm:$0xff]  }
  0x40   : > { %467 = vmatpush2.bf16.msra.mxu0 %v2943_v54  ;;  %v3027_v54 = vld [vmem:[%s4356_s1 + $0x2d4] ss:$8 sps:$4 sm:$0xff]  }
  0x41   : > { %670 = vmatpush2.bf16.msra.mxu1 %v2944_v55  ;;  %468 = vmatprep.subr.bf16.mxu0 %v2945_v57  ;;  %v3030_v55 = vld [vmem:[%s4356_s1 + $0x3d4] ss:$8 sps:$4 sm:$0xff]   ;;  %v3028_v57 = vld [vmem:[%s4356_s1 + $0x3d0] ss:$8 sps:$4 sm:$0xff]  }
  0x42   : > { %671 = vmatprep.subr.bf16.mxu1 %v2947_v58  ;;  %v3033_v58 = vld [vmem:[%s4356_s1 + $0x2c4] ss:$8 sps:$4 sm:$0xff]  }
  0x44   : > { %469 = vmatpush2.bf16.msra.mxu0 %v2949_v60  ;;  %v3031_v60 = vld [vmem:[%s4356_s1 + $0x2c0] ss:$8 sps:$4 sm:$0xff]  }
  0x45   : > { %672 = vmatpush2.bf16.msra.mxu1 %v2950_v61  ;;  %470 = vmatprep.subr.bf16.mxu0 %v2951_v63  ;;  %v3034_v61 = vld [vmem:[%s4356_s1 + $0x3c0] ss:$8 sps:$4 sm:$0xff]   ;;  %v3039_v63 = vld [vmem:[%s4356_s1 + $0x2b4] ss:$8 sps:$4 sm:$0xff]  }
  0x46   : > { %673 = vmatprep.subr.bf16.mxu1 %v2953_v0  ;;  %v3042_v0 = vld [vmem:[%s4356_s1 + $0x3b4] ss:$8 sps:$4 sm:$0xff]  }
  0x48   : > { %471 = vmatpush2.bf16.msra.mxu0 %v2955_v1  ;;  %v3037_v1 = vld [vmem:[%s4356_s1 + $0x2b0] ss:$8 sps:$4 sm:$0xff]  }
  0x49   : > { %674 = vmatpush2.bf16.msra.mxu1 %v2956_v2  ;;  %472 = vmatprep.subr.bf16.mxu0 %v2957_v4  ;;  %v3040_v2 = vld [vmem:[%s4356_s1 + $0x3b0] ss:$8 sps:$4 sm:$0xff]   ;;  %v3048_v4 = vld [vmem:[%s4356_s1 + $0x3a4] ss:$8 sps:$4 sm:$0xff]  }
  0x4a   : > { %675 = vmatprep.subr.bf16.mxu1 %v2959_v5  ;;  %v3043_v5 = vld [vmem:[%s4356_s1 + $0x2a0] ss:$8 sps:$4 sm:$0xff]  }
  0x4c   : > { %473 = vmatpush2.bf16.msra.mxu0 %v2961_v6  ;;  %v3046_v6 = vld [vmem:[%s4356_s1 + $0x3a0] ss:$8 sps:$4 sm:$0xff]  }
  0x4d   : > { %676 = vmatpush2.bf16.msra.mxu1 %v2962_v7  ;;  %882 = vmatprep.subr.bf16.mxu0 %v2967_v10  ;;  %v3051_v7 = vld [vmem:[%s4356_s1 + $0x294] ss:$8 sps:$4 sm:$0xff]   ;;  %v3052_v10 = vld [vmem:[%s4356_s1 + $0x390] ss:$8 sps:$4 sm:$0xff]  }
  0x4e   : > { %1129 = vmatprep.subr.bf16.mxu1 %v2970_v11  ;;  %v3057_v11 = vld [vmem:[%s4356_s1 + $0x284] ss:$8 sps:$4 sm:$0xff]  }
  0x4f   : > { %475 = vmatmul.mubr.bf16.vlgmr.msra.gmra.mxu0 %v272_v12  ;;  %v3060_v12 = vld [vmem:[%s4356_s1 + $0x384] ss:$8 sps:$4 sm:$0xff]  }
  0x50   : > { %678 = vmatmul.mubr.bf16.vlgmr.msra.gmra.mxu1 %v3584_v62  ;;  %883 = vmatpush1.bf16.msra.mxu0 %v2965_v13  ;;  %v1214_v13 = vshll.u32 %v3709_v43, 16 }
  0x51   : > { %1130 = vmatpush1.bf16.msra.mxu1 %v2968_v14  ;;  %884 = vmatprep.subr.bf16.mxu0 %v2973_v15  ;;  %v3055_v14 = vld [vmem:[%s4356_s1 + $0x280] ss:$8 sps:$4 sm:$0xff]  }
  0x52   : > { %1131 = vmatprep.subr.bf16.mxu1 %v2976_v16  ;;  %914 = vmatprep.mubr.bf16.mxu0 %v719_v17  ;;  %v3058_v15 = vld [vmem:[%s4356_s1 + $0x380] ss:$8 sps:$4 sm:$0xff]   ;;  %v3063_v16 = vld [vmem:[%s4356_s1 + $0x474] ss:$8 sps:$4 sm:$0xff]  }
  0x53   : > { %1161 = vmatprep.mubr.bf16.mxu1 %v3709_v43  ;;  %v3068_v17 = vld [vmem:[%s4356_s1 + $0x574] ss:$8 sps:$4 sm:$0xff]  }
  0x54   : > { %885 = vmatpush1.bf16.msra.mxu0 %v2971_v18  ;;  %v1212_v18 = vshrl.u32 %v3709_v43, 16 }
  0x55   : > { %1132 = vmatpush1.bf16.msra.mxu1 %v2974_v19  ;;  %886 = vmatprep.subr.bf16.mxu0 %v2979_v20  ;;  %v1216_v19 = vrot.slane %v1214_v13, 1  ;;  %v718_v20 = vrot.slane %v3584_v62, 1  ;;  %v3071_v62 = vld [vmem:[%s4356_s1 + $0x464] ss:$8 sps:$4 sm:$0xff]   ;;  %v3144_v13 = vld [vmem:[%s4356_s1 + $0x5a0] ss:$8 sps:$4 sm:$0xff]  }
  0x56   : > { %1133 = vmatprep.subr.bf16.mxu1 %v2982_v21  ;;  %v3061_v21 = vld [vmem:[%s4356_s1 + $0x470] ss:$8 sps:$4 sm:$0xff]  }
  0x58   : > { %887 = vmatpush1.bf16.msra.mxu0 %v2977_v22  ;;  %v3828_v22 = vcombine.low %v3699_v40, %v3699_v40  ;;  %v3090_v40 = vld [vmem:[%s4356_s1 + $0x530] ss:$8 sps:$4 sm:$0xff]  }
  0x59   : > { %1134 = vmatpush1.bf16.msra.mxu1 %v2980_v23  ;;  %888 = vmatprep.subr.bf16.mxu0 %v2985_v24  ;;  %v3066_v23 = vld [vmem:[%s4356_s1 + $0x570] ss:$8 sps:$4 sm:$0xff]   ;;  %v3074_v24 = vld [vmem:[%s4356_s1 + $0x564] ss:$8 sps:$4 sm:$0xff]  }
  0x5a   : > { %1135 = vmatprep.subr.bf16.mxu1 %v2988_v25  ;;  %v1217_v25 = vor.u32 %v1216_v19, %v1212_v18  ;;  %v3147_v18 = vld [vmem:[%s4356_s1 + $0x490] ss:$8 sps:$4 sm:$0xff]  }
  0x5b   : > { %v3150_v19 = vld [vmem:[%s4356_s1 + $0x590] ss:$8 sps:$4 sm:$0xff]  }
  0x5c   : > { %889 = vmatpush1.bf16.msra.mxu0 %v2983_v26  ;;  %v1456_v26 = vrot.slane %v3709_v43, 1  ;;  %v3093_v43 = vld [vmem:[%s4356_s1 + $0x420] ss:$8 sps:$4 sm:$0xff]  }
  0x5d   : > { %1136 = vmatpush1.bf16.msra.mxu1 %v2986_v27  ;;  %890 = vmatprep.subr.bf16.mxu0 %v2991_v28  ;;  %v3069_v27 = vld [vmem:[%s4356_s1 + $0x460] ss:$8 sps:$4 sm:$0xff]  }
  0x5e   : > { %1137 = vmatprep.subr.bf16.mxu1 %v2994_v29  ;;  %v3072_v28 = vld [vmem:[%s4356_s1 + $0x560] ss:$8 sps:$4 sm:$0xff]   ;;  %v3077_v29 = vld [vmem:[%s4356_s1 + $0x454] ss:$8 sps:$4 sm:$0xff]  }
  0x60   : > { %891 = vmatpush1.bf16.msra.mxu0 %v2989_v30  ;;  %v3080_v30 = vld [vmem:[%s4356_s1 + $0x554] ss:$8 sps:$4 sm:$0xff]  }
  0x61   : > { %1138 = vmatpush1.bf16.msra.mxu1 %v2992_v31  ;;  %892 = vmatprep.subr.bf16.mxu0 %v2997_v32  ;;  %v3075_v31 = vld [vmem:[%s4356_s1 + $0x450] ss:$8 sps:$4 sm:$0xff]  }
  0x62   : > { %1139 = vmatprep.subr.bf16.mxu1 %v3000_v33  ;;  %v3078_v32 = vld [vmem:[%s4356_s1 + $0x550] ss:$8 sps:$4 sm:$0xff]   ;;  %v3083_v33 = vld [vmem:[%s4356_s1 + $0x444] ss:$8 sps:$4 sm:$0xff]  }
  0x64   : > { %893 = vmatpush1.bf16.msra.mxu0 %v2995_v34  ;;  %v3086_v34 = vld [vmem:[%s4356_s1 + $0x544] ss:$8 sps:$4 sm:$0xff]  }
  0x65   : > { %1140 = vmatpush1.bf16.msra.mxu1 %v2998_v35  ;;  %894 = vmatprep.subr.bf16.mxu0 %v3003_v36  ;;  %v3081_v35 = vld [vmem:[%s4356_s1 + $0x440] ss:$8 sps:$4 sm:$0xff]  }
  0x66   : > { %1141 = vmatprep.subr.bf16.mxu1 %v3006_v37  ;;  %v3084_v36 = vld [vmem:[%s4356_s1 + $0x540] ss:$8 sps:$4 sm:$0xff]   ;;  %v3089_v37 = vld [vmem:[%s4356_s1 + $0x434] ss:$8 sps:$4 sm:$0xff]  }
  0x68   : > { %895 = vmatpush1.bf16.msra.mxu0 %v3001_v38  ;;  %v3092_v38 = vld [vmem:[%s4356_s1 + $0x534] ss:$8 sps:$4 sm:$0xff]  }
  0x69   : > { %1142 = vmatpush1.bf16.msra.mxu1 %v3004_v39  ;;  %896 = vmatprep.subr.bf16.mxu0 %v3009_v41  ;;  %v3087_v39 = vld [vmem:[%s4356_s1 + $0x430] ss:$8 sps:$4 sm:$0xff]   ;;  %v3095_v41 = vld [vmem:[%s4356_s1 + $0x424] ss:$8 sps:$4 sm:$0xff]  }
  0x6a   : > { %1143 = vmatprep.subr.bf16.mxu1 %v3012_v42  ;;  %v3098_v42 = vld [vmem:[%s4356_s1 + $0x524] ss:$8 sps:$4 sm:$0xff]  }
  0x6c   : > { %897 = vmatpush1.bf16.msra.mxu0 %v3007_v44  ;;  %v3096_v44 = vld [vmem:[%s4356_s1 + $0x520] ss:$8 sps:$4 sm:$0xff]  }
  0x6d   : > { %1144 = vmatpush1.bf16.msra.mxu1 %v3010_v45  ;;  %898 = vmatprep.subr.bf16.mxu0 %v3015_v46  ;;  %v3101_v45 = vld [vmem:[%s4356_s1 + $0x414] ss:$8 sps:$4 sm:$0xff]  }
  0x6e   : > { %1145 = vmatprep.subr.bf16.mxu1 %v3018_v47  ;;  %v3104_v46 = vld [vmem:[%s4356_s1 + $0x514] ss:$8 sps:$4 sm:$0xff]   ;;  %v3099_v47 = vld [vmem:[%s4356_s1 + $0x410] ss:$8 sps:$4 sm:$0xff]  }
  0x70   : > { %899 = vmatpush2.bf16.msra.mxu0 %v3013_v48  ;;  %v3102_v48 = vld [vmem:[%s4356_s1 + $0x510] ss:$8 sps:$4 sm:$0xff]  }
  0x71   : > { %1146 = vmatpush2.bf16.msra.mxu1 %v3016_v49  ;;  %900 = vmatprep.subr.bf16.mxu0 %v3021_v50  ;;  %v3107_v49 = vld [vmem:[%s4356_s1 + $0x404] ss:$8 sps:$4 sm:$0xff]  }
  0x72   : > { %1147 = vmatprep.subr.bf16.mxu1 %v3024_v51  ;;  %v3110_v50 = vld [vmem:[%s4356_s1 + $0x504] ss:$8 sps:$4 sm:$0xff]   ;;  %v3105_v51 = vld [vmem:[%s4356_s1 + $0x400] ss:$8 sps:$4 sm:$0xff]  }
  0x74   : > { %901 = vmatpush2.bf16.msra.mxu0 %v3019_v52  ;;  %v3108_v52 = vld [vmem:[%s4356_s1 + $0x500] ss:$8 sps:$4 sm:$0xff]  }
  0x75   : > { %1148 = vmatpush2.bf16.msra.mxu1 %v3022_v53  ;;  %902 = vmatprep.subr.bf16.mxu0 %v3027_v54  ;;  %v3113_v53 = vld [vmem:[%s4356_s1 + $0x4f4] ss:$8 sps:$4 sm:$0xff]  }
  0x76   : > { %1149 = vmatprep.subr.bf16.mxu1 %v3030_v55  ;;  %v3116_v54 = vld [vmem:[%s4356_s1 + $0x5f4] ss:$8 sps:$4 sm:$0xff]   ;;  %v3111_v55 = vld [vmem:[%s4356_s1 + $0x4f0] ss:$8 sps:$4 sm:$0xff]  }
  0x78   : > { %903 = vmatpush2.bf16.msra.mxu0 %v3025_v56  ;;  %v3114_v56 = vld [vmem:[%s4356_s1 + $0x5f0] ss:$8 sps:$4 sm:$0xff]  }
  0x79   : > { %1150 = vmatpush2.bf16.msra.mxu1 %v3028_v57  ;;  %904 = vmatprep.subr.bf16.mxu0 %v3033_v58  ;;  %v3119_v57 = vld [vmem:[%s4356_s1 + $0x4e4] ss:$8 sps:$4 sm:$0xff]  }
  0x7a   : > { %1151 = vmatprep.subr.bf16.mxu1 %v3036_v59  ;;  %v3122_v58 = vld [vmem:[%s4356_s1 + $0x5e4] ss:$8 sps:$4 sm:$0xff]   ;;  %v3117_v59 = vld [vmem:[%s4356_s1 + $0x4e0] ss:$8 sps:$4 sm:$0xff]  }
  0x7c   : > { %905 = vmatpush2.bf16.msra.mxu0 %v3031_v60  ;;  %v3120_v60 = vld [vmem:[%s4356_s1 + $0x5e0] ss:$8 sps:$4 sm:$0xff]  }
  0x7d   : > { %1152 = vmatpush2.bf16.msra.mxu1 %v3034_v61  ;;  %906 = vmatprep.subr.bf16.mxu0 %v3039_v63  ;;  %v3125_v61 = vld [vmem:[%s4356_s1 + $0x4d4] ss:$8 sps:$4 sm:$0xff]  }
  0x7e   : > { %1153 = vmatprep.subr.bf16.mxu1 %v3042_v0  ;;  %v3128_v63 = vld [vmem:[%s4356_s1 + $0x5d4] ss:$8 sps:$4 sm:$0xff]   ;;  %v3123_v0 = vld [vmem:[%s4356_s1 + $0x4d0] ss:$8 sps:$4 sm:$0xff]  }
  0x80   : > { %907 = vmatpush2.bf16.msra.mxu0 %v3037_v1  ;;  %v3126_v1 = vld [vmem:[%s4356_s1 + $0x5d0] ss:$8 sps:$4 sm:$0xff]  }
  0x81   : > { %1154 = vmatpush2.bf16.msra.mxu1 %v3040_v2  ;;  %908 = vmatprep.subr.bf16.mxu0 %v3045_v3  ;;  %v3131_v2 = vld [vmem:[%s4356_s1 + $0x4c4] ss:$8 sps:$4 sm:$0xff]  }
  0x82   : > { %1155 = vmatprep.subr.bf16.mxu1 %v3048_v4  ;;  %v3134_v3 = vld [vmem:[%s4356_s1 + $0x5c4] ss:$8 sps:$4 sm:$0xff]   ;;  %v3129_v4 = vld [vmem:[%s4356_s1 + $0x4c0] ss:$8 sps:$4 sm:$0xff]  }
  0x84   : > { %909 = vmatpush2.bf16.msra.mxu0 %v3043_v5  ;;  %v3132_v5 = vld [vmem:[%s4356_s1 + $0x5c0] ss:$8 sps:$4 sm:$0xff]  }
  0x85   : > { %1156 = vmatpush2.bf16.msra.mxu1 %v3046_v6  ;;  %910 = vmatprep.subr.bf16.mxu0 %v3051_v7  ;;  %v3137_v6 = vld [vmem:[%s4356_s1 + $0x4b4] ss:$8 sps:$4 sm:$0xff]  }
  0x86   : > { %1157 = vmatprep.subr.bf16.mxu1 %v3054_v8  ;;  %v3140_v7 = vld [vmem:[%s4356_s1 + $0x5b4] ss:$8 sps:$4 sm:$0xff]   ;;  %v3135_v8 = vld [vmem:[%s4356_s1 + $0x4b0] ss:$8 sps:$4 sm:$0xff]  }
  0x88   : > { %911 = vmatpush2.bf16.msra.mxu0 %v3049_v9  ;;  %v3138_v9 = vld [vmem:[%s4356_s1 + $0x5b0] ss:$8 sps:$4 sm:$0xff]  }
  0x89   : > { %1158 = vmatpush2.bf16.msra.mxu1 %v3052_v10  ;;  %912 = vmatprep.subr.bf16.mxu0 %v3057_v11  ;;  %v3143_v10 = vld [vmem:[%s4356_s1 + $0x4a4] ss:$8 sps:$4 sm:$0xff]  }
  0x8a   : > { %1159 = vmatprep.subr.bf16.mxu1 %v3060_v12  ;;  %v3146_v11 = vld [vmem:[%s4356_s1 + $0x5a4] ss:$8 sps:$4 sm:$0xff]   ;;  %v3141_v12 = vld [vmem:[%s4356_s1 + $0x4a0] ss:$8 sps:$4 sm:$0xff]  }
  0x8c   : > { %913 = vmatpush2.bf16.msra.mxu0 %v3055_v14  ;;  %v3992_v14 = vld [vmem:[%s3540_s5 + $0x10] sm:$0x77] }
  0x8d   : > { %1160 = vmatpush2.bf16.msra.mxu1 %v3058_v15  ;;  %1380 = vmatprep.subr.bf16.mxu0 %v3063_v16  ;;  %v3149_v15 = vld [vmem:[%s4356_s1 + $0x494] ss:$8 sps:$4 sm:$0xff]  }
  0x8e   : > { %1619 = vmatprep.subr.bf16.mxu1 %v3068_v17  ;;  %v3152_v16 = vld [vmem:[%s4356_s1 + $0x594] ss:$8 sps:$4 sm:$0xff]   ;;  %v4002_v17 = vcombine.high %v3992_v14, %v3992_v14 }
  0x8f   : > { %915 = vmatmul.mubr.bf16.vlgmr.msra.gmra.mxu0 %v718_v20  ;;  %v1207_v20 = vshll.u32 %v3828_v22, 16 }
  0x90   : > { %1162 = vmatmul.mubr.bf16.vlgmr.msra.gmra.mxu1 %v3828_v22  ;;  %1381 = vmatpush1.bf16.msra.mxu0 %v3061_v21  ;;  %v3155_v21 = vld [vmem:[%s4356_s1 + $0x484] ss:$8 sps:$4 sm:$0xff]  }
  0x91   : > { %1620 = vmatpush1.bf16.msra.mxu1 %v3066_v23  ;;  %1382 = vmatprep.subr.bf16.mxu0 %v3071_v62  ;;  %v3158_v23 = vld [vmem:[%s4356_s1 + $0x584] ss:$8 sps:$4 sm:$0xff]   ;;  %v1205_v62 = vshrl.u32 %v3828_v22, 16 }
  0x92   : > { %1621 = vmatprep.subr.bf16.mxu1 %v3074_v24  ;;  %1412 = vmatprep.mubr.bf16.mxu0 %v1217_v25  ;;  %v1951_v24 = vshll.u32 %v4002_v17, 16  ;;  %v3153_v25 = vld [vmem:[%s4356_s1 + $0x480] ss:$8 sps:$4 sm:$0xff]  }
  0x93   : > { %1651 = vmatprep.mubr.bf16.mxu1 %v1456_v26  ;;  %v3156_v26 = vld [vmem:[%s4356_s1 + $0x580] ss:$8 sps:$4 sm:$0xff]  }
  0x94   : > { %1383 = vmatpush1.bf16.msra.mxu0 %v3069_v27  ;;  %v1209_v27 = vrot.slane %v1207_v20, 1  ;;  %v3236_v20 = vld [vmem:[%s4356_s1 + $0x7b4] ss:$8 sps:$4 sm:$0xff]  }
  0x95   : > { %1622 = vmatpush1.bf16.msra.mxu1 %v3072_v28  ;;  %1384 = vmatprep.subr.bf16.mxu0 %v3077_v29  ;;  %v3161_v28 = vld [vmem:[%s4356_s1 + $0x674] ss:$8 sps:$4 sm:$0xff]  }
  0x96   : > { %1623 = vmatprep.subr.bf16.mxu1 %v3080_v30  ;;  %v3164_v29 = vld [vmem:[%s4356_s1 + $0x774] ss:$8 sps:$4 sm:$0xff]   ;;  %v1949_v30 = vshrl.u32 %v4002_v17, 16 }
  0x98   : > { %1385 = vmatpush1.bf16.msra.mxu0 %v3075_v31  ;;  %v1953_v31 = vrot.slane %v1951_v24, 1  ;;  %v3242_v24 = vld [vmem:[%s4356_s1 + $0x7a4] ss:$8 sps:$4 sm:$0xff]  }
  0x99   : > { %1624 = vmatpush1.bf16.msra.mxu1 %v3078_v32  ;;  %1386 = vmatprep.subr.bf16.mxu0 %v3083_v33  ;;  %v1210_v32 = vor.u32 %v1209_v27, %v1205_v62  ;;  %v3159_v33 = vld [vmem:[%s4356_s1 + $0x670] ss:$8 sps:$4 sm:$0xff]   ;;  %v3239_v62 = vld [vmem:[%s4356_s1 + $0x6a4] ss:$8 sps:$4 sm:$0xff]   ;;  %v3240_v27 = vld [vmem:[%s4356_s1 + $0x7a0] ss:$8 sps:$4 sm:$0xff]  }
  0x9a   : > { %1625 = vmatprep.subr.bf16.mxu1 %v3086_v34  ;;  %v1455_v34 = vrot.slane %v3828_v22, 1  ;;  %v3165_v22 = vld [vmem:[%s4356_s1 + $0x660] ss:$8 sps:$4 sm:$0xff]  }
  0x9c   : > { %1387 = vmatpush1.bf16.msra.mxu0 %v3081_v35  ;;  %v3162_v35 = vld [vmem:[%s4356_s1 + $0x770] ss:$8 sps:$4 sm:$0xff]  }
  0x9d   : > { %1626 = vmatpush1.bf16.msra.mxu1 %v3084_v36  ;;  %1388 = vmatprep.subr.bf16.mxu0 %v3089_v37  ;;  %v3167_v36 = vld [vmem:[%s4356_s1 + $0x664] ss:$8 sps:$4 sm:$0xff]  }
  0x9e   : > { %1627 = vmatprep.subr.bf16.mxu1 %v3092_v38  ;;  %v3170_v37 = vld [vmem:[%s4356_s1 + $0x764] ss:$8 sps:$4 sm:$0xff]   ;;  %v1954_v38 = vor.u32 %v1953_v31, %v1949_v30  ;;  %v3243_v30 = vld [vmem:[%s4356_s1 + $0x690] ss:$8 sps:$4 sm:$0xff]  }
  0x9f   : > { %v3246_v31 = vld [vmem:[%s4356_s1 + $0x790] ss:$8 sps:$4 sm:$0xff]  }
  0xa0   : > { %1389 = vmatpush1.bf16.msra.mxu0 %v3087_v39  ;;  %v3168_v39 = vld [vmem:[%s4356_s1 + $0x760] ss:$8 sps:$4 sm:$0xff]  }
  0xa1   : > { %1628 = vmatpush1.bf16.msra.mxu1 %v3090_v40  ;;  %1390 = vmatprep.subr.bf16.mxu0 %v3095_v41  ;;  %v3173_v40 = vld [vmem:[%s4356_s1 + $0x654] ss:$8 sps:$4 sm:$0xff]  }
  0xa2   : > { %1629 = vmatprep.subr.bf16.mxu1 %v3098_v42  ;;  %v3176_v41 = vld [vmem:[%s4356_s1 + $0x754] ss:$8 sps:$4 sm:$0xff]   ;;  %v3171_v42 = vld [vmem:[%s4356_s1 + $0x650] ss:$8 sps:$4 sm:$0xff]  }
  0xa4   : > { %1391 = vmatpush1.bf16.msra.mxu0 %v3093_v43  ;;  %v3174_v43 = vld [vmem:[%s4356_s1 + $0x750] ss:$8 sps:$4 sm:$0xff]  }
  0xa5   : > { %1630 = vmatpush1.bf16.msra.mxu1 %v3096_v44  ;;  %1392 = vmatprep.subr.bf16.mxu0 %v3101_v45  ;;  %v3179_v44 = vld [vmem:[%s4356_s1 + $0x644] ss:$8 sps:$4 sm:$0xff]  }
  0xa6   : > { %1631 = vmatprep.subr.bf16.mxu1 %v3104_v46  ;;  %v3182_v45 = vld [vmem:[%s4356_s1 + $0x744] ss:$8 sps:$4 sm:$0xff]   ;;  %v3177_v46 = vld [vmem:[%s4356_s1 + $0x640] ss:$8 sps:$4 sm:$0xff]  }
  0xa8   : > { %1393 = vmatpush1.bf16.msra.mxu0 %v3099_v47  ;;  %v3180_v47 = vld [vmem:[%s4356_s1 + $0x740] ss:$8 sps:$4 sm:$0xff]  }
  0xa9   : > { %1632 = vmatpush1.bf16.msra.mxu1 %v3102_v48  ;;  %1394 = vmatprep.subr.bf16.mxu0 %v3107_v49  ;;  %v3185_v48 = vld [vmem:[%s4356_s1 + $0x634] ss:$8 sps:$4 sm:$0xff]  }
  0xaa   : > { %1633 = vmatprep.subr.bf16.mxu1 %v3110_v50  ;;  %v3188_v49 = vld [vmem:[%s4356_s1 + $0x734] ss:$8 sps:$4 sm:$0xff]   ;;  %v3183_v50 = vld [vmem:[%s4356_s1 + $0x630] ss:$8 sps:$4 sm:$0xff]  }
  0xac   : > { %1395 = vmatpush1.bf16.msra.mxu0 %v3105_v51  ;;  %v3186_v51 = vld [vmem:[%s4356_s1 + $0x730] ss:$8 sps:$4 sm:$0xff]  }
  0xad   : > { %1634 = vmatpush1.bf16.msra.mxu1 %v3108_v52  ;;  %1396 = vmatprep.subr.bf16.mxu0 %v3113_v53  ;;  %v3191_v52 = vld [vmem:[%s4356_s1 + $0x624] ss:$8 sps:$4 sm:$0xff]  }
  0xae   : > { %1635 = vmatprep.subr.bf16.mxu1 %v3116_v54  ;;  %v3194_v53 = vld [vmem:[%s4356_s1 + $0x724] ss:$8 sps:$4 sm:$0xff]   ;;  %v3189_v54 = vld [vmem:[%s4356_s1 + $0x620] ss:$8 sps:$4 sm:$0xff]  }
  0xb0   : > { %1397 = vmatpush2.bf16.msra.mxu0 %v3111_v55  ;;  %v3192_v55 = vld [vmem:[%s4356_s1 + $0x720] ss:$8 sps:$4 sm:$0xff]  }
  0xb1   : > { %1636 = vmatpush2.bf16.msra.mxu1 %v3114_v56  ;;  %1398 = vmatprep.subr.bf16.mxu0 %v3119_v57  ;;  %v3197_v56 = vld [vmem:[%s4356_s1 + $0x614] ss:$8 sps:$4 sm:$0xff]  }
  0xb2   : > { %1637 = vmatprep.subr.bf16.mxu1 %v3122_v58  ;;  %v3200_v57 = vld [vmem:[%s4356_s1 + $0x714] ss:$8 sps:$4 sm:$0xff]   ;;  %v3195_v58 = vld [vmem:[%s4356_s1 + $0x610] ss:$8 sps:$4 sm:$0xff]  }
  0xb4   : > { %1399 = vmatpush2.bf16.msra.mxu0 %v3117_v59  ;;  %v3198_v59 = vld [vmem:[%s4356_s1 + $0x710] ss:$8 sps:$4 sm:$0xff]  }
  0xb5   : > { %1638 = vmatpush2.bf16.msra.mxu1 %v3120_v60  ;;  %1400 = vmatprep.subr.bf16.mxu0 %v3125_v61  ;;  %v3203_v60 = vld [vmem:[%s4356_s1 + $0x604] ss:$8 sps:$4 sm:$0xff]  }
  0xb6   : > { %1639 = vmatprep.subr.bf16.mxu1 %v3128_v63  ;;  %v3206_v61 = vld [vmem:[%s4356_s1 + $0x704] ss:$8 sps:$4 sm:$0xff]   ;;  %v3201_v63 = vld [vmem:[%s4356_s1 + $0x600] ss:$8 sps:$4 sm:$0xff]  }
  0xb8   : > { %1401 = vmatpush2.bf16.msra.mxu0 %v3123_v0  ;;  %v3204_v0 = vld [vmem:[%s4356_s1 + $0x700] ss:$8 sps:$4 sm:$0xff]  }
  0xb9   : > { %1640 = vmatpush2.bf16.msra.mxu1 %v3126_v1  ;;  %1402 = vmatprep.subr.bf16.mxu0 %v3131_v2  ;;  %v3209_v1 = vld [vmem:[%s4356_s1 + $0x6f4] ss:$8 sps:$4 sm:$0xff]  }
  0xba   : > { %1641 = vmatprep.subr.bf16.mxu1 %v3134_v3  ;;  %v3212_v2 = vld [vmem:[%s4356_s1 + $0x7f4] ss:$8 sps:$4 sm:$0xff]   ;;  %v3207_v3 = vld [vmem:[%s4356_s1 + $0x6f0] ss:$8 sps:$4 sm:$0xff]  }
  0xbc   : > { %1403 = vmatpush2.bf16.msra.mxu0 %v3129_v4  ;;  %v3210_v4 = vld [vmem:[%s4356_s1 + $0x7f0] ss:$8 sps:$4 sm:$0xff]  }
  0xbd   : > { %1642 = vmatpush2.bf16.msra.mxu1 %v3132_v5  ;;  %1404 = vmatprep.subr.bf16.mxu0 %v3137_v6  ;;  %v3215_v5 = vld [vmem:[%s4356_s1 + $0x6e4] ss:$8 sps:$4 sm:$0xff]  }
  0xbe   : > { %1643 = vmatprep.subr.bf16.mxu1 %v3140_v7  ;;  %v3218_v6 = vld [vmem:[%s4356_s1 + $0x7e4] ss:$8 sps:$4 sm:$0xff]   ;;  %v3213_v7 = vld [vmem:[%s4356_s1 + $0x6e0] ss:$8 sps:$4 sm:$0xff]  }
  0xc0   : > { %1405 = vmatpush2.bf16.msra.mxu0 %v3135_v8  ;;  %v3216_v8 = vld [vmem:[%s4356_s1 + $0x7e0] ss:$8 sps:$4 sm:$0xff]  }
  0xc1   : > { %1644 = vmatpush2.bf16.msra.mxu1 %v3138_v9  ;;  %1406 = vmatprep.subr.bf16.mxu0 %v3143_v10  ;;  %v3221_v9 = vld [vmem:[%s4356_s1 + $0x6d4] ss:$8 sps:$4 sm:$0xff]  }
  0xc2   : > { %1645 = vmatprep.subr.bf16.mxu1 %v3146_v11  ;;  %v3224_v10 = vld [vmem:[%s4356_s1 + $0x7d4] ss:$8 sps:$4 sm:$0xff]   ;;  %v3219_v11 = vld [vmem:[%s4356_s1 + $0x6d0] ss:$8 sps:$4 sm:$0xff]  }
  0xc4   : > { %1407 = vmatpush2.bf16.msra.mxu0 %v3141_v12  ;;  %v3222_v12 = vld [vmem:[%s4356_s1 + $0x7d0] ss:$8 sps:$4 sm:$0xff]  }
  0xc5   : > { %1646 = vmatpush2.bf16.msra.mxu1 %v3144_v13  ;;  %1408 = vmatprep.subr.bf16.mxu0 %v3149_v15  ;;  %v3227_v13 = vld [vmem:[%s4356_s1 + $0x6c4] ss:$8 sps:$4 sm:$0xff]  }
  0xc6   : > { %1647 = vmatprep.subr.bf16.mxu1 %v3152_v16  ;;  %v3230_v15 = vld [vmem:[%s4356_s1 + $0x7c4] ss:$8 sps:$4 sm:$0xff]   ;;  %v3225_v16 = vld [vmem:[%s4356_s1 + $0x6c0] ss:$8 sps:$4 sm:$0xff]  }
  0xc8   : > { %1409 = vmatpush2.bf16.msra.mxu0 %v3147_v18  ;;  %v3228_v18 = vld [vmem:[%s4356_s1 + $0x7c0] ss:$8 sps:$4 sm:$0xff]  }
  0xc9   : > { %1648 = vmatpush2.bf16.msra.mxu1 %v3150_v19  ;;  %1410 = vmatprep.subr.bf16.mxu0 %v3155_v21  ;;  %v3233_v19 = vld [vmem:[%s4356_s1 + $0x6b4] ss:$8 sps:$4 sm:$0xff]   ;;  %v3231_v21 = vld [vmem:[%s4356_s1 + $0x6b0] ss:$8 sps:$4 sm:$0xff]  }
  0xca   : > { %1649 = vmatprep.subr.bf16.mxu1 %v3158_v23  ;;  %v3234_v23 = vld [vmem:[%s4356_s1 + $0x7b0] ss:$8 sps:$4 sm:$0xff]  }
  0xcc   : > { %1411 = vmatpush2.bf16.msra.mxu0 %v3153_v25  ;;  %v4192_v25 = vcombine.low %v3992_v14, %v3992_v14  ;;  %v3248_v14 = vld [vmem:[%s4356_s1 + $0x794] ss:$8 sps:$4 sm:$0xff]  }
  0xcd   : > { %1650 = vmatpush2.bf16.msra.mxu1 %v3156_v26  ;;  %1866 = vmatprep.subr.bf16.mxu0 %v3161_v28  ;;  %v3237_v26 = vld [vmem:[%s4356_s1 + $0x6a0] ss:$8 sps:$4 sm:$0xff]   ;;  %v3245_v28 = vld [vmem:[%s4356_s1 + $0x694] ss:$8 sps:$4 sm:$0xff]  }
  0xce   : > { %2117 = vmatprep.subr.bf16.mxu1 %v3164_v29  ;;  %v1944_v29 = vshll.u32 %v4192_v25, 16 }
  0xcf   : > { %1413 = vmatmul.mubr.bf16.vlgmr.msra.gmra.mxu0 %v1210_v32  ;;  %v3251_v32 = vld [vmem:[%s4356_s1 + $0x684] ss:$8 sps:$4 sm:$0xff]  }
  0xd0   : > { %1652 = vmatmul.mubr.bf16.vlgmr.msra.gmra.mxu1 %v1455_v34  ;;  %1867 = vmatpush1.bf16.msra.mxu0 %v3159_v33  ;;  %v3254_v33 = vld [vmem:[%s4356_s1 + $0x784] ss:$8 sps:$4 sm:$0xff]   ;;  %v1942_v34 = vshrl.u32 %v4192_v25, 16 }
  0xd1   : > { %2118 = vmatpush1.bf16.msra.mxu1 %v3162_v35  ;;  %1868 = vmatprep.subr.bf16.mxu0 %v3167_v36  ;;  %v1946_v35 = vrot.slane %v1944_v29, 1  ;;  %v3249_v36 = vld [vmem:[%s4356_s1 + $0x680] ss:$8 sps:$4 sm:$0xff]  }
  0xd2   : > { %2119 = vmatprep.subr.bf16.mxu1 %v3170_v37  ;;  %1898 = vmatprep.mubr.bf16.mxu0 %v4002_v17  ;;  %v3252_v37 = vld [vmem:[%s4356_s1 + $0x780] ss:$8 sps:$4 sm:$0xff]  }
  0xd3   : > { %2149 = vmatprep.mubr.bf16.mxu1 %v1954_v38  ;;  %v3259_v38 = vld [vmem:[%s4356_s1 + $0x874] ss:$8 sps:$4 sm:$0xff]  }
  0xd4   : > { %1869 = vmatpush1.bf16.msra.mxu0 %v3165_v22  ;;  %v1947_v22 = vor.u32 %v1946_v35, %v1942_v34 }
  0xd5   : > { %2120 = vmatpush1.bf16.msra.mxu1 %v3168_v39  ;;  %1870 = vmatprep.subr.bf16.mxu0 %v3173_v40  ;;  %v3257_v39 = vld [vmem:[%s4356_s1 + $0x870] ss:$8 sps:$4 sm:$0xff]   ;;  %v2193_v40 = vrot.slane %v4002_v17, 1 }
  0xd6   : > { %2121 = vmatprep.subr.bf16.mxu1 %v3176_v41  ;;  %v3262_v41 = vld [vmem:[%s4356_s1 + $0x864] ss:$8 sps:$4 sm:$0xff]  }
  0xd8   : > { %1871 = vmatpush1.bf16.msra.mxu0 %v3171_v42 }
  0xd9   : > { %2122 = vmatpush1.bf16.msra.mxu1 %v3174_v43  ;;  %1872 = vmatprep.subr.bf16.mxu0 %v3179_v44 }
  0xda   : > { %2123 = vmatprep.subr.bf16.mxu1 %v3182_v45  ;;  %v3260_v45 = vld [vmem:[%s4356_s1 + $0x860] ss:$8 sps:$4 sm:$0xff]  }
  0xdc   : > { %1873 = vmatpush1.bf16.msra.mxu0 %v3177_v46 }
  0xdd   : > { %2124 = vmatpush1.bf16.msra.mxu1 %v3180_v47  ;;  %1874 = vmatprep.subr.bf16.mxu0 %v3185_v48  ;;  %v3265_v47 = vld [vmem:[%s4356_s1 + $0x854] ss:$8 sps:$4 sm:$0xff]  }
  0xde   : > { %2125 = vmatprep.subr.bf16.mxu1 %v3188_v49 }
  0xe0   : > { %1875 = vmatpush1.bf16.msra.mxu0 %v3183_v50 }
  0xe1   : > { %2126 = vmatpush1.bf16.msra.mxu1 %v3186_v51  ;;  %1876 = vmatprep.subr.bf16.mxu0 %v3191_v52  ;;  %v3263_v51 = vld [vmem:[%s4356_s1 + $0x850] ss:$8 sps:$4 sm:$0xff]  }
  0xe2   : > { %2127 = vmatprep.subr.bf16.mxu1 %v3194_v53  ;;  %v3268_v53 = vld [vmem:[%s4356_s1 + $0x844] ss:$8 sps:$4 sm:$0xff]  }
  0xe4   : > { %1877 = vmatpush1.bf16.msra.mxu0 %v3189_v54 }
  0xe5   : > { %2128 = vmatpush1.bf16.msra.mxu1 %v3192_v55  ;;  %1878 = vmatprep.subr.bf16.mxu0 %v3197_v56  ;;  %v3266_v55 = vld [vmem:[%s4356_s1 + $0x840] ss:$8 sps:$4 sm:$0xff]   ;;  %v3271_v56 = vld [vmem:[%s4356_s1 + $0x834] ss:$8 sps:$4 sm:$0xff]  }
  0xe6   : > { %2129 = vmatprep.subr.bf16.mxu1 %v3200_v57  ;;  %v3269_v57 = vld [vmem:[%s4356_s1 + $0x830] ss:$8 sps:$4 sm:$0xff]  }
  0xe8   : > { %1879 = vmatpush1.bf16.msra.mxu0 %v3195_v58  ;;  %v3274_v58 = vld [vmem:[%s4356_s1 + $0x824] ss:$8 sps:$4 sm:$0xff]  }
  0xe9   : > { %2130 = vmatpush1.bf16.msra.mxu1 %v3198_v59  ;;  %1880 = vmatprep.subr.bf16.mxu0 %v3203_v60  ;;  %v3272_v59 = vld [vmem:[%s4356_s1 + $0x820] ss:$8 sps:$4 sm:$0xff]   ;;  %v3277_v60 = vld [vmem:[%s4356_s1 + $0x814] ss:$8 sps:$4 sm:$0xff]  }
  0xea   : > { %2131 = vmatprep.subr.bf16.mxu1 %v3206_v61  ;;  %v3275_v61 = vld [vmem:[%s4356_s1 + $0x810] ss:$8 sps:$4 sm:$0xff]  }
  0xec   : > { %1881 = vmatpush1.bf16.msra.mxu0 %v3201_v63  ;;  %v3280_v63 = vld [vmem:[%s4356_s1 + $0x804] ss:$8 sps:$4 sm:$0xff]  }
  0xed   : > { %2132 = vmatpush1.bf16.msra.mxu1 %v3204_v0  ;;  %1882 = vmatprep.subr.bf16.mxu0 %v3209_v1  ;;  %v3278_v0 = vld [vmem:[%s4356_s1 + $0x800] ss:$8 sps:$4 sm:$0xff]   ;;  %v3283_v1 = vld [vmem:[%s4356_s1 + $0x8f4] ss:$8 sps:$4 sm:$0xff]  }
  0xee   : > { %2133 = vmatprep.subr.bf16.mxu1 %v3212_v2  ;;  %v3281_v2 = vld [vmem:[%s4356_s1 + $0x8f0] ss:$8 sps:$4 sm:$0xff]  }
  0xf0   : > { %1883 = vmatpush2.bf16.msra.mxu0 %v3207_v3  ;;  %v3286_v3 = vld [vmem:[%s4356_s1 + $0x8e4] ss:$8 sps:$4 sm:$0xff]  }
  0xf1   : > { %2134 = vmatpush2.bf16.msra.mxu1 %v3210_v4  ;;  %1884 = vmatprep.subr.bf16.mxu0 %v3215_v5  ;;  %v3284_v4 = vld [vmem:[%s4356_s1 + $0x8e0] ss:$8 sps:$4 sm:$0xff]   ;;  %v3289_v5 = vld [vmem:[%s4356_s1 + $0x8d4] ss:$8 sps:$4 sm:$0xff]  }
  0xf2   : > { %2135 = vmatprep.subr.bf16.mxu1 %v3218_v6  ;;  %v3287_v6 = vld [vmem:[%s4356_s1 + $0x8d0] ss:$8 sps:$4 sm:$0xff]  }
  0xf4   : > { %1885 = vmatpush2.bf16.msra.mxu0 %v3213_v7  ;;  %v3292_v7 = vld [vmem:[%s4356_s1 + $0x8c4] ss:$8 sps:$4 sm:$0xff]  }
  0xf5   : > { %2136 = vmatpush2.bf16.msra.mxu1 %v3216_v8  ;;  %1886 = vmatprep.subr.bf16.mxu0 %v3221_v9  ;;  %v3290_v8 = vld [vmem:[%s4356_s1 + $0x8c0] ss:$8 sps:$4 sm:$0xff]   ;;  %v3295_v9 = vld [vmem:[%s4356_s1 + $0x8b4] ss:$8 sps:$4 sm:$0xff]  }
  0xf6   : > { %2137 = vmatprep.subr.bf16.mxu1 %v3224_v10  ;;  %v3293_v10 = vld [vmem:[%s4356_s1 + $0x8b0] ss:$8 sps:$4 sm:$0xff]  }
  0xf8   : > { %1887 = vmatpush2.bf16.msra.mxu0 %v3219_v11  ;;  %v3298_v11 = vld [vmem:[%s4356_s1 + $0x8a4] ss:$8 sps:$4 sm:$0xff]  }
  0xf9   : > { %2138 = vmatpush2.bf16.msra.mxu1 %v3222_v12  ;;  %1888 = vmatprep.subr.bf16.mxu0 %v3227_v13  ;;  %v3296_v12 = vld [vmem:[%s4356_s1 + $0x8a0] ss:$8 sps:$4 sm:$0xff]   ;;  %v3301_v13 = vld [vmem:[%s4356_s1 + $0x894] ss:$8 sps:$4 sm:$0xff]  }
  0xfa   : > { %2139 = vmatprep.subr.bf16.mxu1 %v3230_v15  ;;  %v3299_v15 = vld [vmem:[%s4356_s1 + $0x890] ss:$8 sps:$4 sm:$0xff]  }
  0xfc   : > { %1889 = vmatpush2.bf16.msra.mxu0 %v3225_v16  ;;  %v3304_v16 = vld [vmem:[%s4356_s1 + $0x884] ss:$8 sps:$4 sm:$0xff]  }
  0xfd   : > { %2140 = vmatpush2.bf16.msra.mxu1 %v3228_v18  ;;  %1890 = vmatprep.subr.bf16.mxu0 %v3233_v19  ;;  %v3302_v18 = vld [vmem:[%s4356_s1 + $0x880] ss:$8 sps:$4 sm:$0xff]   ;;  %v2192_v19 = vrot.slane %v4192_v25, 1 }
  0xfe   : > { %2141 = vmatprep.subr.bf16.mxu1 %v3236_v20 }
 0x100   : > { %1891 = vmatpush2.bf16.msra.mxu0 %v3231_v21 }
 0x101   : > { %2142 = vmatpush2.bf16.msra.mxu1 %v3234_v23  ;;  %1892 = vmatprep.subr.bf16.mxu0 %v3239_v62 }
 0x102   : > { %2143 = vmatprep.subr.bf16.mxu1 %v3242_v24 }
 0x104   : > { %1893 = vmatpush2.bf16.msra.mxu0 %v3237_v26 }
 0x105   : > { %2144 = vmatpush2.bf16.msra.mxu1 %v3240_v27  ;;  %1894 = vmatprep.subr.bf16.mxu0 %v3245_v28 }
 0x106   : > { %2145 = vmatprep.subr.bf16.mxu1 %v3248_v14 }
 0x108   : > { %1895 = vmatpush2.bf16.msra.mxu0 %v3243_v30 }
 0x109   : > { %2146 = vmatpush2.bf16.msra.mxu1 %v3246_v31  ;;  %1896 = vmatprep.subr.bf16.mxu0 %v3251_v32 }
 0x10a   : > { %2147 = vmatprep.subr.bf16.mxu1 %v3254_v33 }
 0x10c   : > { %1897 = vmatpush2.bf16.msra.mxu0 %v3249_v36 }
 0x10d   : > { %2148 = vmatpush2.bf16.msra.mxu1 %v3252_v37  ;;  %2356 = vmatprep.subr.bf16.mxu0 %v3259_v38 }
 0x10f   : > { %v476_v42 = vpop.f32.mrf.mxu0  ;;  %1899 = vmatmul.mubr.bf16.vlgmr.msra.gmra.mxu0 %v4192_v25 }
 0x110   : > { %v679_v43 = vpop.f32.mrf.mxu1  ;;  %2150 = vmatmul.mubr.bf16.vlgmr.msra.gmra.mxu1 %v1947_v22  ;;  %2357 = vmatpush1.bf16.msra.mxu0 %v3257_v39 }
 0x111   : > { %v4237_v44 = vadd.f32 %v679_v43, %v476_v42  ;;  %2388 = vmatprep.mubr.bf16.mxu0 %v2193_v40  ;;  %v478_v46 = vpop.f32.mrf.mxu0  ;;  %2358 = vmatprep.subr.bf16.mxu0 %v3262_v41 }
 0x112   : > { %v681_v17 = vpop.f32.mrf.mxu1 }
 0x113   : > { %v4245_v48 = vadd.f32 %v681_v17, %v478_v46  ;;  %v480_v49 = vpop.f32.mrf.mxu0 }
 0x114   : > { %v683_v50 = vpop.f32.mrf.mxu1  ;;  %2359 = vmatpush1.bf16.msra.mxu0 %v3260_v45 }
 0x115   : > { %v481_v52 = vpop.f32.mrf.mxu0  ;;  %2360 = vmatprep.subr.bf16.mxu0 %v3265_v47 }
 0x116   : > { %v684_v54 = vpop.f32.mrf.mxu1 }
 0x117   : > { %v2399_v54 = vld [vmem:[%s4357_s2] sm:$0x3] }
 0x118   : > { %2361 = vmatpush1.bf16.msra.mxu0 %v3263_v51  ;;  %v2401_v51 = vlaneseq }
 0x119   : > { %2362 = vmatprep.subr.bf16.mxu0 %v3268_v53 }
 0x11a   : > { %v2402_v52 = vshrl.u32 %v2401_v51, 7 }
 0x11c   : > { %2363 = vmatpush1.bf16.msra.mxu0 %v3266_v55  ;;  %v2403_v53 = vsub.s32 0, %v2402_v52 }
 0x11d   : > { %2364 = vmatprep.subr.bf16.mxu0 %v3271_v56  ;;  %v2407_v56 = vsub.s32 1, %v2402_v52 }
 0x120   : > { %2365 = vmatpush1.bf16.msra.mxu0 %v3269_v57  ;;  %v2404_v57 = vrot.slane %v2399_v54, %v2403_v53 }
 0x121   : > { %2366 = vmatprep.subr.bf16.mxu0 %v3274_v58 }
 0x124   : > { %2367 = vmatpush1.bf16.msra.mxu0 %v3272_v59 }
 0x125   : > { %2368 = vmatprep.subr.bf16.mxu0 %v3277_v60 }
 0x128   : > { %2369 = vmatpush1.bf16.msra.mxu0 %v3275_v61  ;;  %v2408_v61 = vrot.slane %v2399_v54, %v2407_v56 }
 0x129   : > { %2370 = vmatprep.subr.bf16.mxu0 %v3280_v63 }
 0x12c   : > { %2371 = vmatpush1.bf16.msra.mxu0 %v3278_v0 }
 0x12d   : > { %2372 = vmatprep.subr.bf16.mxu0 %v3283_v1 }
 0x130   : > { %2373 = vmatpush2.bf16.msra.mxu0 %v3281_v2 }
 0x131   : > { %2374 = vmatprep.subr.bf16.mxu0 %v3286_v3 }
 0x134   : > { %2375 = vmatpush2.bf16.msra.mxu0 %v3284_v4 }
 0x135   : > { %2376 = vmatprep.subr.bf16.mxu0 %v3289_v5 }
 0x138   : > { %2377 = vmatpush2.bf16.msra.mxu0 %v3287_v6 }
 0x139   : > { %2378 = vmatprep.subr.bf16.mxu0 %v3292_v7 }
 0x13c   : > { %2379 = vmatpush2.bf16.msra.mxu0 %v3290_v8 }
 0x13d   : > { %2380 = vmatprep.subr.bf16.mxu0 %v3295_v9 }
 0x140   : > { %2381 = vmatpush2.bf16.msra.mxu0 %v3293_v10 }
 0x141   : > { %2382 = vmatprep.subr.bf16.mxu0 %v3298_v11 }
 0x144   : > { %2383 = vmatpush2.bf16.msra.mxu0 %v3296_v12 }
 0x145   : > { %2384 = vmatprep.subr.bf16.mxu0 %v3301_v13 }
 0x148   : > { %2385 = vmatpush2.bf16.msra.mxu0 %v3299_v15 }
 0x149   : > { %2386 = vmatprep.subr.bf16.mxu0 %v3304_v16 }
 0x14c   : > { %2387 = vmatpush2.bf16.msra.mxu0 %v3302_v18 }
 0x14f   : > { %v916_v20 = vpop.f32.mrf.mxu0  ;;  %2389 = vmatmul.mubr.bf16.vlgmr.msra.gmra.mxu0 %v2192_v19 }
 0x150   : > { %v1163_v21 = vpop.f32.mrf.mxu1  ;;  %v923_v23 = vadd.f32 %v916_v20, %v4237_v44 }
 0x151   : > { %v918_v62 = vpop.f32.mrf.mxu0 }
 0x152   : > { %v1165_v24 = vpop.f32.mrf.mxu1  ;;  %v924_v26 = vadd.f32 %v918_v62, %v4245_v48  ;;  %v1170_v27 = vadd.f32 %v1163_v21, %v923_v23 }
 0x153   : > { %v920_v28 = vpop.f32.mrf.mxu0 }
 0x154   : > { %v1167_v14 = vpop.f32.mrf.mxu1  ;;  %v1171_v29 = vadd.f32 %v1165_v24, %v924_v26 }
 0x155   : > { %v921_v30 = vpop.f32.mrf.mxu0 }
 0x156   : > { %v1168_v31 = vpop.f32.mrf.mxu1 }
 0x18f   : > { %v1414_v32 = vpop.f32.mrf.mxu0 }
 0x190   : > { %v1653_v33 = vpop.f32.mrf.mxu1  ;;  %v1421_v34 = vadd.f32 %v1414_v32, %v1170_v27 }
 0x191   : > { %v1416_v25 = vpop.f32.mrf.mxu0 }
 0x192   : > { %v1655_v35 = vpop.f32.mrf.mxu1  ;;  %v1422_v36 = vadd.f32 %v1416_v25, %v1171_v29  ;;  %v1660_v37 = vadd.f32 %v1653_v33, %v1421_v34 }
 0x193   : > { %v1418_v38 = vpop.f32.mrf.mxu0 }
 0x194   : > { %v1657_v22 = vpop.f32.mrf.mxu1  ;;  %v1661_v39 = vadd.f32 %v1655_v35, %v1422_v36 }
 0x195   : > { %v1419_v40 = vpop.f32.mrf.mxu0 }
 0x196   : > { %v1658_v41 = vpop.f32.mrf.mxu1 }
 0x1cf   : > { %v1900_v42 = vpop.f32.mrf.mxu0 }
 0x1d0   : > { %v2151_v43 = vpop.f32.mrf.mxu1  ;;  %v1907_v44 = vadd.f32 %v1900_v42, %v1660_v37 }
 0x1d1   : > { %v1902_v45 = vpop.f32.mrf.mxu0 }
 0x1d2   : > { %v2153_v46 = vpop.f32.mrf.mxu1  ;;  %v2158_v17 = vadd.f32 %v2151_v43, %v1907_v44  ;;  %v1908_v55 = vadd.f32 %v1902_v45, %v1661_v39 }
 0x1d3   : > { %v1904_v47 = vpop.f32.mrf.mxu0 }
 0x1d4   : > { %v2155_v48 = vpop.f32.mrf.mxu1  ;;  %v2159_v59 = vadd.f32 %v2153_v46, %v1908_v55 }
 0x1d5   : > { %v1905_v49 = vpop.f32.mrf.mxu0 }
 0x1d6   : > { %v2156_v50 = vpop.f32.mrf.mxu1 }
 0x20f   : > { %v2390_v58 = vpop.f32.mrf.mxu0 }
 0x210   : > { %v2397_v60 = vadd.f32 %v2390_v58, %v2158_v17 }
 0x211   : > { %v2392_v63 = vpop.f32.mrf.mxu0 }
 0x212   : > { %v2411_v0 = vadd.f32 %v2404_v57, %v2397_v60  ;;  %v2398_v1 = vadd.f32 %v2392_v63, %v2159_v59 }
 0x213   : > { %v2394_v2 = vpop.f32.mrf.mxu0 }
 0x214   : > { %v2412_v3 = vadd.f32 %v2408_v61, %v2398_v1  ;;  %v2413_v5 = vmax.f32 %v2411_v0, 0.0 }
 0x215   : > { %v2395_v4 = vpop.f32.mrf.mxu0 }
 0x216   : > { %v2414_v6 = vmax.f32 %v2412_v3, 0.0 }
 0x218   : > { %v2417_v7 = vcombine.low %v2413_v5, %v2414_v6 }
 0x21a   : > { %2419 = vst [vmem:[%s192_s13] sm:$0x77] %v2417_v7 }
 0x21b PF: > { %s13_s16 = sadd.s32 1, %s3343_s16   ;;  %s4359_s12 = smov %s3335_s14 }
 0x21c   : > { %p10_p7 = scmp.ge.s32.totalorder %s13_s16, 8   ;;  %s4360_s13 = smov %s3339_s15 }
 0x21d   : > { %s4361_s14 = smov %s4364_s17  ;;  %s4362_s15 = smov %s4368_s18 }
 0x21e   :  { %12 = sbr.rel (!%p10_p7) target bundleno = 3 (0x3), region = 65 }

// kernel: _lambda_.13
= control target key start
LH: loop header
LB: loop body
LE: loop exit
PB: predicated region body
PF: predicated region fallthrough
CT: control target
= control target key end

     0   :  { %s5011_s12 = smov 0   ;;  %s5013_s13 = smov 0   ;;  %s6493_s0 = inlined_call_operand.vmem [shape: bf16[2,5,5,384], index: 0, kind: input, shape index: {}]   ;;  %s6494_s1 = inlined_call_operand.vmem [shape: bf16[3456,256], index: 1, kind: input, shape index: {}]   ;;  %s6495_s2 = inlined_call_operand.vmem [shape: f32[1,256], index: 2, kind: input, shape index: {}]   ;;  %s6496_s3 = inlined_call_operand.vmem [shape: f32[2,3,3,256], index: 3, kind: output, shape index: {}]  }
   0x1   :  { %s5015_s14 = smov 0   ;;  %s5017_s15 = smov 0  }
   0x2   :  { %s5019_s16 = smov 0  }
   0x3 LB: > { %s22_s17 = sadd.s32 1, %s4980_s14  ;;  %s25_s18 = sadd.s32 1, %s4984_s15  ;;  %s4988_s16 = sphi %s5019_s16, %s13_s16   ;;  %s4984_s15 = sphi %s5017_s15, %s6500_s15   ;;  %s4980_s14 = sphi %s5015_s14, %s6499_s14   ;;  %s4976_s13 = sphi %s5013_s13, %s6498_s13   ;;  %s4972_s12 = sphi %s5011_s12, %s6497_s12  }
   0x4   : > { %p23_p0 = scmp.ge.s32.totalorder %s22_s17, 3  ;;  %p3797_p1 = scmp.ge.s32.totalorder %s4988_s16, 1 }
   0x5   : > { %p151_p2 = scmp.lt.s32.totalorder %s4988_s16, 7 }
   0x6   : > { %s6502_s17 = smov (%p23_p0, %s22_s17), 0  ;;  %s6504_s18 = smov (!%p23_p0, %s25_s18), %s4984_s15 }
   0x7   : > { %p152_p3 = pnand %p3797_p1, %p151_p2  ;;  %p27_p4 = scmp.ge.s32.totalorder %s6504_s18, 2 }
   0x8   : > { %p179_p5 = scmp.lt.s32.totalorder (!%p152_p3), %s4976_s13, 1  ;;  %s4249_s24 = smul.u32 (!%p152_p3), 12, %s4972_s12 }
   0x9   : > { %s6506_s18 = smov (%p27_p4, %s6504_s18), 0  ;;  %155 = sbr.rel (%p152_p3) target bundleno = 669 (0x29d), region = 32 }
   0xa   : > { %p186_p6 = scmp.lt.s32.totalorder (!%p152_p3), %s4972_s12, 2 }
   0xe   : > { %v4293_v0 = vld [vmem:[%s6494_s1 + $0x1f4] ss:$8 sps:$4 sm:$0xff]   ;;  %v4990_v2 = vmov 0   ;;  %v4297_v3 = vld [vmem:[%s6494_s1 + $0x1f0] ss:$8 sps:$4 sm:$0xff]   ;;  %s6508_s13 = smov (!%p179_p5, %s4976_s13), 1 }
   0xf   : > { %v4295_v1 = vld [vmem:[%s6494_s1 + $0x2f4] ss:$8 sps:$4 sm:$0xff]   ;;  %640 = vmatprep.mubr.bf16.mxu1 %v4990_v2  ;;  %567 = vmatprep.subr.bf16.mxu0 %v4293_v0  ;;  %v4298_v4 = vld [vmem:[%s6494_s1 + $0x2f0] ss:$8 sps:$4 sm:$0xff]   ;;  %v4299_v5 = vld [vmem:[%s6494_s1 + $0x1e4] ss:$8 sps:$4 sm:$0xff]  }
  0x10   : > { %608 = vmatprep.subr.bf16.mxu1 %v4295_v1  ;;  %568 = vmatpush1.bf16.msra.mxu0 %v4297_v3  ;;  %v4301_v6 = vld [vmem:[%s6494_s1 + $0x2e4] ss:$8 sps:$4 sm:$0xff]   ;;  %v4303_v7 = vld [vmem:[%s6494_s1 + $0x1e0] ss:$8 sps:$4 sm:$0xff]   ;;  %v4305_v9 = vld [vmem:[%s6494_s1 + $0x1d4] ss:$8 sps:$4 sm:$0xff]  }
  0x11   : > { %609 = vmatpush1.bf16.msra.mxu1 %v4298_v4  ;;  %569 = vmatprep.subr.bf16.mxu0 %v4299_v5  ;;  %v4304_v8 = vld [vmem:[%s6494_s1 + $0x2e0] ss:$8 sps:$4 sm:$0xff]   ;;  %v4307_v10 = vld [vmem:[%s6494_s1 + $0x2d4] ss:$8 sps:$4 sm:$0xff]   ;;  %v4309_v11 = vld [vmem:[%s6494_s1 + $0x1d0] ss:$8 sps:$4 sm:$0xff]  }
  0x12   : > { %610 = vmatprep.subr.bf16.mxu1 %v4301_v6  ;;  %v4310_v12 = vld [vmem:[%s6494_s1 + $0x2d0] ss:$8 sps:$4 sm:$0xff]   ;;  %v4311_v13 = vld [vmem:[%s6494_s1 + $0x1c4] ss:$8 sps:$4 sm:$0xff]   ;;  %v4315_v15 = vld [vmem:[%s6494_s1 + $0x1c0] ss:$8 sps:$4 sm:$0xff]  }
  0x13   : > { %v4313_v14 = vld [vmem:[%s6494_s1 + $0x2c4] ss:$8 sps:$4 sm:$0xff]   ;;  %v4316_v16 = vld [vmem:[%s6494_s1 + $0x2c0] ss:$8 sps:$4 sm:$0xff]   ;;  %v4317_v17 = vld [vmem:[%s6494_s1 + $0x1b4] ss:$8 sps:$4 sm:$0xff]  }
  0x14   : > { %570 = vmatpush1.bf16.msra.mxu0 %v4303_v7  ;;  %v4319_v18 = vld [vmem:[%s6494_s1 + $0x2b4] ss:$8 sps:$4 sm:$0xff]   ;;  %s4250_s8 = smul.u32 60, %s6508_s13  ;;  %v4321_v19 = vld [vmem:[%s6494_s1 + $0x1b0] ss:$8 sps:$4 sm:$0xff]   ;;  %s6510_s12 = smov (!%p186_p6, %s4972_s12), 2 }
  0x15   : > { %611 = vmatpush1.bf16.msra.mxu1 %v4304_v8  ;;  %571 = vmatprep.subr.bf16.mxu0 %v4305_v9  ;;  %v4322_v20 = vld [vmem:[%s6494_s1 + $0x2b0] ss:$8 sps:$4 sm:$0xff]   ;;  %v4323_v21 = vld [vmem:[%s6494_s1 + $0x1a4] ss:$8 sps:$4 sm:$0xff]   ;;  %v4327_v23 = vld [vmem:[%s6494_s1 + $0x1a0] ss:$8 sps:$4 sm:$0xff]  }
  0x16   : > { %612 = vmatprep.subr.bf16.mxu1 %v4307_v10  ;;  %v4325_v22 = vld [vmem:[%s6494_s1 + $0x2a4] ss:$8 sps:$4 sm:$0xff]   ;;  %s183_s27 = scalar_lea.vmem %s6493_s0, %s4250_s8  ;;  %v4328_v24 = vld [vmem:[%s6494_s1 + $0x2a0] ss:$8 sps:$4 sm:$0xff]   ;;  %v4329_v25 = vld [vmem:[%s6494_s1 + $0x194] ss:$8 sps:$4 sm:$0xff]  }
  0x17   : > { %v4331_v26 = vld [vmem:[%s6494_s1 + $0x294] ss:$8 sps:$4 sm:$0xff]   ;;  %s5133_s8 = scalar_lea.vmem %s183_s27, %s4249_s24  ;;  %v4333_v27 = vld [vmem:[%s6494_s1 + $0x190] ss:$8 sps:$4 sm:$0xff]   ;;  %v4335_v29 = vld [vmem:[%s6494_s1 + $0x184] ss:$8 sps:$4 sm:$0xff]  }
  0x18   : > { %572 = vmatpush1.bf16.msra.mxu0 %v4309_v11  ;;  %v4334_v28 = vld [vmem:[%s6494_s1 + $0x290] ss:$8 sps:$4 sm:$0xff]   ;;  %v5145_v30 = vld [vmem:[%s5133_s8 + $0x8] ss:$0 sps:$4 sm:$0x77]   ;;  %s4251_s22 = smul.u32 6, %s6508_s13 }
  0x19   : > { %613 = vmatpush1.bf16.msra.mxu1 %v4310_v12  ;;  %573 = vmatprep.subr.bf16.mxu0 %v4311_v13  ;;  %v4337_v31 = vld [vmem:[%s6494_s1 + $0x284] ss:$8 sps:$4 sm:$0xff]   ;;  %v320_v32 = vshll.u32 %v5145_v30, 16  ;;  %v4339_v33 = vld [vmem:[%s6494_s1 + $0x180] ss:$8 sps:$4 sm:$0xff]   ;;  %v318_v34 = vshrl.u32 %v5145_v30, 16 }
  0x1a   : > { %614 = vmatprep.subr.bf16.mxu1 %v4313_v14  ;;  %v4340_v35 = vld [vmem:[%s6494_s1 + $0x280] ss:$8 sps:$4 sm:$0xff]   ;;  %v4341_v37 = vld [vmem:[%s6494_s1 + $0x274] ss:$8 sps:$4 sm:$0xff]   ;;  %v4343_v39 = vld [vmem:[%s6494_s1 + $0x70] ss:$8 sps:$4 sm:$0xff]  }
  0x1b   : > { %v322_v36 = vrot.slane %v320_v32, 1  ;;  %v4345_v38 = vld [vmem:[%s6494_s1 + $0x74] ss:$8 sps:$4 sm:$0xff]   ;;  %v4346_v41 = vld [vmem:[%s6494_s1 + $0x270] ss:$8 sps:$4 sm:$0xff]   ;;  %s3799_s23 = sshll.u32 %s6510_s12, 1 }
  0x1c   : > { %574 = vmatpush1.bf16.msra.mxu0 %v4315_v15  ;;  %v4348_v42 = vld [vmem:[%s6494_s1 + $0x264] ss:$8 sps:$4 sm:$0xff]   ;;  %v4350_v44 = vld [vmem:[%s6494_s1 + $0x60] ss:$8 sps:$4 sm:$0xff]   ;;  %v4354_v46 = vld [vmem:[%s6494_s1 + $0x254] ss:$8 sps:$4 sm:$0xff]   ;;  %s190_s24 = sadd.s32 %s4251_s22, %s3799_s23 }
  0x1d   : > { %615 = vmatpush1.bf16.msra.mxu1 %v4316_v16  ;;  %575 = vmatprep.subr.bf16.mxu0 %v4317_v17  ;;  %v323_v40 = vor.u32 %v322_v36, %v318_v34  ;;  %v4352_v43 = vld [vmem:[%s6494_s1 + $0x64] ss:$8 sps:$4 sm:$0xff]   ;;  %v4353_v45 = vld [vmem:[%s6494_s1 + $0x260] ss:$8 sps:$4 sm:$0xff]   ;;  %v4358_v47 = vld [vmem:[%s6494_s1 + $0x54] ss:$8 sps:$4 sm:$0xff]  }
  0x1e   : > { %616 = vmatprep.subr.bf16.mxu1 %v4319_v18  ;;  %v4356_v48 = vld [vmem:[%s6494_s1 + $0x50] ss:$8 sps:$4 sm:$0xff]   ;;  %v4360_v50 = vld [vmem:[%s6494_s1 + $0x244] ss:$8 sps:$4 sm:$0xff]   ;;  %v4362_v52 = vld [vmem:[%s6494_s1 + $0x40] ss:$8 sps:$4 sm:$0xff]  }
  0x1f   : > { %v4359_v49 = vld [vmem:[%s6494_s1 + $0x250] ss:$8 sps:$4 sm:$0xff]   ;;  %v4364_v51 = vld [vmem:[%s6494_s1 + $0x44] ss:$8 sps:$4 sm:$0xff]   ;;  %v4365_v54 = vld [vmem:[%s6494_s1 + $0x240] ss:$8 sps:$4 sm:$0xff]  }
  0x20   : > { %576 = vmatpush1.bf16.msra.mxu0 %v4321_v19  ;;  %v197_v53 = vld [vmem:[%s5133_s8] sm:$0x77]  ;;  %v4366_v55 = vld [vmem:[%s6494_s1 + $0x234] ss:$8 sps:$4 sm:$0xff]   ;;  %v4368_v60 = vld [vmem:[%s6494_s1 + $0x30] ss:$8 sps:$4 sm:$0xff]  }
  0x21   : > { %617 = vmatpush1.bf16.msra.mxu1 %v4322_v20  ;;  %577 = vmatprep.subr.bf16.mxu0 %v4323_v21  ;;  %v5210_v56 = vcombine.high %v197_v53, %v197_v53  ;;  %v4370_v57 = vld [vmem:[%s6494_s1 + $0x34] ss:$8 sps:$4 sm:$0xff]   ;;  %v4371_v61 = vld [vmem:[%s6494_s1 + $0x230] ss:$8 sps:$4 sm:$0xff]   ;;  %v4372_v63 = vld [vmem:[%s6494_s1 + $0x224] ss:$8 sps:$4 sm:$0xff]   ;;  %v5233_v4 = vcombine.low %v197_v53, %v197_v53 }
  0x22   : > { %618 = vmatprep.subr.bf16.mxu1 %v4325_v22  ;;  %v4376_v0 = vld [vmem:[%s6494_s1 + $0x24] ss:$8 sps:$4 sm:$0xff]   ;;  %v4374_v3 = vld [vmem:[%s6494_s1 + $0x20] ss:$8 sps:$4 sm:$0xff]   ;;  %v4378_v6 = vld [vmem:[%s6494_s1 + $0x214] ss:$8 sps:$4 sm:$0xff]  }
  0x23   : > { %v311_v58 = vshrl.u32 %v5210_v56, 16  ;;  %v313_v59 = vshll.u32 %v5210_v56, 16  ;;  %v4377_v5 = vld [vmem:[%s6494_s1 + $0x220] ss:$8 sps:$4 sm:$0xff]   ;;  %v4382_v7 = vld [vmem:[%s6494_s1 + $0x14] ss:$8 sps:$4 sm:$0xff]  }
  0x24   : > { %578 = vmatpush1.bf16.msra.mxu0 %v4327_v23  ;;  %v4380_v8 = vld [vmem:[%s6494_s1 + $0x10] ss:$8 sps:$4 sm:$0xff]   ;;  %v306_v9 = vshll.u32 %v5233_v4, 16  ;;  %v4384_v11 = vld [vmem:[%s6494_s1 + $0x204] ss:$8 sps:$4 sm:$0xff]   ;;  %v304_v14 = vshrl.u32 %v5233_v4, 16 }
  0x25   : > { %619 = vmatpush1.bf16.msra.mxu1 %v4328_v24  ;;  %579 = vmatprep.subr.bf16.mxu0 %v4329_v25  ;;  %v315_v62 = vrot.slane %v313_v59, 1  ;;  %v4383_v10 = vld [vmem:[%s6494_s1 + $0x210] ss:$8 sps:$4 sm:$0xff]   ;;  %v4388_v12 = vld [vmem:[%s6494_s1 + $0x4] ss:$8 sps:$4 sm:$0xff]   ;;  %s3800_s25 = sshll.u32 %s190_s24, 2 }
  0x26   : > { %620 = vmatprep.subr.bf16.mxu1 %v4331_v26  ;;  %v4386_v13 = vld [vmem:[%s6494_s1] ss:$8 sps:$4 sm:$0xff]   ;;  %v308_v15 = vrot.slane %v306_v9, 1  ;;  %v4394_v17 = vld [vmem:[%s6494_s1 + $0xf4] ss:$8 sps:$4 sm:$0xff]   ;;  %s192_s13 = scalar_lea.vmem %s6496_s3, %s3800_s25 }
  0x27   : > { %v316_v1 = vor.u32 %v315_v62, %v311_v58  ;;  %v4389_v16 = vld [vmem:[%s6494_s1 + $0x200] ss:$8 sps:$4 sm:$0xff]   ;;  %v4397_v18 = vld [vmem:[%s6494_s1 + $0x174] ss:$8 sps:$4 sm:$0xff]   ;;  %v4392_v20 = vld [vmem:[%s6494_s1 + $0xf0] ss:$8 sps:$4 sm:$0xff]  }
  0x28   : > { %580 = vmatpush1.bf16.msra.mxu0 %v4333_v27  ;;  %v309_v19 = vor.u32 %v308_v15, %v304_v14  ;;  %v4395_v21 = vld [vmem:[%s6494_s1 + $0x170] ss:$8 sps:$4 sm:$0xff]   ;;  %v4400_v22 = vld [vmem:[%s6494_s1 + $0xe4] ss:$8 sps:$4 sm:$0xff]   ;;  %v4398_v24 = vld [vmem:[%s6494_s1 + $0xe0] ss:$8 sps:$4 sm:$0xff]  }
  0x29   : > { %621 = vmatpush1.bf16.msra.mxu1 %v4334_v28  ;;  %581 = vmatprep.subr.bf16.mxu0 %v4335_v29  ;;  %v4403_v23 = vld [vmem:[%s6494_s1 + $0x164] ss:$8 sps:$4 sm:$0xff]   ;;  %v4401_v25 = vld [vmem:[%s6494_s1 + $0x160] ss:$8 sps:$4 sm:$0xff]   ;;  %v4406_v26 = vld [vmem:[%s6494_s1 + $0xd4] ss:$8 sps:$4 sm:$0xff]  }
  0x2a   : > { %622 = vmatprep.subr.bf16.mxu1 %v4337_v31  ;;  %599 = vmatprep.mubr.bf16.mxu0 %v316_v1  ;;  %v4409_v27 = vld [vmem:[%s6494_s1 + $0x154] ss:$8 sps:$4 sm:$0xff]   ;;  %v4404_v28 = vld [vmem:[%s6494_s1 + $0xd0] ss:$8 sps:$4 sm:$0xff]   ;;  %v4412_v31 = vld [vmem:[%s6494_s1 + $0xc4] ss:$8 sps:$4 sm:$0xff]  }
  0x2b   : > { %v4407_v29 = vld [vmem:[%s6494_s1 + $0x150] ss:$8 sps:$4 sm:$0xff]   ;;  %v4415_v32 = vld [vmem:[%s6494_s1 + $0x144] ss:$8 sps:$4 sm:$0xff]   ;;  %v4413_v34 = vld [vmem:[%s6494_s1 + $0x140] ss:$8 sps:$4 sm:$0xff]  }
  0x2c   : > { %582 = vmatpush1.bf16.msra.mxu0 %v4339_v33  ;;  %v4410_v33 = vld [vmem:[%s6494_s1 + $0xc0] ss:$8 sps:$4 sm:$0xff]   ;;  %v4421_v36 = vld [vmem:[%s6494_s1 + $0x134] ss:$8 sps:$4 sm:$0xff]   ;;  %v4440_v53 = vld [vmem:[%s6494_s1 + $0x370] ss:$8 sps:$4 sm:$0xff]  }
  0x2d   : > { %623 = vmatpush1.bf16.msra.mxu1 %v4340_v35  ;;  %583 = vmatprep.subr.bf16.mxu0 %v4341_v37  ;;  %v4418_v35 = vld [vmem:[%s6494_s1 + $0xb4] ss:$8 sps:$4 sm:$0xff]   ;;  %v4416_v37 = vld [vmem:[%s6494_s1 + $0xb0] ss:$8 sps:$4 sm:$0xff]   ;;  %v1023_v58 = vrot.slane %v5210_v56, 1 }
  0x2e   : > { %892 = vmatprep.subr.bf16.mxu1 %v4345_v38  ;;  %v4419_v38 = vld [vmem:[%s6494_s1 + $0x130] ss:$8 sps:$4 sm:$0xff]   ;;  %v4446_v59 = vld [vmem:[%s6494_s1 + $0x360] ss:$8 sps:$4 sm:$0xff]   ;;  %v4463_v1 = vld [vmem:[%s6494_s1 + $0x444] ss:$8 sps:$4 sm:$0xff]  }
  0x2f   : > { %v4452_v62 = vld [vmem:[%s6494_s1 + $0x350] ss:$8 sps:$4 sm:$0xff]   ;;  %v4478_v14 = vld [vmem:[%s6494_s1 + $0x314] ss:$8 sps:$4 sm:$0xff]  }
  0x30   : > { %641 = vmatmul.mubr.bf16.vlgmr.msra.gmra.mxu1 %v323_v40  ;;  %584 = vmatpush2.bf16.msra.mxu0 %v4346_v41  ;;  %v4427_v40 = vld [vmem:[%s6494_s1 + $0x124] ss:$8 sps:$4 sm:$0xff]   ;;  %v4422_v41 = vld [vmem:[%s6494_s1 + $0xa0] ss:$8 sps:$4 sm:$0xff]   ;;  %v4467_v9 = vld [vmem:[%s6494_s1 + $0x430] ss:$8 sps:$4 sm:$0xff]  }
  0x31   : > { %893 = vmatpush1.bf16.msra.mxu1 %v4343_v39  ;;  %585 = vmatprep.subr.bf16.mxu0 %v4348_v42  ;;  %v4424_v39 = vld [vmem:[%s6494_s1 + $0xa4] ss:$8 sps:$4 sm:$0xff]   ;;  %v4425_v42 = vld [vmem:[%s6494_s1 + $0x120] ss:$8 sps:$4 sm:$0xff]   ;;  %v4481_v15 = vld [vmem:[%s6494_s1 + $0x414] ss:$8 sps:$4 sm:$0xff]  }
  0x32   : > { %894 = vmatprep.subr.bf16.mxu1 %v4352_v43  ;;  %924 = vmatprep.mubr.bf16.mxu1 %v5210_v56  ;;  %v4430_v43 = vld [vmem:[%s6494_s1 + $0x94] ss:$8 sps:$4 sm:$0xff]  }
  0x33   : > { %v4454_v56 = vld [vmem:[%s6494_s1 + $0x354] ss:$8 sps:$4 sm:$0xff]  }
  0x34   : > { %586 = vmatpush2.bf16.msra.mxu0 %v4353_v45  ;;  %v4428_v45 = vld [vmem:[%s6494_s1 + $0x90] ss:$8 sps:$4 sm:$0xff]  }
  0x35   : > { %895 = vmatpush1.bf16.msra.mxu1 %v4350_v44  ;;  %587 = vmatprep.subr.bf16.mxu0 %v4354_v46  ;;  %v4433_v44 = vld [vmem:[%s6494_s1 + $0x114] ss:$8 sps:$4 sm:$0xff]   ;;  %v4431_v46 = vld [vmem:[%s6494_s1 + $0x110] ss:$8 sps:$4 sm:$0xff]  }
  0x36   : > { %896 = vmatprep.subr.bf16.mxu1 %v4358_v47  ;;  %v4436_v47 = vld [vmem:[%s6494_s1 + $0x84] ss:$8 sps:$4 sm:$0xff]  }
  0x38   : > { %588 = vmatpush2.bf16.msra.mxu0 %v4359_v49  ;;  %v4434_v49 = vld [vmem:[%s6494_s1 + $0x80] ss:$8 sps:$4 sm:$0xff]  }
  0x39   : > { %897 = vmatpush1.bf16.msra.mxu1 %v4356_v48  ;;  %589 = vmatprep.subr.bf16.mxu0 %v4360_v50  ;;  %v4439_v48 = vld [vmem:[%s6494_s1 + $0x104] ss:$8 sps:$4 sm:$0xff]   ;;  %v4437_v50 = vld [vmem:[%s6494_s1 + $0x100] ss:$8 sps:$4 sm:$0xff]  }
  0x3a   : > { %898 = vmatprep.subr.bf16.mxu1 %v4364_v51  ;;  %v4442_v51 = vld [vmem:[%s6494_s1 + $0x374] ss:$8 sps:$4 sm:$0xff]  }
  0x3c   : > { %590 = vmatpush2.bf16.msra.mxu0 %v4365_v54  ;;  %v4443_v54 = vld [vmem:[%s6494_s1 + $0x470] ss:$8 sps:$4 sm:$0xff]  }
  0x3d   : > { %899 = vmatpush1.bf16.msra.mxu1 %v4362_v52  ;;  %591 = vmatprep.subr.bf16.mxu0 %v4366_v55  ;;  %v4445_v52 = vld [vmem:[%s6494_s1 + $0x474] ss:$8 sps:$4 sm:$0xff]   ;;  %v4448_v55 = vld [vmem:[%s6494_s1 + $0x364] ss:$8 sps:$4 sm:$0xff]  }
  0x3e   : > { %900 = vmatprep.subr.bf16.mxu1 %v4370_v57  ;;  %v4451_v57 = vld [vmem:[%s6494_s1 + $0x464] ss:$8 sps:$4 sm:$0xff]  }
  0x40   : > { %592 = vmatpush2.bf16.msra.mxu0 %v4371_v61  ;;  %v4457_v61 = vld [vmem:[%s6494_s1 + $0x454] ss:$8 sps:$4 sm:$0xff]  }
  0x41   : > { %901 = vmatpush1.bf16.msra.mxu1 %v4368_v60  ;;  %593 = vmatprep.subr.bf16.mxu0 %v4372_v63  ;;  %v4449_v60 = vld [vmem:[%s6494_s1 + $0x460] ss:$8 sps:$4 sm:$0xff]   ;;  %v4455_v63 = vld [vmem:[%s6494_s1 + $0x450] ss:$8 sps:$4 sm:$0xff]  }
  0x42   : > { %902 = vmatprep.subr.bf16.mxu1 %v4376_v0  ;;  %v4460_v0 = vld [vmem:[%s6494_s1 + $0x344] ss:$8 sps:$4 sm:$0xff]  }
  0x44   : > { %594 = vmatpush2.bf16.msra.mxu0 %v4377_v5  ;;  %v4461_v5 = vld [vmem:[%s6494_s1 + $0x440] ss:$8 sps:$4 sm:$0xff]  }
  0x45   : > { %903 = vmatpush1.bf16.msra.mxu1 %v4374_v3  ;;  %595 = vmatprep.subr.bf16.mxu0 %v4378_v6  ;;  %v4458_v3 = vld [vmem:[%s6494_s1 + $0x340] ss:$8 sps:$4 sm:$0xff]   ;;  %v4466_v6 = vld [vmem:[%s6494_s1 + $0x334] ss:$8 sps:$4 sm:$0xff]  }
  0x46   : > { %904 = vmatprep.subr.bf16.mxu1 %v4382_v7  ;;  %v4469_v7 = vld [vmem:[%s6494_s1 + $0x434] ss:$8 sps:$4 sm:$0xff]  }
  0x48   : > { %596 = vmatpush2.bf16.msra.mxu0 %v4383_v10  ;;  %v4472_v10 = vld [vmem:[%s6494_s1 + $0x324] ss:$8 sps:$4 sm:$0xff]  }
  0x49   : > { %905 = vmatpush1.bf16.msra.mxu1 %v4380_v8  ;;  %597 = vmatprep.subr.bf16.mxu0 %v4384_v11  ;;  %v4464_v8 = vld [vmem:[%s6494_s1 + $0x330] ss:$8 sps:$4 sm:$0xff]   ;;  %v4475_v11 = vld [vmem:[%s6494_s1 + $0x424] ss:$8 sps:$4 sm:$0xff]  }
  0x4a   : > { %906 = vmatprep.subr.bf16.mxu1 %v4388_v12  ;;  %v4470_v12 = vld [vmem:[%s6494_s1 + $0x320] ss:$8 sps:$4 sm:$0xff]  }
  0x4c   : > { %598 = vmatpush2.bf16.msra.mxu0 %v4389_v16  ;;  %v4476_v16 = vld [vmem:[%s6494_s1 + $0x310] ss:$8 sps:$4 sm:$0xff]  }
  0x4d   : > { %907 = vmatpush1.bf16.msra.mxu1 %v4386_v13  ;;  %933 = vmatprep.subr.bf16.mxu0 %v4397_v18  ;;  %v4473_v13 = vld [vmem:[%s6494_s1 + $0x420] ss:$8 sps:$4 sm:$0xff]   ;;  %v4484_v18 = vld [vmem:[%s6494_s1 + $0x304] ss:$8 sps:$4 sm:$0xff]  }
  0x4e   : > { %908 = vmatprep.subr.bf16.mxu1 %v4394_v17  ;;  %v4479_v17 = vld [vmem:[%s6494_s1 + $0x410] ss:$8 sps:$4 sm:$0xff]  }
  0x4f   : > { %600 = vmatmul.mubr.bf16.vlgmr.msra.gmra.mxu0 %v309_v19  ;;  %v4487_v19 = vld [vmem:[%s6494_s1 + $0x404] ss:$8 sps:$4 sm:$0xff]  }
  0x50   : > { %934 = vmatpush1.bf16.msra.mxu0 %v4395_v21  ;;  %965 = vmatprep.mubr.bf16.mxu0 %v4990_v2  ;;  %v4485_v21 = vld [vmem:[%s6494_s1 + $0x400] ss:$8 sps:$4 sm:$0xff]  }
  0x51   : > { %909 = vmatpush2.bf16.msra.mxu1 %v4392_v20  ;;  %935 = vmatprep.subr.bf16.mxu0 %v4403_v23  ;;  %v4482_v20 = vld [vmem:[%s6494_s1 + $0x300] ss:$8 sps:$4 sm:$0xff]   ;;  %v4493_v23 = vld [vmem:[%s6494_s1 + $0x4f4] ss:$8 sps:$4 sm:$0xff]  }
  0x52   : > { %910 = vmatprep.subr.bf16.mxu1 %v4400_v22  ;;  %v4490_v22 = vld [vmem:[%s6494_s1 + $0x3f4] ss:$8 sps:$4 sm:$0xff]  }
  0x54   : > { %936 = vmatpush1.bf16.msra.mxu0 %v4401_v25  ;;  %v1024_v25 = vrot.slane %v5145_v30, 1 }
  0x55   : > { %911 = vmatpush2.bf16.msra.mxu1 %v4398_v24  ;;  %937 = vmatprep.subr.bf16.mxu0 %v4409_v27  ;;  %v4488_v24 = vld [vmem:[%s6494_s1 + $0x3f0] ss:$8 sps:$4 sm:$0xff]   ;;  %v4496_v27 = vld [vmem:[%s6494_s1 + $0x3e4] ss:$8 sps:$4 sm:$0xff]  }
  0x56   : > { %912 = vmatprep.subr.bf16.mxu1 %v4406_v26  ;;  %v4491_v26 = vld [vmem:[%s6494_s1 + $0x4f0] ss:$8 sps:$4 sm:$0xff]  }
  0x58   : > { %938 = vmatpush1.bf16.msra.mxu0 %v4407_v29  ;;  %v5481_v29 = vld [vmem:[%s5133_s8 + $0xc] sm:$0x77] }
  0x59   : > { %913 = vmatpush2.bf16.msra.mxu1 %v4404_v28  ;;  %939 = vmatprep.subr.bf16.mxu0 %v4415_v32  ;;  %v4499_v28 = vld [vmem:[%s6494_s1 + $0x4e4] ss:$8 sps:$4 sm:$0xff]   ;;  %v4497_v32 = vld [vmem:[%s6494_s1 + $0x4e0] ss:$8 sps:$4 sm:$0xff]  }
  0x5a   : > { %914 = vmatprep.subr.bf16.mxu1 %v4412_v31  ;;  %v4494_v31 = vld [vmem:[%s6494_s1 + $0x3e0] ss:$8 sps:$4 sm:$0xff]  }
  0x5c   : > { %940 = vmatpush1.bf16.msra.mxu0 %v4413_v34  ;;  %v4505_v34 = vld [vmem:[%s6494_s1 + $0x4d4] ss:$8 sps:$4 sm:$0xff]  }
  0x5d   : > { %915 = vmatpush2.bf16.msra.mxu1 %v4410_v33  ;;  %941 = vmatprep.subr.bf16.mxu0 %v4421_v36  ;;  %v4502_v33 = vld [vmem:[%s6494_s1 + $0x3d4] ss:$8 sps:$4 sm:$0xff]   ;;  %v4503_v36 = vld [vmem:[%s6494_s1 + $0x4d0] ss:$8 sps:$4 sm:$0xff]  }
  0x5e   : > { %916 = vmatprep.subr.bf16.mxu1 %v4418_v35  ;;  %v4500_v35 = vld [vmem:[%s6494_s1 + $0x3d0] ss:$8 sps:$4 sm:$0xff]  }
  0x60   : > { %942 = vmatpush1.bf16.msra.mxu0 %v4419_v38  ;;  %v4511_v38 = vld [vmem:[%s6494_s1 + $0x4c4] ss:$8 sps:$4 sm:$0xff]  }
  0x61   : > { %917 = vmatpush2.bf16.msra.mxu1 %v4416_v37  ;;  %943 = vmatprep.subr.bf16.mxu0 %v4427_v40  ;;  %v4508_v37 = vld [vmem:[%s6494_s1 + $0x3c4] ss:$8 sps:$4 sm:$0xff]   ;;  %v4509_v40 = vld [vmem:[%s6494_s1 + $0x4c0] ss:$8 sps:$4 sm:$0xff]  }
  0x62   : > { %918 = vmatprep.subr.bf16.mxu1 %v4424_v39  ;;  %v4506_v39 = vld [vmem:[%s6494_s1 + $0x3c0] ss:$8 sps:$4 sm:$0xff]  }
  0x64   : > { %944 = vmatpush1.bf16.msra.mxu0 %v4425_v42  ;;  %v4517_v42 = vld [vmem:[%s6494_s1 + $0x4b4] ss:$8 sps:$4 sm:$0xff]  }
  0x65   : > { %919 = vmatpush2.bf16.msra.mxu1 %v4422_v41  ;;  %945 = vmatprep.subr.bf16.mxu0 %v4433_v44  ;;  %v4514_v41 = vld [vmem:[%s6494_s1 + $0x3b4] ss:$8 sps:$4 sm:$0xff]   ;;  %v4515_v44 = vld [vmem:[%s6494_s1 + $0x4b0] ss:$8 sps:$4 sm:$0xff]  }
  0x66   : > { %920 = vmatprep.subr.bf16.mxu1 %v4430_v43  ;;  %v4512_v43 = vld [vmem:[%s6494_s1 + $0x3b0] ss:$8 sps:$4 sm:$0xff]  }
  0x68   : > { %946 = vmatpush1.bf16.msra.mxu0 %v4431_v46  ;;  %v4523_v46 = vld [vmem:[%s6494_s1 + $0x4a4] ss:$8 sps:$4 sm:$0xff]  }
  0x69   : > { %921 = vmatpush2.bf16.msra.mxu1 %v4428_v45  ;;  %947 = vmatprep.subr.bf16.mxu0 %v4439_v48  ;;  %v4520_v45 = vld [vmem:[%s6494_s1 + $0x3a4] ss:$8 sps:$4 sm:$0xff]   ;;  %v4521_v48 = vld [vmem:[%s6494_s1 + $0x4a0] ss:$8 sps:$4 sm:$0xff]  }
  0x6a   : > { %922 = vmatprep.subr.bf16.mxu1 %v4436_v47  ;;  %v4518_v47 = vld [vmem:[%s6494_s1 + $0x3a0] ss:$8 sps:$4 sm:$0xff]  }
  0x6c   : > { %948 = vmatpush1.bf16.msra.mxu0 %v4437_v50  ;;  %v4529_v50 = vld [vmem:[%s6494_s1 + $0x494] ss:$8 sps:$4 sm:$0xff]  }
  0x6d   : > { %923 = vmatpush2.bf16.msra.mxu1 %v4434_v49  ;;  %1268 = vmatprep.subr.bf16.mxu0 %v4442_v51  ;;  %v4526_v49 = vld [vmem:[%s6494_s1 + $0x394] ss:$8 sps:$4 sm:$0xff]   ;;  %v4524_v51 = vld [vmem:[%s6494_s1 + $0x390] ss:$8 sps:$4 sm:$0xff]  }
  0x6e   : > { %1309 = vmatprep.subr.bf16.mxu1 %v4445_v52  ;;  %v4527_v52 = vld [vmem:[%s6494_s1 + $0x490] ss:$8 sps:$4 sm:$0xff]  }
  0x6f   : > { %966 = vmatmul.mubr.bf16.vlgmr.msra.gmra.mxu0 %v5145_v30  ;;  %v5485_v30 = vcombine.high %v5481_v29, %v5481_v29 }
  0x70   : > { %925 = vmatmul.mubr.bf16.vlgmr.msra.gmra.mxu1 %v5233_v4  ;;  %1269 = vmatpush1.bf16.msra.mxu0 %v4440_v53  ;;  %v4532_v53 = vld [vmem:[%s6494_s1 + $0x384] ss:$8 sps:$4 sm:$0xff]  }
  0x71   : > { %1310 = vmatpush1.bf16.msra.mxu1 %v4443_v54  ;;  %1270 = vmatprep.subr.bf16.mxu0 %v4448_v55  ;;  %v4535_v54 = vld [vmem:[%s6494_s1 + $0x484] ss:$8 sps:$4 sm:$0xff]   ;;  %v4530_v55 = vld [vmem:[%s6494_s1 + $0x380] ss:$8 sps:$4 sm:$0xff]  }
  0x72   : > { %1311 = vmatprep.subr.bf16.mxu1 %v4451_v57  ;;  %1341 = vmatprep.mubr.bf16.mxu1 %v4990_v2  ;;  %v4533_v57 = vld [vmem:[%s6494_s1 + $0x480] ss:$8 sps:$4 sm:$0xff]  }
  0x73   : > { %1300 = vmatprep.mubr.bf16.mxu0 %v1023_v58  ;;  %v4538_v58 = vld [vmem:[%s6494_s1 + $0x574] ss:$8 sps:$4 sm:$0xff]  }
  0x74   : > { %1271 = vmatpush1.bf16.msra.mxu0 %v4446_v59  ;;  %v4541_v59 = vld [vmem:[%s6494_s1 + $0x5f4] ss:$8 sps:$4 sm:$0xff]  }
  0x75   : > { %1312 = vmatpush1.bf16.msra.mxu1 %v4449_v60  ;;  %1272 = vmatprep.subr.bf16.mxu0 %v4454_v56  ;;  %v1022_v60 = vrot.slane %v5233_v4, 1  ;;  %v4536_v56 = vld [vmem:[%s6494_s1 + $0x570] ss:$8 sps:$4 sm:$0xff]   ;;  %v4547_v4 = vld [vmem:[%s6494_s1 + $0x5e4] ss:$8 sps:$4 sm:$0xff]  }
  0x76   : > { %1313 = vmatprep.subr.bf16.mxu1 %v4457_v61  ;;  %v4539_v61 = vld [vmem:[%s6494_s1 + $0x5f0] ss:$8 sps:$4 sm:$0xff]  }
  0x78   : > { %1273 = vmatpush1.bf16.msra.mxu0 %v4452_v62  ;;  %v4544_v62 = vld [vmem:[%s6494_s1 + $0x564] ss:$8 sps:$4 sm:$0xff]  }
  0x79   : > { %1314 = vmatpush1.bf16.msra.mxu1 %v4455_v63  ;;  %1274 = vmatprep.subr.bf16.mxu0 %v4460_v0  ;;  %v4542_v63 = vld [vmem:[%s6494_s1 + $0x560] ss:$8 sps:$4 sm:$0xff]  }
  0x7a   : > { %1315 = vmatprep.subr.bf16.mxu1 %v4463_v1  ;;  %v4545_v0 = vld [vmem:[%s6494_s1 + $0x5e0] ss:$8 sps:$4 sm:$0xff]   ;;  %v4550_v1 = vld [vmem:[%s6494_s1 + $0x554] ss:$8 sps:$4 sm:$0xff]  }
  0x7c   : > { %1275 = vmatpush1.bf16.msra.mxu0 %v4458_v3  ;;  %v4553_v3 = vld [vmem:[%s6494_s1 + $0x5d4] ss:$8 sps:$4 sm:$0xff]  }
  0x7d   : > { %1316 = vmatpush1.bf16.msra.mxu1 %v4461_v5  ;;  %1276 = vmatprep.subr.bf16.mxu0 %v4466_v6  ;;  %v4548_v5 = vld [vmem:[%s6494_s1 + $0x550] ss:$8 sps:$4 sm:$0xff]  }
  0x7e   : > { %1317 = vmatprep.subr.bf16.mxu1 %v4469_v7  ;;  %v4551_v6 = vld [vmem:[%s6494_s1 + $0x5d0] ss:$8 sps:$4 sm:$0xff]   ;;  %v4556_v7 = vld [vmem:[%s6494_s1 + $0x544] ss:$8 sps:$4 sm:$0xff]  }
  0x80   : > { %1277 = vmatpush1.bf16.msra.mxu0 %v4464_v8  ;;  %v4559_v8 = vld [vmem:[%s6494_s1 + $0x5c4] ss:$8 sps:$4 sm:$0xff]  }
  0x81   : > { %1318 = vmatpush1.bf16.msra.mxu1 %v4467_v9  ;;  %1278 = vmatprep.subr.bf16.mxu0 %v4472_v10  ;;  %v4554_v9 = vld [vmem:[%s6494_s1 + $0x540] ss:$8 sps:$4 sm:$0xff]  }
  0x82   : > { %1319 = vmatprep.subr.bf16.mxu1 %v4475_v11  ;;  %v4557_v10 = vld [vmem:[%s6494_s1 + $0x5c0] ss:$8 sps:$4 sm:$0xff]   ;;  %v4562_v11 = vld [vmem:[%s6494_s1 + $0x534] ss:$8 sps:$4 sm:$0xff]  }
  0x84   : > { %1279 = vmatpush1.bf16.msra.mxu0 %v4470_v12  ;;  %v4565_v12 = vld [vmem:[%s6494_s1 + $0x5b4] ss:$8 sps:$4 sm:$0xff]  }
  0x85   : > { %1320 = vmatpush1.bf16.msra.mxu1 %v4473_v13  ;;  %1280 = vmatprep.subr.bf16.mxu0 %v4478_v14  ;;  %v4560_v13 = vld [vmem:[%s6494_s1 + $0x530] ss:$8 sps:$4 sm:$0xff]  }
  0x86   : > { %1321 = vmatprep.subr.bf16.mxu1 %v4481_v15  ;;  %v4563_v14 = vld [vmem:[%s6494_s1 + $0x5b0] ss:$8 sps:$4 sm:$0xff]   ;;  %v4568_v15 = vld [vmem:[%s6494_s1 + $0x524] ss:$8 sps:$4 sm:$0xff]  }
  0x88   : > { %1281 = vmatpush1.bf16.msra.mxu0 %v4476_v16  ;;  %v4571_v16 = vld [vmem:[%s6494_s1 + $0x5a4] ss:$8 sps:$4 sm:$0xff]  }
  0x89   : > { %1322 = vmatpush1.bf16.msra.mxu1 %v4479_v17  ;;  %1282 = vmatprep.subr.bf16.mxu0 %v4484_v18  ;;  %v4566_v17 = vld [vmem:[%s6494_s1 + $0x520] ss:$8 sps:$4 sm:$0xff]  }
  0x8a   : > { %1323 = vmatprep.subr.bf16.mxu1 %v4487_v19  ;;  %v4569_v18 = vld [vmem:[%s6494_s1 + $0x5a0] ss:$8 sps:$4 sm:$0xff]   ;;  %v4574_v19 = vld [vmem:[%s6494_s1 + $0x514] ss:$8 sps:$4 sm:$0xff]  }
  0x8c   : > { %1283 = vmatpush1.bf16.msra.mxu0 %v4482_v20  ;;  %v4577_v20 = vld [vmem:[%s6494_s1 + $0x594] ss:$8 sps:$4 sm:$0xff]  }
  0x8d   : > { %1324 = vmatpush1.bf16.msra.mxu1 %v4485_v21  ;;  %1284 = vmatprep.subr.bf16.mxu0 %v4490_v22  ;;  %v4572_v21 = vld [vmem:[%s6494_s1 + $0x510] ss:$8 sps:$4 sm:$0xff]  }
  0x8e   : > { %1657 = vmatprep.subr.bf16.mxu1 %v4493_v23  ;;  %v4575_v22 = vld [vmem:[%s6494_s1 + $0x590] ss:$8 sps:$4 sm:$0xff]   ;;  %v4580_v23 = vld [vmem:[%s6494_s1 + $0x504] ss:$8 sps:$4 sm:$0xff]  }
  0x90   : > { %1342 = vmatmul.mubr.bf16.vlgmr.msra.gmra.mxu1 %v1024_v25  ;;  %1285 = vmatpush2.bf16.msra.mxu0 %v4488_v24  ;;  %v4583_v24 = vld [vmem:[%s6494_s1 + $0x584] ss:$8 sps:$4 sm:$0xff]   ;;  %v1799_v25 = vshll.u32 %v5485_v30, 16 }
  0x91   : > { %1658 = vmatpush1.bf16.msra.mxu1 %v4491_v26  ;;  %1286 = vmatprep.subr.bf16.mxu0 %v4496_v27  ;;  %v4578_v26 = vld [vmem:[%s6494_s1 + $0x500] ss:$8 sps:$4 sm:$0xff]  }
  0x92   : > { %1659 = vmatprep.subr.bf16.mxu1 %v4499_v28  ;;  %1689 = vmatprep.mubr.bf16.mxu1 %v5485_v30  ;;  %v4581_v27 = vld [vmem:[%s6494_s1 + $0x580] ss:$8 sps:$4 sm:$0xff]   ;;  %v4589_v28 = vld [vmem:[%s6494_s1 + $0x674] ss:$8 sps:$4 sm:$0xff]  }
  0x94   : > { %1287 = vmatpush2.bf16.msra.mxu0 %v4494_v31  ;;  %v4592_v31 = vld [vmem:[%s6494_s1 + $0x774] ss:$8 sps:$4 sm:$0xff]  }
  0x95   : > { %1660 = vmatpush1.bf16.msra.mxu1 %v4497_v32  ;;  %1288 = vmatprep.subr.bf16.mxu0 %v4502_v33  ;;  %v5672_v32 = vld [vmem:[%s5133_s8 + $0x14] ss:$0 sps:$4 sm:$0x77]   ;;  %v1797_v33 = vshrl.u32 %v5485_v30, 16 }
  0x96   : > { %1661 = vmatprep.subr.bf16.mxu1 %v4505_v34  ;;  %v1801_v34 = vrot.slane %v1799_v25, 1  ;;  %v4653_v25 = vld [vmem:[%s6494_s1 + $0x6c0] ss:$8 sps:$4 sm:$0xff]  }
  0x98   : > { %1289 = vmatpush2.bf16.msra.mxu0 %v4500_v35  ;;  %v5677_v35 = vcombine.low %v5481_v29, %v5481_v29  ;;  %v4598_v29 = vld [vmem:[%s6494_s1 + $0x764] ss:$8 sps:$4 sm:$0xff]  }
  0x99   : > { %1662 = vmatpush1.bf16.msra.mxu1 %v4503_v36  ;;  %1290 = vmatprep.subr.bf16.mxu0 %v4508_v37  ;;  %v4587_v36 = vld [vmem:[%s6494_s1 + $0x670] ss:$8 sps:$4 sm:$0xff]  }
  0x9a   : > { %1663 = vmatprep.subr.bf16.mxu1 %v4511_v38  ;;  %v4590_v37 = vld [vmem:[%s6494_s1 + $0x770] ss:$8 sps:$4 sm:$0xff]   ;;  %v4595_v38 = vld [vmem:[%s6494_s1 + $0x664] ss:$8 sps:$4 sm:$0xff]  }
  0x9c   : > { %1291 = vmatpush2.bf16.msra.mxu0 %v4506_v39  ;;  %v1802_v39 = vor.u32 %v1801_v34, %v1797_v33  ;;  %v4662_v33 = vld [vmem:[%s6494_s1 + $0x7b0] ss:$8 sps:$4 sm:$0xff]   ;;  %v4667_v34 = vld [vmem:[%s6494_s1 + $0x6a4] ss:$8 sps:$4 sm:$0xff]  }
  0x9d   : > { %1664 = vmatpush1.bf16.msra.mxu1 %v4509_v40  ;;  %1292 = vmatprep.subr.bf16.mxu0 %v4514_v41  ;;  %v4593_v40 = vld [vmem:[%s6494_s1 + $0x660] ss:$8 sps:$4 sm:$0xff]  }
  0x9e   : > { %1665 = vmatprep.subr.bf16.mxu1 %v4517_v42  ;;  %v4596_v41 = vld [vmem:[%s6494_s1 + $0x760] ss:$8 sps:$4 sm:$0xff]   ;;  %v4601_v42 = vld [vmem:[%s6494_s1 + $0x654] ss:$8 sps:$4 sm:$0xff]  }
  0xa0   : > { %1293 = vmatpush2.bf16.msra.mxu0 %v4512_v43  ;;  %v4604_v43 = vld [vmem:[%s6494_s1 + $0x754] ss:$8 sps:$4 sm:$0xff]  }
  0xa1   : > { %1666 = vmatpush1.bf16.msra.mxu1 %v4515_v44  ;;  %1294 = vmatprep.subr.bf16.mxu0 %v4520_v45  ;;  %v4599_v44 = vld [vmem:[%s6494_s1 + $0x650] ss:$8 sps:$4 sm:$0xff]  }
  0xa2   : > { %1667 = vmatprep.subr.bf16.mxu1 %v4523_v46  ;;  %v4602_v45 = vld [vmem:[%s6494_s1 + $0x750] ss:$8 sps:$4 sm:$0xff]   ;;  %v4607_v46 = vld [vmem:[%s6494_s1 + $0x644] ss:$8 sps:$4 sm:$0xff]  }
  0xa4   : > { %1295 = vmatpush2.bf16.msra.mxu0 %v4518_v47  ;;  %v4610_v47 = vld [vmem:[%s6494_s1 + $0x744] ss:$8 sps:$4 sm:$0xff]  }
  0xa5   : > { %1668 = vmatpush1.bf16.msra.mxu1 %v4521_v48  ;;  %1296 = vmatprep.subr.bf16.mxu0 %v4526_v49  ;;  %v4605_v48 = vld [vmem:[%s6494_s1 + $0x640] ss:$8 sps:$4 sm:$0xff]  }
  0xa6   : > { %1669 = vmatprep.subr.bf16.mxu1 %v4529_v50  ;;  %v4608_v49 = vld [vmem:[%s6494_s1 + $0x740] ss:$8 sps:$4 sm:$0xff]   ;;  %v4613_v50 = vld [vmem:[%s6494_s1 + $0x634] ss:$8 sps:$4 sm:$0xff]  }
  0xa8   : > { %1297 = vmatpush2.bf16.msra.mxu0 %v4524_v51  ;;  %v4616_v51 = vld [vmem:[%s6494_s1 + $0x734] ss:$8 sps:$4 sm:$0xff]  }
  0xa9   : > { %1670 = vmatpush1.bf16.msra.mxu1 %v4527_v52  ;;  %1298 = vmatprep.subr.bf16.mxu0 %v4532_v53  ;;  %v4611_v52 = vld [vmem:[%s6494_s1 + $0x630] ss:$8 sps:$4 sm:$0xff]  }
  0xaa   : > { %1671 = vmatprep.subr.bf16.mxu1 %v4535_v54  ;;  %v4614_v53 = vld [vmem:[%s6494_s1 + $0x730] ss:$8 sps:$4 sm:$0xff]   ;;  %v4619_v54 = vld [vmem:[%s6494_s1 + $0x624] ss:$8 sps:$4 sm:$0xff]  }
  0xac   : > { %1299 = vmatpush2.bf16.msra.mxu0 %v4530_v55  ;;  %v4622_v55 = vld [vmem:[%s6494_s1 + $0x724] ss:$8 sps:$4 sm:$0xff]  }
  0xad   : > { %1672 = vmatpush1.bf16.msra.mxu1 %v4533_v57  ;;  %1698 = vmatprep.subr.bf16.mxu0 %v4541_v59  ;;  %v4617_v57 = vld [vmem:[%s6494_s1 + $0x620] ss:$8 sps:$4 sm:$0xff]   ;;  %v4625_v59 = vld [vmem:[%s6494_s1 + $0x614] ss:$8 sps:$4 sm:$0xff]  }
  0xae   : > { %1673 = vmatprep.subr.bf16.mxu1 %v4538_v58  ;;  %v4620_v58 = vld [vmem:[%s6494_s1 + $0x720] ss:$8 sps:$4 sm:$0xff]  }
  0xaf   : > { %1301 = vmatmul.mubr.bf16.vlgmr.msra.gmra.mxu0 %v1022_v60  ;;  %v4628_v60 = vld [vmem:[%s6494_s1 + $0x714] ss:$8 sps:$4 sm:$0xff]  }
  0xb0   : > { %1699 = vmatpush1.bf16.msra.mxu0 %v4539_v61  ;;  %1730 = vmatprep.mubr.bf16.mxu0 %v4990_v2  ;;  %v4626_v61 = vld [vmem:[%s6494_s1 + $0x710] ss:$8 sps:$4 sm:$0xff]  }
  0xb1   : > { %1674 = vmatpush2.bf16.msra.mxu1 %v4536_v56  ;;  %1700 = vmatprep.subr.bf16.mxu0 %v4547_v4  ;;  %v4623_v56 = vld [vmem:[%s6494_s1 + $0x610] ss:$8 sps:$4 sm:$0xff]   ;;  %v4631_v4 = vld [vmem:[%s6494_s1 + $0x604] ss:$8 sps:$4 sm:$0xff]  }
  0xb2   : > { %1675 = vmatprep.subr.bf16.mxu1 %v4544_v62  ;;  %v1806_v62 = vshll.u32 %v5672_v32, 16 }
  0xb4   : > { %1701 = vmatpush1.bf16.msra.mxu0 %v4545_v0  ;;  %v1804_v0 = vshrl.u32 %v5672_v32, 16 }
  0xb5   : > { %1676 = vmatpush2.bf16.msra.mxu1 %v4542_v63  ;;  %1702 = vmatprep.subr.bf16.mxu0 %v4553_v3  ;;  %v4634_v63 = vld [vmem:[%s6494_s1 + $0x704] ss:$8 sps:$4 sm:$0xff]   ;;  %v4629_v3 = vld [vmem:[%s6494_s1 + $0x600] ss:$8 sps:$4 sm:$0xff]  }
  0xb6   : > { %1677 = vmatprep.subr.bf16.mxu1 %v4550_v1  ;;  %v1808_v1 = vrot.slane %v1806_v62, 1  ;;  %v4700_v62 = vld [vmem:[%s6494_s1 + $0x8d4] ss:$8 sps:$4 sm:$0xff]  }
  0xb8   : > { %1703 = vmatpush1.bf16.msra.mxu0 %v4551_v6  ;;  %v4637_v6 = vld [vmem:[%s6494_s1 + $0x6f4] ss:$8 sps:$4 sm:$0xff]  }
  0xb9   : > { %1678 = vmatpush2.bf16.msra.mxu1 %v4548_v5  ;;  %1704 = vmatprep.subr.bf16.mxu0 %v4559_v8  ;;  %v4632_v5 = vld [vmem:[%s6494_s1 + $0x700] ss:$8 sps:$4 sm:$0xff]   ;;  %v1809_v8 = vor.u32 %v1808_v1, %v1804_v0  ;;  %v4698_v0 = vld [vmem:[%s6494_s1 + $0x8d0] ss:$8 sps:$4 sm:$0xff]  }
  0xba   : > { %1679 = vmatprep.subr.bf16.mxu1 %v4556_v7  ;;  %v4640_v7 = vld [vmem:[%s6494_s1 + $0x7f4] ss:$8 sps:$4 sm:$0xff]  }
  0xbc   : > { %1705 = vmatpush1.bf16.msra.mxu0 %v4557_v10  ;;  %v4638_v10 = vld [vmem:[%s6494_s1 + $0x7f0] ss:$8 sps:$4 sm:$0xff]  }
  0xbd   : > { %1680 = vmatpush2.bf16.msra.mxu1 %v4554_v9  ;;  %1706 = vmatprep.subr.bf16.mxu0 %v4565_v12  ;;  %v4635_v9 = vld [vmem:[%s6494_s1 + $0x6f0] ss:$8 sps:$4 sm:$0xff]   ;;  %v4646_v12 = vld [vmem:[%s6494_s1 + $0x7e4] ss:$8 sps:$4 sm:$0xff]  }
  0xbe   : > { %1681 = vmatprep.subr.bf16.mxu1 %v4562_v11  ;;  %v4643_v11 = vld [vmem:[%s6494_s1 + $0x6e4] ss:$8 sps:$4 sm:$0xff]  }
  0xc0   : > { %1707 = vmatpush1.bf16.msra.mxu0 %v4563_v14 }
  0xc1   : > { %1682 = vmatpush2.bf16.msra.mxu1 %v4560_v13  ;;  %1708 = vmatprep.subr.bf16.mxu0 %v4571_v16  ;;  %v2186_v13 = vrot.slane %v5485_v30, 1  ;;  %v4644_v16 = vld [vmem:[%s6494_s1 + $0x7e0] ss:$8 sps:$4 sm:$0xff]   ;;  %v4652_v30 = vld [vmem:[%s6494_s1 + $0x7d4] ss:$8 sps:$4 sm:$0xff]  }
  0xc2   : > { %1683 = vmatprep.subr.bf16.mxu1 %v4568_v15  ;;  %v4641_v15 = vld [vmem:[%s6494_s1 + $0x6e0] ss:$8 sps:$4 sm:$0xff]  }
  0xc4   : > { %1709 = vmatpush1.bf16.msra.mxu0 %v4569_v18 }
  0xc5   : > { %1684 = vmatpush2.bf16.msra.mxu1 %v4566_v17  ;;  %1710 = vmatprep.subr.bf16.mxu0 %v4577_v20  ;;  %v4649_v17 = vld [vmem:[%s6494_s1 + $0x6d4] ss:$8 sps:$4 sm:$0xff]   ;;  %v4647_v20 = vld [vmem:[%s6494_s1 + $0x6d0] ss:$8 sps:$4 sm:$0xff]  }
  0xc6   : > { %1685 = vmatprep.subr.bf16.mxu1 %v4574_v19 }
  0xc8   : > { %1711 = vmatpush1.bf16.msra.mxu0 %v4575_v22  ;;  %v4655_v22 = vld [vmem:[%s6494_s1 + $0x6c4] ss:$8 sps:$4 sm:$0xff]  }
  0xc9   : > { %1686 = vmatpush2.bf16.msra.mxu1 %v4572_v21  ;;  %1712 = vmatprep.subr.bf16.mxu0 %v4583_v24  ;;  %v4650_v21 = vld [vmem:[%s6494_s1 + $0x7d0] ss:$8 sps:$4 sm:$0xff]  }
  0xca   : > { %1687 = vmatprep.subr.bf16.mxu1 %v4580_v23  ;;  %v4658_v23 = vld [vmem:[%s6494_s1 + $0x7c4] ss:$8 sps:$4 sm:$0xff]  }
  0xcc   : > { %1713 = vmatpush1.bf16.msra.mxu0 %v4581_v27  ;;  %v4661_v27 = vld [vmem:[%s6494_s1 + $0x6b4] ss:$8 sps:$4 sm:$0xff]  }
  0xcd   : > { %1688 = vmatpush2.bf16.msra.mxu1 %v4578_v26  ;;  %2053 = vmatprep.subr.bf16.mxu0 %v4589_v28  ;;  %v4656_v26 = vld [vmem:[%s6494_s1 + $0x7c0] ss:$8 sps:$4 sm:$0xff]   ;;  %v4664_v28 = vld [vmem:[%s6494_s1 + $0x7b4] ss:$8 sps:$4 sm:$0xff]  }
  0xce   : > { %2094 = vmatprep.subr.bf16.mxu1 %v4592_v31  ;;  %v4659_v31 = vld [vmem:[%s6494_s1 + $0x6b0] ss:$8 sps:$4 sm:$0xff]  }
  0xcf   : > { %1731 = vmatmul.mubr.bf16.vlgmr.msra.gmra.mxu0 %v5672_v32 }
  0xd0   : > { %1690 = vmatmul.mubr.bf16.vlgmr.msra.gmra.mxu1 %v5677_v35  ;;  %2054 = vmatpush1.bf16.msra.mxu0 %v4587_v36  ;;  %v4670_v36 = vld [vmem:[%s6494_s1 + $0x7a4] ss:$8 sps:$4 sm:$0xff]  }
  0xd1   : > { %2095 = vmatpush1.bf16.msra.mxu1 %v4590_v37  ;;  %2055 = vmatprep.subr.bf16.mxu0 %v4595_v38  ;;  %v4665_v37 = vld [vmem:[%s6494_s1 + $0x6a0] ss:$8 sps:$4 sm:$0xff]  }
  0xd2   : > { %2096 = vmatprep.subr.bf16.mxu1 %v4598_v29  ;;  %2126 = vmatprep.mubr.bf16.mxu1 %v4990_v2  ;;  %v4668_v38 = vld [vmem:[%s6494_s1 + $0x7a0] ss:$8 sps:$4 sm:$0xff]   ;;  %v4673_v29 = vld [vmem:[%s6494_s1 + $0x694] ss:$8 sps:$4 sm:$0xff]  }
  0xd3   : > { %2085 = vmatprep.mubr.bf16.mxu0 %v1802_v39  ;;  %v4676_v39 = vld [vmem:[%s6494_s1 + $0x794] ss:$8 sps:$4 sm:$0xff]  }
  0xd4   : > { %2056 = vmatpush1.bf16.msra.mxu0 %v4593_v40  ;;  %v4671_v40 = vld [vmem:[%s6494_s1 + $0x690] ss:$8 sps:$4 sm:$0xff]  }
  0xd5   : > { %2097 = vmatpush1.bf16.msra.mxu1 %v4596_v41  ;;  %2057 = vmatprep.subr.bf16.mxu0 %v4601_v42  ;;  %v1792_v41 = vshll.u32 %v5677_v35, 16  ;;  %v4674_v42 = vld [vmem:[%s6494_s1 + $0x790] ss:$8 sps:$4 sm:$0xff]  }
  0xd6   : > { %2098 = vmatprep.subr.bf16.mxu1 %v4604_v43  ;;  %v4679_v43 = vld [vmem:[%s6494_s1 + $0x684] ss:$8 sps:$4 sm:$0xff]  }
  0xd8   : > { %2058 = vmatpush1.bf16.msra.mxu0 %v4599_v44  ;;  %v4682_v44 = vld [vmem:[%s6494_s1 + $0x784] ss:$8 sps:$4 sm:$0xff]  }
  0xd9   : > { %2099 = vmatpush1.bf16.msra.mxu1 %v4602_v45  ;;  %2059 = vmatprep.subr.bf16.mxu0 %v4607_v46  ;;  %v4677_v45 = vld [vmem:[%s6494_s1 + $0x680] ss:$8 sps:$4 sm:$0xff]   ;;  %v1790_v46 = vshrl.u32 %v5677_v35, 16 }
  0xda   : > { %2100 = vmatprep.subr.bf16.mxu1 %v4610_v47  ;;  %v1794_v47 = vrot.slane %v1792_v41, 1 }
  0xdc   : > { %2060 = vmatpush1.bf16.msra.mxu0 %v4605_v48  ;;  %v4680_v48 = vld [vmem:[%s6494_s1 + $0x780] ss:$8 sps:$4 sm:$0xff]  }
  0xdd   : > { %2101 = vmatpush1.bf16.msra.mxu1 %v4608_v49  ;;  %2061 = vmatprep.subr.bf16.mxu0 %v4613_v50  ;;  %v4685_v49 = vld [vmem:[%s6494_s1 + $0x874] ss:$8 sps:$4 sm:$0xff]  }
  0xde   : > { %2102 = vmatprep.subr.bf16.mxu1 %v4616_v51  ;;  %v4688_v50 = vld [vmem:[%s6494_s1 + $0x8f4] ss:$8 sps:$4 sm:$0xff]   ;;  %v1795_v51 = vor.u32 %v1794_v47, %v1790_v46 }
  0xe0   : > { %2062 = vmatpush1.bf16.msra.mxu0 %v4611_v52  ;;  %v4683_v52 = vld [vmem:[%s6494_s1 + $0x870] ss:$8 sps:$4 sm:$0xff]  }
  0xe1   : > { %2103 = vmatpush1.bf16.msra.mxu1 %v4614_v53  ;;  %2063 = vmatprep.subr.bf16.mxu0 %v4619_v54  ;;  %v4686_v53 = vld [vmem:[%s6494_s1 + $0x8f0] ss:$8 sps:$4 sm:$0xff]   ;;  %v4691_v54 = vld [vmem:[%s6494_s1 + $0x864] ss:$8 sps:$4 sm:$0xff]  }
  0xe2   : > { %2104 = vmatprep.subr.bf16.mxu1 %v4622_v55  ;;  %v4694_v55 = vld [vmem:[%s6494_s1 + $0x8e4] ss:$8 sps:$4 sm:$0xff]  }
  0xe4   : > { %2064 = vmatpush1.bf16.msra.mxu0 %v4617_v57 }
  0xe5   : > { %2105 = vmatpush1.bf16.msra.mxu1 %v4620_v58  ;;  %2065 = vmatprep.subr.bf16.mxu0 %v4625_v59  ;;  %v4689_v58 = vld [vmem:[%s6494_s1 + $0x860] ss:$8 sps:$4 sm:$0xff]  }
  0xe6   : > { %2106 = vmatprep.subr.bf16.mxu1 %v4628_v60  ;;  %v4692_v60 = vld [vmem:[%s6494_s1 + $0x8e0] ss:$8 sps:$4 sm:$0xff]  }
  0xe8   : > { %2066 = vmatpush1.bf16.msra.mxu0 %v4623_v56  ;;  %v4697_v56 = vld [vmem:[%s6494_s1 + $0x854] ss:$8 sps:$4 sm:$0xff]  }
  0xe9   : > { %2107 = vmatpush1.bf16.msra.mxu1 %v4626_v61  ;;  %2067 = vmatprep.subr.bf16.mxu0 %v4631_v4 }
  0xea   : > { %2108 = vmatprep.subr.bf16.mxu1 %v4634_v63  ;;  %v4695_v63 = vld [vmem:[%s6494_s1 + $0x850] ss:$8 sps:$4 sm:$0xff]  }
  0xec   : > { %2068 = vmatpush1.bf16.msra.mxu0 %v4629_v3 }
  0xed   : > { %2109 = vmatpush1.bf16.msra.mxu1 %v4632_v5  ;;  %2069 = vmatprep.subr.bf16.mxu0 %v4637_v6  ;;  %v4703_v5 = vld [vmem:[%s6494_s1 + $0x844] ss:$8 sps:$4 sm:$0xff]  }
  0xee   : > { %2431 = vmatprep.subr.bf16.mxu1 %v4640_v7  ;;  %v4706_v6 = vld [vmem:[%s6494_s1 + $0x8c4] ss:$8 sps:$4 sm:$0xff]   ;;  %v4701_v7 = vld [vmem:[%s6494_s1 + $0x840] ss:$8 sps:$4 sm:$0xff]  }
  0xf0   : > { %2127 = vmatmul.mubr.bf16.vlgmr.msra.gmra.mxu1 %v1809_v8  ;;  %v5793_v14 = vpop.f32.mrf.mxu1  ;;  %2070 = vmatpush2.bf16.msra.mxu0 %v4635_v9  ;;  %v4704_v8 = vld [vmem:[%s6494_s1 + $0x8c0] ss:$8 sps:$4 sm:$0xff]   ;;  %v4709_v9 = vld [vmem:[%s6494_s1 + $0x834] ss:$8 sps:$4 sm:$0xff]  }
  0xf1   : > { %2432 = vmatpush1.bf16.msra.mxu1 %v4638_v10  ;;  %2071 = vmatprep.subr.bf16.mxu0 %v4643_v11  ;;  %v4712_v10 = vld [vmem:[%s6494_s1 + $0x8b4] ss:$8 sps:$4 sm:$0xff]   ;;  %v4707_v11 = vld [vmem:[%s6494_s1 + $0x830] ss:$8 sps:$4 sm:$0xff]  }
  0xf2   : > { %2433 = vmatprep.subr.bf16.mxu1 %v4646_v12  ;;  %v5807_v18 = vpop.f32.mrf.mxu1  ;;  %2463 = vmatprep.mubr.bf16.mxu1 %v2186_v13  ;;  %v4710_v12 = vld [vmem:[%s6494_s1 + $0x8b0] ss:$8 sps:$4 sm:$0xff]   ;;  %v4715_v13 = vld [vmem:[%s6494_s1 + $0x824] ss:$8 sps:$4 sm:$0xff]  }
  0xf4   : > { %v646_v19 = vpop.f32.mrf.mxu1  ;;  %2072 = vmatpush2.bf16.msra.mxu0 %v4641_v15  ;;  %v4713_v15 = vld [vmem:[%s6494_s1 + $0x820] ss:$8 sps:$4 sm:$0xff]  }
  0xf5   : > { %2434 = vmatpush1.bf16.msra.mxu1 %v4644_v16  ;;  %2073 = vmatprep.subr.bf16.mxu0 %v4649_v17  ;;  %v4716_v16 = vld [vmem:[%s6494_s1 + $0x8a0] ss:$8 sps:$4 sm:$0xff]   ;;  %v4721_v17 = vld [vmem:[%s6494_s1 + $0x814] ss:$8 sps:$4 sm:$0xff]   ;;  %v4722_v19 = vld [vmem:[%s6494_s1 + $0x890] ss:$8 sps:$4 sm:$0xff]  }
  0xf6   : > { %2435 = vmatprep.subr.bf16.mxu1 %v4652_v30  ;;  %v647_v24 = vpop.f32.mrf.mxu1  ;;  %v4724_v30 = vld [vmem:[%s6494_s1 + $0x894] ss:$8 sps:$4 sm:$0xff]  }
  0xf7   : > { %v4733_v24 = vld [vmem:[%s6494_s1 + $0x974] ss:$8 sps:$4 sm:$0xff]  }
  0xf8   : > { %2074 = vmatpush2.bf16.msra.mxu0 %v4647_v20  ;;  %v4727_v20 = vld [vmem:[%s6494_s1 + $0x804] ss:$8 sps:$4 sm:$0xff]  }
  0xf9   : > { %2436 = vmatpush1.bf16.msra.mxu1 %v4650_v21  ;;  %2075 = vmatprep.subr.bf16.mxu0 %v4655_v22  ;;  %v4730_v21 = vld [vmem:[%s6494_s1 + $0x884] ss:$8 sps:$4 sm:$0xff]   ;;  %v4725_v22 = vld [vmem:[%s6494_s1 + $0x800] ss:$8 sps:$4 sm:$0xff]  }
  0xfa   : > { %2437 = vmatprep.subr.bf16.mxu1 %v4658_v23  ;;  %v4728_v23 = vld [vmem:[%s6494_s1 + $0x880] ss:$8 sps:$4 sm:$0xff]  }
  0xfc   : > { %2076 = vmatpush2.bf16.msra.mxu0 %v4653_v25  ;;  %v4736_v25 = vld [vmem:[%s6494_s1 + $0xa74] ss:$8 sps:$4 sm:$0xff]  }
  0xfd   : > { %2438 = vmatpush1.bf16.msra.mxu1 %v4656_v26  ;;  %2077 = vmatprep.subr.bf16.mxu0 %v4661_v27  ;;  %v2185_v26 = vrot.slane %v5677_v35, 1  ;;  %v2187_v27 = vrot.slane %v5672_v32, 1  ;;  %v4739_v35 = vld [vmem:[%s6494_s1 + $0x964] ss:$8 sps:$4 sm:$0xff]  }
  0xfe   : > { %2439 = vmatprep.subr.bf16.mxu1 %v4664_v28  ;;  %v5989_v28 = vld [vmem:[%s5133_s8 + $0x18] sm:$0x77]  ;;  %v4742_v32 = vld [vmem:[%s6494_s1 + $0xa64] ss:$8 sps:$4 sm:$0xff]  }
 0x100   : > { %2078 = vmatpush2.bf16.msra.mxu0 %v4659_v31  ;;  %v4731_v31 = vld [vmem:[%s6494_s1 + $0x970] ss:$8 sps:$4 sm:$0xff]  }
 0x101   : > { %2440 = vmatpush1.bf16.msra.mxu1 %v4662_v33  ;;  %2079 = vmatprep.subr.bf16.mxu0 %v4667_v34  ;;  %v4734_v33 = vld [vmem:[%s6494_s1 + $0xa70] ss:$8 sps:$4 sm:$0xff]   ;;  %v6005_v34 = vcombine.high %v5989_v28, %v5989_v28 }
 0x102   : > { %2441 = vmatprep.subr.bf16.mxu1 %v4670_v36 }
 0x104   : > { %2080 = vmatpush2.bf16.msra.mxu0 %v4665_v37 }
 0x105   : > { %2442 = vmatpush1.bf16.msra.mxu1 %v4668_v38  ;;  %2081 = vmatprep.subr.bf16.mxu0 %v4673_v29  ;;  %v4737_v29 = vld [vmem:[%s6494_s1 + $0x960] ss:$8 sps:$4 sm:$0xff]  }
 0x106   : > { %2443 = vmatprep.subr.bf16.mxu1 %v4676_v39  ;;  %v4740_v39 = vld [vmem:[%s6494_s1 + $0xa60] ss:$8 sps:$4 sm:$0xff]  }
 0x108   : > { %2082 = vmatpush2.bf16.msra.mxu0 %v4671_v40 }
 0x109   : > { %2444 = vmatpush1.bf16.msra.mxu1 %v4674_v42  ;;  %2083 = vmatprep.subr.bf16.mxu0 %v4679_v43  ;;  %v4745_v42 = vld [vmem:[%s6494_s1 + $0x954] ss:$8 sps:$4 sm:$0xff]  }
 0x10a   : > { %2445 = vmatprep.subr.bf16.mxu1 %v4682_v44  ;;  %v4748_v43 = vld [vmem:[%s6494_s1 + $0xa54] ss:$8 sps:$4 sm:$0xff]  }
 0x10c   : > { %2084 = vmatpush2.bf16.msra.mxu0 %v4677_v45 }
 0x10d   : > { %2446 = vmatpush1.bf16.msra.mxu1 %v4680_v48  ;;  %2472 = vmatprep.subr.bf16.mxu0 %v4688_v50  ;;  %v4746_v50 = vld [vmem:[%s6494_s1 + $0xa50] ss:$8 sps:$4 sm:$0xff]  }
 0x10e   : > { %2447 = vmatprep.subr.bf16.mxu1 %v4685_v49  ;;  %v4743_v49 = vld [vmem:[%s6494_s1 + $0x950] ss:$8 sps:$4 sm:$0xff]  }
 0x10f   : > { %v601_v57 = vpop.f32.mrf.mxu0  ;;  %2086 = vmatmul.mubr.bf16.vlgmr.msra.gmra.mxu0 %v1795_v51 }
 0x110   : > { %v5899_v59 = vadd.f32 %v5793_v14, %v601_v57  ;;  %2473 = vmatpush1.bf16.msra.mxu0 %v4686_v53  ;;  %2504 = vmatprep.mubr.bf16.mxu0 %v4990_v2  ;;  %v4718_v14 = vld [vmem:[%s6494_s1 + $0x8a4] ss:$8 sps:$4 sm:$0xff]   ;;  %v4752_v57 = vld [vmem:[%s6494_s1 + $0xa40] ss:$8 sps:$4 sm:$0xff]  }
 0x111   : > { %2448 = vmatpush2.bf16.msra.mxu1 %v4683_v52  ;;  %v603_v61 = vpop.f32.mrf.mxu0  ;;  %2474 = vmatprep.subr.bf16.mxu0 %v4694_v55  ;;  %v4751_v52 = vld [vmem:[%s6494_s1 + $0x944] ss:$8 sps:$4 sm:$0xff]   ;;  %v4749_v55 = vld [vmem:[%s6494_s1 + $0x940] ss:$8 sps:$4 sm:$0xff]  }
 0x112   : > { %2449 = vmatprep.subr.bf16.mxu1 %v4691_v54  ;;  %v5911_v4 = vadd.f32 %v5807_v18, %v603_v61  ;;  %v4719_v18 = vld [vmem:[%s6494_s1 + $0x810] ss:$8 sps:$4 sm:$0xff]   ;;  %v4754_v53 = vld [vmem:[%s6494_s1 + $0xa44] ss:$8 sps:$4 sm:$0xff]  }
 0x113   : > { %v605_v1 = vpop.f32.mrf.mxu0  ;;  %v4763_v61 = vld [vmem:[%s6494_s1 + $0x924] ss:$8 sps:$4 sm:$0xff]  }
 0x114   : > { %2475 = vmatpush1.bf16.msra.mxu0 %v4692_v60  ;;  %v4755_v60 = vld [vmem:[%s6494_s1 + $0x930] ss:$8 sps:$4 sm:$0xff]   ;;  %v4772_v1 = vld [vmem:[%s6494_s1 + $0xa14] ss:$8 sps:$4 sm:$0xff]  }
 0x115   : > { %2450 = vmatpush2.bf16.msra.mxu1 %v4689_v58  ;;  %v606_v3 = vpop.f32.mrf.mxu0  ;;  %2476 = vmatprep.subr.bf16.mxu0 %v4700_v62  ;;  %v4757_v58 = vld [vmem:[%s6494_s1 + $0x934] ss:$8 sps:$4 sm:$0xff]   ;;  %v4766_v62 = vld [vmem:[%s6494_s1 + $0xa24] ss:$8 sps:$4 sm:$0xff]  }
 0x116   : > { %2451 = vmatprep.subr.bf16.mxu1 %v4697_v56  ;;  %v4758_v56 = vld [vmem:[%s6494_s1 + $0xa30] ss:$8 sps:$4 sm:$0xff]  }
 0x117   : > { %v4767_v3 = vld [vmem:[%s6494_s1 + $0x910] ss:$8 sps:$4 sm:$0xff]  }
 0x118   : > { %2477 = vmatpush1.bf16.msra.mxu0 %v4698_v0  ;;  %v4769_v0 = vld [vmem:[%s6494_s1 + $0x914] ss:$8 sps:$4 sm:$0xff]  }
 0x119   : > { %2452 = vmatpush2.bf16.msra.mxu1 %v4695_v63  ;;  %2478 = vmatprep.subr.bf16.mxu0 %v4706_v6  ;;  %v4764_v63 = vld [vmem:[%s6494_s1 + $0xa20] ss:$8 sps:$4 sm:$0xff]   ;;  %v4775_v6 = vld [vmem:[%s6494_s1 + $0x904] ss:$8 sps:$4 sm:$0xff]  }
 0x11a   : > { %2453 = vmatprep.subr.bf16.mxu1 %v4703_v5  ;;  %v4770_v5 = vld [vmem:[%s6494_s1 + $0xa10] ss:$8 sps:$4 sm:$0xff]  }
 0x11c   : > { %2479 = vmatpush1.bf16.msra.mxu0 %v4704_v8  ;;  %v2962_v8 = vshll.u32 %v6005_v34, 16 }
 0x11d   : > { %2454 = vmatpush2.bf16.msra.mxu1 %v4701_v7  ;;  %2480 = vmatprep.subr.bf16.mxu0 %v4712_v10  ;;  %v4778_v7 = vld [vmem:[%s6494_s1 + $0xa04] ss:$8 sps:$4 sm:$0xff]   ;;  %v4776_v10 = vld [vmem:[%s6494_s1 + $0xa00] ss:$8 sps:$4 sm:$0xff]  }
 0x11e   : > { %2455 = vmatprep.subr.bf16.mxu1 %v4709_v9  ;;  %v4773_v9 = vld [vmem:[%s6494_s1 + $0x900] ss:$8 sps:$4 sm:$0xff]  }
 0x120   : > { %2481 = vmatpush1.bf16.msra.mxu0 %v4710_v12  ;;  %v4784_v12 = vld [vmem:[%s6494_s1 + $0xaf4] ss:$8 sps:$4 sm:$0xff]  }
 0x121   : > { %2456 = vmatpush2.bf16.msra.mxu1 %v4707_v11  ;;  %2482 = vmatprep.subr.bf16.mxu0 %v4718_v14  ;;  %v4781_v11 = vld [vmem:[%s6494_s1 + $0x9f4] ss:$8 sps:$4 sm:$0xff]   ;;  %v2964_v14 = vrot.slane %v2962_v8, 1 }
 0x122   : > { %2457 = vmatprep.subr.bf16.mxu1 %v4715_v13  ;;  %v2960_v13 = vshrl.u32 %v6005_v34, 16 }
 0x124   : > { %2483 = vmatpush1.bf16.msra.mxu0 %v4716_v16  ;;  %v4779_v16 = vld [vmem:[%s6494_s1 + $0x9f0] ss:$8 sps:$4 sm:$0xff]  }
 0x125   : > { %2458 = vmatpush2.bf16.msra.mxu1 %v4713_v15  ;;  %2484 = vmatprep.subr.bf16.mxu0 %v4724_v30  ;;  %v6102_v15 = vld [vmem:[%s5133_s8 + $0x20] ss:$0 sps:$4 sm:$0x77]   ;;  %v4788_v30 = vld [vmem:[%s6494_s1 + $0x9e4] ss:$8 sps:$4 sm:$0xff]  }
 0x126   : > { %2459 = vmatprep.subr.bf16.mxu1 %v4721_v17  ;;  %v4782_v17 = vld [vmem:[%s6494_s1 + $0xaf0] ss:$8 sps:$4 sm:$0xff]  }
 0x128   : > { %2485 = vmatpush1.bf16.msra.mxu0 %v4722_v19  ;;  %v2965_v19 = vor.u32 %v2964_v14, %v2960_v13  ;;  %v4851_v13 = vld [vmem:[%s6494_s1 + $0xbc0] ss:$8 sps:$4 sm:$0xff]   ;;  %v4856_v14 = vld [vmem:[%s6494_s1 + $0xb34] ss:$8 sps:$4 sm:$0xff]  }
 0x129   : > { %2460 = vmatpush2.bf16.msra.mxu1 %v4719_v18  ;;  %2486 = vmatprep.subr.bf16.mxu0 %v4730_v21  ;;  %v4791_v18 = vld [vmem:[%s6494_s1 + $0xae4] ss:$8 sps:$4 sm:$0xff]   ;;  %v4786_v21 = vld [vmem:[%s6494_s1 + $0x9e0] ss:$8 sps:$4 sm:$0xff]  }
 0x12a   : > { %2461 = vmatprep.subr.bf16.mxu1 %v4727_v20 }
 0x12c   : > { %2487 = vmatpush1.bf16.msra.mxu0 %v4728_v23  ;;  %v4794_v23 = vld [vmem:[%s6494_s1 + $0x9d4] ss:$8 sps:$4 sm:$0xff]  }
 0x12d   : > { %2462 = vmatpush2.bf16.msra.mxu1 %v4725_v22  ;;  %2820 = vmatprep.subr.bf16.mxu0 %v4733_v24  ;;  %v4789_v22 = vld [vmem:[%s6494_s1 + $0xae0] ss:$8 sps:$4 sm:$0xff]   ;;  %v4797_v24 = vld [vmem:[%s6494_s1 + $0xad4] ss:$8 sps:$4 sm:$0xff]  }
 0x12e   : > { %2861 = vmatprep.subr.bf16.mxu1 %v4736_v25 }
 0x12f   : > { %v967_v37 = vpop.f32.mrf.mxu0  ;;  %2505 = vmatmul.mubr.bf16.vlgmr.msra.gmra.mxu0 %v2187_v27  ;;  %v4792_v27 = vld [vmem:[%s6494_s1 + $0x9d0] ss:$8 sps:$4 sm:$0xff]  }
 0x130   : > { %v926_v36 = vpop.f32.mrf.mxu1  ;;  %2464 = vmatmul.mubr.bf16.vlgmr.msra.gmra.mxu1 %v2185_v26  ;;  %2821 = vmatpush1.bf16.msra.mxu0 %v4731_v31  ;;  %v4795_v31 = vld [vmem:[%s6494_s1 + $0xad0] ss:$8 sps:$4 sm:$0xff]  }
 0x131   : > { %v927_v38 = vadd.f32 %v926_v36, %v5899_v59  ;;  %2862 = vmatpush1.bf16.msra.mxu1 %v4734_v33  ;;  %v969_v41 = vpop.f32.mrf.mxu0  ;;  %2822 = vmatprep.subr.bf16.mxu0 %v4739_v35  ;;  %v4760_v59 = vld [vmem:[%s6494_s1 + $0xa34] ss:$8 sps:$4 sm:$0xff]   ;;  %v4800_v33 = vld [vmem:[%s6494_s1 + $0x9c4] ss:$8 sps:$4 sm:$0xff]   ;;  %v4798_v36 = vld [vmem:[%s6494_s1 + $0x9c0] ss:$8 sps:$4 sm:$0xff]  }
 0x132   : > { %v928_v40 = vpop.f32.mrf.mxu1  ;;  %2863 = vmatprep.subr.bf16.mxu1 %v4742_v32  ;;  %2893 = vmatprep.mubr.bf16.mxu1 %v4990_v2  ;;  %v4803_v35 = vld [vmem:[%s6494_s1 + $0xac4] ss:$8 sps:$4 sm:$0xff]  }
 0x133   : > { %v6020_v44 = vadd.f32 %v967_v37, %v927_v38  ;;  %v929_v45 = vadd.f32 %v928_v40, %v5911_v4  ;;  %2852 = vmatprep.mubr.bf16.mxu0 %v6005_v34  ;;  %v971_v46 = vpop.f32.mrf.mxu0  ;;  %v4761_v4 = vld [vmem:[%s6494_s1 + $0x920] ss:$8 sps:$4 sm:$0xff]   ;;  %v4806_v38 = vld [vmem:[%s6494_s1 + $0x9b4] ss:$8 sps:$4 sm:$0xff]   ;;  %v4807_v40 = vld [vmem:[%s6494_s1 + $0xab0] ss:$8 sps:$4 sm:$0xff]  }
 0x134   : > { %v930_v47 = vpop.f32.mrf.mxu1  ;;  %2823 = vmatpush1.bf16.msra.mxu0 %v4737_v29  ;;  %v4801_v37 = vld [vmem:[%s6494_s1 + $0xac0] ss:$8 sps:$4 sm:$0xff]   ;;  %v4809_v29 = vld [vmem:[%s6494_s1 + $0xab4] ss:$8 sps:$4 sm:$0xff]  }
 0x135   : > { %v6025_v48 = vadd.f32 %v969_v41, %v929_v45  ;;  %2864 = vmatpush1.bf16.msra.mxu1 %v4740_v39  ;;  %v972_v51 = vpop.f32.mrf.mxu0  ;;  %2824 = vmatprep.subr.bf16.mxu0 %v4745_v42  ;;  %v4804_v39 = vld [vmem:[%s6494_s1 + $0x9b0] ss:$8 sps:$4 sm:$0xff]   ;;  %v4812_v41 = vld [vmem:[%s6494_s1 + $0x9a4] ss:$8 sps:$4 sm:$0xff]   ;;  %v4813_v45 = vld [vmem:[%s6494_s1 + $0xaa0] ss:$8 sps:$4 sm:$0xff]  }
 0x136   : > { %2865 = vmatprep.subr.bf16.mxu1 %v4748_v43  ;;  %v931_v54 = vpop.f32.mrf.mxu1  ;;  %v4815_v42 = vld [vmem:[%s6494_s1 + $0xaa4] ss:$8 sps:$4 sm:$0xff]   ;;  %v4810_v43 = vld [vmem:[%s6494_s1 + $0x9a0] ss:$8 sps:$4 sm:$0xff]   ;;  %v4818_v46 = vld [vmem:[%s6494_s1 + $0x994] ss:$8 sps:$4 sm:$0xff]  }
 0x137   : > { %v4821_v47 = vld [vmem:[%s6494_s1 + $0xa94] ss:$8 sps:$4 sm:$0xff]   ;;  %v4824_v51 = vld [vmem:[%s6494_s1 + $0x984] ss:$8 sps:$4 sm:$0xff]   ;;  %v4825_v54 = vld [vmem:[%s6494_s1 + $0xa80] ss:$8 sps:$4 sm:$0xff]  }
 0x138   : > { %2825 = vmatpush1.bf16.msra.mxu0 %v4743_v49  ;;  %v4816_v49 = vld [vmem:[%s6494_s1 + $0x990] ss:$8 sps:$4 sm:$0xff]  }
 0x139   : > { %2866 = vmatpush1.bf16.msra.mxu1 %v4746_v50  ;;  %2826 = vmatprep.subr.bf16.mxu0 %v4751_v52  ;;  %v4819_v50 = vld [vmem:[%s6494_s1 + $0xa90] ss:$8 sps:$4 sm:$0xff]   ;;  %v4827_v52 = vld [vmem:[%s6494_s1 + $0xa84] ss:$8 sps:$4 sm:$0xff]  }
 0x13a   : > { %2867 = vmatprep.subr.bf16.mxu1 %v4754_v53  ;;  %v4822_v53 = vld [vmem:[%s6494_s1 + $0x980] ss:$8 sps:$4 sm:$0xff]  }
 0x13c   : > { %2827 = vmatpush1.bf16.msra.mxu0 %v4749_v55  ;;  %v4832_v55 = vld [vmem:[%s6494_s1 + $0xb74] ss:$8 sps:$4 sm:$0xff]  }
 0x13d   : > { %2868 = vmatpush1.bf16.msra.mxu1 %v4752_v57  ;;  %2828 = vmatprep.subr.bf16.mxu0 %v4757_v58  ;;  %v4835_v57 = vld [vmem:[%s6494_s1 + $0xbf4] ss:$8 sps:$4 sm:$0xff]   ;;  %v6207_v58 = vcombine.low %v5989_v28, %v5989_v28  ;;  %v4841_v28 = vld [vmem:[%s6494_s1 + $0xbe4] ss:$8 sps:$4 sm:$0xff]  }
 0x13e   : > { %2869 = vmatprep.subr.bf16.mxu1 %v4760_v59  ;;  %v4830_v59 = vld [vmem:[%s6494_s1 + $0xb70] ss:$8 sps:$4 sm:$0xff]  }
 0x140   : > { %2829 = vmatpush1.bf16.msra.mxu0 %v4755_v60  ;;  %v4833_v60 = vld [vmem:[%s6494_s1 + $0xbf0] ss:$8 sps:$4 sm:$0xff]  }
 0x141   : > { %2870 = vmatpush1.bf16.msra.mxu1 %v4758_v56  ;;  %2830 = vmatprep.subr.bf16.mxu0 %v4763_v61  ;;  %v4838_v56 = vld [vmem:[%s6494_s1 + $0xb64] ss:$8 sps:$4 sm:$0xff]  }
 0x142   : > { %2871 = vmatprep.subr.bf16.mxu1 %v4766_v62 }
 0x144   : > { %2831 = vmatpush1.bf16.msra.mxu0 %v4761_v4  ;;  %v4836_v4 = vld [vmem:[%s6494_s1 + $0xb60] ss:$8 sps:$4 sm:$0xff]  }
 0x145   : > { %2872 = vmatpush1.bf16.msra.mxu1 %v4764_v63  ;;  %2832 = vmatprep.subr.bf16.mxu0 %v4769_v0  ;;  %v4839_v63 = vld [vmem:[%s6494_s1 + $0xbe0] ss:$8 sps:$4 sm:$0xff]  }
 0x146   : > { %2873 = vmatprep.subr.bf16.mxu1 %v4772_v1  ;;  %v4844_v1 = vld [vmem:[%s6494_s1 + $0xb54] ss:$8 sps:$4 sm:$0xff]  }
 0x148   : > { %2833 = vmatpush1.bf16.msra.mxu0 %v4767_v3  ;;  %v4847_v3 = vld [vmem:[%s6494_s1 + $0xbd4] ss:$8 sps:$4 sm:$0xff]  }
 0x149   : > { %2874 = vmatpush1.bf16.msra.mxu1 %v4770_v5  ;;  %2834 = vmatprep.subr.bf16.mxu0 %v4775_v6 }
 0x14a   : > { %2875 = vmatprep.subr.bf16.mxu1 %v4778_v7 }
 0x14c   : > { %2835 = vmatpush1.bf16.msra.mxu0 %v4773_v9  ;;  %v4842_v9 = vld [vmem:[%s6494_s1 + $0xb50] ss:$8 sps:$4 sm:$0xff]  }
 0x14d   : > { %2876 = vmatpush1.bf16.msra.mxu1 %v4776_v10  ;;  %2836 = vmatprep.subr.bf16.mxu0 %v4781_v11  ;;  %v4845_v10 = vld [vmem:[%s6494_s1 + $0xbd0] ss:$8 sps:$4 sm:$0xff]   ;;  %v4850_v11 = vld [vmem:[%s6494_s1 + $0xb44] ss:$8 sps:$4 sm:$0xff]  }
 0x14e   : > { %3216 = vmatprep.subr.bf16.mxu1 %v4784_v12  ;;  %v4848_v12 = vld [vmem:[%s6494_s1 + $0xb40] ss:$8 sps:$4 sm:$0xff]  }
 0x150   : > { %2894 = vmatmul.mubr.bf16.vlgmr.msra.gmra.mxu1 %v6102_v15  ;;  %v6117_v20 = vpop.f32.mrf.mxu1  ;;  %2837 = vmatpush2.bf16.msra.mxu0 %v4779_v16  ;;  %v4859_v16 = vld [vmem:[%s6494_s1 + $0xbb4] ss:$8 sps:$4 sm:$0xff]  }
 0x151   : > { %3217 = vmatpush1.bf16.msra.mxu1 %v4782_v17  ;;  %2838 = vmatprep.subr.bf16.mxu0 %v4788_v30  ;;  %v4854_v17 = vld [vmem:[%s6494_s1 + $0xb30] ss:$8 sps:$4 sm:$0xff]  }
 0x152   : > { %3218 = vmatprep.subr.bf16.mxu1 %v4791_v18  ;;  %v6131_v25 = vpop.f32.mrf.mxu1  ;;  %3248 = vmatprep.mubr.bf16.mxu1 %v2965_v19  ;;  %v4857_v30 = vld [vmem:[%s6494_s1 + $0xbb0] ss:$8 sps:$4 sm:$0xff]   ;;  %v4862_v18 = vld [vmem:[%s6494_s1 + $0xb24] ss:$8 sps:$4 sm:$0xff]  }
 0x153   : > { %v4865_v19 = vld [vmem:[%s6494_s1 + $0xba4] ss:$8 sps:$4 sm:$0xff]  }
 0x154   : > { %v1347_v26 = vpop.f32.mrf.mxu1  ;;  %2839 = vmatpush2.bf16.msra.mxu0 %v4786_v21  ;;  %v4863_v21 = vld [vmem:[%s6494_s1 + $0xba0] ss:$8 sps:$4 sm:$0xff]  }
 0x155   : > { %3219 = vmatpush1.bf16.msra.mxu1 %v4789_v22  ;;  %2840 = vmatprep.subr.bf16.mxu0 %v4794_v23  ;;  %v4868_v22 = vld [vmem:[%s6494_s1 + $0xb14] ss:$8 sps:$4 sm:$0xff]   ;;  %v4866_v26 = vld [vmem:[%s6494_s1 + $0xb10] ss:$8 sps:$4 sm:$0xff]  }
 0x156   : > { %3220 = vmatprep.subr.bf16.mxu1 %v4797_v24  ;;  %v1348_v32 = vpop.f32.mrf.mxu1  ;;  %v4871_v23 = vld [vmem:[%s6494_s1 + $0xb94] ss:$8 sps:$4 sm:$0xff]   ;;  %v2955_v24 = vshll.u32 %v6207_v58, 16 }
 0x158   : > { %2841 = vmatpush2.bf16.msra.mxu0 %v4792_v27  ;;  %v4869_v27 = vld [vmem:[%s6494_s1 + $0xb90] ss:$8 sps:$4 sm:$0xff]   ;;  %v2957_v32 = vrot.slane %v2955_v24, 1  ;;  %v4916_v24 = vld [vmem:[%s6494_s1 + $0xce4] ss:$8 sps:$4 sm:$0xff]  }
 0x159   : > { %3221 = vmatpush1.bf16.msra.mxu1 %v4795_v31  ;;  %2842 = vmatprep.subr.bf16.mxu0 %v4800_v33  ;;  %v4874_v31 = vld [vmem:[%s6494_s1 + $0xb04] ss:$8 sps:$4 sm:$0xff]  }
 0x15a   : > { %3222 = vmatprep.subr.bf16.mxu1 %v4803_v35  ;;  %v4877_v33 = vld [vmem:[%s6494_s1 + $0xb84] ss:$8 sps:$4 sm:$0xff]   ;;  %v2953_v35 = vshrl.u32 %v6207_v58, 16 }
 0x15c   : > { %2843 = vmatpush2.bf16.msra.mxu0 %v4798_v36  ;;  %v2967_v36 = vshrl.u32 %v6102_v15, 16 }
 0x15d   : > { %3223 = vmatpush1.bf16.msra.mxu1 %v4801_v37  ;;  %2844 = vmatprep.subr.bf16.mxu0 %v4806_v38  ;;  %v4872_v38 = vld [vmem:[%s6494_s1 + $0xb00] ss:$8 sps:$4 sm:$0xff]  }
 0x15e   : > { %3224 = vmatprep.subr.bf16.mxu1 %v4809_v29  ;;  %v4875_v29 = vld [vmem:[%s6494_s1 + $0xb80] ss:$8 sps:$4 sm:$0xff]  }
 0x160   : > { %2845 = vmatpush2.bf16.msra.mxu0 %v4804_v39  ;;  %v4880_v39 = vld [vmem:[%s6494_s1 + $0xc74] ss:$8 sps:$4 sm:$0xff]  }
 0x161   : > { %3225 = vmatpush1.bf16.msra.mxu1 %v4807_v40  ;;  %2846 = vmatprep.subr.bf16.mxu0 %v4812_v41  ;;  %v4901_v40 = vld [vmem:[%s6494_s1 + $0xd74] ss:$8 sps:$4 sm:$0xff]   ;;  %v2958_v41 = vor.u32 %v2957_v32, %v2953_v35  ;;  %v4928_v35 = vld [vmem:[%s6494_s1 + $0xcc4] ss:$8 sps:$4 sm:$0xff]  }
 0x162   : > { %3226 = vmatprep.subr.bf16.mxu1 %v4815_v42 }
 0x164   : > { %2847 = vmatpush2.bf16.msra.mxu0 %v4810_v43  ;;  %v4878_v43 = vld [vmem:[%s6494_s1 + $0xc70] ss:$8 sps:$4 sm:$0xff]  }
 0x165   : > { %3227 = vmatpush1.bf16.msra.mxu1 %v4813_v45  ;;  %2848 = vmatprep.subr.bf16.mxu0 %v4818_v46  ;;  %v4899_v45 = vld [vmem:[%s6494_s1 + $0xd70] ss:$8 sps:$4 sm:$0xff]   ;;  %v4883_v46 = vld [vmem:[%s6494_s1 + $0xc64] ss:$8 sps:$4 sm:$0xff]  }
 0x166   : > { %3228 = vmatprep.subr.bf16.mxu1 %v4821_v47  ;;  %v4907_v47 = vld [vmem:[%s6494_s1 + $0xd64] ss:$8 sps:$4 sm:$0xff]  }
 0x168   : > { %2849 = vmatpush2.bf16.msra.mxu0 %v4816_v49  ;;  %v3349_v49 = vrot.slane %v6005_v34, 1  ;;  %v4886_v34 = vld [vmem:[%s6494_s1 + $0xc54] ss:$8 sps:$4 sm:$0xff]  }
 0x169   : > { %3229 = vmatpush1.bf16.msra.mxu1 %v4819_v50  ;;  %2850 = vmatprep.subr.bf16.mxu0 %v4824_v51 }
 0x16a   : > { %3230 = vmatprep.subr.bf16.mxu1 %v4827_v52 }
 0x16c   : > { %2851 = vmatpush2.bf16.msra.mxu0 %v4822_v53  ;;  %v4881_v53 = vld [vmem:[%s6494_s1 + $0xc60] ss:$8 sps:$4 sm:$0xff]  }
 0x16d   : > { %3231 = vmatpush1.bf16.msra.mxu1 %v4825_v54  ;;  %3257 = vmatprep.subr.bf16.mxu0 %v4835_v57  ;;  %v4905_v54 = vld [vmem:[%s6494_s1 + $0xd60] ss:$8 sps:$4 sm:$0xff]  }
 0x16e   : > { %3232 = vmatprep.subr.bf16.mxu1 %v4832_v55 }
 0x16f   : > { %v1302_v61 = vpop.f32.mrf.mxu0  ;;  %2853 = vmatmul.mubr.bf16.vlgmr.msra.gmra.mxu0 %v6207_v58 }
 0x170   : > { %v1344_v62 = vadd.f32 %v6117_v20, %v1302_v61  ;;  %3258 = vmatpush1.bf16.msra.mxu0 %v4833_v60  ;;  %3289 = vmatprep.mubr.bf16.mxu0 %v4990_v2  ;;  %v4860_v20 = vld [vmem:[%s6494_s1 + $0xb20] ss:$8 sps:$4 sm:$0xff]  }
 0x171   : > { %3233 = vmatpush2.bf16.msra.mxu1 %v4830_v59  ;;  %v1304_v0 = vpop.f32.mrf.mxu0  ;;  %3259 = vmatprep.subr.bf16.mxu0 %v4841_v28  ;;  %v4913_v59 = vld [vmem:[%s6494_s1 + $0xd54] ss:$8 sps:$4 sm:$0xff]  }
 0x172   : > { %3234 = vmatprep.subr.bf16.mxu1 %v4838_v56  ;;  %v6236_v5 = vadd.f32 %v1344_v62, %v6020_v44  ;;  %v1346_v6 = vadd.f32 %v6131_v25, %v1304_v0  ;;  %v2969_v25 = vshll.u32 %v6102_v15, 16 }
 0x173   : > { %v1306_v7 = vpop.f32.mrf.mxu0 }
 0x174   : > { %v6241_v8 = vadd.f32 %v1346_v6, %v6025_v48  ;;  %3260 = vmatpush1.bf16.msra.mxu0 %v4839_v63  ;;  %v4853_v48 = vld [vmem:[%s6494_s1 + $0xbc4] ss:$8 sps:$4 sm:$0xff]   ;;  %v2971_v37 = vrot.slane %v2969_v25, 1  ;;  %v4911_v63 = vld [vmem:[%s6494_s1 + $0xd50] ss:$8 sps:$4 sm:$0xff]  }
 0x175   : > { %3235 = vmatpush2.bf16.msra.mxu1 %v4836_v4  ;;  %v1307_v44 = vpop.f32.mrf.mxu0  ;;  %3261 = vmatprep.subr.bf16.mxu0 %v4847_v3  ;;  %v4884_v4 = vld [vmem:[%s6494_s1 + $0xc50] ss:$8 sps:$4 sm:$0xff]   ;;  %v4919_v3 = vld [vmem:[%s6494_s1 + $0xd44] ss:$8 sps:$4 sm:$0xff]   ;;  %v4917_v6 = vld [vmem:[%s6494_s1 + $0xd40] ss:$8 sps:$4 sm:$0xff]  }
 0x176   : > { %3236 = vmatprep.subr.bf16.mxu1 %v4844_v1  ;;  %v2972_v42 = vor.u32 %v2971_v37, %v2967_v36  ;;  %v4892_v7 = vld [vmem:[%s6494_s1 + $0xc34] ss:$8 sps:$4 sm:$0xff]   ;;  %v4895_v44 = vld [vmem:[%s6494_s1 + $0xc24] ss:$8 sps:$4 sm:$0xff]   ;;  %v4926_v36 = vld [vmem:[%s6494_s1 + $0xcc0] ss:$8 sps:$4 sm:$0xff]  }
 0x177   : > { %v4934_v37 = vld [vmem:[%s6494_s1 + $0xcb4] ss:$8 sps:$4 sm:$0xff]  }
 0x178   : > { %3262 = vmatpush1.bf16.msra.mxu0 %v4845_v10  ;;  %v4923_v10 = vld [vmem:[%s6494_s1 + $0xd30] ss:$8 sps:$4 sm:$0xff]  }
 0x179   : > { %3237 = vmatpush2.bf16.msra.mxu1 %v4842_v9  ;;  %3263 = vmatprep.subr.bf16.mxu0 %v4853_v48  ;;  %v4890_v9 = vld [vmem:[%s6494_s1 + $0xc30] ss:$8 sps:$4 sm:$0xff]   ;;  %v4893_v48 = vld [vmem:[%s6494_s1 + $0xc20] ss:$8 sps:$4 sm:$0xff]  }
 0x17a   : > { %3238 = vmatprep.subr.bf16.mxu1 %v4850_v11  ;;  %v4931_v11 = vld [vmem:[%s6494_s1 + $0xd24] ss:$8 sps:$4 sm:$0xff]  }
 0x17c   : > { %3264 = vmatpush1.bf16.msra.mxu0 %v4851_v13  ;;  %v4898_v13 = vld [vmem:[%s6494_s1 + $0xc14] ss:$8 sps:$4 sm:$0xff]  }
 0x17d   : > { %3239 = vmatpush2.bf16.msra.mxu1 %v4848_v12  ;;  %3265 = vmatprep.subr.bf16.mxu0 %v4859_v16  ;;  %v4929_v12 = vld [vmem:[%s6494_s1 + $0xd20] ss:$8 sps:$4 sm:$0xff]   ;;  %v4896_v16 = vld [vmem:[%s6494_s1 + $0xc10] ss:$8 sps:$4 sm:$0xff]  }
 0x17e   : > { %3240 = vmatprep.subr.bf16.mxu1 %v4856_v14  ;;  %v4937_v14 = vld [vmem:[%s6494_s1 + $0xd14] ss:$8 sps:$4 sm:$0xff]  }
 0x180   : > { %3266 = vmatpush1.bf16.msra.mxu0 %v4857_v30  ;;  %v4904_v30 = vld [vmem:[%s6494_s1 + $0xc04] ss:$8 sps:$4 sm:$0xff]  }
 0x181   : > { %3241 = vmatpush2.bf16.msra.mxu1 %v4854_v17  ;;  %3267 = vmatprep.subr.bf16.mxu0 %v4865_v19  ;;  %v4935_v17 = vld [vmem:[%s6494_s1 + $0xd10] ss:$8 sps:$4 sm:$0xff]   ;;  %v4902_v19 = vld [vmem:[%s6494_s1 + $0xc00] ss:$8 sps:$4 sm:$0xff]  }
 0x182   : > { %3242 = vmatprep.subr.bf16.mxu1 %v4862_v18  ;;  %v4943_v18 = vld [vmem:[%s6494_s1 + $0xd04] ss:$8 sps:$4 sm:$0xff]  }
 0x184   : > { %3268 = vmatpush1.bf16.msra.mxu0 %v4863_v21  ;;  %v4910_v21 = vld [vmem:[%s6494_s1 + $0xcf4] ss:$8 sps:$4 sm:$0xff]  }
 0x185   : > { %3243 = vmatpush2.bf16.msra.mxu1 %v4860_v20  ;;  %3269 = vmatprep.subr.bf16.mxu0 %v4871_v23  ;;  %v4941_v20 = vld [vmem:[%s6494_s1 + $0xd00] ss:$8 sps:$4 sm:$0xff]   ;;  %v4908_v23 = vld [vmem:[%s6494_s1 + $0xcf0] ss:$8 sps:$4 sm:$0xff]  }
 0x186   : > { %3244 = vmatprep.subr.bf16.mxu1 %v4868_v22  ;;  %v3350_v22 = vrot.slane %v6102_v15, 1  ;;  %v4922_v15 = vld [vmem:[%s6494_s1 + $0xcd4] ss:$8 sps:$4 sm:$0xff]  }
 0x188   : > { %3270 = vmatpush1.bf16.msra.mxu0 %v4869_v27 }
 0x189   : > { %3245 = vmatpush2.bf16.msra.mxu1 %v4866_v26  ;;  %3271 = vmatprep.subr.bf16.mxu0 %v4877_v33  ;;  %v4914_v26 = vld [vmem:[%s6494_s1 + $0xce0] ss:$8 sps:$4 sm:$0xff]   ;;  %v4920_v33 = vld [vmem:[%s6494_s1 + $0xcd0] ss:$8 sps:$4 sm:$0xff]  }
 0x18a   : > { %3246 = vmatprep.subr.bf16.mxu1 %v4874_v31 }
 0x18c   : > { %3272 = vmatpush1.bf16.msra.mxu0 %v4875_v29  ;;  %v4940_v29 = vld [vmem:[%s6494_s1 + $0xca4] ss:$8 sps:$4 sm:$0xff]  }
 0x18d   : > { %3247 = vmatpush2.bf16.msra.mxu1 %v4872_v38  ;;  %3594 = vmatprep.subr.bf16.mxu0 %v4880_v39  ;;  %v4932_v38 = vld [vmem:[%s6494_s1 + $0xcb0] ss:$8 sps:$4 sm:$0xff]   ;;  %v4938_v39 = vld [vmem:[%s6494_s1 + $0xca0] ss:$8 sps:$4 sm:$0xff]  }
 0x18e   : > { %3635 = vmatprep.subr.bf16.mxu1 %v4901_v40  ;;  %v4946_v40 = vld [vmem:[%s6494_s1 + $0xc94] ss:$8 sps:$4 sm:$0xff]  }
 0x18f   : > { %v1732_v51 = vpop.f32.mrf.mxu0  ;;  %3290 = vmatmul.mubr.bf16.vlgmr.msra.gmra.mxu0 %v2972_v42  ;;  %v4949_v42 = vld [vmem:[%s6494_s1 + $0xc84] ss:$8 sps:$4 sm:$0xff]  }
 0x190   : > { %v1691_v50 = vpop.f32.mrf.mxu1  ;;  %3249 = vmatmul.mubr.bf16.vlgmr.msra.gmra.mxu1 %v2958_v41  ;;  %3595 = vmatpush1.bf16.msra.mxu0 %v4878_v43  ;;  %v4944_v41 = vld [vmem:[%s6494_s1 + $0xc90] ss:$8 sps:$4 sm:$0xff]   ;;  %v4947_v43 = vld [vmem:[%s6494_s1 + $0xc80] ss:$8 sps:$4 sm:$0xff]  }
 0x191   : > { %v1733_v52 = vadd.f32 %v1732_v51, %v1691_v50  ;;  %3636 = vmatpush1.bf16.msra.mxu1 %v4899_v45  ;;  %v1734_v57 = vpop.f32.mrf.mxu0  ;;  %3596 = vmatprep.subr.bf16.mxu0 %v4883_v46  ;;  %v3348_v45 = vrot.slane %v6207_v58, 1 }
 0x192   : > { %v1693_v55 = vpop.f32.mrf.mxu1  ;;  %3637 = vmatprep.subr.bf16.mxu1 %v4907_v47  ;;  %3667 = vmatprep.mubr.bf16.mxu1 %v4990_v2  ;;  %v4889_v2 = vld [vmem:[%s6494_s1 + $0xc44] ss:$8 sps:$4 sm:$0xff]  }
 0x193   : > { %v6345_v60 = vadd.f32 %v1733_v52, %v6236_v5  ;;  %v1735_v56 = vadd.f32 %v1734_v57, %v1693_v55  ;;  %3626 = vmatprep.mubr.bf16.mxu0 %v3349_v49  ;;  %v1736_v28 = vpop.f32.mrf.mxu0  ;;  %v4887_v5 = vld [vmem:[%s6494_s1 + $0xc40] ss:$8 sps:$4 sm:$0xff]  }
 0x194   : > { %v1695_v61 = vpop.f32.mrf.mxu1  ;;  %3597 = vmatpush1.bf16.msra.mxu0 %v4881_v53 }
 0x195   : > { %v6349_v62 = vadd.f32 %v1735_v56, %v6241_v8  ;;  %3638 = vmatpush1.bf16.msra.mxu1 %v4905_v54  ;;  %v1737_v0 = vpop.f32.mrf.mxu0  ;;  %3598 = vmatprep.subr.bf16.mxu0 %v4886_v34  ;;  %v4925_v8 = vld [vmem:[%s6494_s1 + $0xd34] ss:$8 sps:$4 sm:$0xff]  }
 0x196   : > { %v1696_v1 = vpop.f32.mrf.mxu1  ;;  %3639 = vmatprep.subr.bf16.mxu1 %v4913_v59 }
 0x198   : > { %3599 = vmatpush1.bf16.msra.mxu0 %v4884_v4 }
 0x199   : > { %3640 = vmatpush1.bf16.msra.mxu1 %v4911_v63  ;;  %3600 = vmatprep.subr.bf16.mxu0 %v4889_v2 }
 0x19a   : > { %3641 = vmatprep.subr.bf16.mxu1 %v4919_v3 }
 0x19c   : > { %3601 = vmatpush1.bf16.msra.mxu0 %v4887_v5 }
 0x19d   : > { %3642 = vmatpush1.bf16.msra.mxu1 %v4917_v6  ;;  %3602 = vmatprep.subr.bf16.mxu0 %v4892_v7 }
 0x19e   : > { %3643 = vmatprep.subr.bf16.mxu1 %v4925_v8 }
 0x1a0   : > { %3603 = vmatpush1.bf16.msra.mxu0 %v4890_v9 }
 0x1a1   : > { %3644 = vmatpush1.bf16.msra.mxu1 %v4923_v10  ;;  %3604 = vmatprep.subr.bf16.mxu0 %v4895_v44 }
 0x1a2   : > { %3645 = vmatprep.subr.bf16.mxu1 %v4931_v11 }
 0x1a4   : > { %3605 = vmatpush1.bf16.msra.mxu0 %v4893_v48 }
 0x1a5   : > { %3646 = vmatpush1.bf16.msra.mxu1 %v4929_v12  ;;  %3606 = vmatprep.subr.bf16.mxu0 %v4898_v13 }
 0x1a6   : > { %3647 = vmatprep.subr.bf16.mxu1 %v4937_v14 }
 0x1a8   : > { %3607 = vmatpush1.bf16.msra.mxu0 %v4896_v16 }
 0x1a9   : > { %3648 = vmatpush1.bf16.msra.mxu1 %v4935_v17  ;;  %3608 = vmatprep.subr.bf16.mxu0 %v4904_v30 }
 0x1aa   : > { %3649 = vmatprep.subr.bf16.mxu1 %v4943_v18 }
 0x1ac   : > { %3609 = vmatpush1.bf16.msra.mxu0 %v4902_v19 }
 0x1ad   : > { %3650 = vmatpush1.bf16.msra.mxu1 %v4941_v20  ;;  %3610 = vmatprep.subr.bf16.mxu0 %v4910_v21 }
 0x1b0   : > { %3668 = vmatmul.mubr.bf16.vlgmr.msra.gmra.mxu1 %v3350_v22  ;;  %v2128_v25 = vpop.f32.mrf.mxu1  ;;  %3611 = vmatpush2.bf16.msra.mxu0 %v4908_v23 }
 0x1b1   : > { %3612 = vmatprep.subr.bf16.mxu0 %v4916_v24 }
 0x1b2   : > { %v2130_v27 = vpop.f32.mrf.mxu1 }
 0x1b4   : > { %v2132_v31 = vpop.f32.mrf.mxu1  ;;  %3613 = vmatpush2.bf16.msra.mxu0 %v4914_v26 }
 0x1b5   : > { %3614 = vmatprep.subr.bf16.mxu0 %v4922_v15 }
 0x1b6   : > { %v2133_v32 = vpop.f32.mrf.mxu1 }
 0x1b8   : > { %3615 = vmatpush2.bf16.msra.mxu0 %v4920_v33 }
 0x1b9   : > { %3616 = vmatprep.subr.bf16.mxu0 %v4928_v35 }
 0x1bc   : > { %3617 = vmatpush2.bf16.msra.mxu0 %v4926_v36 }
 0x1bd   : > { %3618 = vmatprep.subr.bf16.mxu0 %v4934_v37 }
 0x1c0   : > { %3619 = vmatpush2.bf16.msra.mxu0 %v4932_v38 }
 0x1c1   : > { %3620 = vmatprep.subr.bf16.mxu0 %v4940_v29 }
 0x1c4   : > { %3621 = vmatpush2.bf16.msra.mxu0 %v4938_v39 }
 0x1c5   : > { %3622 = vmatprep.subr.bf16.mxu0 %v4946_v40 }
 0x1c8   : > { %3623 = vmatpush2.bf16.msra.mxu0 %v4944_v41 }
 0x1c9   : > { %3624 = vmatprep.subr.bf16.mxu0 %v4949_v42 }
 0x1cc   : > { %3625 = vmatpush2.bf16.msra.mxu0 %v4947_v43 }
 0x1cf   : > { %v2087_v46 = vpop.f32.mrf.mxu0  ;;  %3627 = vmatmul.mubr.bf16.vlgmr.msra.gmra.mxu0 %v3348_v45 }
 0x1d0   : > { %v2129_v47 = vadd.f32 %v2128_v25, %v2087_v46  ;;  %v3680_v25 = vlaneseq }
 0x1d1   : > { %v2089_v49 = vpop.f32.mrf.mxu0 }
 0x1d2   : > { %v2135_v50 = vadd.f32 %v2129_v47, %v6345_v60  ;;  %v2131_v51 = vadd.f32 %v2130_v27, %v2089_v49  ;;  %v3681_v26 = vshrl.u32 %v3680_v25, 7  ;;  %v3678_v27 = vld [vmem:[%s6495_s2] sm:$0x3] }
 0x1d3   : > { %v2091_v52 = vpop.f32.mrf.mxu0 }
 0x1d4   : > { %v2136_v53 = vadd.f32 %v2131_v51, %v6349_v62  ;;  %v3682_v15 = vsub.s32 0, %v3681_v26  ;;  %v3686_v33 = vsub.s32 1, %v3681_v26 }
 0x1d5   : > { %v2092_v54 = vpop.f32.mrf.mxu0 }
 0x1d6   : > { %v3683_v36 = vrot.slane %v3678_v27, %v3682_v15  ;;  %v3687_v40 = vrot.slane %v3678_v27, %v3686_v33 }
 0x1ef   : > { %v2506_v57 = vpop.f32.mrf.mxu0 }
 0x1f0   : > { %v2465_v55 = vpop.f32.mrf.mxu1 }
 0x1f1   : > { %v2507_v34 = vadd.f32 %v2506_v57, %v2465_v55  ;;  %v2508_v56 = vpop.f32.mrf.mxu0 }
 0x1f2   : > { %v2467_v59 = vpop.f32.mrf.mxu1 }
 0x1f3   : > { %v2513_v28 = vadd.f32 %v2507_v34, %v2135_v50  ;;  %v2509_v61 = vadd.f32 %v2508_v56, %v2467_v59  ;;  %v2510_v58 = vpop.f32.mrf.mxu0 }
 0x1f4   : > { %v2469_v4 = vpop.f32.mrf.mxu1 }
 0x1f5   : > { %v2514_v63 = vadd.f32 %v2509_v61, %v2136_v53  ;;  %v2511_v0 = vpop.f32.mrf.mxu0 }
 0x1f6   : > { %v2470_v2 = vpop.f32.mrf.mxu1 }
 0x210   : > { %v2895_v1 = vpop.f32.mrf.mxu1 }
 0x212   : > { %v2897_v3 = vpop.f32.mrf.mxu1 }
 0x214   : > { %v2899_v60 = vpop.f32.mrf.mxu1 }
 0x216   : > { %v2900_v5 = vpop.f32.mrf.mxu1 }
 0x22f   : > { %v2854_v6 = vpop.f32.mrf.mxu0 }
 0x230   : > { %v2896_v7 = vadd.f32 %v2895_v1, %v2854_v6 }
 0x231   : > { %v2856_v62 = vpop.f32.mrf.mxu0 }
 0x232   : > { %v2902_v8 = vadd.f32 %v2896_v7, %v2513_v28  ;;  %v2898_v9 = vadd.f32 %v2897_v3, %v2856_v62 }
 0x233   : > { %v2858_v10 = vpop.f32.mrf.mxu0 }
 0x234   : > { %v2903_v44 = vadd.f32 %v2898_v9, %v2514_v63 }
 0x235   : > { %v2859_v11 = vpop.f32.mrf.mxu0 }
 0x24f   : > { %v3291_v12 = vpop.f32.mrf.mxu0 }
 0x250   : > { %v3250_v48 = vpop.f32.mrf.mxu1 }
 0x251   : > { %v3292_v13 = vadd.f32 %v3291_v12, %v3250_v48  ;;  %v3293_v16 = vpop.f32.mrf.mxu0 }
 0x252   : > { %v3252_v14 = vpop.f32.mrf.mxu1 }
 0x253   : > { %v3298_v17 = vadd.f32 %v3292_v13, %v2902_v8  ;;  %v3295_v30 = vpop.f32.mrf.mxu0  ;;  %v3294_v31 = vadd.f32 %v3293_v16, %v3252_v14 }
 0x254   : > { %v3254_v18 = vpop.f32.mrf.mxu1 }
 0x255   : > { %v3296_v19 = vpop.f32.mrf.mxu0  ;;  %v3299_v38 = vadd.f32 %v3294_v31, %v2903_v44 }
 0x256   : > { %v3255_v20 = vpop.f32.mrf.mxu1 }
 0x270   : > { %v3669_v21 = vpop.f32.mrf.mxu1 }
 0x272   : > { %v3671_v22 = vpop.f32.mrf.mxu1 }
 0x274   : > { %v3673_v23 = vpop.f32.mrf.mxu1 }
 0x276   : > { %v3674_v24 = vpop.f32.mrf.mxu1 }
 0x28f   : > { %v3628_v35 = vpop.f32.mrf.mxu0 }
 0x290   : > { %v3670_v32 = vadd.f32 %v3669_v21, %v3628_v35 }
 0x291   : > { %v3630_v37 = vpop.f32.mrf.mxu0 }
 0x292   : > { %v3676_v29 = vadd.f32 %v3670_v32, %v3298_v17  ;;  %v3672_v39 = vadd.f32 %v3671_v22, %v3630_v37 }
 0x293   : > { %v3632_v41 = vpop.f32.mrf.mxu0 }
 0x294   : > { %v3690_v42 = vadd.f32 %v3683_v36, %v3676_v29  ;;  %v3677_v43 = vadd.f32 %v3672_v39, %v3299_v38 }
 0x295   : > { %v3633_v45 = vpop.f32.mrf.mxu0 }
 0x296   : > { %v3691_v46 = vadd.f32 %v3687_v40, %v3677_v43  ;;  %v3692_v47 = vmax.f32 %v3690_v42, 0.0 }
 0x298   : > { %v3693_v49 = vmax.f32 %v3691_v46, 0.0 }
 0x29a   : > { %v3696_v50 = vcombine.low %v3692_v47, %v3693_v49 }
 0x29c   : > { %3698 = vst [vmem:[%s192_s13] sm:$0x77] %v3696_v50 }
 0x29d PF: > { %s13_s16 = sadd.s32 1, %s4988_s16   ;;  %s6497_s12 = smov %s4980_s14 }
 0x29e   : > { %p10_p7 = scmp.ge.s32.totalorder %s13_s16, 8   ;;  %s6498_s13 = smov %s4984_s15 }
 0x29f   : > { %s6499_s14 = smov %s6502_s17  ;;  %s6500_s15 = smov %s6506_s18 }
 0x2a0   :  { %12 = sbr.rel (!%p10_p7) target bundleno = 3 (0x3), region = 65 }

</bundles_post_ra>
